<compile_context>
chip_gen: v5e
topology: v5e:2x2
jax: 0.10.0
libtpu: 0.0.40
codegen_flags: <defaults>
</compile_context>

<pallas_src>
import functools
import math

import jax
import jax.numpy as jnp
from jax import lax
from jax.experimental import pallas as pl

# ---- small synthetic config (mirrors args.*) --------------------------------
B = 2            # batch
S = 8            # max_seq_len / seq_len
H = 48           # hidden_dim (divisible by 3 and by n_heads)
NH = 4           # n_heads
HD = H // NH     # per-head dim
NL = 2           # n_layers (LSTM)
N_TEST = 10
N_Q = 20
N_TAG = 5
E3 = H // 3      # per-feature embedding width
GW = 128         # per-gate lane slot width (one vreg column tile)


def full_spec(shape):
    """BlockSpec covering the whole array, grid=(1,)."""
    nd = len(shape)
    return pl.BlockSpec(shape, lambda i, nd=nd: (0,) * nd)


# ----------------------------- fused Pallas kernel ---------------------------
def _fused_kernel(
    emb_ref,      # [M, 4*E3]
    mat_ref,      # [4*E3 + 4*H, H]   comb_w | q_comb | wo | ffn_w1 | ffn_w2
    kvw_ref,      # [H, 2H]           k_comb | v_comb stacked on lanes
    bias_ref,     # [12, H]           all 48-wide bias / gain rows
    lstmw_ref,    # [H + 3*GW, 4*GW]  wih1 | whh1(padded rows) | w2(=[wih2;whh2] padded)
    lstmb_ref,    # [2, 4*GW]         b1 | b2  (gate-slot padded)
    fcw_ref,      # [S*GW, S]         block-diagonal fc weight
    o_ref,        # [B, S]
    *, batch, seq, hidden, n_heads):
    f32 = jnp.float32
    M = batch * seq
    hd = hidden // n_heads
    gw = lstmb_ref.shape[1] // 4

    def mm(a, b):
        return jnp.dot(a, b, preferred_element_type=f32)

    mat = mat_ref[...]
    bias = bias_ref[...]

    # static row offsets into the matrix slab
    e4 = emb_ref.shape[1]
    off = 0
    comb_w = mat[off:off + e4, :];      off += e4
    q_w    = mat[off:off + hidden, :];  off += hidden
    wo     = mat[off:off + hidden, :];  off += hidden
    ffn_w1 = mat[off:off + hidden, :];  off += hidden
    ffn_w2 = mat[off:off + hidden, :]

    # ---- comb_proj over concatenated embeddings ----
    embed = mm(emb_ref[...], comb_w) + bias[0:1, :]              # [M, H]
    embed3 = embed.reshape(batch, seq, hidden)                   # [B, S, H]
    embed_last = embed3[:, seq - 1, :]                           # [B, H]

    # ---- fused (query/key/value Linear ∘ MHA in-projection) ----
    scale = 1.0 / math.sqrt(hd)
    q_full = (mm(embed_last, q_w) + bias[1:2, :]) * scale        # [B, H]
    kv_bias = jnp.concatenate([bias[2:3, :], bias[3:4, :]], axis=1)   # [1, 2H]
    kv = mm(embed, kvw_ref[...]) + kv_bias                       # [M, 2H]
    k3 = kv[:, 0:hidden].reshape(batch, seq, hidden)             # [B, S, H]
    v3 = kv[:, hidden:2 * hidden].reshape(batch, seq, hidden)    # [B, S, H]

    # ---- attention over the last query (per-head slices, no per-head matmuls) ----
    ctx_parts = []
    for n in range(n_heads):                                     # NH=4, unrolled
        lo = n * hd
        qn = q_full[:, lo:lo + hd].reshape(batch, 1, hd)         # [B, 1, hd]
        kn = k3[:, :, lo:lo + hd]                                # [B, S, hd]
        vn = v3[:, :, lo:lo + hd]                                # [B, S, hd]
        s = jnp.einsum('bqd,bkd->bqk', qn, kn,
                       preferred_element_type=f32)               # [B, 1, S]
        s = s - jnp.max(s, axis=-1, keepdims=True)
        e = jnp.exp(s)
        p = e / jnp.sum(e, axis=-1, keepdims=True)
        cn = jnp.einsum('bqk,bkd->bqd', p, vn,
                        preferred_element_type=f32)              # [B, 1, hd]
        ctx_parts.append(cn.reshape(batch, hd))
    ctx = jnp.concatenate(ctx_parts, axis=1)                     # [B, H]
    attn = mm(ctx, wo) + bias[4:5, :]                            # [B, H] (single out-proj)

    # ---- residual + LN1 + FFN + residual + LN2 ----
    def layernorm(x, g, b):
        mu = jnp.mean(x, axis=-1, keepdims=True)
        var = jnp.mean((x - mu) * (x - mu), axis=-1, keepdims=True)
        return (x - mu) * lax.rsqrt(var + 1e-5) * g + b

    x1 = (embed3 + attn[:, None, :]).reshape(M, hidden)          # residual 1
    y1 = layernorm(x1, bias[5:6, :], bias[6:7, :])
    hmid = jnp.maximum(mm(y1, ffn_w1) + bias[7:8, :], 0.0)
    y2 = mm(hmid, ffn_w2) + bias[8:9, :]
    x2 = embed + y2                                              # residual 2
    out2 = layernorm(x2, bias[9:10, :], bias[10:11, :])          # [M, H]

    # ---- 2-layer LSTM, gate slots (i, f, o, g) padded to 128 lanes, layers
    #      interleaved in one unrolled time loop ----
    lw = lstmw_ref[...]
    wih1 = lw[0:hidden, :]                                       # [H,   4GW]
    whh1 = lw[hidden:hidden + gw, :]                             # [GW,  4GW]
    w2   = lw[hidden + gw:hidden + 3 * gw, :]                    # [2GW, 4GW]
    b1 = lstmb_ref[0:1, :]
    b2 = lstmb_ref[1:2, :]

    # hoisted layer-1 input projection (one matmul for all timesteps / gates)
    xg1 = (mm(out2, wih1) + b1).reshape(batch, seq, 4 * gw)      # [B, S, 4GW]

    h1 = jnp.zeros((batch, gw), f32); c1 = jnp.zeros((batch, gw), f32)
    h2 = jnp.zeros((batch, gw), f32); c2 = jnp.zeros((batch, gw), f32)
    h2_steps = []
    for t in range(seq):                                         # S=8, unrolled
        # layer 1: one recurrent matmul, aligned 128-lane gate slices
        g1 = xg1[:, t, :] + mm(h1, whh1)                         # [B, 4GW]
        sg1 = jax.nn.sigmoid(g1[:, 0:3 * gw])                    # i | f | o
        gg1 = jnp.tanh(g1[:, 3 * gw:4 * gw])                     # g
        c1 = sg1[:, gw:2 * gw] * c1 + sg1[:, 0:gw] * gg1
        h1 = sg1[:, 2 * gw:3 * gw] * jnp.tanh(c1)
        # layer 2: input projection folded into recurrent matmul via [h1 | h2]
        g2 = mm(jnp.concatenate([h1, h2], axis=1), w2) + b2      # [B, 4GW]
        sg2 = jax.nn.sigmoid(g2[:, 0:3 * gw])
        gg2 = jnp.tanh(g2[:, 3 * gw:4 * gw])
        c2 = sg2[:, gw:2 * gw] * c2 + sg2[:, 0:gw] * gg2
        h2 = sg2[:, 2 * gw:3 * gw] * jnp.tanh(c2)
        h2_steps.append(h2)

    # ---- fc + sigmoid: single block-diagonal matmul -> lane-major [B, S] ----
    hcat = jnp.concatenate(h2_steps, axis=1)                     # [B, S*GW] (128-aligned pieces)
    logits = mm(hcat, fcw_ref[...]) + bias[11:12, 0:1]           # [B, S]
    o_ref[...] = jax.nn.sigmoid(logits)


# ----------------------------- parameters -------------------------------------
def init_params(key):
    keys = iter(jax.random.split(key, 64))

    def nrm(shape, s=0.1):
        return jax.random.normal(next(keys), shape, jnp.float32) * s

    p = {}
    p['emb_interaction'] = nrm((3, E3))
    p['emb_test'] = nrm((N_TEST + 1, E3))
    p['emb_question'] = nrm((N_Q + 1, E3))
    p['emb_tag'] = nrm((N_TAG + 1, E3))
    # NOTE: embedding_position exists in __init__ but is never used in forward.
    p['comb_w'] = nrm((4 * E3, H)); p['comb_b'] = nrm((H,))
    p['q_w'] = nrm((H, H)); p['q_b'] = nrm((H,))
    p['k_w'] = nrm((H, H)); p['k_b'] = nrm((H,))
    p['v_w'] = nrm((H, H)); p['v_b'] = nrm((H,))
    # nn.MultiheadAttention: in_proj (q,k,v) + out_proj (synthetic [in, out] layout)
    p['mha_wq'] = nrm((H, H)); p['mha_bq'] = nrm((H,))
    p['mha_wk'] = nrm((H, H)); p['mha_bk'] = nrm((H,))
    p['mha_wv'] = nrm((H, H)); p['mha_bv'] = nrm((H,))
    p['mha_wo'] = nrm((H, H)); p['mha_bo'] = nrm((H,))
    p['ln1_g'] = jnp.ones((H,), jnp.float32); p['ln1_b'] = jnp.zeros((H,), jnp.float32)
    p['ln2_g'] = jnp.ones((H,), jnp.float32); p['ln2_b'] = jnp.zeros((H,), jnp.float32)
    p['ffn_w1'] = nrm((H, H)); p['ffn_b1'] = nrm((H,))
    p['ffn_w2'] = nrm((H, H)); p['ffn_b2'] = nrm((H,))
    lstm = []
    hin = H
    for _ in range(NL):
        lstm.append({'wih': nrm((hin, 4 * H)),   # W_ih^T, gate column order i,f,g,o
                     'whh': nrm((H, 4 * H)),     # W_hh^T
                     'b': nrm((4 * H,))})        # b_ih + b_hh (combined)
        hin = H
    p['lstm'] = lstm
    p['fc_w'] = nrm((H, 1)); p['fc_b'] = nrm((1,))
    return p


# ----------------------------- forward ----------------------------------------
def last_query_forward(params, inputs):
    test, question, tag, _, mask, interaction, index = inputs  # mask/index unused (as in torch)
    Bx, Sx = interaction.shape
    M = Bx * Sx

    # TODO(synk): embedding-table gathers stay in JAX glue (data-dependent row
    # gather); everything downstream runs inside the single fused kernel.
    emb = jnp.concatenate([
        jnp.take(params['emb_interaction'], interaction, axis=0),
        jnp.take(params['emb_test'], test, axis=0),
        jnp.take(params['emb_question'], question, axis=0),
        jnp.take(params['emb_tag'], tag, axis=0)], axis=2)       # [B, S, 4*E3]
    emb2d = emb.reshape(M, 4 * E3).astype(jnp.float32)

    # ---- host-side weight folding / packing (one-time, free) ----------------
    # Fold the standalone q/k/v Linears into the MHA in-projection.
    q_w = params['q_w'] @ params['mha_wq']
    q_b = params['q_b'] @ params['mha_wq'] + params['mha_bq']
    k_w = params['k_w'] @ params['mha_wk']
    k_b = params['k_b'] @ params['mha_wk'] + params['mha_bk']
    v_w = params['v_w'] @ params['mha_wv']
    v_b = params['v_b'] @ params['mha_wv'] + params['mha_bv']
    kvw = jnp.concatenate([k_w, v_w], axis=1)                    # [H, 2H]

    mat48 = jnp.concatenate([params['comb_w'], q_w, params['mha_wo'],
                             params['ffn_w1'], params['ffn_w2']], axis=0)

    bias48 = jnp.stack([
        params['comb_b'], q_b, k_b, v_b, params['mha_bo'],
        params['ln1_g'], params['ln1_b'], params['ffn_b1'], params['ffn_b2'],
        params['ln2_g'], params['ln2_b'],
        jnp.full((H,), params['fc_b'][0], jnp.float32)], axis=0)  # [12, H]

    # LSTM gate stacking: slot order (i, f, o, g), each slot padded to GW lanes
    # so in-kernel gate slices are 128-aligned and one sigmoid covers 3 slots.
    def gate_stack(w):                      # [hin, 4H] (i,f,g,o) -> [hin, 4*GW]
        hin = w.shape[0]
        out = jnp.zeros((hin, 4 * GW), jnp.float32)
        for slot, gate in enumerate((0, 1, 3, 2)):               # i, f, o, g
            out = out.at[:, slot * GW:slot * GW + H].set(w[:, gate * H:(gate + 1) * H])
        return out

    def gate_stack_bias(b):                 # [4H] -> [1, 4*GW]
        out = jnp.zeros((1, 4 * GW), jnp.float32)
        for slot, gate in enumerate((0, 1, 3, 2)):
            out = out.at[0, slot * GW:slot * GW + H].set(b[gate * H:(gate + 1) * H])
        return out

    l0, l1 = params['lstm']
    wih1 = gate_stack(l0['wih'])                                               # [H, 4GW]
    whh1 = jnp.zeros((GW, 4 * GW), jnp.float32).at[:H, :].set(gate_stack(l0['whh']))
    w2 = jnp.zeros((2 * GW, 4 * GW), jnp.float32)
    w2 = w2.at[0:H, :].set(gate_stack(l1['wih']))                # rows for x_t (= h1)
    w2 = w2.at[GW:GW + H, :].set(gate_stack(l1['whh']))          # rows for h2
    lstm_w = jnp.concatenate([wih1, whh1, w2], axis=0)           # [H + 3*GW, 4GW]
    lstm_b = jnp.concatenate([gate_stack_bias(l0['b']),
                              gate_stack_bias(l1['b'])], axis=0)  # [2, 4GW]

    # fc as one block-diagonal matmul producing [B, S] directly (lane-major).
    fc_block = jnp.zeros((Sx * GW, Sx), jnp.float32)
    for t in range(Sx):
        fc_block = fc_block.at[t * GW:t * GW + H, t].set(params['fc_w'][:, 0])

    args = (emb2d, mat48, kvw, bias48, lstm_w, lstm_b, fc_block)
    kern = functools.partial(_fused_kernel, batch=Bx, seq=Sx, hidden=H, n_heads=NH)
    preds = pl.pallas_call(
        kern,
        out_shape=jax.ShapeDtypeStruct((Bx, Sx), jnp.float32),
        grid=(1,),
        in_specs=[full_spec(a.shape) for a in args],
        out_specs=full_spec((Bx, Sx)),
    )(*args)
    return preds


# ----------------------------- main --------------------------------------------
if __name__ == "__main__":
    root = jax.random.PRNGKey(0)
    kp_, k1, k2, k3, k4 = jax.random.split(root, 5)
    params = init_params(kp_)

    test = jax.random.randint(k1, (B, S), 0, N_TEST + 1)
    question = jax.random.randint(k2, (B, S), 0, N_Q + 1)
    tag = jax.random.randint(k3, (B, S), 0, N_TAG + 1)
    interaction = jax.random.randint(k4, (B, S), 0, 3)
    dummy = jnp.zeros((B, S), jnp.float32)
    mask = jnp.ones((B, S), jnp.int32)
    index = jnp.arange(B, dtype=jnp.int32)

    preds = last_query_forward(
        params, (test, question, tag, dummy, mask, interaction, index))
    jax.block_until_ready(preds)
    assert preds.shape == (B, S) and preds.dtype == jnp.float32
    assert bool(jnp.all(jnp.isfinite(preds)))
    assert bool(jnp.all((preds > 0.0) & (preds < 1.0)))
    print("KERNEL_OK")
</pallas_src>

<mosaic_0001>
module attributes {stable_mosaic.version = 11 : i64} {
  func.func @_fused_kernel(%arg0: i32, %arg1: memref<16x64xf32, #tpu.memory_space<vmem>>, %arg2: memref<256x48xf32, #tpu.memory_space<vmem>>, %arg3: memref<48x96xf32, #tpu.memory_space<vmem>>, %arg4: memref<12x48xf32, #tpu.memory_space<vmem>>, %arg5: memref<432x512xf32, #tpu.memory_space<vmem>>, %arg6: memref<2x512xf32, #tpu.memory_space<vmem>>, %arg7: memref<1024x8xf32, #tpu.memory_space<vmem>>, %arg8: memref<2x8xf32, #tpu.memory_space<vmem>>) attributes {dimension_semantics = [#tpu.dimension_semantics<arbitrary>], iteration_bounds = array<i64: 1>, scalar_prefetch = 0 : i64, scratch_operands = 0 : i64, tpu.core_type = #tpu.core_type<tc>, window_params = [{pipeline_mode = #tpu.pipeline_mode<synchronous>, transform_indices = @transform_0, window_bounds = array<i64: 16, 64>}, {pipeline_mode = #tpu.pipeline_mode<synchronous>, transform_indices = @transform_1, window_bounds = array<i64: 256, 48>}, {pipeline_mode = #tpu.pipeline_mode<synchronous>, transform_indices = @transform_2, window_bounds = array<i64: 48, 96>}, {pipeline_mode = #tpu.pipeline_mode<synchronous>, transform_indices = @transform_3, window_bounds = array<i64: 12, 48>}, {pipeline_mode = #tpu.pipeline_mode<synchronous>, transform_indices = @transform_4, window_bounds = array<i64: 432, 512>}, {pipeline_mode = #tpu.pipeline_mode<synchronous>, transform_indices = @transform_5, window_bounds = array<i64: 2, 512>}, {pipeline_mode = #tpu.pipeline_mode<synchronous>, transform_indices = @transform_6, window_bounds = array<i64: 1024, 8>}, {pipeline_mode = #tpu.pipeline_mode<synchronous>, transform_indices = @transform_7, window_bounds = array<i64: 2, 8>}]} {
    %c0 = arith.constant 0 : index
    %c0_0 = arith.constant 0 : index
    %0 = vector.load %arg2[%c0, %c0_0] : memref<256x48xf32, #tpu.memory_space<vmem>>, vector<256x48xf32>
    %c0_1 = arith.constant 0 : index
    %c0_2 = arith.constant 0 : index
    %1 = vector.load %arg4[%c0_1, %c0_2] : memref<12x48xf32, #tpu.memory_space<vmem>>, vector<12x48xf32>
    %2 = vector.extract_strided_slice %0 {offsets = [0, 0], sizes = [64, 48], strides = [1, 1]} : vector<256x48xf32> to vector<64x48xf32>
    %3 = vector.extract_strided_slice %0 {offsets = [64, 0], sizes = [48, 48], strides = [1, 1]} : vector<256x48xf32> to vector<48x48xf32>
    %4 = vector.extract_strided_slice %0 {offsets = [112, 0], sizes = [48, 48], strides = [1, 1]} : vector<256x48xf32> to vector<48x48xf32>
    %5 = vector.extract_strided_slice %0 {offsets = [160, 0], sizes = [48, 48], strides = [1, 1]} : vector<256x48xf32> to vector<48x48xf32>
    %6 = vector.extract_strided_slice %0 {offsets = [208, 0], sizes = [48, 48], strides = [1, 1]} : vector<256x48xf32> to vector<48x48xf32>
    %c0_3 = arith.constant 0 : index
    %c0_4 = arith.constant 0 : index
    %7 = vector.load %arg1[%c0_3, %c0_4] : memref<16x64xf32, #tpu.memory_space<vmem>>, vector<16x64xf32>
    %cst = arith.constant dense<0.000000e+00> : vector<16x48xf32>
    %8 = tpu.matmul %7, %2, %cst {dimension_numbers = #tpu.dot_dimension_numbers<[1], [0], [0], [1], [0, 0, 1, 1], [], []>} : vector<16x64xf32>, vector<64x48xf32>, vector<16x48xf32> -> vector<16x48xf32>
    %9 = vector.extract_strided_slice %1 {offsets = [0, 0], sizes = [1, 48], strides = [1, 1]} : vector<12x48xf32> to vector<1x48xf32>
    %10 = vector.broadcast %9 : vector<1x48xf32> to vector<16x48xf32>
    %11 = arith.addf %8, %10 : vector<16x48xf32>
    %12 = vector.shape_cast %11 : vector<16x48xf32> to vector<2x8x48xf32>
    %13 = vector.extract_strided_slice %12 {offsets = [0, 7, 0], sizes = [2, 1, 48], strides = [1, 1, 1]} : vector<2x8x48xf32> to vector<2x1x48xf32>
    %14 = vector.shape_cast %13 : vector<2x1x48xf32> to vector<2x48xf32>
    %cst_5 = arith.constant dense<0.000000e+00> : vector<2x48xf32>
    %15 = tpu.matmul %14, %3, %cst_5 {dimension_numbers = #tpu.dot_dimension_numbers<[1], [0], [0], [1], [0, 0, 1, 1], [], []>} : vector<2x48xf32>, vector<48x48xf32>, vector<2x48xf32> -> vector<2x48xf32>
    %16 = vector.extract_strided_slice %1 {offsets = [1, 0], sizes = [1, 48], strides = [1, 1]} : vector<12x48xf32> to vector<1x48xf32>
    %17 = vector.broadcast %16 : vector<1x48xf32> to vector<2x48xf32>
    %18 = arith.addf %15, %17 : vector<2x48xf32>
    %cst_6 = arith.constant 0.288675129 : f32
    %19 = vector.broadcast %cst_6 : f32 to vector<2x48xf32>
    %20 = arith.mulf %18, %19 : vector<2x48xf32>
    %21 = vector.extract_strided_slice %1 {offsets = [2, 0], sizes = [1, 48], strides = [1, 1]} : vector<12x48xf32> to vector<1x48xf32>
    %22 = vector.extract_strided_slice %1 {offsets = [3, 0], sizes = [1, 48], strides = [1, 1]} : vector<12x48xf32> to vector<1x48xf32>
    %23 = tpu.concatenate %21, %22 in 1 : vector<1x48xf32>, vector<1x48xf32> -> vector<1x96xf32>
    %c0_7 = arith.constant 0 : index
    %c0_8 = arith.constant 0 : index
    %24 = vector.load %arg3[%c0_7, %c0_8] : memref<48x96xf32, #tpu.memory_space<vmem>>, vector<48x96xf32>
    %cst_9 = arith.constant dense<0.000000e+00> : vector<16x96xf32>
    %25 = tpu.matmul %11, %24, %cst_9 {dimension_numbers = #tpu.dot_dimension_numbers<[1], [0], [0], [1], [0, 0, 1, 1], [], []>} : vector<16x48xf32>, vector<48x96xf32>, vector<16x96xf32> -> vector<16x96xf32>
    %26 = vector.broadcast %23 : vector<1x96xf32> to vector<16x96xf32>
    %27 = arith.addf %25, %26 : vector<16x96xf32>
    %28 = vector.extract_strided_slice %27 {offsets = [0, 0], sizes = [16, 48], strides = [1, 1]} : vector<16x96xf32> to vector<16x48xf32>
    %29 = vector.shape_cast %28 : vector<16x48xf32> to vector<2x8x48xf32>
    %30 = vector.extract_strided_slice %27 {offsets = [0, 48], sizes = [16, 48], strides = [1, 1]} : vector<16x96xf32> to vector<16x48xf32>
    %31 = vector.shape_cast %30 : vector<16x48xf32> to vector<2x8x48xf32>
    %32 = vector.extract_strided_slice %20 {offsets = [0, 0], sizes = [2, 12], strides = [1, 1]} : vector<2x48xf32> to vector<2x12xf32>
    %33 = vector.shape_cast %32 : vector<2x12xf32> to vector<2x1x12xf32>
    %34 = vector.extract_strided_slice %29 {offsets = [0, 0, 0], sizes = [2, 8, 12], strides = [1, 1, 1]} : vector<2x8x48xf32> to vector<2x8x12xf32>
    %35 = vector.extract_strided_slice %31 {offsets = [0, 0, 0], sizes = [2, 8, 12], strides = [1, 1, 1]} : vector<2x8x48xf32> to vector<2x8x12xf32>
    "tpu.trace_start"() <{level = 10 : i32, message = "bqd,bkd->bqk"}> : () -> ()
    %cst_10 = arith.constant dense<0.000000e+00> : vector<2x1x8xf32>
    %36 = tpu.matmul %33, %34, %cst_10 {dimension_numbers = #tpu.dot_dimension_numbers<[2], [2], [1], [1], [0, 0, 0, 1, 1, 1], [0], [0]>} : vector<2x1x12xf32>, vector<2x8x12xf32>, vector<2x1x8xf32> -> vector<2x1x8xf32>
    "tpu.trace_stop"() : () -> ()
    %cst_11 = arith.constant dense<0xFF800000> : vector<2x1xf32>
    %37 = vector.multi_reduction <maximumf>, %36, %cst_11 [2] : vector<2x1x8xf32> to vector<2x1xf32>
    %38 = vector.shape_cast %37 : vector<2x1xf32> to vector<2x1x1xf32>
    %39 = vector.broadcast %38 : vector<2x1x1xf32> to vector<2x1x8xf32>
    %40 = arith.subf %36, %39 : vector<2x1x8xf32>
    %41 = math.exp %40 : vector<2x1x8xf32>
    %cst_12 = arith.constant dense<0.000000e+00> : vector<2x1xf32>
    %42 = vector.multi_reduction <add>, %41, %cst_12 [2] : vector<2x1x8xf32> to vector<2x1xf32>
    %43 = vector.shape_cast %42 : vector<2x1xf32> to vector<2x1x1xf32>
    %44 = vector.broadcast %43 : vector<2x1x1xf32> to vector<2x1x8xf32>
    %45 = arith.divf %41, %44 : vector<2x1x8xf32>
    "tpu.trace_start"() <{level = 10 : i32, message = "bqk,bkd->bqd"}> : () -> ()
    %cst_13 = arith.constant dense<0.000000e+00> : vector<2x1x12xf32>
    %46 = tpu.matmul %45, %35, %cst_13 {dimension_numbers = #tpu.dot_dimension_numbers<[2], [1], [1], [2], [0, 0, 0, 1, 1, 2], [0], [0]>} : vector<2x1x8xf32>, vector<2x8x12xf32>, vector<2x1x12xf32> -> vector<2x1x12xf32>
    "tpu.trace_stop"() : () -> ()
    %47 = vector.shape_cast %46 : vector<2x1x12xf32> to vector<2x12xf32>
    %48 = vector.extract_strided_slice %20 {offsets = [0, 12], sizes = [2, 12], strides = [1, 1]} : vector<2x48xf32> to vector<2x12xf32>
    %49 = vector.shape_cast %48 : vector<2x12xf32> to vector<2x1x12xf32>
    %50 = vector.extract_strided_slice %29 {offsets = [0, 0, 12], sizes = [2, 8, 12], strides = [1, 1, 1]} : vector<2x8x48xf32> to vector<2x8x12xf32>
    %51 = vector.extract_strided_slice %31 {offsets = [0, 0, 12], sizes = [2, 8, 12], strides = [1, 1, 1]} : vector<2x8x48xf32> to vector<2x8x12xf32>
    "tpu.trace_start"() <{level = 10 : i32, message = "bqd,bkd->bqk"}> : () -> ()
    %cst_14 = arith.constant dense<0.000000e+00> : vector<2x1x8xf32>
    %52 = tpu.matmul %49, %50, %cst_14 {dimension_numbers = #tpu.dot_dimension_numbers<[2], [2], [1], [1], [0, 0, 0, 1, 1, 1], [0], [0]>} : vector<2x1x12xf32>, vector<2x8x12xf32>, vector<2x1x8xf32> -> vector<2x1x8xf32>
    "tpu.trace_stop"() : () -> ()
    %cst_15 = arith.constant dense<0xFF800000> : vector<2x1xf32>
    %53 = vector.multi_reduction <maximumf>, %52, %cst_15 [2] : vector<2x1x8xf32> to vector<2x1xf32>
    %54 = vector.shape_cast %53 : vector<2x1xf32> to vector<2x1x1xf32>
    %55 = vector.broadcast %54 : vector<2x1x1xf32> to vector<2x1x8xf32>
    %56 = arith.subf %52, %55 : vector<2x1x8xf32>
    %57 = math.exp %56 : vector<2x1x8xf32>
    %cst_16 = arith.constant dense<0.000000e+00> : vector<2x1xf32>
    %58 = vector.multi_reduction <add>, %57, %cst_16 [2] : vector<2x1x8xf32> to vector<2x1xf32>
    %59 = vector.shape_cast %58 : vector<2x1xf32> to vector<2x1x1xf32>
    %60 = vector.broadcast %59 : vector<2x1x1xf32> to vector<2x1x8xf32>
    %61 = arith.divf %57, %60 : vector<2x1x8xf32>
    "tpu.trace_start"() <{level = 10 : i32, message = "bqk,bkd->bqd"}> : () -> ()
    %cst_17 = arith.constant dense<0.000000e+00> : vector<2x1x12xf32>
    %62 = tpu.matmul %61, %51, %cst_17 {dimension_numbers = #tpu.dot_dimension_numbers<[2], [1], [1], [2], [0, 0, 0, 1, 1, 2], [0], [0]>} : vector<2x1x8xf32>, vector<2x8x12xf32>, vector<2x1x12xf32> -> vector<2x1x12xf32>
    "tpu.trace_stop"() : () -> ()
    %63 = vector.shape_cast %62 : vector<2x1x12xf32> to vector<2x12xf32>
    %64 = vector.extract_strided_slice %20 {offsets = [0, 24], sizes = [2, 12], strides = [1, 1]} : vector<2x48xf32> to vector<2x12xf32>
    %65 = vector.shape_cast %64 : vector<2x12xf32> to vector<2x1x12xf32>
    %66 = vector.extract_strided_slice %29 {offsets = [0, 0, 24], sizes = [2, 8, 12], strides = [1, 1, 1]} : vector<2x8x48xf32> to vector<2x8x12xf32>
    %67 = vector.extract_strided_slice %31 {offsets = [0, 0, 24], sizes = [2, 8, 12], strides = [1, 1, 1]} : vector<2x8x48xf32> to vector<2x8x12xf32>
    "tpu.trace_start"() <{level = 10 : i32, message = "bqd,bkd->bqk"}> : () -> ()
    %cst_18 = arith.constant dense<0.000000e+00> : vector<2x1x8xf32>
    %68 = tpu.matmul %65, %66, %cst_18 {dimension_numbers = #tpu.dot_dimension_numbers<[2], [2], [1], [1], [0, 0, 0, 1, 1, 1], [0], [0]>} : vector<2x1x12xf32>, vector<2x8x12xf32>, vector<2x1x8xf32> -> vector<2x1x8xf32>
    "tpu.trace_stop"() : () -> ()
    %cst_19 = arith.constant dense<0xFF800000> : vector<2x1xf32>
    %69 = vector.multi_reduction <maximumf>, %68, %cst_19 [2] : vector<2x1x8xf32> to vector<2x1xf32>
    %70 = vector.shape_cast %69 : vector<2x1xf32> to vector<2x1x1xf32>
    %71 = vector.broadcast %70 : vector<2x1x1xf32> to vector<2x1x8xf32>
    %72 = arith.subf %68, %71 : vector<2x1x8xf32>
    %73 = math.exp %72 : vector<2x1x8xf32>
    %cst_20 = arith.constant dense<0.000000e+00> : vector<2x1xf32>
    %74 = vector.multi_reduction <add>, %73, %cst_20 [2] : vector<2x1x8xf32> to vector<2x1xf32>
    %75 = vector.shape_cast %74 : vector<2x1xf32> to vector<2x1x1xf32>
    %76 = vector.broadcast %75 : vector<2x1x1xf32> to vector<2x1x8xf32>
    %77 = arith.divf %73, %76 : vector<2x1x8xf32>
    "tpu.trace_start"() <{level = 10 : i32, message = "bqk,bkd->bqd"}> : () -> ()
    %cst_21 = arith.constant dense<0.000000e+00> : vector<2x1x12xf32>
    %78 = tpu.matmul %77, %67, %cst_21 {dimension_numbers = #tpu.dot_dimension_numbers<[2], [1], [1], [2], [0, 0, 0, 1, 1, 2], [0], [0]>} : vector<2x1x8xf32>, vector<2x8x12xf32>, vector<2x1x12xf32> -> vector<2x1x12xf32>
    "tpu.trace_stop"() : () -> ()
    %79 = vector.shape_cast %78 : vector<2x1x12xf32> to vector<2x12xf32>
    %80 = vector.extract_strided_slice %20 {offsets = [0, 36], sizes = [2, 12], strides = [1, 1]} : vector<2x48xf32> to vector<2x12xf32>
    %81 = vector.shape_cast %80 : vector<2x12xf32> to vector<2x1x12xf32>
    %82 = vector.extract_strided_slice %29 {offsets = [0, 0, 36], sizes = [2, 8, 12], strides = [1, 1, 1]} : vector<2x8x48xf32> to vector<2x8x12xf32>
    %83 = vector.extract_strided_slice %31 {offsets = [0, 0, 36], sizes = [2, 8, 12], strides = [1, 1, 1]} : vector<2x8x48xf32> to vector<2x8x12xf32>
    "tpu.trace_start"() <{level = 10 : i32, message = "bqd,bkd->bqk"}> : () -> ()
    %cst_22 = arith.constant dense<0.000000e+00> : vector<2x1x8xf32>
    %84 = tpu.matmul %81, %82, %cst_22 {dimension_numbers = #tpu.dot_dimension_numbers<[2], [2], [1], [1], [0, 0, 0, 1, 1, 1], [0], [0]>} : vector<2x1x12xf32>, vector<2x8x12xf32>, vector<2x1x8xf32> -> vector<2x1x8xf32>
    "tpu.trace_stop"() : () -> ()
    %cst_23 = arith.constant dense<0xFF800000> : vector<2x1xf32>
    %85 = vector.multi_reduction <maximumf>, %84, %cst_23 [2] : vector<2x1x8xf32> to vector<2x1xf32>
    %86 = vector.shape_cast %85 : vector<2x1xf32> to vector<2x1x1xf32>
    %87 = vector.broadcast %86 : vector<2x1x1xf32> to vector<2x1x8xf32>
    %88 = arith.subf %84, %87 : vector<2x1x8xf32>
    %89 = math.exp %88 : vector<2x1x8xf32>
    %cst_24 = arith.constant dense<0.000000e+00> : vector<2x1xf32>
    %90 = vector.multi_reduction <add>, %89, %cst_24 [2] : vector<2x1x8xf32> to vector<2x1xf32>
    %91 = vector.shape_cast %90 : vector<2x1xf32> to vector<2x1x1xf32>
    %92 = vector.broadcast %91 : vector<2x1x1xf32> to vector<2x1x8xf32>
    %93 = arith.divf %89, %92 : vector<2x1x8xf32>
    "tpu.trace_start"() <{level = 10 : i32, message = "bqk,bkd->bqd"}> : () -> ()
    %cst_25 = arith.constant dense<0.000000e+00> : vector<2x1x12xf32>
    %94 = tpu.matmul %93, %83, %cst_25 {dimension_numbers = #tpu.dot_dimension_numbers<[2], [1], [1], [2], [0, 0, 0, 1, 1, 2], [0], [0]>} : vector<2x1x8xf32>, vector<2x8x12xf32>, vector<2x1x12xf32> -> vector<2x1x12xf32>
    "tpu.trace_stop"() : () -> ()
    %95 = vector.shape_cast %94 : vector<2x1x12xf32> to vector<2x12xf32>
    %96 = tpu.concatenate %47, %63, %79, %95 in 1 : vector<2x12xf32>, vector<2x12xf32>, vector<2x12xf32>, vector<2x12xf32> -> vector<2x48xf32>
    %cst_26 = arith.constant dense<0.000000e+00> : vector<2x48xf32>
    %97 = tpu.matmul %96, %4, %cst_26 {dimension_numbers = #tpu.dot_dimension_numbers<[1], [0], [0], [1], [0, 0, 1, 1], [], []>} : vector<2x48xf32>, vector<48x48xf32>, vector<2x48xf32> -> vector<2x48xf32>
    %98 = vector.extract_strided_slice %1 {offsets = [4, 0], sizes = [1, 48], strides = [1, 1]} : vector<12x48xf32> to vector<1x48xf32>
    %99 = vector.broadcast %98 : vector<1x48xf32> to vector<2x48xf32>
    %100 = arith.addf %97, %99 : vector<2x48xf32>
    %101 = vector.shape_cast %100 : vector<2x48xf32> to vector<2x1x48xf32>
    %102 = vector.broadcast %101 : vector<2x1x48xf32> to vector<2x8x48xf32>
    %103 = arith.addf %12, %102 : vector<2x8x48xf32>
    %104 = vector.shape_cast %103 : vector<2x8x48xf32> to vector<16x48xf32>
    %105 = vector.extract_strided_slice %1 {offsets = [5, 0], sizes = [1, 48], strides = [1, 1]} : vector<12x48xf32> to vector<1x48xf32>
    %106 = vector.extract_strided_slice %1 {offsets = [6, 0], sizes = [1, 48], strides = [1, 1]} : vector<12x48xf32> to vector<1x48xf32>
    %cst_27 = arith.constant dense<0.000000e+00> : vector<16xf32>
    %107 = vector.multi_reduction <add>, %104, %cst_27 [1] : vector<16x48xf32> to vector<16xf32>
    %108 = vector.shape_cast %107 : vector<16xf32> to vector<16x1xf32>
    %cst_28 = arith.constant 4.800000e+01 : f32
    %109 = vector.broadcast %cst_28 : f32 to vector<16x1xf32>
    %110 = arith.divf %108, %109 : vector<16x1xf32>
    %111 = vector.broadcast %110 : vector<16x1xf32> to vector<16x48xf32>
    %112 = arith.subf %104, %111 : vector<16x48xf32>
    %113 = vector.broadcast %110 : vector<16x1xf32> to vector<16x48xf32>
    %114 = arith.subf %104, %113 : vector<16x48xf32>
    %115 = arith.mulf %112, %114 : vector<16x48xf32>
    %cst_29 = arith.constant dense<0.000000e+00> : vector<16xf32>
    %116 = vector.multi_reduction <add>, %115, %cst_29 [1] : vector<16x48xf32> to vector<16xf32>
    %117 = vector.shape_cast %116 : vector<16xf32> to vector<16x1xf32>
    %cst_30 = arith.constant 4.800000e+01 : f32
    %118 = vector.broadcast %cst_30 : f32 to vector<16x1xf32>
    %119 = arith.divf %117, %118 : vector<16x1xf32>
    %120 = vector.broadcast %110 : vector<16x1xf32> to vector<16x48xf32>
    %121 = arith.subf %104, %120 : vector<16x48xf32>
    %cst_31 = arith.constant 9.99999974E-6 : f32
    %122 = vector.broadcast %cst_31 : f32 to vector<16x1xf32>
    %123 = arith.addf %119, %122 : vector<16x1xf32>
    %124 = math.rsqrt %123 : vector<16x1xf32>
    %125 = vector.broadcast %124 : vector<16x1xf32> to vector<16x48xf32>
    %126 = arith.mulf %121, %125 : vector<16x48xf32>
    %127 = vector.broadcast %105 : vector<1x48xf32> to vector<16x48xf32>
    %128 = arith.mulf %126, %127 : vector<16x48xf32>
    %129 = vector.broadcast %106 : vector<1x48xf32> to vector<16x48xf32>
    %130 = arith.addf %128, %129 : vector<16x48xf32>
    %cst_32 = arith.constant dense<0.000000e+00> : vector<16x48xf32>
    %131 = tpu.matmul %130, %5, %cst_32 {dimension_numbers = #tpu.dot_dimension_numbers<[1], [0], [0], [1], [0, 0, 1, 1], [], []>} : vector<16x48xf32>, vector<48x48xf32>, vector<16x48xf32> -> vector<16x48xf32>
    %132 = vector.extract_strided_slice %1 {offsets = [7, 0], sizes = [1, 48], strides = [1, 1]} : vector<12x48xf32> to vector<1x48xf32>
    %133 = vector.broadcast %132 : vector<1x48xf32> to vector<16x48xf32>
    %134 = arith.addf %131, %133 : vector<16x48xf32>
    %cst_33 = arith.constant 0.000000e+00 : f32
    %135 = vector.broadcast %cst_33 : f32 to vector<16x48xf32>
    %136 = arith.maximumf %134, %135 : vector<16x48xf32>
    %cst_34 = arith.constant dense<0.000000e+00> : vector<16x48xf32>
    %137 = tpu.matmul %136, %6, %cst_34 {dimension_numbers = #tpu.dot_dimension_numbers<[1], [0], [0], [1], [0, 0, 1, 1], [], []>} : vector<16x48xf32>, vector<48x48xf32>, vector<16x48xf32> -> vector<16x48xf32>
    %138 = vector.extract_strided_slice %1 {offsets = [8, 0], sizes = [1, 48], strides = [1, 1]} : vector<12x48xf32> to vector<1x48xf32>
    %139 = vector.broadcast %138 : vector<1x48xf32> to vector<16x48xf32>
    %140 = arith.addf %137, %139 : vector<16x48xf32>
    %141 = arith.addf %11, %140 : vector<16x48xf32>
    %142 = vector.extract_strided_slice %1 {offsets = [9, 0], sizes = [1, 48], strides = [1, 1]} : vector<12x48xf32> to vector<1x48xf32>
    %143 = vector.extract_strided_slice %1 {offsets = [10, 0], sizes = [1, 48], strides = [1, 1]} : vector<12x48xf32> to vector<1x48xf32>
    %cst_35 = arith.constant dense<0.000000e+00> : vector<16xf32>
    %144 = vector.multi_reduction <add>, %141, %cst_35 [1] : vector<16x48xf32> to vector<16xf32>
    %145 = vector.shape_cast %144 : vector<16xf32> to vector<16x1xf32>
    %cst_36 = arith.constant 4.800000e+01 : f32
    %146 = vector.broadcast %cst_36 : f32 to vector<16x1xf32>
    %147 = arith.divf %145, %146 : vector<16x1xf32>
    %148 = vector.broadcast %147 : vector<16x1xf32> to vector<16x48xf32>
    %149 = arith.subf %141, %148 : vector<16x48xf32>
    %150 = vector.broadcast %147 : vector<16x1xf32> to vector<16x48xf32>
    %151 = arith.subf %141, %150 : vector<16x48xf32>
    %152 = arith.mulf %149, %151 : vector<16x48xf32>
    %cst_37 = arith.constant dense<0.000000e+00> : vector<16xf32>
    %153 = vector.multi_reduction <add>, %152, %cst_37 [1] : vector<16x48xf32> to vector<16xf32>
    %154 = vector.shape_cast %153 : vector<16xf32> to vector<16x1xf32>
    %cst_38 = arith.constant 4.800000e+01 : f32
    %155 = vector.broadcast %cst_38 : f32 to vector<16x1xf32>
    %156 = arith.divf %154, %155 : vector<16x1xf32>
    %157 = vector.broadcast %147 : vector<16x1xf32> to vector<16x48xf32>
    %158 = arith.subf %141, %157 : vector<16x48xf32>
    %cst_39 = arith.constant 9.99999974E-6 : f32
    %159 = vector.broadcast %cst_39 : f32 to vector<16x1xf32>
    %160 = arith.addf %156, %159 : vector<16x1xf32>
    %161 = math.rsqrt %160 : vector<16x1xf32>
    %162 = vector.broadcast %161 : vector<16x1xf32> to vector<16x48xf32>
    %163 = arith.mulf %158, %162 : vector<16x48xf32>
    %164 = vector.broadcast %142 : vector<1x48xf32> to vector<16x48xf32>
    %165 = arith.mulf %163, %164 : vector<16x48xf32>
    %166 = vector.broadcast %143 : vector<1x48xf32> to vector<16x48xf32>
    %167 = arith.addf %165, %166 : vector<16x48xf32>
    %c0_40 = arith.constant 0 : index
    %c0_41 = arith.constant 0 : index
    %168 = vector.load %arg5[%c0_40, %c0_41] : memref<432x512xf32, #tpu.memory_space<vmem>>, vector<432x512xf32>
    %169 = vector.extract_strided_slice %168 {offsets = [0, 0], sizes = [48, 512], strides = [1, 1]} : vector<432x512xf32> to vector<48x512xf32>
    %170 = vector.extract_strided_slice %168 {offsets = [48, 0], sizes = [128, 512], strides = [1, 1]} : vector<432x512xf32> to vector<128x512xf32>
    %171 = vector.extract_strided_slice %168 {offsets = [176, 0], sizes = [256, 512], strides = [1, 1]} : vector<432x512xf32> to vector<256x512xf32>
    %c0_42 = arith.constant 0 : index
    %c0_43 = arith.constant 0 : index
    %172 = vector.load %arg6[%c0_42, %c0_43] : memref<2x512xf32, #tpu.memory_space<vmem>>, vector<1x512xf32>
    %c1 = arith.constant 1 : index
    %c0_44 = arith.constant 0 : index
    %173 = vector.load %arg6[%c1, %c0_44] : memref<2x512xf32, #tpu.memory_space<vmem>>, vector<1x512xf32>
    %cst_45 = arith.constant dense<0.000000e+00> : vector<16x512xf32>
    %174 = tpu.matmul %167, %169, %cst_45 {dimension_numbers = #tpu.dot_dimension_numbers<[1], [0], [0], [1], [0, 0, 1, 1], [], []>} : vector<16x48xf32>, vector<48x512xf32>, vector<16x512xf32> -> vector<16x512xf32>
    %175 = vector.broadcast %172 : vector<1x512xf32> to vector<16x512xf32>
    %176 = arith.addf %174, %175 : vector<16x512xf32>
    %177 = vector.shape_cast %176 : vector<16x512xf32> to vector<2x8x512xf32>
    %cst_46 = arith.constant 0.000000e+00 : f32
    %178 = vector.broadcast %cst_46 : f32 to vector<2x128xf32>
    %cst_47 = arith.constant 0.000000e+00 : f32
    %179 = vector.broadcast %cst_47 : f32 to vector<2x128xf32>
    %cst_48 = arith.constant 0.000000e+00 : f32
    %180 = vector.broadcast %cst_48 : f32 to vector<2x128xf32>
    %cst_49 = arith.constant 0.000000e+00 : f32
    %181 = vector.broadcast %cst_49 : f32 to vector<2x128xf32>
    %182 = vector.extract_strided_slice %177 {offsets = [0, 0, 0], sizes = [2, 1, 512], strides = [1, 1, 1]} : vector<2x8x512xf32> to vector<2x1x512xf32>
    %183 = vector.shape_cast %182 : vector<2x1x512xf32> to vector<2x512xf32>
    %cst_50 = arith.constant dense<0.000000e+00> : vector<2x512xf32>
    %184 = tpu.matmul %178, %170, %cst_50 {dimension_numbers = #tpu.dot_dimension_numbers<[1], [0], [0], [1], [0, 0, 1, 1], [], []>} : vector<2x128xf32>, vector<128x512xf32>, vector<2x512xf32> -> vector<2x512xf32>
    %185 = arith.addf %183, %184 : vector<2x512xf32>
    %186 = vector.extract_strided_slice %185 {offsets = [0, 0], sizes = [2, 384], strides = [1, 1]} : vector<2x512xf32> to vector<2x384xf32>
    %187 = arith.negf %186 : vector<2x384xf32>
    %188 = math.exp %187 : vector<2x384xf32>
    %cst_51 = arith.constant 1.000000e+00 : f32
    %189 = vector.broadcast %cst_51 : f32 to vector<2x384xf32>
    %190 = arith.addf %189, %188 : vector<2x384xf32>
    %191 = arith.divf %189, %190 : vector<2x384xf32>
    %192 = vector.extract_strided_slice %185 {offsets = [0, 384], sizes = [2, 128], strides = [1, 1]} : vector<2x512xf32> to vector<2x128xf32>
    %193 = math.tanh %192 : vector<2x128xf32>
    %194 = vector.extract_strided_slice %191 {offsets = [0, 128], sizes = [2, 128], strides = [1, 1]} : vector<2x384xf32> to vector<2x128xf32>
    %195 = arith.mulf %194, %179 : vector<2x128xf32>
    %196 = vector.extract_strided_slice %191 {offsets = [0, 0], sizes = [2, 128], strides = [1, 1]} : vector<2x384xf32> to vector<2x128xf32>
    %197 = arith.mulf %196, %193 : vector<2x128xf32>
    %198 = arith.addf %195, %197 : vector<2x128xf32>
    %199 = vector.extract_strided_slice %191 {offsets = [0, 256], sizes = [2, 128], strides = [1, 1]} : vector<2x384xf32> to vector<2x128xf32>
    %200 = math.tanh %198 : vector<2x128xf32>
    %201 = arith.mulf %199, %200 : vector<2x128xf32>
    %202 = tpu.concatenate %201, %180 in 1 : vector<2x128xf32>, vector<2x128xf32> -> vector<2x256xf32>
    %cst_52 = arith.constant dense<0.000000e+00> : vector<2x512xf32>
    %203 = tpu.matmul %202, %171, %cst_52 {dimension_numbers = #tpu.dot_dimension_numbers<[1], [0], [0], [1], [0, 0, 1, 1], [], []>} : vector<2x256xf32>, vector<256x512xf32>, vector<2x512xf32> -> vector<2x512xf32>
    %204 = vector.broadcast %173 : vector<1x512xf32> to vector<2x512xf32>
    %205 = arith.addf %203, %204 : vector<2x512xf32>
    %206 = vector.extract_strided_slice %205 {offsets = [0, 0], sizes = [2, 384], strides = [1, 1]} : vector<2x512xf32> to vector<2x384xf32>
    %207 = arith.negf %206 : vector<2x384xf32>
    %208 = math.exp %207 : vector<2x384xf32>
    %cst_53 = arith.constant 1.000000e+00 : f32
    %209 = vector.broadcast %cst_53 : f32 to vector<2x384xf32>
    %210 = arith.addf %209, %208 : vector<2x384xf32>
    %211 = arith.divf %209, %210 : vector<2x384xf32>
    %212 = vector.extract_strided_slice %205 {offsets = [0, 384], sizes = [2, 128], strides = [1, 1]} : vector<2x512xf32> to vector<2x128xf32>
    %213 = math.tanh %212 : vector<2x128xf32>
    %214 = vector.extract_strided_slice %211 {offsets = [0, 128], sizes = [2, 128], strides = [1, 1]} : vector<2x384xf32> to vector<2x128xf32>
    %215 = arith.mulf %214, %181 : vector<2x128xf32>
    %216 = vector.extract_strided_slice %211 {offsets = [0, 0], sizes = [2, 128], strides = [1, 1]} : vector<2x384xf32> to vector<2x128xf32>
    %217 = arith.mulf %216, %213 : vector<2x128xf32>
    %218 = arith.addf %215, %217 : vector<2x128xf32>
    %219 = vector.extract_strided_slice %211 {offsets = [0, 256], sizes = [2, 128], strides = [1, 1]} : vector<2x384xf32> to vector<2x128xf32>
    %220 = math.tanh %218 : vector<2x128xf32>
    %221 = arith.mulf %219, %220 : vector<2x128xf32>
    %222 = vector.extract_strided_slice %177 {offsets = [0, 1, 0], sizes = [2, 1, 512], strides = [1, 1, 1]} : vector<2x8x512xf32> to vector<2x1x512xf32>
    %223 = vector.shape_cast %222 : vector<2x1x512xf32> to vector<2x512xf32>
    %cst_54 = arith.constant dense<0.000000e+00> : vector<2x512xf32>
    %224 = tpu.matmul %201, %170, %cst_54 {dimension_numbers = #tpu.dot_dimension_numbers<[1], [0], [0], [1], [0, 0, 1, 1], [], []>} : vector<2x128xf32>, vector<128x512xf32>, vector<2x512xf32> -> vector<2x512xf32>
    %225 = arith.addf %223, %224 : vector<2x512xf32>
    %226 = vector.extract_strided_slice %225 {offsets = [0, 0], sizes = [2, 384], strides = [1, 1]} : vector<2x512xf32> to vector<2x384xf32>
    %227 = arith.negf %226 : vector<2x384xf32>
    %228 = math.exp %227 : vector<2x384xf32>
    %cst_55 = arith.constant 1.000000e+00 : f32
    %229 = vector.broadcast %cst_55 : f32 to vector<2x384xf32>
    %230 = arith.addf %229, %228 : vector<2x384xf32>
    %231 = arith.divf %229, %230 : vector<2x384xf32>
    %232 = vector.extract_strided_slice %225 {offsets = [0, 384], sizes = [2, 128], strides = [1, 1]} : vector<2x512xf32> to vector<2x128xf32>
    %233 = math.tanh %232 : vector<2x128xf32>
    %234 = vector.extract_strided_slice %231 {offsets = [0, 128], sizes = [2, 128], strides = [1, 1]} : vector<2x384xf32> to vector<2x128xf32>
    %235 = arith.mulf %234, %198 : vector<2x128xf32>
    %236 = vector.extract_strided_slice %231 {offsets = [0, 0], sizes = [2, 128], strides = [1, 1]} : vector<2x384xf32> to vector<2x128xf32>
    %237 = arith.mulf %236, %233 : vector<2x128xf32>
    %238 = arith.addf %235, %237 : vector<2x128xf32>
    %239 = vector.extract_strided_slice %231 {offsets = [0, 256], sizes = [2, 128], strides = [1, 1]} : vector<2x384xf32> to vector<2x128xf32>
    %240 = math.tanh %238 : vector<2x128xf32>
    %241 = arith.mulf %239, %240 : vector<2x128xf32>
    %242 = tpu.concatenate %241, %221 in 1 : vector<2x128xf32>, vector<2x128xf32> -> vector<2x256xf32>
    %cst_56 = arith.constant dense<0.000000e+00> : vector<2x512xf32>
    %243 = tpu.matmul %242, %171, %cst_56 {dimension_numbers = #tpu.dot_dimension_numbers<[1], [0], [0], [1], [0, 0, 1, 1], [], []>} : vector<2x256xf32>, vector<256x512xf32>, vector<2x512xf32> -> vector<2x512xf32>
    %244 = vector.broadcast %173 : vector<1x512xf32> to vector<2x512xf32>
    %245 = arith.addf %243, %244 : vector<2x512xf32>
    %246 = vector.extract_strided_slice %245 {offsets = [0, 0], sizes = [2, 384], strides = [1, 1]} : vector<2x512xf32> to vector<2x384xf32>
    %247 = arith.negf %246 : vector<2x384xf32>
    %248 = math.exp %247 : vector<2x384xf32>
    %cst_57 = arith.constant 1.000000e+00 : f32
    %249 = vector.broadcast %cst_57 : f32 to vector<2x384xf32>
    %250 = arith.addf %249, %248 : vector<2x384xf32>
    %251 = arith.divf %249, %250 : vector<2x384xf32>
    %252 = vector.extract_strided_slice %245 {offsets = [0, 384], sizes = [2, 128], strides = [1, 1]} : vector<2x512xf32> to vector<2x128xf32>
    %253 = math.tanh %252 : vector<2x128xf32>
    %254 = vector.extract_strided_slice %251 {offsets = [0, 128], sizes = [2, 128], strides = [1, 1]} : vector<2x384xf32> to vector<2x128xf32>
    %255 = arith.mulf %254, %218 : vector<2x128xf32>
    %256 = vector.extract_strided_slice %251 {offsets = [0, 0], sizes = [2, 128], strides = [1, 1]} : vector<2x384xf32> to vector<2x128xf32>
    %257 = arith.mulf %256, %253 : vector<2x128xf32>
    %258 = arith.addf %255, %257 : vector<2x128xf32>
    %259 = vector.extract_strided_slice %251 {offsets = [0, 256], sizes = [2, 128], strides = [1, 1]} : vector<2x384xf32> to vector<2x128xf32>
    %260 = math.tanh %258 : vector<2x128xf32>
    %261 = arith.mulf %259, %260 : vector<2x128xf32>
    %262 = vector.extract_strided_slice %177 {offsets = [0, 2, 0], sizes = [2, 1, 512], strides = [1, 1, 1]} : vector<2x8x512xf32> to vector<2x1x512xf32>
    %263 = vector.shape_cast %262 : vector<2x1x512xf32> to vector<2x512xf32>
    %cst_58 = arith.constant dense<0.000000e+00> : vector<2x512xf32>
    %264 = tpu.matmul %241, %170, %cst_58 {dimension_numbers = #tpu.dot_dimension_numbers<[1], [0], [0], [1], [0, 0, 1, 1], [], []>} : vector<2x128xf32>, vector<128x512xf32>, vector<2x512xf32> -> vector<2x512xf32>
    %265 = arith.addf %263, %264 : vector<2x512xf32>
    %266 = vector.extract_strided_slice %265 {offsets = [0, 0], sizes = [2, 384], strides = [1, 1]} : vector<2x512xf32> to vector<2x384xf32>
    %267 = arith.negf %266 : vector<2x384xf32>
    %268 = math.exp %267 : vector<2x384xf32>
    %cst_59 = arith.constant 1.000000e+00 : f32
    %269 = vector.broadcast %cst_59 : f32 to vector<2x384xf32>
    %270 = arith.addf %269, %268 : vector<2x384xf32>
    %271 = arith.divf %269, %270 : vector<2x384xf32>
    %272 = vector.extract_strided_slice %265 {offsets = [0, 384], sizes = [2, 128], strides = [1, 1]} : vector<2x512xf32> to vector<2x128xf32>
    %273 = math.tanh %272 : vector<2x128xf32>
    %274 = vector.extract_strided_slice %271 {offsets = [0, 128], sizes = [2, 128], strides = [1, 1]} : vector<2x384xf32> to vector<2x128xf32>
    %275 = arith.mulf %274, %238 : vector<2x128xf32>
    %276 = vector.extract_strided_slice %271 {offsets = [0, 0], sizes = [2, 128], strides = [1, 1]} : vector<2x384xf32> to vector<2x128xf32>
    %277 = arith.mulf %276, %273 : vector<2x128xf32>
    %278 = arith.addf %275, %277 : vector<2x128xf32>
    %279 = vector.extract_strided_slice %271 {offsets = [0, 256], sizes = [2, 128], strides = [1, 1]} : vector<2x384xf32> to vector<2x128xf32>
    %280 = math.tanh %278 : vector<2x128xf32>
    %281 = arith.mulf %279, %280 : vector<2x128xf32>
    %282 = tpu.concatenate %281, %261 in 1 : vector<2x128xf32>, vector<2x128xf32> -> vector<2x256xf32>
    %cst_60 = arith.constant dense<0.000000e+00> : vector<2x512xf32>
    %283 = tpu.matmul %282, %171, %cst_60 {dimension_numbers = #tpu.dot_dimension_numbers<[1], [0], [0], [1], [0, 0, 1, 1], [], []>} : vector<2x256xf32>, vector<256x512xf32>, vector<2x512xf32> -> vector<2x512xf32>
    %284 = vector.broadcast %173 : vector<1x512xf32> to vector<2x512xf32>
    %285 = arith.addf %283, %284 : vector<2x512xf32>
    %286 = vector.extract_strided_slice %285 {offsets = [0, 0], sizes = [2, 384], strides = [1, 1]} : vector<2x512xf32> to vector<2x384xf32>
    %287 = arith.negf %286 : vector<2x384xf32>
    %288 = math.exp %287 : vector<2x384xf32>
    %cst_61 = arith.constant 1.000000e+00 : f32
    %289 = vector.broadcast %cst_61 : f32 to vector<2x384xf32>
    %290 = arith.addf %289, %288 : vector<2x384xf32>
    %291 = arith.divf %289, %290 : vector<2x384xf32>
    %292 = vector.extract_strided_slice %285 {offsets = [0, 384], sizes = [2, 128], strides = [1, 1]} : vector<2x512xf32> to vector<2x128xf32>
    %293 = math.tanh %292 : vector<2x128xf32>
    %294 = vector.extract_strided_slice %291 {offsets = [0, 128], sizes = [2, 128], strides = [1, 1]} : vector<2x384xf32> to vector<2x128xf32>
    %295 = arith.mulf %294, %258 : vector<2x128xf32>
    %296 = vector.extract_strided_slice %291 {offsets = [0, 0], sizes = [2, 128], strides = [1, 1]} : vector<2x384xf32> to vector<2x128xf32>
    %297 = arith.mulf %296, %293 : vector<2x128xf32>
    %298 = arith.addf %295, %297 : vector<2x128xf32>
    %299 = vector.extract_strided_slice %291 {offsets = [0, 256], sizes = [2, 128], strides = [1, 1]} : vector<2x384xf32> to vector<2x128xf32>
    %300 = math.tanh %298 : vector<2x128xf32>
    %301 = arith.mulf %299, %300 : vector<2x128xf32>
    %302 = vector.extract_strided_slice %177 {offsets = [0, 3, 0], sizes = [2, 1, 512], strides = [1, 1, 1]} : vector<2x8x512xf32> to vector<2x1x512xf32>
    %303 = vector.shape_cast %302 : vector<2x1x512xf32> to vector<2x512xf32>
    %cst_62 = arith.constant dense<0.000000e+00> : vector<2x512xf32>
    %304 = tpu.matmul %281, %170, %cst_62 {dimension_numbers = #tpu.dot_dimension_numbers<[1], [0], [0], [1], [0, 0, 1, 1], [], []>} : vector<2x128xf32>, vector<128x512xf32>, vector<2x512xf32> -> vector<2x512xf32>
    %305 = arith.addf %303, %304 : vector<2x512xf32>
    %306 = vector.extract_strided_slice %305 {offsets = [0, 0], sizes = [2, 384], strides = [1, 1]} : vector<2x512xf32> to vector<2x384xf32>
    %307 = arith.negf %306 : vector<2x384xf32>
    %308 = math.exp %307 : vector<2x384xf32>
    %cst_63 = arith.constant 1.000000e+00 : f32
    %309 = vector.broadcast %cst_63 : f32 to vector<2x384xf32>
    %310 = arith.addf %309, %308 : vector<2x384xf32>
    %311 = arith.divf %309, %310 : vector<2x384xf32>
    %312 = vector.extract_strided_slice %305 {offsets = [0, 384], sizes = [2, 128], strides = [1, 1]} : vector<2x512xf32> to vector<2x128xf32>
    %313 = math.tanh %312 : vector<2x128xf32>
    %314 = vector.extract_strided_slice %311 {offsets = [0, 128], sizes = [2, 128], strides = [1, 1]} : vector<2x384xf32> to vector<2x128xf32>
    %315 = arith.mulf %314, %278 : vector<2x128xf32>
    %316 = vector.extract_strided_slice %311 {offsets = [0, 0], sizes = [2, 128], strides = [1, 1]} : vector<2x384xf32> to vector<2x128xf32>
    %317 = arith.mulf %316, %313 : vector<2x128xf32>
    %318 = arith.addf %315, %317 : vector<2x128xf32>
    %319 = vector.extract_strided_slice %311 {offsets = [0, 256], sizes = [2, 128], strides = [1, 1]} : vector<2x384xf32> to vector<2x128xf32>
    %320 = math.tanh %318 : vector<2x128xf32>
    %321 = arith.mulf %319, %320 : vector<2x128xf32>
    %322 = tpu.concatenate %321, %301 in 1 : vector<2x128xf32>, vector<2x128xf32> -> vector<2x256xf32>
    %cst_64 = arith.constant dense<0.000000e+00> : vector<2x512xf32>
    %323 = tpu.matmul %322, %171, %cst_64 {dimension_numbers = #tpu.dot_dimension_numbers<[1], [0], [0], [1], [0, 0, 1, 1], [], []>} : vector<2x256xf32>, vector<256x512xf32>, vector<2x512xf32> -> vector<2x512xf32>
    %324 = vector.broadcast %173 : vector<1x512xf32> to vector<2x512xf32>
    %325 = arith.addf %323, %324 : vector<2x512xf32>
    %326 = vector.extract_strided_slice %325 {offsets = [0, 0], sizes = [2, 384], strides = [1, 1]} : vector<2x512xf32> to vector<2x384xf32>
    %327 = arith.negf %326 : vector<2x384xf32>
    %328 = math.exp %327 : vector<2x384xf32>
    %cst_65 = arith.constant 1.000000e+00 : f32
    %329 = vector.broadcast %cst_65 : f32 to vector<2x384xf32>
    %330 = arith.addf %329, %328 : vector<2x384xf32>
    %331 = arith.divf %329, %330 : vector<2x384xf32>
    %332 = vector.extract_strided_slice %325 {offsets = [0, 384], sizes = [2, 128], strides = [1, 1]} : vector<2x512xf32> to vector<2x128xf32>
    %333 = math.tanh %332 : vector<2x128xf32>
    %334 = vector.extract_strided_slice %331 {offsets = [0, 128], sizes = [2, 128], strides = [1, 1]} : vector<2x384xf32> to vector<2x128xf32>
    %335 = arith.mulf %334, %298 : vector<2x128xf32>
    %336 = vector.extract_strided_slice %331 {offsets = [0, 0], sizes = [2, 128], strides = [1, 1]} : vector<2x384xf32> to vector<2x128xf32>
    %337 = arith.mulf %336, %333 : vector<2x128xf32>
    %338 = arith.addf %335, %337 : vector<2x128xf32>
    %339 = vector.extract_strided_slice %331 {offsets = [0, 256], sizes = [2, 128], strides = [1, 1]} : vector<2x384xf32> to vector<2x128xf32>
    %340 = math.tanh %338 : vector<2x128xf32>
    %341 = arith.mulf %339, %340 : vector<2x128xf32>
    %342 = vector.extract_strided_slice %177 {offsets = [0, 4, 0], sizes = [2, 1, 512], strides = [1, 1, 1]} : vector<2x8x512xf32> to vector<2x1x512xf32>
    %343 = vector.shape_cast %342 : vector<2x1x512xf32> to vector<2x512xf32>
    %cst_66 = arith.constant dense<0.000000e+00> : vector<2x512xf32>
    %344 = tpu.matmul %321, %170, %cst_66 {dimension_numbers = #tpu.dot_dimension_numbers<[1], [0], [0], [1], [0, 0, 1, 1], [], []>} : vector<2x128xf32>, vector<128x512xf32>, vector<2x512xf32> -> vector<2x512xf32>
    %345 = arith.addf %343, %344 : vector<2x512xf32>
    %346 = vector.extract_strided_slice %345 {offsets = [0, 0], sizes = [2, 384], strides = [1, 1]} : vector<2x512xf32> to vector<2x384xf32>
    %347 = arith.negf %346 : vector<2x384xf32>
    %348 = math.exp %347 : vector<2x384xf32>
    %cst_67 = arith.constant 1.000000e+00 : f32
    %349 = vector.broadcast %cst_67 : f32 to vector<2x384xf32>
    %350 = arith.addf %349, %348 : vector<2x384xf32>
    %351 = arith.divf %349, %350 : vector<2x384xf32>
    %352 = vector.extract_strided_slice %345 {offsets = [0, 384], sizes = [2, 128], strides = [1, 1]} : vector<2x512xf32> to vector<2x128xf32>
    %353 = math.tanh %352 : vector<2x128xf32>
    %354 = vector.extract_strided_slice %351 {offsets = [0, 128], sizes = [2, 128], strides = [1, 1]} : vector<2x384xf32> to vector<2x128xf32>
    %355 = arith.mulf %354, %318 : vector<2x128xf32>
    %356 = vector.extract_strided_slice %351 {offsets = [0, 0], sizes = [2, 128], strides = [1, 1]} : vector<2x384xf32> to vector<2x128xf32>
    %357 = arith.mulf %356, %353 : vector<2x128xf32>
    %358 = arith.addf %355, %357 : vector<2x128xf32>
    %359 = vector.extract_strided_slice %351 {offsets = [0, 256], sizes = [2, 128], strides = [1, 1]} : vector<2x384xf32> to vector<2x128xf32>
    %360 = math.tanh %358 : vector<2x128xf32>
    %361 = arith.mulf %359, %360 : vector<2x128xf32>
    %362 = tpu.concatenate %361, %341 in 1 : vector<2x128xf32>, vector<2x128xf32> -> vector<2x256xf32>
    %cst_68 = arith.constant dense<0.000000e+00> : vector<2x512xf32>
    %363 = tpu.matmul %362, %171, %cst_68 {dimension_numbers = #tpu.dot_dimension_numbers<[1], [0], [0], [1], [0, 0, 1, 1], [], []>} : vector<2x256xf32>, vector<256x512xf32>, vector<2x512xf32> -> vector<2x512xf32>
    %364 = vector.broadcast %173 : vector<1x512xf32> to vector<2x512xf32>
    %365 = arith.addf %363, %364 : vector<2x512xf32>
    %366 = vector.extract_strided_slice %365 {offsets = [0, 0], sizes = [2, 384], strides = [1, 1]} : vector<2x512xf32> to vector<2x384xf32>
    %367 = arith.negf %366 : vector<2x384xf32>
    %368 = math.exp %367 : vector<2x384xf32>
    %cst_69 = arith.constant 1.000000e+00 : f32
    %369 = vector.broadcast %cst_69 : f32 to vector<2x384xf32>
    %370 = arith.addf %369, %368 : vector<2x384xf32>
    %371 = arith.divf %369, %370 : vector<2x384xf32>
    %372 = vector.extract_strided_slice %365 {offsets = [0, 384], sizes = [2, 128], strides = [1, 1]} : vector<2x512xf32> to vector<2x128xf32>
    %373 = math.tanh %372 : vector<2x128xf32>
    %374 = vector.extract_strided_slice %371 {offsets = [0, 128], sizes = [2, 128], strides = [1, 1]} : vector<2x384xf32> to vector<2x128xf32>
    %375 = arith.mulf %374, %338 : vector<2x128xf32>
    %376 = vector.extract_strided_slice %371 {offsets = [0, 0], sizes = [2, 128], strides = [1, 1]} : vector<2x384xf32> to vector<2x128xf32>
    %377 = arith.mulf %376, %373 : vector<2x128xf32>
    %378 = arith.addf %375, %377 : vector<2x128xf32>
    %379 = vector.extract_strided_slice %371 {offsets = [0, 256], sizes = [2, 128], strides = [1, 1]} : vector<2x384xf32> to vector<2x128xf32>
    %380 = math.tanh %378 : vector<2x128xf32>
    %381 = arith.mulf %379, %380 : vector<2x128xf32>
    %382 = vector.extract_strided_slice %177 {offsets = [0, 5, 0], sizes = [2, 1, 512], strides = [1, 1, 1]} : vector<2x8x512xf32> to vector<2x1x512xf32>
    %383 = vector.shape_cast %382 : vector<2x1x512xf32> to vector<2x512xf32>
    %cst_70 = arith.constant dense<0.000000e+00> : vector<2x512xf32>
    %384 = tpu.matmul %361, %170, %cst_70 {dimension_numbers = #tpu.dot_dimension_numbers<[1], [0], [0], [1], [0, 0, 1, 1], [], []>} : vector<2x128xf32>, vector<128x512xf32>, vector<2x512xf32> -> vector<2x512xf32>
    %385 = arith.addf %383, %384 : vector<2x512xf32>
    %386 = vector.extract_strided_slice %385 {offsets = [0, 0], sizes = [2, 384], strides = [1, 1]} : vector<2x512xf32> to vector<2x384xf32>
    %387 = arith.negf %386 : vector<2x384xf32>
    %388 = math.exp %387 : vector<2x384xf32>
    %cst_71 = arith.constant 1.000000e+00 : f32
    %389 = vector.broadcast %cst_71 : f32 to vector<2x384xf32>
    %390 = arith.addf %389, %388 : vector<2x384xf32>
    %391 = arith.divf %389, %390 : vector<2x384xf32>
    %392 = vector.extract_strided_slice %385 {offsets = [0, 384], sizes = [2, 128], strides = [1, 1]} : vector<2x512xf32> to vector<2x128xf32>
    %393 = math.tanh %392 : vector<2x128xf32>
    %394 = vector.extract_strided_slice %391 {offsets = [0, 128], sizes = [2, 128], strides = [1, 1]} : vector<2x384xf32> to vector<2x128xf32>
    %395 = arith.mulf %394, %358 : vector<2x128xf32>
    %396 = vector.extract_strided_slice %391 {offsets = [0, 0], sizes = [2, 128], strides = [1, 1]} : vector<2x384xf32> to vector<2x128xf32>
    %397 = arith.mulf %396, %393 : vector<2x128xf32>
    %398 = arith.addf %395, %397 : vector<2x128xf32>
    %399 = vector.extract_strided_slice %391 {offsets = [0, 256], sizes = [2, 128], strides = [1, 1]} : vector<2x384xf32> to vector<2x128xf32>
    %400 = math.tanh %398 : vector<2x128xf32>
    %401 = arith.mulf %399, %400 : vector<2x128xf32>
    %402 = tpu.concatenate %401, %381 in 1 : vector<2x128xf32>, vector<2x128xf32> -> vector<2x256xf32>
    %cst_72 = arith.constant dense<0.000000e+00> : vector<2x512xf32>
    %403 = tpu.matmul %402, %171, %cst_72 {dimension_numbers = #tpu.dot_dimension_numbers<[1], [0], [0], [1], [0, 0, 1, 1], [], []>} : vector<2x256xf32>, vector<256x512xf32>, vector<2x512xf32> -> vector<2x512xf32>
    %404 = vector.broadcast %173 : vector<1x512xf32> to vector<2x512xf32>
    %405 = arith.addf %403, %404 : vector<2x512xf32>
    %406 = vector.extract_strided_slice %405 {offsets = [0, 0], sizes = [2, 384], strides = [1, 1]} : vector<2x512xf32> to vector<2x384xf32>
    %407 = arith.negf %406 : vector<2x384xf32>
    %408 = math.exp %407 : vector<2x384xf32>
    %cst_73 = arith.constant 1.000000e+00 : f32
    %409 = vector.broadcast %cst_73 : f32 to vector<2x384xf32>
    %410 = arith.addf %409, %408 : vector<2x384xf32>
    %411 = arith.divf %409, %410 : vector<2x384xf32>
    %412 = vector.extract_strided_slice %405 {offsets = [0, 384], sizes = [2, 128], strides = [1, 1]} : vector<2x512xf32> to vector<2x128xf32>
    %413 = math.tanh %412 : vector<2x128xf32>
    %414 = vector.extract_strided_slice %411 {offsets = [0, 128], sizes = [2, 128], strides = [1, 1]} : vector<2x384xf32> to vector<2x128xf32>
    %415 = arith.mulf %414, %378 : vector<2x128xf32>
    %416 = vector.extract_strided_slice %411 {offsets = [0, 0], sizes = [2, 128], strides = [1, 1]} : vector<2x384xf32> to vector<2x128xf32>
    %417 = arith.mulf %416, %413 : vector<2x128xf32>
    %418 = arith.addf %415, %417 : vector<2x128xf32>
    %419 = vector.extract_strided_slice %411 {offsets = [0, 256], sizes = [2, 128], strides = [1, 1]} : vector<2x384xf32> to vector<2x128xf32>
    %420 = math.tanh %418 : vector<2x128xf32>
    %421 = arith.mulf %419, %420 : vector<2x128xf32>
    %422 = vector.extract_strided_slice %177 {offsets = [0, 6, 0], sizes = [2, 1, 512], strides = [1, 1, 1]} : vector<2x8x512xf32> to vector<2x1x512xf32>
    %423 = vector.shape_cast %422 : vector<2x1x512xf32> to vector<2x512xf32>
    %cst_74 = arith.constant dense<0.000000e+00> : vector<2x512xf32>
    %424 = tpu.matmul %401, %170, %cst_74 {dimension_numbers = #tpu.dot_dimension_numbers<[1], [0], [0], [1], [0, 0, 1, 1], [], []>} : vector<2x128xf32>, vector<128x512xf32>, vector<2x512xf32> -> vector<2x512xf32>
    %425 = arith.addf %423, %424 : vector<2x512xf32>
    %426 = vector.extract_strided_slice %425 {offsets = [0, 0], sizes = [2, 384], strides = [1, 1]} : vector<2x512xf32> to vector<2x384xf32>
    %427 = arith.negf %426 : vector<2x384xf32>
    %428 = math.exp %427 : vector<2x384xf32>
    %cst_75 = arith.constant 1.000000e+00 : f32
    %429 = vector.broadcast %cst_75 : f32 to vector<2x384xf32>
    %430 = arith.addf %429, %428 : vector<2x384xf32>
    %431 = arith.divf %429, %430 : vector<2x384xf32>
    %432 = vector.extract_strided_slice %425 {offsets = [0, 384], sizes = [2, 128], strides = [1, 1]} : vector<2x512xf32> to vector<2x128xf32>
    %433 = math.tanh %432 : vector<2x128xf32>
    %434 = vector.extract_strided_slice %431 {offsets = [0, 128], sizes = [2, 128], strides = [1, 1]} : vector<2x384xf32> to vector<2x128xf32>
    %435 = arith.mulf %434, %398 : vector<2x128xf32>
    %436 = vector.extract_strided_slice %431 {offsets = [0, 0], sizes = [2, 128], strides = [1, 1]} : vector<2x384xf32> to vector<2x128xf32>
    %437 = arith.mulf %436, %433 : vector<2x128xf32>
    %438 = arith.addf %435, %437 : vector<2x128xf32>
    %439 = vector.extract_strided_slice %431 {offsets = [0, 256], sizes = [2, 128], strides = [1, 1]} : vector<2x384xf32> to vector<2x128xf32>
    %440 = math.tanh %438 : vector<2x128xf32>
    %441 = arith.mulf %439, %440 : vector<2x128xf32>
    %442 = tpu.concatenate %441, %421 in 1 : vector<2x128xf32>, vector<2x128xf32> -> vector<2x256xf32>
    %cst_76 = arith.constant dense<0.000000e+00> : vector<2x512xf32>
    %443 = tpu.matmul %442, %171, %cst_76 {dimension_numbers = #tpu.dot_dimension_numbers<[1], [0], [0], [1], [0, 0, 1, 1], [], []>} : vector<2x256xf32>, vector<256x512xf32>, vector<2x512xf32> -> vector<2x512xf32>
    %444 = vector.broadcast %173 : vector<1x512xf32> to vector<2x512xf32>
    %445 = arith.addf %443, %444 : vector<2x512xf32>
    %446 = vector.extract_strided_slice %445 {offsets = [0, 0], sizes = [2, 384], strides = [1, 1]} : vector<2x512xf32> to vector<2x384xf32>
    %447 = arith.negf %446 : vector<2x384xf32>
    %448 = math.exp %447 : vector<2x384xf32>
    %cst_77 = arith.constant 1.000000e+00 : f32
    %449 = vector.broadcast %cst_77 : f32 to vector<2x384xf32>
    %450 = arith.addf %449, %448 : vector<2x384xf32>
    %451 = arith.divf %449, %450 : vector<2x384xf32>
    %452 = vector.extract_strided_slice %445 {offsets = [0, 384], sizes = [2, 128], strides = [1, 1]} : vector<2x512xf32> to vector<2x128xf32>
    %453 = math.tanh %452 : vector<2x128xf32>
    %454 = vector.extract_strided_slice %451 {offsets = [0, 128], sizes = [2, 128], strides = [1, 1]} : vector<2x384xf32> to vector<2x128xf32>
    %455 = arith.mulf %454, %418 : vector<2x128xf32>
    %456 = vector.extract_strided_slice %451 {offsets = [0, 0], sizes = [2, 128], strides = [1, 1]} : vector<2x384xf32> to vector<2x128xf32>
    %457 = arith.mulf %456, %453 : vector<2x128xf32>
    %458 = arith.addf %455, %457 : vector<2x128xf32>
    %459 = vector.extract_strided_slice %451 {offsets = [0, 256], sizes = [2, 128], strides = [1, 1]} : vector<2x384xf32> to vector<2x128xf32>
    %460 = math.tanh %458 : vector<2x128xf32>
    %461 = arith.mulf %459, %460 : vector<2x128xf32>
    %462 = vector.extract_strided_slice %177 {offsets = [0, 7, 0], sizes = [2, 1, 512], strides = [1, 1, 1]} : vector<2x8x512xf32> to vector<2x1x512xf32>
    %463 = vector.shape_cast %462 : vector<2x1x512xf32> to vector<2x512xf32>
    %cst_78 = arith.constant dense<0.000000e+00> : vector<2x512xf32>
    %464 = tpu.matmul %441, %170, %cst_78 {dimension_numbers = #tpu.dot_dimension_numbers<[1], [0], [0], [1], [0, 0, 1, 1], [], []>} : vector<2x128xf32>, vector<128x512xf32>, vector<2x512xf32> -> vector<2x512xf32>
    %465 = arith.addf %463, %464 : vector<2x512xf32>
    %466 = vector.extract_strided_slice %465 {offsets = [0, 0], sizes = [2, 384], strides = [1, 1]} : vector<2x512xf32> to vector<2x384xf32>
    %467 = arith.negf %466 : vector<2x384xf32>
    %468 = math.exp %467 : vector<2x384xf32>
    %cst_79 = arith.constant 1.000000e+00 : f32
    %469 = vector.broadcast %cst_79 : f32 to vector<2x384xf32>
    %470 = arith.addf %469, %468 : vector<2x384xf32>
    %471 = arith.divf %469, %470 : vector<2x384xf32>
    %472 = vector.extract_strided_slice %465 {offsets = [0, 384], sizes = [2, 128], strides = [1, 1]} : vector<2x512xf32> to vector<2x128xf32>
    %473 = math.tanh %472 : vector<2x128xf32>
    %474 = vector.extract_strided_slice %471 {offsets = [0, 128], sizes = [2, 128], strides = [1, 1]} : vector<2x384xf32> to vector<2x128xf32>
    %475 = arith.mulf %474, %438 : vector<2x128xf32>
    %476 = vector.extract_strided_slice %471 {offsets = [0, 0], sizes = [2, 128], strides = [1, 1]} : vector<2x384xf32> to vector<2x128xf32>
    %477 = arith.mulf %476, %473 : vector<2x128xf32>
    %478 = arith.addf %475, %477 : vector<2x128xf32>
    %479 = vector.extract_strided_slice %471 {offsets = [0, 256], sizes = [2, 128], strides = [1, 1]} : vector<2x384xf32> to vector<2x128xf32>
    %480 = math.tanh %478 : vector<2x128xf32>
    %481 = arith.mulf %479, %480 : vector<2x128xf32>
    %482 = tpu.concatenate %481, %461 in 1 : vector<2x128xf32>, vector<2x128xf32> -> vector<2x256xf32>
    %cst_80 = arith.constant dense<0.000000e+00> : vector<2x512xf32>
    %483 = tpu.matmul %482, %171, %cst_80 {dimension_numbers = #tpu.dot_dimension_numbers<[1], [0], [0], [1], [0, 0, 1, 1], [], []>} : vector<2x256xf32>, vector<256x512xf32>, vector<2x512xf32> -> vector<2x512xf32>
    %484 = vector.broadcast %173 : vector<1x512xf32> to vector<2x512xf32>
    %485 = arith.addf %483, %484 : vector<2x512xf32>
    %486 = vector.extract_strided_slice %485 {offsets = [0, 0], sizes = [2, 384], strides = [1, 1]} : vector<2x512xf32> to vector<2x384xf32>
    %487 = arith.negf %486 : vector<2x384xf32>
    %488 = math.exp %487 : vector<2x384xf32>
    %cst_81 = arith.constant 1.000000e+00 : f32
    %489 = vector.broadcast %cst_81 : f32 to vector<2x384xf32>
    %490 = arith.addf %489, %488 : vector<2x384xf32>
    %491 = arith.divf %489, %490 : vector<2x384xf32>
    %492 = vector.extract_strided_slice %485 {offsets = [0, 384], sizes = [2, 128], strides = [1, 1]} : vector<2x512xf32> to vector<2x128xf32>
    %493 = math.tanh %492 : vector<2x128xf32>
    %494 = vector.extract_strided_slice %491 {offsets = [0, 128], sizes = [2, 128], strides = [1, 1]} : vector<2x384xf32> to vector<2x128xf32>
    %495 = arith.mulf %494, %458 : vector<2x128xf32>
    %496 = vector.extract_strided_slice %491 {offsets = [0, 0], sizes = [2, 128], strides = [1, 1]} : vector<2x384xf32> to vector<2x128xf32>
    %497 = arith.mulf %496, %493 : vector<2x128xf32>
    %498 = arith.addf %495, %497 : vector<2x128xf32>
    %499 = vector.extract_strided_slice %491 {offsets = [0, 256], sizes = [2, 128], strides = [1, 1]} : vector<2x384xf32> to vector<2x128xf32>
    %500 = math.tanh %498 : vector<2x128xf32>
    %501 = arith.mulf %499, %500 : vector<2x128xf32>
    %502 = tpu.concatenate %221, %261, %301, %341, %381, %421, %461, %501 in 1 : vector<2x128xf32>, vector<2x128xf32>, vector<2x128xf32>, vector<2x128xf32>, vector<2x128xf32>, vector<2x128xf32>, vector<2x128xf32>, vector<2x128xf32> -> vector<2x1024xf32>
    %c0_82 = arith.constant 0 : index
    %c0_83 = arith.constant 0 : index
    %503 = vector.load %arg7[%c0_82, %c0_83] : memref<1024x8xf32, #tpu.memory_space<vmem>>, vector<1024x8xf32>
    %cst_84 = arith.constant dense<0.000000e+00> : vector<2x8xf32>
    %504 = tpu.matmul %502, %503, %cst_84 {dimension_numbers = #tpu.dot_dimension_numbers<[1], [0], [0], [1], [0, 0, 1, 1], [], []>} : vector<2x1024xf32>, vector<1024x8xf32>, vector<2x8xf32> -> vector<2x8xf32>
    %505 = vector.extract_strided_slice %1 {offsets = [11, 0], sizes = [1, 1], strides = [1, 1]} : vector<12x48xf32> to vector<1x1xf32>
    %506 = vector.broadcast %505 : vector<1x1xf32> to vector<2x8xf32>
    %507 = arith.addf %504, %506 : vector<2x8xf32>
    %508 = arith.negf %507 : vector<2x8xf32>
    %509 = math.exp %508 : vector<2x8xf32>
    %cst_85 = arith.constant 1.000000e+00 : f32
    %510 = vector.broadcast %cst_85 : f32 to vector<2x8xf32>
    %511 = arith.addf %510, %509 : vector<2x8xf32>
    %512 = arith.divf %510, %511 : vector<2x8xf32>
    %c0_86 = arith.constant 0 : index
    %c0_87 = arith.constant 0 : index
    %513 = vector.load %arg8[%c0_86, %c0_87] : memref<2x8xf32, #tpu.memory_space<vmem>>, vector<2x8xf32>
    tpu.vector_store %arg8[%c0_86, %c0_87], %512 {strides = array<i32>} : memref<2x8xf32, #tpu.memory_space<vmem>>, vector<2x8xf32>,
    return
  }
  func.func @transform_0(%arg0: i32) -> (i32, i32) {
    %c0_i32 = arith.constant 0 : i32
    %c0_i32_0 = arith.constant 0 : i32
    %c0_i32_1 = arith.constant 0 : i32
    return %c0_i32, %c0_i32_0 : i32, i32
  }
  func.func @transform_1(%arg0: i32) -> (i32, i32) {
    %c0_i32 = arith.constant 0 : i32
    %c0_i32_0 = arith.constant 0 : i32
    %c0_i32_1 = arith.constant 0 : i32
    return %c0_i32, %c0_i32_0 : i32, i32
  }
  func.func @transform_2(%arg0: i32) -> (i32, i32) {
    %c0_i32 = arith.constant 0 : i32
    %c0_i32_0 = arith.constant 0 : i32
    %c0_i32_1 = arith.constant 0 : i32
    return %c0_i32, %c0_i32_0 : i32, i32
  }
  func.func @transform_3(%arg0: i32) -> (i32, i32) {
    %c0_i32 = arith.constant 0 : i32
    %c0_i32_0 = arith.constant 0 : i32
    %c0_i32_1 = arith.constant 0 : i32
    return %c0_i32, %c0_i32_0 : i32, i32
  }
  func.func @transform_4(%arg0: i32) -> (i32, i32) {
    %c0_i32 = arith.constant 0 : i32
    %c0_i32_0 = arith.constant 0 : i32
    %c0_i32_1 = arith.constant 0 : i32
    return %c0_i32, %c0_i32_0 : i32, i32
  }
  func.func @transform_5(%arg0: i32) -> (i32, i32) {
    %c0_i32 = arith.constant 0 : i32
    %c0_i32_0 = arith.constant 0 : i32
    %c0_i32_1 = arith.constant 0 : i32
    return %c0_i32, %c0_i32_0 : i32, i32
  }
  func.func @transform_6(%arg0: i32) -> (i32, i32) {
    %c0_i32 = arith.constant 0 : i32
    %c0_i32_0 = arith.constant 0 : i32
    %c0_i32_1 = arith.constant 0 : i32
    return %c0_i32, %c0_i32_0 : i32, i32
  }
  func.func @transform_7(%arg0: i32) -> (i32, i32) {
    %c0_i32 = arith.constant 0 : i32
    %c0_i32_0 = arith.constant 0 : i32
    %c0_i32_1 = arith.constant 0 : i32
    return %c0_i32, %c0_i32_0 : i32, i32
  }
}

</mosaic_0001>

<bundles_post_ra>
// kernel: tpu_custom_call.1
= control target key start
LH: loop header
LB: loop body
LE: loop exit
PB: predicated region body
PF: predicated region fallthrough
CT: control target
= control target key end

     0   :  { %12 = vsyncpa [#allocation3], 0  ;;  %s11948_s0 = inlined_call_operand.vmem [shape: f32[16,64], index: 0, kind: input, shape index: {}]   ;;  %s11949_s1 = inlined_call_operand.vmem [shape: f32[256,48], index: 1, kind: input, shape index: {}]   ;;  %s11950_s2 = inlined_call_operand.vmem [shape: f32[48,96], index: 2, kind: input, shape index: {}]   ;;  %s11951_s3 = inlined_call_operand.vmem [shape: f32[12,48], index: 3, kind: input, shape index: {}]   ;;  %s11952_s4 = inlined_call_operand.hbm [shape: f32[432,512], index: 4, kind: input, shape index: {}]   ;;  %s11953_s5 = inlined_call_operand.vmem [shape: f32[2,512], index: 5, kind: input, shape index: {}]   ;;  %s11954_s6 = inlined_call_operand.vmem [shape: f32[1024,8], index: 6, kind: input, shape index: {}]   ;;  %s11955_s7 = inlined_call_operand.hbm [shape: f32[2,8], index: 7, kind: output, shape index: {}]  }
   0x1   :  { %13 = vsyncpa [#allocation4], 0  ;;  %s26_s26 = sshll.u32 %s11952_s4, 4  ;;  %s6741_s27 = smov [#allocation2]   ;;  %s27_s26 = int_to_ptr.hbm [resolvable:$true] %s26_s26 }
   0x2   :  { %s28_s28 = sshll.u32 %s6741_s27, 4  ;;  %s6742_s29 = smov 512   ;;  %s29_s28 = int_to_ptr.vmem [resolvable:$true] %s28_s28 }
   0x3   :  { %s6743_s30 = smov 32  }
   0x4   :  { %34 = dma.hbm_to_vmem [thread:$0]  %s27_s26, 27648, %s29_s28, [#allocation3], %s6742_s29, %s6742_s29, %s6743_s30  }
   0x5   :  { %6737 = dma.done.wait [#allocation3], 27648  }
   0x6   :  { %6738 = vsyncadd [#allocation3], 4294939648  ;;  %v50_v0 = vld [vmem:[%s11949_s1 + $0x38] sm:$0xff]  ;;  %v49_v1 = vld [vmem:[%s11949_s1 + $0x30] sm:$0xff]  ;;  %vm80_vm0 = vcmask 523264   ;;  %s6744_s25 = smov 48  }
   0x7   :  { %95 = vmatpush.msra.mxu0 %v50_v0  ;;  %v48_v2 = vld [vmem:[%s11949_s1 + $0x28] sm:$0xff]  ;;  %v47_v4 = vld [vmem:[%s11949_s1 + $0x20] sm:$0xff]  ;;  %v46_v6 = vld [vmem:[%s11949_s1 + $0x18] sm:$0xff]  ;;  %vm117_vm1 = vcmask 392192   ;;  %vm115_vm2 = vcmask 1041409   ;;  %vm183_vm3 = vcmask 97280  }
   0x8   :  { %v152_v3 = vld [vmem:[%s11950_s2 + $0x28] sm:$0xff]  ;;  %v151_v5 = vld [vmem:[%s11950_s2 + $0x20] sm:$0xff]  ;;  %v150_v7 = vld [vmem:[%s11950_s2 + $0x18] sm:$0xff]  ;;  %s6745_s28 = smov 80   ;;  %s6746_s29 = smov 104   ;;  %vm234_vm4 = vcmask 57344  }
   0x9   :  { %96 = vmatpush.msra.mxu0 %v49_v1  ;;  %5620 = vmatpush.msra.mxu2 %v152_v3  ;;  %v45_v8 = vld [vmem:[%s11949_s1 + $0x10] sm:$0xff]  ;;  %v44_v10 = vld [vmem:[%s11949_s1 + $0x8] sm:$0xff]  ;;  %v43_v11 = vld [vmem:[%s11949_s1] sm:$0xff]  ;;  %s6747_s30 = smov 116   ;;  %s6748_s8 = smov 92   ;;  %vm286_vm9 = vcmask 64512  }
   0xa   :  { %v149_v9 = vld [vmem:[%s11950_s2 + $0x10] sm:$0xff]  ;;  %v77_v12 = vld [vmem:[%s11948_s0] sm:$0xff]  ;;  %v78_v13 = vld [vmem:[%s11948_s0 + $0x8] sm:$0xff]  ;;  %s6749_s9 = smov 56   ;;  %s6750_s10 = smov 68  }
   0xb   :  { %97 = vmatpush.msra.mxu0 %v48_v2  ;;  %5621 = vmatpush.msra.mxu2 %v151_v5  ;;  %v148_v14 = vld [vmem:[%s11950_s2 + $0x8] sm:$0xff]  ;;  %v147_v15 = vld [vmem:[%s11950_s2] sm:$0xff]  ;;  %v54_v18 = vld [vmem:[%s11949_s1 + $0x58] sm:$0xff]  ;;  %s6751_s11 = smov 44   ;;  %s6752_s12 = smov 12  }
   0xc   :  { %v56_v16 = vld [vmem:[%s11949_s1 + $0x68] sm:$0xff]  ;;  %v55_v17 = vld [vmem:[%s11949_s1 + $0x60] sm:$0xff]  ;;  %v53_v20 = vld [vmem:[%s11949_s1 + $0x50] sm:$0xff]  ;;  %s6753_s4 = smov 24   ;;  %s6754_s13 = smov 36  }
   0xd   :  { %98 = vmatpush.msra.mxu0 %v47_v4  ;;  %5622 = vmatpush.msra.mxu2 %v150_v7  ;;  %v6861_v19 = vld [vmem:[%s11951_s3] sm:$0xff]  ;;  %v52_v22 = vld [vmem:[%s11949_s1 + $0x48] sm:$0xff] }
   0xe   :  { %130 = vmatpush.msra.mxu1 %v56_v16  ;;  %v142_v21 = vrot.slane %v6861_v19, 1  ;;  %v51_v23 = vld [vmem:[%s11949_s1 + $0x40] sm:$0xff]  ;;  %v79_v24 = vperm.slane %v6861_v19, 0  ;;  %v110_v37 = vperm.slane %v6861_v19, 1 }
   0xf   :  { %99 = vmatpush.msra.mxu0 %v46_v6  ;;  %5623 = vmatpush.msra.mxu2 %v149_v9 }
  0x10   :  { %131 = vmatpush.msra.mxu1 %v55_v17  ;;  %143 = vrot.lane.b32.xlu0 %v142_v21, %s6744_s25 }
  0x11   :  { %100 = vmatpush.msra.mxu0 %v45_v8  ;;  %5624 = vmatpush.msra.mxu2 %v148_v14 }
  0x12   :  { %132 = vmatpush.msra.mxu1 %v54_v18 }
  0x13   :  { %101 = vmatpush.msra.mxu0 %v44_v10  ;;  %5625 = vmatpush.msra.mxu2 %v147_v15 }
  0x14   :  { %133 = vmatpush.msra.mxu1 %v53_v20 }
  0x15   :  { %102 = vmatpush.msra.mxu0 %v43_v11 }
  0x16   :  { %5503 = vmatmul.msk.f32.vlgmr.msra.gmra.mxu0 %vm80_vm0, %v77_v12  ;;  %134 = vmatpush.msra.mxu1 %v52_v22 }
  0x17   :  { %168 = vmatpush.msrb.mxu0 %v152_v3 }
  0x18   :  { %135 = vmatpush.msra.mxu1 %v51_v23 }
  0x19   :  { %169 = vmatpush.msrb.mxu0 %v151_v5 }
  0x1b   :  { %170 = vmatpush.msrb.mxu0 %v150_v7 }
  0x1d   :  { %171 = vmatpush.msrb.mxu0 %v149_v9 }
  0x1e   :  { %5504 = vmatmul.msk.f32.gmra.mxu0 %vm80_vm0, %v78_v13 }
  0x1f   :  { %172 = vmatpush.msrb.mxu0 %v148_v14 }
  0x21   :  { %173 = vmatpush.msrb.mxu0 %v147_v15 }
  0x82   :  { %v144_v32 = vpop.permute.xlu0 %143 }
  0x83   :  { %v146_v33 = vsel %vm117_vm1, %v6861_v19, %v144_v32 }
  0x84   :  { %v153_v34 = vperm.slane %v146_v33, 2 }
  0x93   :  { %v104_v25 = vpop.f32.mrf.mxu0 }
  0x94   :  { %v6874_v26 = vadd.f32 %v104_v25, %v79_v24 }
  0x96   :  { %5506 = vmatmul.msk.f32.vlgmr.msrb.gmra.mxu0 %vm117_vm1, %v6874_v26  ;;  %v113_v29 = vrot.slane %v6874_v26, 7 }
  0x9b   :  { %v107_v27 = vpop.f32.mrf.mxu0 }
  0x9c   :  { %v6878_v28 = vadd.f32 %v107_v27, %v79_v24 }
  0x9e   :  { %5507 = vmatmul.msk.f32.vlgmr.msra.gmra.mxu2 %vm117_vm1, %v6878_v28  ;;  %v114_v30 = vrot.slane %v6878_v28, 6 }
  0xa0   :  { %v116_v31 = vsel %vm115_vm2, %v114_v30, %v113_v29 }
  0xa1   :  { %5505 = vmatmul.msk.f32.vlgmr.msra.gmra.mxu1 %vm117_vm1, %v116_v31 }
 0x113   :  { %v175_v35 = vpop.f32.mrf.mxu0 }
 0x114   :  { %v6888_v36 = vadd.f32 %v175_v35, %v153_v34 }
 0x116   :  { %283 = vrot.lane.b32.xlu1 %v6888_v36, %s6745_s28  ;;  %5508 = vmatpush.xpose.msk.msra.mxu3 %vm183_vm3, %v6888_v36 }
 0x11e   :  { %496 = vrot.lane.b32.xlu1 %v6888_v36, %s6746_s29  ;;  %v137_v38 = vpop.f32.mrf.mxu1 }
 0x11f   :  { %v138_v39 = vadd.f32 %v137_v38, %v110_v37 }
 0x121   :  { %v140_v40 = vmul.f32 0.28867513, %v138_v39  ;;  %v178_v41 = vpop.f32.mrf.mxu2 }
 0x122   :  { %v6896_v42 = vadd.f32 %v178_v41, %v153_v34 }
 0x123   :  { %5509 = vmatmul.msk.f32.vlgmr.msra.gmra.mxu3 %vm183_vm3, %v140_v40  ;;  %v336_v43 = vperm.slane %v140_v40, 0  ;;  %v182_v44 = vrot.slane %v140_v40, 1 }
 0x124   :  { %368 = vrot.lane.b32.xlu2 %v6896_v42, %s6747_s30  ;;  %5510 = vmatpush.xpose.msk.msrb.mxu3 %vm183_vm3, %v6896_v42 }
 0x125   :  { %v365_v45 = vperm.slane %v182_v44, 0 }
 0x126   :  { %494 = vrot.lane.b32.xlu1 %v336_v43, %s6746_s29 }
 0x12b   :  { %5511 = vmatmul.msk.f32.vlgmr.msrb.gmra.mxu3 %vm183_vm3, %v182_v44 }
 0x12c   :  { %339 = vrot.lane.b32.xlu2 %v6888_v36, %s6747_s30 }
 0x134   :  { %366 = vrot.lane.b32.xlu2 %v365_v45, %s6747_s30 }
 0x13c   :  { %337 = vrot.lane.b32.xlu2 %v336_v43, %s6747_s30 }
 0x144   :  { %524 = vrot.lane.b32.xlu2 %v6896_v42, %s6746_s29 }
 0x14c   :  { %522 = vrot.lane.b32.xlu2 %v365_v45, %s6746_s29 }
 0x154   :  { %680 = vrot.lane.b32.xlu2 %v6896_v42, %s6748_s8 }
 0x15c   :  { %650 = vrot.lane.b32.xlu2 %v336_v43, %s6748_s8 }
 0x17e   :  { %v369_v46 = vpop.permute.xlu2 %368 }
 0x17f   :  { %5516 = vmatpush.xpose.msk.msrb.mxu2 %vm183_vm3, %v369_v46 }
 0x186   :  { %v340_v47 = vpop.permute.xlu2 %339 }
 0x188   :  { %v284_v48 = vpop.permute.xlu1 %283 }
 0x189   :  { %305 = vmatpush.msrb.mxu1 %v284_v48 }
 0x18b   :  { %5514 = vmatpush.xpose.msk.msra.mxu1 %vm183_vm3, %v340_v47 }
 0x18e   :  { %v367_v49 = vpop.permute.xlu2 %366 }
 0x18f   :  { %5517 = vmatmul.msk.f32.vlgmr.msrb.gmra.mxu2 %vm183_vm3, %v367_v49 }
 0x190   :  { %v497_v2 = vpop.permute.xlu1 %496 }
 0x196   :  { %v338_v50 = vpop.permute.xlu2 %337 }
 0x198   :  { %v495_v3 = vpop.permute.xlu1 %494 }
 0x19e   :  { %v525_v51 = vpop.permute.xlu2 %524 }
 0x19f   :  { %5522 = vmatpush.xpose.msk.msra.mxu2 %vm183_vm3, %v525_v51 }
 0x1a6   :  { %v206_v52 = vpop.f32.mrf.mxu3  ;;  %v523_v53 = vpop.permute.xlu2 %522 }
 0x1a7   :  { %5523 = vmatmul.msk.f32.vlgmr.msra.gmra.mxu2 %vm183_vm3, %v523_v53  ;;  %v235_v54 = vsel %vm234_vm4, %v206_v52, -inf }
 0x1a8   :  { %236 = vmax.xlane.f32.xlu0 %v235_v54 }
 0x1ae   :  { %v681_v55 = vpop.permute.xlu2 %680  ;;  %v231_v0 = vpop.f32.mrf.mxu3 }
 0x1af   :  { %5528 = vmatpush.xpose.msk.msrb.mxu2 %vm183_vm3, %v681_v55  ;;  %v238_v1 = vsel %vm234_vm4, %v231_v0, -inf }
 0x1b6   :  { %v651_v27 = vpop.permute.xlu2 %650 }
 0x1bc   :  { %678 = vrot.lane.b32.xlu0 %v365_v45, %s6748_s8 }
 0x212   :  { %v391_v56 = vpop.f32.mrf.mxu2 }
 0x213   :  { %v397_v57 = vsel %vm234_vm4, %v391_v56, -inf }
 0x214   :  { %398 = vmax.xlane.f32.xlu0 %v397_v57 }
 0x21b   :  { %v237_v58 = vpop.xlane.xlu0 %236 }
 0x21c   :  { %v241_v59 = vsub.f32 %v206_v52, %v237_v58 }
 0x21e   :  { %v243_v60 = vmul.f32 1.442695, %v241_v59 }
 0x220   :  { %5650 = vpow2.f32 %v243_v60 }
 0x226   :  { %v5651_v61 = vpop.eup %5650 }
 0x227   :  { %v247_v62 = vsel %vm234_vm4, %v5651_v61, 0.0 }
 0x228   :  { %248 = vadd.xlane.f32.xlu1 %v247_v62 }
 0x22a   :  { %v547_v13 = vpop.f32.mrf.mxu2 }
 0x22b   :  { %v553_v39 = vsel %vm234_vm4, %v547_v13, -inf }
 0x22e   :  { %v679_v63 = vpop.permute.xlu0 %678 }
 0x22f   :  { %5529 = vmatmul.msk.f32.vlgmr.msrb.gmra.mxu2 %vm183_vm3, %v679_v63 }
 0x241   :  { %652 = vrot.lane.b32.xlu1 %v6888_v36, %s6748_s8  ;;  %s6757_s8 = smov [#allocation5]  }
 0x26b   :  { %239 = vmax.xlane.f32.xlu1 %v238_v1 }
 0x287   :  { %v399_v9 = vpop.xlane.xlu0 %398 }
 0x288   :  { %v401_v14 = vsub.f32 %v391_v56, %v399_v9 }
 0x28a   :  { %v404_v20 = vmul.f32 1.442695, %v401_v14 }
 0x29b   :  { %v249_v4 = vpop.xlane.xlu1 %248 }
 0x29c   :  { %5652 = vrcp.f32 %v249_v4  ;;  %v264_v8 = vand.u32 2147483648, %v249_v4  ;;  %v262_v11 = vand.u32 2147483647, %v249_v4  ;;  %vm258_vm6 = vweird.f32 %v249_v4 }
 0x29d   :  { %5654 = vpow2.f32 %v404_v20 }
 0x29e   :  { %v265_v15 = vor.u32 1.1754944e-38, %v264_v8  ;;  %vm263_vm8 = vcmp.eq.f32.partialorder %v262_v11, 8.507059e+37 }
 0x2a2   :  { %v5653_v5 = vpop.eup %5652 }
 0x2a3   :  { %v254_v6 = vmul.f32 %v5653_v5, %v249_v4  ;;  %vm259_vm5 = vweird.f32 %v5653_v5  ;;  %v6926_v24 = vpop.eup %5654 }
 0x2a4   :  { %vm260_vm7 = vmor %vm258_vm6, %vm259_vm5  ;;  %v409_v25 = vsel %vm234_vm4, %v6926_v24, 0.0 }
 0x2a5   :  { %v255_v7 = vsub.f32 1.0, %v254_v6 }
 0x2a7   :  { %v256_v10 = vmul.f32 %v5653_v5, %v255_v7 }
 0x2a9   :  { %v257_v12 = vadd.f32 %v5653_v5, %v256_v10 }
 0x2ab   :  { %v261_v16 = vsel %vm260_vm7, %v5653_v5, %v257_v12 }
 0x2ac   :  { %v266_v17 = vsel %vm263_vm8, %v265_v15, %v261_v16  ;;  %v5645_v16 = vpack.i.bf16 %v6896_v42, %v6888_v36 }
 0x2ad   :  { %v267_v18 = vmul.f32 %v5651_v61, %v266_v17 }
 0x2af   :  { %5512 = vmatmul.msk.f32.vlgmr.msrb.gmra.mxu1 %vm286_vm9, %v267_v18 }
 0x2b0   :  { %5520 = vmatpush.xpose.msk.msrb.mxu1 %vm183_vm3, %v497_v2 }
 0x2b2   :  { %v703_v21 = vpop.f32.mrf.mxu2 }
 0x2b3   :  { %v709_v22 = vsel %vm234_vm4, %v703_v21, -inf  ;;  %v653_v23 = vpop.permute.xlu1 %652 }
 0x2b4   :  { %710 = vmax.xlane.f32.xlu0 %v709_v22 }
 0x2b7   :  { %5515 = vmatmul.msk.f32.vlgmr.msra.gmra.mxu1 %vm183_vm3, %v338_v50 }
 0x2b8   :  { %5526 = vmatpush.xpose.msk.msra.mxu1 %vm183_vm3, %v653_v23 }
 0x2bc   :  { %410 = vadd.xlane.f32.xlu0 %v409_v25 }
 0x2bf   :  { %5521 = vmatmul.msk.f32.vlgmr.msrb.gmra.mxu1 %vm183_vm3, %v495_v3 }
 0x2c7   :  { %5527 = vmatmul.msk.f32.vlgmr.msra.gmra.mxu1 %vm183_vm3, %v651_v27 }
 0x2de   :  { %v240_v30 = vpop.xlane.xlu1 %239 }
 0x2df   :  { %v242_v31 = vsub.f32 %v231_v0, %v240_v30 }
 0x2e1   :  { %v245_v34 = vmul.f32 1.442695, %v242_v31 }
 0x2e3   :  { %5656 = vpow2.f32 %v245_v34 }
 0x2e9   :  { %v5657_v43 = vpop.eup %5656 }
 0x2ea   :  { %v250_v46 = vsel %vm234_vm4, %v5657_v43, 0.0 }
 0x327   :  { %v711_v35 = vpop.xlane.xlu0 %710 }
 0x328   :  { %v713_v37 = vsub.f32 %v703_v21, %v711_v35 }
 0x32a   :  { %v716_v41 = vmul.f32 1.442695, %v713_v37 }
 0x32c   :  { %v6933_v29 = vpop.f32.mrf.mxu1  ;;  %5658 = vpow2.f32 %v716_v41 }
 0x32f   :  { %v411_v20 = vpop.xlane.xlu0 %410 }
 0x330   :  { %vm432_vm15 = vweird.f32 %v411_v20 }
 0x332   :  { %v6940_v47 = vpop.eup %5658 }
 0x333   :  { %v721_v48 = vsel %vm234_vm4, %v6940_v47, 0.0 }
 0x334   :  { %v362_v32 = vpop.f32.mrf.mxu1 }
 0x335   :  { %v394_v33 = vsel %vm234_vm4, %v362_v32, -inf }
 0x336   :  { %395 = vmax.xlane.f32.xlu2 %v394_v33 }
 0x33c   :  { %v519_v38 = vpop.f32.mrf.mxu1 }
 0x33d   :  { %v550_v40 = vsel %vm234_vm4, %v519_v38, -inf }
 0x33e   :  { %554 = vmax.xlane.f32.xlu2 %v553_v39  ;;  %551 = vmax.xlane.f32.xlu1 %v550_v40  ;;  %v438_v39 = vand.u32 2147483648, %v411_v20 }
 0x344   :  { %v675_v44 = vpop.f32.mrf.mxu1 }
 0x345   :  { %v706_v45 = vsel %vm234_vm4, %v675_v44, -inf }
 0x346   :  { %707 = vmax.xlane.f32.xlu1 %v706_v45  ;;  %251 = vadd.xlane.f32.xlu2 %v250_v46 }
 0x34e   :  { %722 = vadd.xlane.f32.xlu2 %v721_v48 }
 0x35f   :  { %310 = vrot.lane.b32.xlu1 %v6896_v42, %s6745_s28 }
 0x3a9   :  { %v396_v49 = vpop.xlane.xlu2 %395 }
 0x3aa   :  { %v400_v50 = vsub.f32 %v362_v32, %v396_v49 }
 0x3ac   :  { %v402_v51 = vmul.f32 1.442695, %v400_v50 }
 0x3ae   :  { %5660 = vpow2.f32 %v402_v51 }
 0x3b1   :  { %v555_v52 = vpop.xlane.xlu2 %554  ;;  %v552_v53 = vpop.xlane.xlu1 %551 }
 0x3b2   :  { %v557_v54 = vsub.f32 %v547_v13, %v555_v52  ;;  %v556_v55 = vsub.f32 %v519_v38, %v552_v53  ;;  %v439_v52 = vor.u32 1.1754944e-38, %v438_v39 }
 0x3b4   :  { %v6946_v56 = vpop.eup %5660  ;;  %v560_v57 = vmul.f32 1.442695, %v557_v54  ;;  %v558_v58 = vmul.f32 1.442695, %v556_v55 }
 0x3b5   :  { %v406_v59 = vsel %vm234_vm4, %v6946_v56, 0.0 }
 0x3b6   :  { %5662 = vpow2.f32 %v560_v57  ;;  %407 = vadd.xlane.f32.xlu1 %v406_v59 }
 0x3b7   :  { %5664 = vpow2.f32 %v558_v58 }
 0x3b9   :  { %v252_v60 = vpop.xlane.xlu2 %251  ;;  %v708_v61 = vpop.xlane.xlu1 %707 }
 0x3ba   :  { %5666 = vrcp.f32 %v252_v60  ;;  %v712_v62 = vsub.f32 %v675_v44, %v708_v61  ;;  %v279_v11 = vand.u32 2147483648, %v252_v60  ;;  %vm273_vm11 = vweird.f32 %v252_v60 }
 0x3bb   :  { %v277_v12 = vand.u32 2147483647, %v252_v60 }
 0x3bc   :  { %v6950_v63 = vpop.eup %5662  ;;  %v714_v1 = vmul.f32 1.442695, %v712_v62  ;;  %v280_v14 = vor.u32 1.1754944e-38, %v279_v11 }
 0x3bd   :  { %v6952_v0 = vpop.eup %5664  ;;  %v565_v2 = vsel %vm234_vm4, %v6950_v63, 0.0  ;;  %vm278_vm13 = vcmp.eq.f32.partialorder %v277_v12, 8.507059e+37 }
 0x3be   :  { %566 = vadd.xlane.f32.xlu0 %v565_v2  ;;  %v562_v3 = vsel %vm234_vm4, %v6952_v0, 0.0  ;;  %5668 = vpow2.f32 %v714_v1 }
 0x3bf   :  { %563 = vadd.xlane.f32.xlu2 %v562_v3  ;;  %5670 = vrcp.f32 %v411_v20 }
 0x3c0   :  { %v5667_v4 = vpop.eup %5666 }
 0x3c1   :  { %v269_v5 = vmul.f32 %v5667_v4, %v252_v60  ;;  %vm274_vm10 = vweird.f32 %v5667_v4  ;;  %v6969_v23 = vpop.xlane.xlu2 %722 }
 0x3c2   :  { %vm275_vm12 = vmor %vm273_vm11, %vm274_vm10 }
 0x3c3   :  { %v270_v6 = vsub.f32 1.0, %v269_v5 }
 0x3c4   :  { %v6958_v7 = vpop.eup %5668 }
 0x3c5   :  { %v271_v8 = vmul.f32 %v5667_v4, %v270_v6  ;;  %v718_v9 = vsel %vm234_vm4, %v6958_v7, 0.0  ;;  %v5671_v21 = vpop.eup %5670 }
 0x3c6   :  { %v428_v25 = vmul.f32 %v5671_v21, %v411_v20  ;;  %vm433_vm14 = vweird.f32 %v5671_v21 }
 0x3c7   :  { %v272_v10 = vadd.f32 %v5667_v4, %v271_v8  ;;  %719 = vadd.xlane.f32.xlu2 %v718_v9  ;;  %vm6984_vm0 = vmor %vm432_vm15, %vm433_vm14 }
 0x3c8   :  { %v429_v27 = vsub.f32 1.0, %v428_v25 }
 0x3c9   :  { %v276_v13 = vsel %vm275_vm12, %v5667_v4, %v272_v10 }
 0x3ca   :  { %v281_v15 = vsel %vm278_vm13, %v280_v14, %v276_v13  ;;  %v430_v33 = vmul.f32 %v5671_v21, %v429_v27 }
 0x3cb   :  { %v282_v18 = vmul.f32 %v5657_v43, %v281_v15  ;;  %v436_v43 = vand.u32 2147483647, %v411_v20 }
 0x3cc   :  { %v431_v34 = vadd.f32 %v5671_v21, %v430_v33 }
 0x3cd   :  { %vm437_vm5 = vcmp.eq.f32.partialorder %v436_v43, 8.507059e+37 }
 0x3ce   :  { %v435_v46 = vsel %vm6984_vm0, %v5671_v21, %v431_v34 }
 0x3cf   :  { %624 = vrot.lane.b32.xlu1 %v6896_v42, %s6749_s9  ;;  %v440_v55 = vsel %vm437_vm5, %v439_v52, %v435_v46 }
 0x3d0   :  { %v441_v3 = vmul.f32 %v6926_v24, %v440_v55 }
 0x3d1   :  { %v311_v17 = vpop.permute.xlu1 %310 }
 0x3d2   :  { %5646 = vrot.lane.b32.xlu0 %v5645_v16, %s6750_s10  ;;  %331 = vmatpush.msra.mxu3 %v311_v17 }
 0x3d3   :  { %5513 = vmatmul.msk.f32.vlgmr.msra.gmra.mxu3 %vm286_vm9, %v282_v18 }
 0x3d7   :  { %780 = vrot.lane.b32.xlu1 %v6896_v42, %s6751_s11 }
 0x3da   :  { %754 = vrot.lane.b32.xlu0 %v6888_v36, %s6751_s11 }
 0x3df   :  { %598 = vrot.lane.b32.xlu2 %v6888_v36, %s6749_s9  ;;  %s5491_s9 = sshll.u32 %s6757_s8, 4  ;;  %s5492_s9 = int_to_ptr.vmem [resolvable:$true] %s5491_s9 }
 0x429   :  { %v408_v22 = vpop.xlane.xlu1 %407 }
 0x42a   :  { %5672 = vrcp.f32 %v408_v22  ;;  %v423_v53 = vand.u32 2147483648, %v408_v22  ;;  %vm417_vm6 = vweird.f32 %v408_v22  ;;  %v421_v54 = vand.u32 2147483647, %v408_v22 }
 0x42c   :  { %v424_v62 = vor.u32 1.1754944e-38, %v423_v53  ;;  %vm422_vm8 = vcmp.eq.f32.partialorder %v421_v54, 8.507059e+37 }
 0x430   :  { %v5673_v30 = vpop.eup %5672 }
 0x431   :  { %v413_v31 = vmul.f32 %v5673_v30, %v408_v22  ;;  %v6971_v32 = vpop.xlane.xlu0 %566  ;;  %vm418_vm4 = vweird.f32 %v5673_v30 }
 0x432   :  { %5674 = vrcp.f32 %v6971_v32  ;;  %v6974_v42 = vpop.xlane.xlu2 %563  ;;  %vm419_vm7 = vmor %vm417_vm6, %vm418_vm4  ;;  %vm588_vm10 = vweird.f32 %v6971_v32  ;;  %v594_v11 = vand.u32 2147483648, %v6971_v32  ;;  %v592_v15 = vand.u32 2147483647, %v6971_v32 }
 0x433   :  { %5676 = vrcp.f32 %v6974_v42  ;;  %v414_v36 = vsub.f32 1.0, %v413_v31  ;;  %v579_v12 = vand.u32 2147483648, %v6974_v42  ;;  %vm573_vm14 = vweird.f32 %v6974_v42 }
 0x434   :  { %5678 = vrcp.f32 %v6969_v23  ;;  %v577_v16 = vand.u32 2147483647, %v6974_v42  ;;  %vm593_vm0 = vcmp.eq.f32.partialorder %v592_v15, 8.507059e+37 }
 0x435   :  { %v415_v37 = vmul.f32 %v5673_v30, %v414_v36 }
 0x436   :  { %vm578_vm4 = vcmp.eq.f32.partialorder %v577_v16, 8.507059e+37 }
 0x437   :  { %v416_v49 = vadd.f32 %v5673_v30, %v415_v37  ;;  %v750_v37 = vand.u32 2147483648, %v6969_v23 }
 0x438   :  { %v6978_v35 = vpop.eup %5674 }
 0x439   :  { %v6980_v38 = vpop.eup %5676  ;;  %v584_v40 = vmul.f32 %v6978_v35, %v6971_v32  ;;  %v420_v58 = vsel %vm419_vm7, %v5673_v30, %v416_v49  ;;  %vm589_vm11 = vweird.f32 %v6978_v35  ;;  %v580_v30 = vor.u32 1.1754944e-38, %v579_v12 }
 0x43a   :  { %v569_v44 = vmul.f32 %v6980_v38, %v6974_v42  ;;  %v6990_v45 = vpop.xlane.xlu2 %719  ;;  %v6995_v48 = vpop.eup %5678  ;;  %v425_v5 = vsel %vm422_vm8, %v424_v62, %v420_v58  ;;  %vm574_vm12 = vweird.f32 %v6980_v38  ;;  %vm7013_vm13 = vmor %vm588_vm10, %vm589_vm11  ;;  %vm744_vm7 = vweird.f32 %v6969_v23  ;;  %v61_v62 = vld [vmem:[%s11949_s1 + $0x90] sm:$0xff] }
 0x43b   :  { %5680 = vrcp.f32 %v6990_v45  ;;  %v585_v50 = vsub.f32 1.0, %v584_v40  ;;  %v740_v57 = vmul.f32 %v6995_v48, %v6969_v23  ;;  %v426_v17 = vmul.f32 %v6946_v56, %v425_v5  ;;  %vm7022_vm15 = vmor %vm573_vm14, %vm574_vm12 }
 0x43c   :  { %v570_v51 = vsub.f32 1.0, %v569_v44  ;;  %v595_v56 = vor.u32 1.1754944e-38, %v594_v11  ;;  %vm745_vm5 = vweird.f32 %v6995_v48  ;;  %vm729_vm10 = vweird.f32 %v6990_v45 }
 0x43d   :  { %v586_v59 = vmul.f32 %v6978_v35, %v585_v50  ;;  %v741_v4 = vsub.f32 1.0, %v740_v57  ;;  %vm746_vm8 = vmor %vm744_vm7, %vm745_vm5  ;;  %v733_v39 = vand.u32 2147483647, %v6990_v45  ;;  %vm835_vm14 = vcmask 293888  }
 0x43e   :  { %v571_v60 = vmul.f32 %v6980_v38, %v570_v51 }
 0x43f   :  { %v587_v6 = vadd.f32 %v6978_v35, %v586_v59  ;;  %v742_v18 = vmul.f32 %v6995_v48, %v741_v4  ;;  %v57_v4 = vld [vmem:[%s11949_s1 + $0x70] sm:$0xff] }
 0x440   :  { %v572_v8 = vadd.f32 %v6980_v38, %v571_v60 }
 0x441   :  { %v7001_v61 = vpop.eup %5680  ;;  %v625_v1 = vpop.permute.xlu1 %624  ;;  %v591_v21 = vsel %vm7013_vm13, %v6978_v35, %v587_v6  ;;  %v743_v33 = vadd.f32 %v6995_v48, %v742_v18  ;;  %v748_v35 = vand.u32 2147483647, %v6969_v23  ;;  %v751_v23 = vor.u32 1.1754944e-38, %v750_v37 }
 0x442   :  { %v725_v2 = vmul.f32 %v7001_v61, %v6990_v45  ;;  %v576_v22 = vsel %vm7022_vm15, %v6980_v38, %v572_v8  ;;  %v599_v27 = vpop.permute.xlu2 %598  ;;  %v596_v32 = vsel %vm593_vm0, %v595_v56, %v591_v21  ;;  %vm730_vm6 = vweird.f32 %v7001_v61 }
 0x443   :  { %v581_v42 = vsel %vm578_vm4, %v580_v30, %v576_v22  ;;  %v735_v38 = vand.u32 2147483648, %v6990_v45  ;;  %v597_v41 = vmul.f32 %v6950_v63, %v596_v32  ;;  %vm731_vm11 = vmor %vm729_vm10, %vm730_vm6  ;;  %v747_v43 = vsel %vm746_vm8, %v6995_v48, %v743_v33 }
 0x444   :  { %v726_v9 = vsub.f32 1.0, %v725_v2  ;;  %v5647_v10 = vpop.permute.xlu0 %5646  ;;  %v582_v40 = vmul.f32 %v6952_v0, %v581_v42  ;;  %vm749_vm12 = vcmp.eq.f32.partialorder %v748_v35, 8.507059e+37  ;;  %vm734_vm13 = vcmp.eq.f32.partialorder %v733_v39, 8.507059e+37  ;;  %v59_v2 = vld [vmem:[%s11949_s1 + $0x80] sm:$0xff] }
 0x445   :  { %v5649_v13 = vunpack.i.h.bf16 %v5647_v10  ;;  %v5648_v24 = vunpack.i.l.bf16 %v5647_v10  ;;  %v736_v46 = vor.u32 1.1754944e-38, %v735_v38  ;;  %v752_v49 = vsel %vm749_vm12, %v751_v23, %v747_v43  ;;  %v67_v23 = vld [vmem:[%s11949_s1 + $0xc0] sm:$0xff] }
 0x446   :  { %v727_v25 = vmul.f32 %v7001_v61, %v726_v9  ;;  %v753_v0 = vmul.f32 %v6940_v47, %v752_v49  ;;  %v65_v49 = vld [vmem:[%s11949_s1 + $0xb0] sm:$0xff] }
 0x447   :  { %463 = vmatpush.msrb.mxu3 %v5648_v24  ;;  %489 = vmatpush.msra.mxu0 %v5649_v13  ;;  %v837_v24 = vperm.slane %v6861_v19, 4 }
 0x448   :  { %5518 = vmatmul.msk.f32.vlgmr.msrb.gmra.mxu3 %vm286_vm9, %v426_v17  ;;  %5519 = vmatmul.msk.f32.vlgmr.msra.gmra.mxu0 %vm286_vm9, %v441_v3  ;;  %v728_v36 = vadd.f32 %v7001_v61, %v727_v25  ;;  %v58_v3 = vld [vmem:[%s11949_s1 + $0x78] sm:$0xff]  ;;  %v6755_v25 = vmov 48.0  }
 0x449   :  { %619 = vmatpush.msra.mxu3 %v599_v27  ;;  %645 = vmatpush.msrb.mxu0 %v625_v1  ;;  %v781_v31 = vpop.permute.xlu1 %780  ;;  %v60_v1 = vld [vmem:[%s11949_s1 + $0x88] sm:$0xff]  ;;  %5682 = vrcp.f32 %v6755_v25 }
 0x44a   :  { %v732_v44 = vsel %vm731_vm11, %v7001_v61, %v728_v36  ;;  %v62_v61 = vld [vmem:[%s11949_s1 + $0x98] sm:$0xff] }
 0x44b   :  { %801 = vmatpush.msra.mxu0 %v781_v31  ;;  %v737_v50 = vsel %vm734_vm13, %v736_v46, %v732_v44  ;;  %851 = vmatpush.msrb.mxu1 %v62_v61  ;;  %v68_v44 = vld [vmem:[%s11949_s1 + $0xc8] sm:$0xff]  ;;  %v66_v46 = vld [vmem:[%s11949_s1 + $0xb8] sm:$0xff] }
 0x44c   :  { %v755_v34 = vpop.permute.xlu0 %754  ;;  %v738_v45 = vmul.f32 %v6958_v7, %v737_v50  ;;  %943 = vmatpush.msra.mxu2 %v68_v44  ;;  %v64_v50 = vld [vmem:[%s11949_s1 + $0xa8] sm:$0xff] }
 0x44d   :  { %775 = vmatpush.msrb.mxu3 %v755_v34  ;;  %852 = vmatpush.msrb.mxu1 %v61_v62 }
 0x44e   :  { %944 = vmatpush.msra.mxu2 %v67_v23 }
 0x44f   :  { %853 = vmatpush.msrb.mxu1 %v60_v1  ;;  %v5683_v27 = vpop.eup %5682 }
 0x450   :  { %5524 = vmatmul.msk.f32.vlgmr.msra.gmra.mxu3 %vm286_vm9, %v582_v40  ;;  %5525 = vmatmul.msk.f32.vlgmr.msrb.gmra.mxu0 %vm286_vm9, %v597_v41  ;;  %v876_v56 = vmul.f32 48.0, %v5683_v27 }
 0x451   :  { %854 = vmatpush.msrb.mxu1 %v59_v2  ;;  %945 = vmatpush.msra.mxu2 %v66_v46 }
 0x452   :  { %v877_v30 = vsub.f32 1.0, %v876_v56 }
 0x453   :  { %855 = vmatpush.msrb.mxu1 %v58_v3  ;;  %946 = vmatpush.msra.mxu2 %v65_v49 }
 0x454   :  { %v878_v31 = vmul.f32 %v5683_v27, %v877_v30  ;;  %v7139_v30 = vld [vmem:[%s11951_s3 + $0x8] sm:$0xf] }
 0x455   :  { %856 = vmatpush.msrb.mxu1 %v57_v4  ;;  %947 = vmatpush.msra.mxu2 %v64_v50  ;;  %v1060_v50 = vld [vmem:[#allocation2 + $0xa0] sm:$0xff] }
 0x456   :  { %v333_v63 = vpop.f32.mrf.mxu3  ;;  %v879_v32 = vadd.f32 %v5683_v27, %v878_v31  ;;  %v958_v31 = vperm.slane %v7139_v30, 0  ;;  %1284 = vmatpush.msrb.mxu0 %v1060_v50  ;;  %v7208_v50 = vld [vmem:[#allocation2 + $0x1b8] sm:$0xff] }
 0x457   :  { %v808_v5 = vrot.slane %v333_v63, 7 }
 0x458   :  { %5530 = vmatmul.msk.f32.vlgmr.msrb.gmra.mxu3 %vm286_vm9, %v738_v45  ;;  %5531 = vmatmul.msk.f32.vlgmr.msra.gmra.mxu0 %vm286_vm9, %v753_v0  ;;  %vm833_vm9 = vcmask 195584   ;;  %v63_v45 = vld [vmem:[%s11949_s1 + $0xa0] sm:$0xff] }
 0x459   :  { %v809_v8 = vsel %vm115_vm2, %v808_v5, %v6933_v29  ;;  %948 = vmatpush.msra.mxu2 %v63_v45  ;;  %v920_v5 = vperm.slane %v6861_v19, 5  ;;  %v1061_v45 = vld [vmem:[#allocation2 + $0xa8] sm:$0xff] }
 0x45a   :  { %1307 = vmatpush.msra.mxu1 %v1061_v45  ;;  %v1088_v45 = vld [vmem:[#allocation2 + $0x180] sm:$0xff] }
 0x4c5   :  { %v491_v48 = vpop.f32.mrf.mxu0 }
 0x4c6   :  { %v813_v51 = vrot.slane %v491_v48, 7 }
 0x4cb   :  { %v465_v52 = vpop.f32.mrf.mxu3 }
 0x4cc   :  { %v814_v53 = vsel %vm115_vm2, %v813_v51, %v465_v52 }
 0x4cd   :  { %815 = vrot.lane.b32.xlu0 %v814_v53, %s6752_s12  ;;  %v647_v54 = vpop.f32.mrf.mxu0  ;;  %s5493_s12 = sshll.u32 %s11955_s7, 4  ;;  %s5494_s12 = int_to_ptr.hbm [resolvable:$true] %s5493_s12 }
 0x4ce   :  { %v820_v55 = vrot.slane %v647_v54, 7  ;;  %v74_v54 = vld [vmem:[%s11949_s1 + $0xf8] sm:$0xff] }
 0x4cf   :  { %975 = vmatpush.msra.mxu3 %v74_v54  ;;  %v1052_v54 = vld [vmem:[#allocation2 + $0x60] sm:$0xff] }
 0x4d3   :  { %v621_v57 = vpop.f32.mrf.mxu3 }
 0x4d4   :  { %v821_v58 = vsel %vm115_vm2, %v820_v55, %v621_v57  ;;  %v73_v55 = vld [vmem:[%s11949_s1 + $0xf0] sm:$0xff]  ;;  %v72_v57 = vld [vmem:[%s11949_s1 + $0xe8] sm:$0xff] }
 0x4d5   :  { %822 = vrot.lane.b32.xlu1 %v821_v58, %s6753_s4  ;;  %v803_v47 = vpop.f32.mrf.mxu0  ;;  %976 = vmatpush.msra.mxu3 %v73_v55  ;;  %v1053_v55 = vld [vmem:[#allocation2 + $0x68] sm:$0xff] }
 0x4d6   :  { %v827_v7 = vrot.slane %v803_v47, 7 }
 0x4d7   :  { %977 = vmatpush.msra.mxu3 %v72_v57  ;;  %v1054_v57 = vld [vmem:[#allocation2 + $0x70] sm:$0xff] }
 0x4db   :  { %v777_v59 = vpop.f32.mrf.mxu3 }
 0x4dc   :  { %v828_v60 = vsel %vm115_vm2, %v827_v7, %v777_v59 }
 0x4dd   :  { %829 = vrot.lane.b32.xlu2 %v828_v60, %s6754_s13 }
 0x537   :  { %v830_v11 = vpop.permute.xlu2 %829 }
 0x53f   :  { %v816_v6 = vpop.permute.xlu0 %815 }
 0x540   :  { %v832_v9 = vsel %vm183_vm3, %v809_v8, %v816_v6  ;;  %vm880_vm3 = vweird.f32 %v5683_v27 }
 0x541   :  { %v7085_v42 = vsel %vm880_vm3, %v5683_v27, %v879_v32 }
 0x547   :  { %v823_v10 = vpop.permute.xlu1 %822 }
 0x548   :  { %v834_v12 = vsel %vm833_vm9, %v832_v9, %v823_v10  ;;  %v923_v10 = vperm.slane %v6861_v19, 6 }
 0x549   :  { %v836_v13 = vsel %vm835_vm14, %v834_v12, %v830_v11 }
 0x54a   :  { %5532 = vmatmul.msk.f32.vlgmr.msrb.gmra.mxu1 %vm117_vm1, %v836_v13 }
 0x5c7   :  { %v858_v14 = vpop.f32.mrf.mxu1 }
 0x5c8   :  { %v859_v15 = vadd.f32 %v858_v14, %v837_v24 }
 0x5ca   :  { %v862_v16 = vrot.slane %v859_v15, 1  ;;  %v863_v17 = vperm.slane %v859_v15, 0 }
 0x5cc   :  { %v864_v18 = vperm.slane %v862_v16, 0  ;;  %v867_v20 = vadd.f32 %v863_v17, %v6874_v26  ;;  %v71_v16 = vld [vmem:[%s11949_s1 + $0xe0] sm:$0xff]  ;;  %v70_v17 = vld [vmem:[%s11949_s1 + $0xd8] sm:$0xff] }
 0x5cd   :  { %978 = vmatpush.msra.mxu3 %v71_v16  ;;  %v7169_v16 = vld [vmem:[#allocation2 + $0x268] sm:$0xff] }
 0x5ce   :  { %v869_v29 = vsel %vm117_vm1, %v867_v20, 0.0  ;;  %v868_v21 = vadd.f32 %v864_v18, %v6878_v28  ;;  %v69_v18 = vld [vmem:[%s11949_s1 + $0xd0] sm:$0xff] }
 0x5cf   :  { %870 = vadd.xlane.f32.xlu0 %v869_v29  ;;  %979 = vmatpush.msra.mxu3 %v70_v17  ;;  %v1118_v17 = vld [vmem:[#allocation2 + $0x270] sm:$0xff] }
 0x5d0   :  { %v872_v22 = vsel %vm117_vm1, %v868_v21, 0.0 }
 0x5d1   :  { %873 = vadd.xlane.f32.xlu1 %v872_v22  ;;  %980 = vmatpush.msra.mxu3 %v69_v18  ;;  %v7172_v18 = vld [vmem:[#allocation2 + $0x278] sm:$0xff] }
 0x642   :  { %v871_v33 = vpop.xlane.xlu0 %870 }
 0x643   :  { %v882_v36 = vmul.f32 %v7085_v42, %v871_v33 }
 0x644   :  { %v874_v34 = vpop.xlane.xlu1 %873 }
 0x645   :  { %v884_v35 = vsub.f32 %v867_v20, %v882_v36  ;;  %v883_v37 = vmul.f32 %v7085_v42, %v874_v34  ;;  %v926_v20 = vperm.slane %v6861_v19, 7 }
 0x647   :  { %v885_v38 = vsub.f32 %v868_v21, %v883_v37  ;;  %v886_v39 = vmul.f32 %v884_v35, %v884_v35 }
 0x649   :  { %v888_v40 = vsel %vm117_vm1, %v886_v39, 0.0  ;;  %v887_v41 = vmul.f32 %v885_v38, %v885_v38 }
 0x64a   :  { %889 = vadd.xlane.f32.xlu2 %v888_v40 }
 0x64b   :  { %v891_v43 = vsel %vm117_vm1, %v887_v41, 0.0 }
 0x64c   :  { %892 = vadd.xlane.f32.xlu0 %v891_v43 }
 0x6bd   :  { %v890_v0 = vpop.xlane.xlu2 %889 }
 0x6be   :  { %v894_v63 = vmul.f32 %v890_v0, %v7085_v42  ;;  %v1062_v0 = vld [vmem:[#allocation2 + $0xb0] sm:$0xff] }
 0x6bf   :  { %v893_v48 = vpop.xlane.xlu0 %892  ;;  %1330 = vmatpush.msrb.mxu2 %v1062_v0  ;;  %v7210_v0 = vld [vmem:[#allocation2 + $0x188] sm:$0xff] }
 0x6c0   :  { %v896_v51 = vadd.f32 1e-05, %v894_v63  ;;  %v895_v52 = vmul.f32 %v893_v48, %v7085_v42  ;;  %v1063_v63 = vld [vmem:[#allocation2 + $0xb8] sm:$0xff]  ;;  %v1056_v48 = vld [vmem:[#allocation2 + $0x80] sm:$0xff] }
 0x6c1   :  { %1353 = vmatpush.msrb.mxu3 %v1063_v63  ;;  %1285 = vmatpush.msrb.mxu0 %v1056_v48  ;;  %v1090_v48 = vld [vmem:[#allocation2 + $0x190] sm:$0xff] }
 0x6c2   :  { %5684 = vrsqrt.f32 %v896_v51  ;;  %v897_v53 = vadd.f32 1e-05, %v895_v52  ;;  %vm904_vm0 = vweird.f32 %v896_v51  ;;  %v1058_v52 = vld [vmem:[#allocation2 + $0x90] sm:$0xff] }
 0x6c3   :  { %1331 = vmatpush.msrb.mxu2 %v1058_v52  ;;  %1286 = vmatpush.msrb.mxu0 %v1052_v54  ;;  %v1084_v52 = vld [vmem:[#allocation2 + $0x160] sm:$0xff] }
 0x6c4   :  { %5686 = vrsqrt.f32 %v897_v53  ;;  %vm914_vm6 = vweird.f32 %v897_v53 }
 0x6c5   :  { %1332 = vmatpush.msrb.mxu2 %v1054_v57  ;;  %v7222_v57 = vld [vmem:[#allocation2 + $0x178] sm:$0xff] }
 0x6c8   :  { %v5685_v58 = vpop.eup %5684 }
 0x6c9   :  { %v899_v47 = vmul.f32 %v5685_v58, %v896_v51  ;;  %vm905_vm15 = vweird.f32 %v5685_v58  ;;  %v1057_v51 = vld [vmem:[#allocation2 + $0x88] sm:$0xff] }
 0x6ca   :  { %v5687_v7 = vpop.eup %5686  ;;  %vm906_vm5 = vmor %vm904_vm0, %vm905_vm15  ;;  %1308 = vmatpush.msra.mxu1 %v1057_v51  ;;  %v7214_v51 = vld [vmem:[#allocation2 + $0x198] sm:$0xff] }
 0x6cb   :  { %v900_v59 = vmul.f32 %v5685_v58, %v899_v47  ;;  %v909_v60 = vmul.f32 %v5687_v7, %v897_v53  ;;  %vm915_vm4 = vweird.f32 %v5687_v7  ;;  %v1059_v53 = vld [vmem:[#allocation2 + $0x98] sm:$0xff]  ;;  %v1048_v47 = vld [vmem:[#allocation2 + $0x40] sm:$0xff] }
 0x6cc   :  { %vm916_vm7 = vmor %vm914_vm6, %vm915_vm4  ;;  %1354 = vmatpush.msrb.mxu3 %v1059_v53  ;;  %1309 = vmatpush.msra.mxu1 %v1053_v55  ;;  %v7217_v53 = vld [vmem:[#allocation2 + $0x168] sm:$0xff]  ;;  %v1086_v55 = vld [vmem:[#allocation2 + $0x170] sm:$0xff] }
 0x6cd   :  { %v901_v61 = vmul.f32 0.5, %v900_v59  ;;  %v910_v62 = vmul.f32 %v5687_v7, %v909_v60  ;;  %v1050_v59 = vld [vmem:[#allocation2 + $0x50] sm:$0xff]  ;;  %1287 = vmatpush.msrb.mxu0 %v1048_v47  ;;  %v1051_v60 = vld [vmem:[#allocation2 + $0x58] sm:$0xff]  ;;  %v7225_v47 = vld [vmem:[#allocation2 + $0x148] sm:$0xff] }
 0x6ce   :  { %1333 = vmatpush.msrb.mxu2 %v1050_v59  ;;  %v7229_v59 = vld [vmem:[#allocation2 + $0x158] sm:$0xff] }
 0x6cf   :  { %v902_v1 = vsub.f32 1.5, %v901_v61  ;;  %v911_v2 = vmul.f32 0.5, %v910_v62  ;;  %v1044_v61 = vld [vmem:[#allocation2 + $0x20] sm:$0xff]  ;;  %v1045_v62 = vld [vmem:[#allocation2 + $0x28] sm:$0xff] }
 0x6d0   :  { %1288 = vmatpush.msrb.mxu0 %v1044_v61  ;;  %v7232_v61 = vld [vmem:[#allocation2 + $0x128] sm:$0xff] }
 0x6d1   :  { %v903_v3 = vmul.f32 %v5685_v58, %v902_v1  ;;  %v912_v4 = vsub.f32 1.5, %v911_v2  ;;  %v1046_v1 = vld [vmem:[#allocation2 + $0x30] sm:$0xff]  ;;  %v1047_v2 = vld [vmem:[#allocation2 + $0x38] sm:$0xff] }
 0x6d2   :  { %1334 = vmatpush.msrb.mxu2 %v1046_v1  ;;  %v7235_v1 = vld [vmem:[#allocation2 + $0x138] sm:$0xff] }
 0x6d3   :  { %v907_v6 = vsel %vm906_vm5, %v5685_v58, %v903_v3  ;;  %v913_v8 = vmul.f32 %v5687_v7, %v912_v4  ;;  %v1055_v58 = vld [vmem:[#allocation2 + $0x78] sm:$0xff]  ;;  %v1040_v3 = vld [vmem:[#allocation2] sm:$0xff]  ;;  %v1041_v4 = vld [vmem:[#allocation2 + $0x8] sm:$0xff] }
 0x6d4   :  { %v918_v9 = vmul.f32 %v907_v6, %v884_v35  ;;  %1355 = vmatpush.msrb.mxu3 %v1055_v58  ;;  %1289 = vmatpush.msrb.mxu0 %v1040_v3  ;;  %v1043_v6 = vld [vmem:[#allocation2 + $0x18] sm:$0xff]  ;;  %v1080_v58 = vld [vmem:[#allocation2 + $0x140] sm:$0xff] }
 0x6d5   :  { %v917_v11 = vsel %vm916_vm7, %v5687_v7, %v913_v8  ;;  %v1049_v7 = vld [vmem:[#allocation2 + $0x48] sm:$0xff]  ;;  %v1124_v8 = vld [vmem:[#allocation2 + $0x2a0] sm:$0xff] }
 0x6d6   :  { %v921_v12 = vmul.f32 %v920_v5, %v918_v9  ;;  %v919_v24 = vmul.f32 %v917_v11, %v885_v38  ;;  %1310 = vmatpush.msra.mxu1 %v1049_v7  ;;  %1356 = vmatpush.msrb.mxu3 %v1051_v60  ;;  %v7158_v9 = vld [vmem:[#allocation2 + $0x2a8] sm:$0xff]  ;;  %v7160_v11 = vld [vmem:[#allocation2 + $0x2b8] sm:$0xff]  ;;  %v1082_v7 = vld [vmem:[#allocation2 + $0x150] sm:$0xff] }
 0x6d7   :  { %1366 = vmatpush.msra.mxu0 %v1124_v8  ;;  %v1076_v60 = vld [vmem:[#allocation2 + $0x120] sm:$0xff]  ;;  %v7242_v8 = vld [vmem:[#allocation2 + $0x118] sm:$0xff] }
 0x6d8   :  { %v924_v13 = vadd.f32 %v923_v10, %v921_v12  ;;  %v922_v14 = vmul.f32 %v920_v5, %v919_v24  ;;  %1311 = vmatpush.msra.mxu1 %v1045_v62  ;;  %1357 = vmatpush.msrb.mxu3 %v1047_v2  ;;  %v1042_v5 = vld [vmem:[#allocation2 + $0x10] sm:$0xff]  ;;  %v1120_v12 = vld [vmem:[#allocation2 + $0x280] sm:$0xff] }
 0x6d9   :  { %1335 = vmatpush.msrb.mxu2 %v1042_v5  ;;  %v1122_v24 = vld [vmem:[#allocation2 + $0x290] sm:$0xff]  ;;  %1367 = vmatpush.msra.mxu0 %v1120_v12  ;;  %v1072_v3 = vld [vmem:[#allocation2 + $0x100] sm:$0xff]  ;;  %v7245_v12 = vld [vmem:[#allocation2 + $0xe8] sm:$0xff] }
 0x6da   :  { %5533 = vmatmul.msk.f32.vlgmr.msra.gmra.mxu2 %vm117_vm1, %v924_v13  ;;  %v925_v15 = vadd.f32 %v923_v10, %v922_v14  ;;  %1312 = vmatpush.msra.mxu1 %v1041_v4  ;;  %v1126_v10 = vld [vmem:[#allocation2 + $0x2b0] sm:$0xff]  ;;  %v7163_v13 = vld [vmem:[#allocation2 + $0x288] sm:$0xff]  ;;  %v7166_v14 = vld [vmem:[#allocation2 + $0x298] sm:$0xff] }
 0x6db   :  { %1358 = vmatpush.msrb.mxu3 %v1043_v6  ;;  %1406 = vmatpush.msra.mxu2 %v1126_v10  ;;  %v1078_v62 = vld [vmem:[#allocation2 + $0x130] sm:$0xff]  ;;  %v7238_v4 = vld [vmem:[#allocation2 + $0x108] sm:$0xff]  ;;  %v1068_v10 = vld [vmem:[#allocation2 + $0xe0] sm:$0xff] }
 0x6dc   :  { %1386 = vmatpush.msrb.mxu1 %v7158_v9  ;;  %v1074_v6 = vld [vmem:[#allocation2 + $0x110] sm:$0xff] }
 0x6dd   :  { %1407 = vmatpush.msra.mxu2 %v1122_v24 }
 0x6de   :  { %1387 = vmatpush.msrb.mxu1 %v7163_v13 }
 0x6df   :  { %1408 = vmatpush.msra.mxu2 %v1118_v17  ;;  %v1070_v17 = vld [vmem:[#allocation2 + $0xf0] sm:$0xff] }
 0x6e0   :  { %1388 = vmatpush.msrb.mxu1 %v7169_v16 }
 0x6e2   :  { %5534 = vmatmul.msk.f32.gmra.mxu2 %vm117_vm1, %v925_v15  ;;  %v1116_v15 = vld [vmem:[#allocation2 + $0x260] sm:$0xff] }
 0x6e3   :  { %1368 = vmatpush.msra.mxu0 %v1116_v15 }
 0x75d   :  { %v950_v29 = vpop.f32.mrf.mxu2 }
 0x75e   :  { %v951_v21 = vadd.f32 %v950_v29, %v926_v20  ;;  %v7175_v29 = vld [vmem:[#allocation2 + $0x248] sm:$0xff] }
 0x75f   :  { %1389 = vmatpush.msrb.mxu1 %v7175_v29 }
 0x760   :  { %v956_v22 = vmax.f32 %v951_v21, 0.0  ;;  %v1114_v21 = vld [vmem:[#allocation2 + $0x250] sm:$0xff] }
 0x761   :  { %1409 = vmatpush.msra.mxu2 %v1114_v21  ;;  %v1064_v21 = vld [vmem:[#allocation2 + $0xc0] sm:$0xff] }
 0x762   :  { %5535 = vmatmul.msk.f32.vlgmr.msra.gmra.mxu3 %vm117_vm1, %v956_v22  ;;  %v7178_v22 = vld [vmem:[#allocation2 + $0x258] sm:$0xff] }
 0x763   :  { %1426 = vmatpush.msra.mxu3 %v7160_v11 }
 0x765   :  { %v953_v25 = vpop.f32.mrf.mxu2  ;;  %1427 = vmatpush.msra.mxu3 %v7166_v14 }
 0x766   :  { %v954_v27 = vadd.f32 %v953_v25, %v926_v20  ;;  %v1112_v20 = vld [vmem:[#allocation2 + $0x240] sm:$0xff] }
 0x767   :  { %1428 = vmatpush.msra.mxu3 %v7172_v18  ;;  %1369 = vmatpush.msra.mxu0 %v1112_v20  ;;  %v1108_v25 = vld [vmem:[#allocation2 + $0x220] sm:$0xff]  ;;  %v7248_v20 = vld [vmem:[#allocation2 + $0xf8] sm:$0xff] }
 0x768   :  { %v957_v56 = vmax.f32 %v954_v27, 0.0  ;;  %v7181_v27 = vld [vmem:[#allocation2 + $0x228] sm:$0xff] }
 0x769   :  { %1429 = vmatpush.msra.mxu3 %v7178_v22  ;;  %1370 = vmatpush.msra.mxu0 %v1108_v25  ;;  %v7252_v25 = vld [vmem:[#allocation2 + $0xc8] sm:$0xff] }
 0x76a   :  { %5536 = vmatmul.msk.f32.gmra.mxu3 %vm117_vm1, %v957_v56  ;;  %v1110_v56 = vld [vmem:[#allocation2 + $0x230] sm:$0xff]  ;;  %1390 = vmatpush.msrb.mxu1 %v7181_v27 }
 0x76b   :  { %1410 = vmatpush.msra.mxu2 %v1110_v56  ;;  %v1066_v56 = vld [vmem:[#allocation2 + $0xd0] sm:$0xff] }
 0x7e5   :  { %v982_v32 = vpop.f32.mrf.mxu3 }
 0x7e6   :  { %v983_v33 = vadd.f32 %v982_v32, %v958_v31  ;;  %v1104_v32 = vld [vmem:[#allocation2 + $0x200] sm:$0xff] }
 0x7e7   :  { %1371 = vmatpush.msra.mxu0 %v1104_v32  ;;  %v7255_v32 = vld [vmem:[#allocation2 + $0xd8] sm:$0xff] }
 0x7e8   :  { %v988_v19 = vadd.f32 %v983_v33, %v6874_v26  ;;  %v7187_v33 = vld [vmem:[#allocation2 + $0x208] sm:$0xff] }
 0x7e9   :  { %1391 = vmatpush.msrb.mxu1 %v7187_v33 }
 0x7ea   :  { %v990_v36 = vsel %vm117_vm1, %v988_v19, 0.0 }
 0x7eb   :  { %991 = vadd.xlane.f32.xlu1 %v990_v36  ;;  %v7190_v36 = vld [vmem:[#allocation2 + $0x218] sm:$0xff] }
 0x7ed   :  { %v985_v34 = vpop.f32.mrf.mxu3 }
 0x7ee   :  { %v986_v35 = vadd.f32 %v985_v34, %v958_v31  ;;  %v7184_v31 = vld [vmem:[#allocation2 + $0x238] sm:$0xff]  ;;  %v1100_v34 = vld [vmem:[#allocation2 + $0x1e0] sm:$0xff] }
 0x7ef   :  { %1430 = vmatpush.msra.mxu3 %v7184_v31  ;;  %1372 = vmatpush.msra.mxu0 %v1100_v34 }
 0x7f0   :  { %v989_v37 = vadd.f32 %v986_v35, %v6878_v28  ;;  %v7193_v35 = vld [vmem:[#allocation2 + $0x1e8] sm:$0xff] }
 0x7f1   :  { %1431 = vmatpush.msra.mxu3 %v7190_v36  ;;  %1392 = vmatpush.msrb.mxu1 %v7193_v35 }
 0x7f2   :  { %v993_v38 = vsel %vm117_vm1, %v989_v37, 0.0 }
 0x7f3   :  { %994 = vadd.xlane.f32.xlu2 %v993_v38  ;;  %v7196_v38 = vld [vmem:[#allocation2 + $0x1f8] sm:$0xff] }
 0x7f4   :  { %1432 = vmatpush.msra.mxu3 %v7196_v38 }
 0x85e   :  { %v992_v39 = vpop.xlane.xlu1 %991 }
 0x85f   :  { %v996_v40 = vmul.f32 %v992_v39, %v7085_v42  ;;  %v1096_v39 = vld [vmem:[#allocation2 + $0x1c0] sm:$0xff] }
 0x860   :  { %1373 = vmatpush.msra.mxu0 %v1096_v39 }
 0x861   :  { %v7147_v41 = vsub.f32 %v988_v19, %v996_v40  ;;  %v1106_v19 = vld [vmem:[#allocation2 + $0x210] sm:$0xff]  ;;  %v7199_v40 = vld [vmem:[#allocation2 + $0x1c8] sm:$0xff] }
 0x862   :  { %1411 = vmatpush.msra.mxu2 %v1106_v19  ;;  %1393 = vmatpush.msrb.mxu1 %v7199_v40 }
 0x863   :  { %v1000_v43 = vmul.f32 %v7147_v41, %v7147_v41 }
 0x865   :  { %v1002_v26 = vsel %vm117_vm1, %v1000_v43, 0.0  ;;  %v1098_v43 = vld [vmem:[#allocation2 + $0x1d0] sm:$0xff] }
 0x866   :  { %v995_v44 = vpop.xlane.xlu2 %994  ;;  %1003 = vadd.xlane.f32.xlu0 %v1002_v26  ;;  %v7202_v26 = vld [vmem:[#allocation2 + $0x1d8] sm:$0xff] }
 0x867   :  { %v997_v23 = vmul.f32 %v995_v44, %v7085_v42  ;;  %v1092_v44 = vld [vmem:[#allocation2 + $0x1a0] sm:$0xff]  ;;  %1433 = vmatpush.msra.mxu3 %v7202_v26 }
 0x868   :  { %1374 = vmatpush.msra.mxu0 %v1092_v44 }
 0x869   :  { %v7153_v46 = vsub.f32 %v989_v37, %v997_v23  ;;  %v1102_v37 = vld [vmem:[#allocation2 + $0x1f0] sm:$0xff]  ;;  %v7205_v23 = vld [vmem:[#allocation2 + $0x1a8] sm:$0xff]  ;;  %1434 = vmatpush.msra.mxu3 %v7208_v50 }
 0x86a   :  { %1412 = vmatpush.msra.mxu2 %v1102_v37  ;;  %1394 = vmatpush.msrb.mxu1 %v7205_v23 }
 0x86b   :  { %v1001_v28 = vmul.f32 %v7153_v46, %v7153_v46  ;;  %1375 = vmatpush.msra.mxu0 %v1088_v45  ;;  %1435 = vmatpush.msra.mxu3 %v7214_v51 }
 0x86c   :  { %1413 = vmatpush.msra.mxu2 %v1098_v43  ;;  %1395 = vmatpush.msrb.mxu1 %v7210_v0 }
 0x86d   :  { %v1005_v49 = vsel %vm117_vm1, %v1001_v28, 0.0  ;;  %v1094_v28 = vld [vmem:[#allocation2 + $0x1b0] sm:$0xff]  ;;  %1376 = vmatpush.msra.mxu0 %v1084_v52  ;;  %1436 = vmatpush.msra.mxu3 %v7222_v57 }
 0x86e   :  { %1006 = vadd.xlane.f32.xlu1 %v1005_v49  ;;  %1414 = vmatpush.msra.mxu2 %v1094_v28  ;;  %v1034_v28 = vperm.slane %v7139_v30, 1 }
 0x86f   :  { %1396 = vmatpush.msrb.mxu1 %v7217_v53  ;;  %1377 = vmatpush.msra.mxu0 %v1080_v58 }
 0x870   :  { %1415 = vmatpush.msra.mxu2 %v1090_v48  ;;  %1437 = vmatpush.msra.mxu3 %v7229_v59 }
 0x871   :  { %1397 = vmatpush.msrb.mxu1 %v7225_v47  ;;  %1378 = vmatpush.msra.mxu0 %v1076_v60 }
 0x872   :  { %1416 = vmatpush.msra.mxu2 %v1086_v55  ;;  %1438 = vmatpush.msra.mxu3 %v7235_v1 }
 0x873   :  { %1398 = vmatpush.msrb.mxu1 %v7232_v61  ;;  %1379 = vmatpush.msra.mxu0 %v1072_v3 }
 0x874   :  { %1417 = vmatpush.msra.mxu2 %v1082_v7  ;;  %1439 = vmatpush.msra.mxu3 %v7242_v8 }
 0x875   :  { %1399 = vmatpush.msrb.mxu1 %v7238_v4  ;;  %1380 = vmatpush.msra.mxu0 %v1068_v10 }
 0x876   :  { %1418 = vmatpush.msra.mxu2 %v1078_v62  ;;  %1440 = vmatpush.msra.mxu3 %v7248_v20  ;;  %v7264_v62 = vld [vmem:[#allocation2 + $0x6a0] sm:$0xff] }
 0x877   :  { %1400 = vmatpush.msrb.mxu1 %v7245_v12  ;;  %1381 = vmatpush.msra.mxu0 %v1064_v21  ;;  %v7301_v21 = vld [vmem:[#allocation2 + $0x600] sm:$0xff] }
 0x878   :  { %1419 = vmatpush.msra.mxu2 %v1074_v6  ;;  %1441 = vmatpush.msra.mxu3 %v7255_v32  ;;  %v7281_v6 = vld [vmem:[#allocation2 + $0x668] sm:$0xff] }
 0x879   :  { %1401 = vmatpush.msrb.mxu1 %v7252_v25 }
 0x87a   :  { %1420 = vmatpush.msra.mxu2 %v1070_v17  ;;  %v7295_v17 = vld [vmem:[#allocation2 + $0x620] sm:$0xff] }
 0x87c   :  { %1421 = vmatpush.msra.mxu2 %v1066_v56  ;;  %v7303_v56 = vld [vmem:[#allocation2 + $0x608] sm:$0xff] }
 0x8d9   :  { %v1004_v49 = vpop.xlane.xlu0 %1003 }
 0x8da   :  { %v1008_v63 = vmul.f32 %v1004_v49, %v7085_v42 }
 0x8dc   :  { %v7219_v54 = vadd.f32 1e-05, %v1008_v63  ;;  %v1037_v63 = vperm.slane %v7139_v30, 2  ;;  %v7272_v30 = vld [vmem:[#allocation2 + $0x680] sm:$0xff] }
 0x8de   :  { %5688 = vrsqrt.f32 %v7219_v54  ;;  %vm1018_vm10 = vweird.f32 %v7219_v54 }
 0x8e1   :  { %v1007_v2 = vpop.xlane.xlu1 %1006 }
 0x8e2   :  { %v1009_v5 = vmul.f32 %v1007_v2, %v7085_v42 }
 0x8e4   :  { %v5689_v24 = vpop.eup %5688  ;;  %v1011_v15 = vadd.f32 1e-05, %v1009_v5  ;;  %v7279_v5 = vld [vmem:[#allocation2 + $0x660] sm:$0xff] }
 0x8e5   :  { %v1013_v42 = vmul.f32 %v5689_v24, %v7219_v54  ;;  %vm1019_vm8 = vweird.f32 %v5689_v24  ;;  %v7266_v54 = vld [vmem:[#allocation2 + $0x6a8] sm:$0xff] }
 0x8e6   :  { %5690 = vrsqrt.f32 %v1011_v15  ;;  %vm1020_vm11 = vmor %vm1018_vm10, %vm1019_vm8  ;;  %vm1028_vm13 = vweird.f32 %v1011_v15 }
 0x8e7   :  { %v1014_v19 = vmul.f32 %v5689_v24, %v1013_v42  ;;  %v7297_v42 = vld [vmem:[#allocation2 + $0x628] sm:$0xff] }
 0x8e9   :  { %v1015_v34 = vmul.f32 0.5, %v1014_v19  ;;  %v7309_v19 = vld [vmem:[#allocation2 + $0x5e0] sm:$0xff] }
 0x8eb   :  { %v1016_v37 = vsub.f32 1.5, %v1015_v34  ;;  %v7311_v34 = vld [vmem:[#allocation2 + $0x5e8] sm:$0xff] }
 0x8ec   :  { %v5691_v39 = vpop.eup %5690 }
 0x8ed   :  { %v1017_v43 = vmul.f32 %v5689_v24, %v1016_v37  ;;  %v1023_v44 = vmul.f32 %v5691_v39, %v1011_v15  ;;  %vm1029_vm12 = vweird.f32 %v5691_v39  ;;  %v7287_v15 = vld [vmem:[#allocation2 + $0x640] sm:$0xff]  ;;  %v11956_v37 = vmov 0.0  }
 0x8ee   :  { %vm1030_vm9 = vmor %vm1028_vm13, %vm1029_vm12 }
 0x8ef   :  { %v1021_v49 = vsel %vm1020_vm11, %v5689_v24, %v1017_v43  ;;  %v1024_v45 = vmul.f32 %v5691_v39, %v1023_v44  ;;  %v7319_v43 = vld [vmem:[#allocation2 + $0x5c8] sm:$0xff]  ;;  %v7323_v44 = vld [vmem:[#allocation2 + $0x5a0] sm:$0xff] }
 0x8f0   :  { %v1032_v48 = vmul.f32 %v1021_v49, %v7147_v41  ;;  %v7274_v41 = vld [vmem:[#allocation2 + $0x688] sm:$0xff]  ;;  %12496 = vst [vmem:[#allocation9_spill] sm:$0xff] %v7319_v43  ;;  %v7329_v49 = vld [vmem:[#allocation2 + $0x580] sm:$0xff] }
 0x8f1   :  { %v1025_v52 = vmul.f32 0.5, %v1024_v45  ;;  %12497 = vst [vmem:[#allocation10_spill] sm:$0xff] %v7323_v44  ;;  %v7331_v45 = vld [vmem:[#allocation2 + $0x588] sm:$0xff] }
 0x8f2   :  { %v1035_v55 = vmul.f32 %v1034_v28, %v1032_v48  ;;  %12499 = vst [vmem:[#allocation12_spill] sm:$0xff] %v7329_v49  ;;  %v7337_v48 = vld [vmem:[#allocation2 + $0x568] sm:$0xff] }
 0x8f3   :  { %v1026_v58 = vsub.f32 1.5, %v1025_v52  ;;  %12500 = vst [vmem:[#allocation13_spill] sm:$0xff] %v7331_v45  ;;  %v7341_v52 = vld [vmem:[#allocation2 + $0x540] sm:$0xff] }
 0x8f4   :  { %v1038_v7 = vadd.f32 %v1037_v63, %v1035_v55  ;;  %12502 = vst [vmem:[#allocation15_spill] sm:$0xff] %v7337_v48  ;;  %v7343_v55 = vld [vmem:[#allocation2 + $0x548] sm:$0xff] }
 0x8f5   :  { %v1027_v60 = vmul.f32 %v5691_v39, %v1026_v58  ;;  %12503 = vst [vmem:[#allocation16_spill] sm:$0xff] %v7341_v52  ;;  %v7347_v58 = vld [vmem:[#allocation2 + $0x520] sm:$0xff] }
 0x8f6   :  { %5538 = vmatmul.msk.f32.vlgmr.msrb.gmra.mxu0 %vm117_vm1, %v1038_v7  ;;  %5540 = vmatmul.msk.f32.vlgmr.msra.gmra.mxu1 %vm117_vm1, %v1038_v7  ;;  %12504 = vst [vmem:[#allocation17_spill] sm:$0xff] %v7343_v55 }
 0x8f7   :  { %v1031_v2 = vsel %vm1030_vm9, %v5691_v39, %v1027_v60  ;;  %5542 = vmatmul.msk.f32.vlgmr.msrb.gmra.mxu2 %vm117_vm1, %v1038_v7  ;;  %5544 = vmatmul.msk.f32.vlgmr.msrb.gmra.mxu3 %vm117_vm1, %v1038_v7  ;;  %v7317_v39 = vld [vmem:[#allocation2 + $0x5c0] sm:$0xff]  ;;  %12505 = vst [vmem:[#allocation18_spill] sm:$0xff] %v7347_v58  ;;  %v7349_v7 = vld [vmem:[#allocation2 + $0x528] sm:$0xff] }
 0x8f8   :  { %v1033_v3 = vmul.f32 %v1031_v2, %v7153_v46  ;;  %1630 = vmatpush.msra.mxu1 %v7264_v62  ;;  %1670 = vmatpush.msrb.mxu3 %v7266_v54  ;;  %v7289_v46 = vld [vmem:[#allocation2 + $0x648] sm:$0xff]  ;;  %12495 = vst [vmem:[#allocation8_spill] sm:$0xff] %v7317_v39  ;;  %v7353_v60 = vld [vmem:[#allocation2 + $0x500] sm:$0xff] }
 0x8f9   :  { %12506 = vst [vmem:[#allocation19_spill] sm:$0xff] %v7349_v7  ;;  %v7355_v2 = vld [vmem:[#allocation2 + $0x508] sm:$0xff] }
 0x8fa   :  { %v1036_v10 = vmul.f32 %v1034_v28, %v1033_v3  ;;  %1631 = vmatpush.msra.mxu1 %v7272_v30  ;;  %1671 = vmatpush.msrb.mxu3 %v7274_v41  ;;  %v7325_v28 = vld [vmem:[#allocation2 + $0x5a8] sm:$0xff]  ;;  %12507 = vst [vmem:[#allocation20_spill] sm:$0xff] %v7353_v60  ;;  %v7361_v3 = vld [vmem:[#allocation2 + $0x4e0] sm:$0xff] }
 0x8fb   :  { %12498 = vst [vmem:[#allocation11_spill] sm:$0xff] %v7325_v28 }
 0x8fc   :  { %v1039_v24 = vadd.f32 %v1037_v63, %v1036_v10  ;;  %1632 = vmatpush.msra.mxu1 %v7279_v5  ;;  %1672 = vmatpush.msrb.mxu3 %v7281_v6  ;;  %v7335_v63 = vld [vmem:[#allocation2 + $0x560] sm:$0xff]  ;;  %12508 = vst [vmem:[#allocation21_spill] sm:$0xff] %v7355_v2  ;;  %v7363_v10 = vld [vmem:[#allocation2 + $0x4e8] sm:$0xff] }
 0x8fd   :  { %12501 = vst [vmem:[#allocation14_spill] sm:$0xff] %v7335_v63 }
 0x8fe   :  { %5539 = vmatmul.msk.f32.gmra.mxu0 %vm117_vm1, %v1039_v24  ;;  %5541 = vmatmul.msk.f32.gmra.mxu1 %vm117_vm1, %v1039_v24  ;;  %12509 = vst [vmem:[#allocation22_spill] sm:$0xff] %v7361_v3 }
 0x8ff   :  { %5543 = vmatmul.msk.f32.gmra.mxu2 %vm117_vm1, %v1039_v24  ;;  %5545 = vmatmul.msk.f32.gmra.mxu3 %vm117_vm1, %v1039_v24  ;;  %12510 = vst [vmem:[#allocation23_spill] sm:$0xff] %v7363_v10  ;;  %v7365_v24 = vld [vmem:[#allocation2 + $0x4c0] sm:$0xff] }
 0x900   :  { %1633 = vmatpush.msra.mxu1 %v7287_v15  ;;  %1673 = vmatpush.msrb.mxu3 %v7289_v46  ;;  %12511 = vst [vmem:[#allocation24_spill] sm:$0xff] %v7365_v24 }
 0x902   :  { %1634 = vmatpush.msra.mxu1 %v7295_v17  ;;  %1674 = vmatpush.msrb.mxu3 %v7297_v42 }
 0x904   :  { %1635 = vmatpush.msra.mxu1 %v7301_v21  ;;  %1675 = vmatpush.msrb.mxu3 %v7303_v56 }
 0x906   :  { %1382 = vmatmul.f32.vlgmr.msra.gmra.mxu0 %v11956_v37  ;;  %1402 = vmatmul.f32.vlgmr.msrb.gmra.mxu1 %v11956_v37 }
 0x907   :  { %1422 = vmatmul.f32.vlgmr.msra.gmra.mxu2 %v11956_v37  ;;  %1442 = vmatmul.f32.vlgmr.msra.gmra.mxu3 %v11956_v37  ;;  %v7369_v37 = vld [vmem:[#allocation2 + $0x4c8] sm:$0xff] }
 0x908   :  { %1636 = vmatpush.msra.mxu1 %v7309_v19  ;;  %1676 = vmatpush.msrb.mxu3 %v7311_v34  ;;  %12512 = vst [vmem:[#allocation25_spill] sm:$0xff] %v7369_v37 }
 0x90a   :  { %1637 = vmatpush.msra.mxu1 %v7317_v39  ;;  %1677 = vmatpush.msrb.mxu3 %v7319_v43 }
 0x90c   :  { %1638 = vmatpush.msra.mxu1 %v7323_v44  ;;  %1678 = vmatpush.msrb.mxu3 %v7325_v28  ;;  %v7572_v28 = vld [vmem:[#allocation2 + $0x4d0] sm:$0xff]  ;;  %v7580_v44 = vld [vmem:[#allocation2 + $0x4b8] sm:$0xff] }
 0x90d   :  { %12576 = vst [vmem:[#allocation88_spill] sm:$0xff] %v7572_v28 }
 0x90e   :  { %1639 = vmatpush.msra.mxu1 %v7329_v49  ;;  %1679 = vmatpush.msrb.mxu3 %v7331_v45  ;;  %v7568_v45 = vld [vmem:[#allocation2 + $0x2c0] sm:$0xff]  ;;  %v7570_v49 = vld [vmem:[#allocation2 + $0x2c8] sm:$0xff]  ;;  %12579 = vst [vmem:[#allocation91_spill] sm:$0xff] %v7580_v44 }
 0x90f   :  { %12574 = vst [vmem:[#allocation86_spill] sm:$0xff] %v7568_v45 }
 0x910   :  { %1640 = vmatpush.msra.mxu1 %v7335_v63  ;;  %1680 = vmatpush.msrb.mxu3 %v7337_v48  ;;  %v7427_v48 = vld [vmem:[#allocation2 + $0x638] sm:$0xff]  ;;  %12575 = vst [vmem:[#allocation87_spill] sm:$0xff] %v7570_v49 }
 0x911   :  { %12533 = vst [vmem:[#allocation45_spill] sm:$0xff] %v7427_v48 }
 0x912   :  { %1641 = vmatpush.msra.mxu1 %v7341_v52  ;;  %1681 = vmatpush.msrb.mxu3 %v7343_v55  ;;  %v7371_v55 = vld [vmem:[#allocation2 + $0x4a0] sm:$0xff]  ;;  %v7389_v52 = vld [vmem:[#allocation2 + $0x698] sm:$0xff] }
 0x913   :  { %12513 = vst [vmem:[#allocation26_spill] sm:$0xff] %v7371_v55  ;;  %1610 = vmatpush.msrb.mxu0 %v7371_v55  ;;  %v7399_v55 = vld [vmem:[#allocation2 + $0x468] sm:$0xff] }
 0x914   :  { %1642 = vmatpush.msra.mxu1 %v7347_v58  ;;  %1682 = vmatpush.msrb.mxu3 %v7349_v7  ;;  %v7373_v58 = vld [vmem:[#allocation2 + $0x4a8] sm:$0xff]  ;;  %v7381_v7 = vld [vmem:[#allocation2 + $0x480] sm:$0xff]  ;;  %12520 = vst [vmem:[#allocation33_spill] sm:$0xff] %v7389_v52 }
 0x915   :  { %12514 = vst [vmem:[#allocation27_spill] sm:$0xff] %v7373_v58  ;;  %1650 = vmatpush.msrb.mxu2 %v7373_v58  ;;  %1611 = vmatpush.msrb.mxu0 %v7381_v7  ;;  %v7397_v58 = vld [vmem:[#allocation2 + $0x460] sm:$0xff] }
 0x916   :  { %1643 = vmatpush.msra.mxu1 %v7353_v60  ;;  %1683 = vmatpush.msrb.mxu3 %v7355_v2  ;;  %v7377_v2 = vld [vmem:[#allocation2 + $0x6b0] sm:$0xff]  ;;  %v7379_v60 = vld [vmem:[#allocation2 + $0x6b8] sm:$0xff]  ;;  %12517 = vst [vmem:[#allocation30_spill] sm:$0xff] %v7381_v7 }
 0x917   :  { %12515 = vst [vmem:[#allocation28_spill] sm:$0xff] %v7377_v2  ;;  %1612 = vmatpush.msrb.mxu0 %v7397_v58  ;;  %v7407_v7 = vld [vmem:[#allocation2 + $0x678] sm:$0xff] }
 0x918   :  { %1644 = vmatpush.msra.mxu1 %v7361_v3  ;;  %1684 = vmatpush.msrb.mxu3 %v7363_v10  ;;  %12516 = vst [vmem:[#allocation29_spill] sm:$0xff] %v7379_v60  ;;  %v7385_v10 = vld [vmem:[#allocation2 + $0x488] sm:$0xff]  ;;  %v7387_v3 = vld [vmem:[#allocation2 + $0x690] sm:$0xff] }
 0x919   :  { %12518 = vst [vmem:[#allocation31_spill] sm:$0xff] %v7385_v10  ;;  %1651 = vmatpush.msrb.mxu2 %v7385_v10  ;;  %v7409_v10 = vld [vmem:[#allocation2 + $0x440] sm:$0xff] }
 0x91a   :  { %1645 = vmatpush.msra.mxu1 %v7365_v24  ;;  %1685 = vmatpush.msrb.mxu3 %v7369_v37  ;;  %12519 = vst [vmem:[#allocation32_spill] sm:$0xff] %v7387_v3  ;;  %v7401_v37 = vld [vmem:[#allocation2 + $0x670] sm:$0xff]  ;;  %v12524_v24 = vmov 0.0  }
 0x91b   :  { %12521 = vst [vmem:[#allocation34_spill] sm:$0xff] %v7397_v58  ;;  %1646 = vmatmul.f32.vlgmr.msra.gmra.mxu1 %v12524_v24  ;;  %1686 = vmatmul.f32.vlgmr.msrb.gmra.mxu3 %v12524_v24  ;;  %v7425_v58 = vld [vmem:[#allocation2 + $0x630] sm:$0xff] }
 0x91c   :  { %1710 = vmatpush.msrb.mxu1 %v7377_v2  ;;  %1750 = vmatpush.msra.mxu3 %v7379_v60  ;;  %12522 = vst [vmem:[#allocation35_spill] sm:$0xff] %v7399_v55  ;;  %v7417_v60 = vld [vmem:[#allocation2 + $0x658] sm:$0xff]  ;;  %v7419_v2 = vld [vmem:[#allocation2 + $0x420] sm:$0xff] }
 0x91d   :  { %12523 = vst [vmem:[#allocation36_spill] sm:$0xff] %v7401_v37  ;;  %1652 = vmatpush.msrb.mxu2 %v7399_v55  ;;  %1613 = vmatpush.msrb.mxu0 %v7409_v10  ;;  %v7423_v55 = vld [vmem:[#allocation2 + $0x428] sm:$0xff] }
 0x91e   :  { %1711 = vmatpush.msrb.mxu1 %v7387_v3  ;;  %1751 = vmatpush.msra.mxu3 %v7389_v52  ;;  %12525 = vst [vmem:[#allocation37_spill] sm:$0xff] %v7407_v7  ;;  %v7411_v3 = vld [vmem:[#allocation2 + $0x448] sm:$0xff]  ;;  %v7415_v52 = vld [vmem:[#allocation2 + $0x650] sm:$0xff] }
 0x91f   :  { %12526 = vst [vmem:[#allocation38_spill] sm:$0xff] %v7409_v10  ;;  %1653 = vmatpush.msrb.mxu2 %v7411_v3  ;;  %1614 = vmatpush.msrb.mxu0 %v7419_v2  ;;  %v7437_v10 = vld [vmem:[#allocation2 + $0x610] sm:$0xff] }
 0x920   :  { %12527 = vst [vmem:[#allocation39_spill] sm:$0xff] %v7411_v3  ;;  %1712 = vmatpush.msrb.mxu1 %v7401_v37  ;;  %1752 = vmatpush.msra.mxu3 %v7407_v7  ;;  %v7431_v7 = vld [vmem:[#allocation2 + $0x400] sm:$0xff]  ;;  %v7433_v37 = vld [vmem:[#allocation2 + $0x408] sm:$0xff]  ;;  %v7439_v3 = vld [vmem:[#allocation2 + $0x618] sm:$0xff] }
 0x921   :  { %12528 = vst [vmem:[#allocation40_spill] sm:$0xff] %v7415_v52  ;;  %1654 = vmatpush.msrb.mxu2 %v7423_v55  ;;  %1615 = vmatpush.msrb.mxu0 %v7431_v7 }
 0x922   :  { %12529 = vst [vmem:[#allocation41_spill] sm:$0xff] %v7417_v60  ;;  %1713 = vmatpush.msrb.mxu1 %v7415_v52  ;;  %1753 = vmatpush.msra.mxu3 %v7417_v60  ;;  %v7447_v60 = vld [vmem:[#allocation2 + $0x3e0] sm:$0xff]  ;;  %v7531_v52 = vld [vmem:[#allocation2 + $0x538] sm:$0xff] }
 0x923   :  { %12530 = vst [vmem:[#allocation42_spill] sm:$0xff] %v7419_v2  ;;  %1655 = vmatpush.msrb.mxu2 %v7433_v37  ;;  %v7449_v2 = vld [vmem:[#allocation2 + $0x3e8] sm:$0xff]  ;;  %1616 = vmatpush.msrb.mxu0 %v7447_v60 }
 0x924   :  { %12531 = vst [vmem:[#allocation43_spill] sm:$0xff] %v7423_v55  ;;  %1714 = vmatpush.msrb.mxu1 %v7425_v58  ;;  %1754 = vmatpush.msra.mxu3 %v7427_v48  ;;  %v7451_v55 = vld [vmem:[#allocation2 + $0x5f0] sm:$0xff] }
 0x925   :  { %12532 = vst [vmem:[#allocation44_spill] sm:$0xff] %v7425_v58  ;;  %1656 = vmatpush.msrb.mxu2 %v7449_v2  ;;  %v7455_v58 = vld [vmem:[#allocation2 + $0x5f8] sm:$0xff]  ;;  %v7515_v48 = vld [vmem:[#allocation2 + $0x550] sm:$0xff] }
 0x926   :  { %12534 = vst [vmem:[#allocation46_spill] sm:$0xff] %v7431_v7  ;;  %1715 = vmatpush.msrb.mxu1 %v7437_v10  ;;  %1755 = vmatpush.msra.mxu3 %v7439_v3  ;;  %v7461_v7 = vld [vmem:[#allocation2 + $0x3c8] sm:$0xff] }
 0x927   :  { %12535 = vst [vmem:[#allocation47_spill] sm:$0xff] %v7433_v37  ;;  %v7459_v37 = vld [vmem:[#allocation2 + $0x3c0] sm:$0xff]  ;;  %1657 = vmatpush.msrb.mxu2 %v7461_v7 }
 0x928   :  { %12536 = vst [vmem:[#allocation48_spill] sm:$0xff] %v7437_v10  ;;  %1716 = vmatpush.msrb.mxu1 %v7451_v55  ;;  %1756 = vmatpush.msra.mxu3 %v7455_v58  ;;  %v7467_v10 = vld [vmem:[#allocation2 + $0x5d8] sm:$0xff] }
 0x929   :  { %12537 = vst [vmem:[#allocation49_spill] sm:$0xff] %v7439_v3  ;;  %v7463_v3 = vld [vmem:[#allocation2 + $0x5d0] sm:$0xff]  ;;  %1617 = vmatpush.msrb.mxu0 %v7459_v37 }
 0x92a   :  { %12538 = vst [vmem:[#allocation50_spill] sm:$0xff] %v7447_v60  ;;  %1717 = vmatpush.msrb.mxu1 %v7463_v3  ;;  %1757 = vmatpush.msra.mxu3 %v7467_v10  ;;  %v7473_v60 = vld [vmem:[#allocation2 + $0x3a8] sm:$0xff] }
 0x92b   :  { %12539 = vst [vmem:[#allocation51_spill] sm:$0xff] %v7449_v2  ;;  %v7471_v2 = vld [vmem:[#allocation2 + $0x3a0] sm:$0xff]  ;;  %1658 = vmatpush.msrb.mxu2 %v7473_v60 }
 0x92c   :  { %12540 = vst [vmem:[#allocation52_spill] sm:$0xff] %v7451_v55  ;;  %1618 = vmatpush.msrb.mxu0 %v7471_v2  ;;  %v7479_v55 = vld [vmem:[#allocation2 + $0x5b8] sm:$0xff] }
 0x92d   :  { %12541 = vst [vmem:[#allocation53_spill] sm:$0xff] %v7455_v58  ;;  %v7475_v58 = vld [vmem:[#allocation2 + $0x5b0] sm:$0xff]  ;;  %1758 = vmatpush.msra.mxu3 %v7479_v55 }
 0x92e   :  { %12542 = vst [vmem:[#allocation54_spill] sm:$0xff] %v7459_v37  ;;  %1718 = vmatpush.msrb.mxu1 %v7475_v58  ;;  %v7485_v37 = vld [vmem:[#allocation2 + $0x388] sm:$0xff] }
 0x92f   :  { %12543 = vst [vmem:[#allocation55_spill] sm:$0xff] %v7461_v7  ;;  %v7483_v7 = vld [vmem:[#allocation2 + $0x380] sm:$0xff]  ;;  %1659 = vmatpush.msrb.mxu2 %v7485_v37 }
 0x930   :  { %12544 = vst [vmem:[#allocation56_spill] sm:$0xff] %v7463_v3  ;;  %1619 = vmatpush.msrb.mxu0 %v7483_v7  ;;  %v7491_v3 = vld [vmem:[#allocation2 + $0x598] sm:$0xff] }
 0x931   :  { %12545 = vst [vmem:[#allocation57_spill] sm:$0xff] %v7467_v10  ;;  %v7487_v10 = vld [vmem:[#allocation2 + $0x590] sm:$0xff]  ;;  %1759 = vmatpush.msra.mxu3 %v7491_v3 }
 0x932   :  { %12546 = vst [vmem:[#allocation58_spill] sm:$0xff] %v7471_v2  ;;  %1719 = vmatpush.msrb.mxu1 %v7487_v10  ;;  %v7497_v2 = vld [vmem:[#allocation2 + $0x368] sm:$0xff] }
 0x933   :  { %12547 = vst [vmem:[#allocation59_spill] sm:$0xff] %v7473_v60  ;;  %v7495_v60 = vld [vmem:[#allocation2 + $0x360] sm:$0xff]  ;;  %1660 = vmatpush.msrb.mxu2 %v7497_v2 }
 0x934   :  { %12548 = vst [vmem:[#allocation60_spill] sm:$0xff] %v7475_v58  ;;  %1620 = vmatpush.msrb.mxu0 %v7495_v60  ;;  %v7503_v58 = vld [vmem:[#allocation2 + $0x578] sm:$0xff] }
 0x935   :  { %12549 = vst [vmem:[#allocation61_spill] sm:$0xff] %v7479_v55  ;;  %v7499_v55 = vld [vmem:[#allocation2 + $0x570] sm:$0xff]  ;;  %1760 = vmatpush.msra.mxu3 %v7503_v58 }
 0x936   :  { %12550 = vst [vmem:[#allocation62_spill] sm:$0xff] %v7483_v7  ;;  %1720 = vmatpush.msrb.mxu1 %v7499_v55 }
 0x937   :  { %12551 = vst [vmem:[#allocation63_spill] sm:$0xff] %v7485_v37 }
 0x938   :  { %12552 = vst [vmem:[#allocation64_spill] sm:$0xff] %v7487_v10  ;;  %v7513_v10 = vld [vmem:[#allocation2 + $0x348] sm:$0xff]  ;;  %1721 = vmatpush.msrb.mxu1 %v7515_v48 }
 0x939   :  { %12553 = vst [vmem:[#allocation65_spill] sm:$0xff] %v7491_v3  ;;  %v7511_v3 = vld [vmem:[#allocation2 + $0x340] sm:$0xff]  ;;  %1661 = vmatpush.msrb.mxu2 %v7513_v10 }
 0x93a   :  { %12554 = vst [vmem:[#allocation66_spill] sm:$0xff] %v7495_v60  ;;  %1621 = vmatpush.msrb.mxu0 %v7511_v3  ;;  %v7523_v60 = vld [vmem:[#allocation2 + $0x320] sm:$0xff] }
 0x93b   :  { %12555 = vst [vmem:[#allocation67_spill] sm:$0xff] %v7497_v2  ;;  %v7519_v2 = vld [vmem:[#allocation2 + $0x558] sm:$0xff] }
 0x93c   :  { %12556 = vst [vmem:[#allocation68_spill] sm:$0xff] %v7499_v55  ;;  %1761 = vmatpush.msra.mxu3 %v7519_v2  ;;  %v7525_v55 = vld [vmem:[#allocation2 + $0x328] sm:$0xff]  ;;  %1622 = vmatpush.msrb.mxu0 %v7523_v60 }
 0x93d   :  { %12557 = vst [vmem:[#allocation69_spill] sm:$0xff] %v7503_v58  ;;  %v7527_v58 = vld [vmem:[#allocation2 + $0x530] sm:$0xff]  ;;  %1662 = vmatpush.msrb.mxu2 %v7525_v55 }
 0x93e   :  { %12558 = vst [vmem:[#allocation70_spill] sm:$0xff] %v7511_v3  ;;  %1722 = vmatpush.msrb.mxu1 %v7527_v58  ;;  %1762 = vmatpush.msra.mxu3 %v7531_v52  ;;  %v7537_v3 = vld [vmem:[#allocation2 + $0x308] sm:$0xff] }
 0x93f   :  { %12559 = vst [vmem:[#allocation71_spill] sm:$0xff] %v7513_v10  ;;  %v7535_v10 = vld [vmem:[#allocation2 + $0x300] sm:$0xff]  ;;  %1663 = vmatpush.msrb.mxu2 %v7537_v3 }
 0x940   :  { %12560 = vst [vmem:[#allocation72_spill] sm:$0xff] %v7515_v48  ;;  %1623 = vmatpush.msrb.mxu0 %v7535_v10  ;;  %v7543_v48 = vld [vmem:[#allocation2 + $0x518] sm:$0xff] }
 0x941   :  { %12561 = vst [vmem:[#allocation73_spill] sm:$0xff] %v7519_v2  ;;  %v7539_v2 = vld [vmem:[#allocation2 + $0x510] sm:$0xff]  ;;  %1763 = vmatpush.msra.mxu3 %v7543_v48 }
 0x942   :  { %12562 = vst [vmem:[#allocation74_spill] sm:$0xff] %v7523_v60  ;;  %1723 = vmatpush.msrb.mxu1 %v7539_v2  ;;  %v7549_v60 = vld [vmem:[#allocation2 + $0x2e8] sm:$0xff] }
 0x943   :  { %12563 = vst [vmem:[#allocation75_spill] sm:$0xff] %v7525_v55  ;;  %v7547_v55 = vld [vmem:[#allocation2 + $0x2e0] sm:$0xff]  ;;  %1664 = vmatpush.msrb.mxu2 %v7549_v60 }
 0x944   :  { %12564 = vst [vmem:[#allocation76_spill] sm:$0xff] %v7527_v58  ;;  %v7556_v58 = vld [vmem:[%s11953_s5] ss:$2 sm:$0xf]  ;;  %1624 = vmatpush.msrb.mxu0 %v7547_v55 }
 0x945   :  { %12565 = vst [vmem:[#allocation77_spill] sm:$0xff] %v7531_v52  ;;  %v7551_v52 = vld [vmem:[#allocation2 + $0x4f0] sm:$0xff]  ;;  %1665 = vmatpush.msrb.mxu2 %v7570_v49  ;;  %v7590_v49 = vld [vmem:[#allocation2 + $0x498] sm:$0xff] }
 0x946   :  { %12566 = vst [vmem:[#allocation78_spill] sm:$0xff] %v7535_v10  ;;  %1724 = vmatpush.msrb.mxu1 %v7551_v52  ;;  %1625 = vmatpush.msrb.mxu0 %v7568_v45  ;;  %v7588_v45 = vld [vmem:[#allocation2 + $0x490] sm:$0xff] }
 0x947   :  { %12567 = vst [vmem:[#allocation79_spill] sm:$0xff] %v7537_v3  ;;  %1730 = vmatpush.msra.mxu2 %v7580_v44 }
 0x948   :  { %12568 = vst [vmem:[#allocation80_spill] sm:$0xff] %v7539_v2  ;;  %1725 = vmatpush.msrb.mxu1 %v7572_v28  ;;  %v7598_v28 = vld [vmem:[#allocation2 + $0x478] sm:$0xff] }
 0x949   :  { %12569 = vst [vmem:[#allocation81_spill] sm:$0xff] %v7543_v48  ;;  %v7564_v48 = vld [vmem:[#allocation2 + $0x4f8] sm:$0xff]  ;;  %1731 = vmatpush.msra.mxu2 %v7590_v49  ;;  %1726 = vmatmul.f32.vlgmr.msrb.gmra.mxu1 %v12524_v24 }
 0x94a   :  { %12570 = vst [vmem:[#allocation82_spill] sm:$0xff] %v7547_v55  ;;  %1764 = vmatpush.msra.mxu3 %v7564_v48  ;;  %v7576_v55 = vld [vmem:[#allocation2 + $0x4d8] sm:$0xff]  ;;  %1853 = vmatpush.msra.mxu1 %v7158_v9 }
 0x94b   :  { %12571 = vst [vmem:[#allocation83_spill] sm:$0xff] %v7549_v60  ;;  %v7578_v60 = vld [vmem:[#allocation2 + $0x4b0] sm:$0xff]  ;;  %1732 = vmatpush.msra.mxu2 %v7598_v28 }
 0x94c   :  { %12572 = vst [vmem:[#allocation84_spill] sm:$0xff] %v7551_v52  ;;  %1765 = vmatpush.msra.mxu3 %v7576_v55  ;;  %v1261_v52 = vperm.slane %v7556_v58, 1  ;;  %1690 = vmatpush.msra.mxu0 %v7578_v60 }
 0x94d   :  { %12573 = vst [vmem:[#allocation85_spill] sm:$0xff] %v7564_v48  ;;  %v1260_v48 = vperm.slane %v7556_v58, 0  ;;  %1854 = vmatpush.msra.mxu1 %v7163_v13  ;;  %1766 = vmatmul.f32.vlgmr.msra.gmra.mxu3 %v12524_v24 }
 0x94e   :  { %12577 = vst [vmem:[#allocation89_spill] sm:$0xff] %v7576_v55  ;;  %1893 = vmatpush.msrb.mxu3 %v7160_v11  ;;  %1691 = vmatpush.msra.mxu0 %v7588_v45  ;;  %v7596_v55 = vld [vmem:[#allocation2 + $0x470] sm:$0xff] }
 0x94f   :  { %12578 = vst [vmem:[#allocation90_spill] sm:$0xff] %v7578_v60  ;;  %1855 = vmatpush.msra.mxu1 %v7169_v16 }
 0x950   :  { %12580 = vst [vmem:[#allocation92_spill] sm:$0xff] %v7588_v45  ;;  %1894 = vmatpush.msrb.mxu3 %v7166_v14  ;;  %1692 = vmatpush.msra.mxu0 %v7596_v55  ;;  %v7614_v45 = vld [vmem:[#allocation2 + $0x458] sm:$0xff] }
 0x951   :  { %12581 = vst [vmem:[#allocation93_spill] sm:$0xff] %v7590_v49  ;;  %v7612_v49 = vld [vmem:[#allocation2 + $0x450] sm:$0xff]  ;;  %1733 = vmatpush.msra.mxu2 %v7614_v45  ;;  %1856 = vmatpush.msra.mxu1 %v7175_v29 }
 0x952   :  { %12582 = vst [vmem:[#allocation94_spill] sm:$0xff] %v7596_v55  ;;  %1895 = vmatpush.msrb.mxu3 %v7172_v18  ;;  %1693 = vmatpush.msra.mxu0 %v7612_v49 }
 0x953   :  { %12583 = vst [vmem:[#allocation95_spill] sm:$0xff] %v7598_v28  ;;  %1857 = vmatpush.msra.mxu1 %v7181_v27 }
 0x954   :  { %1896 = vmatpush.msrb.mxu3 %v7178_v22 }
 0x955   :  { %1858 = vmatpush.msra.mxu1 %v7187_v33  ;;  %v7665_v33 = vld [vmem:[#allocation2 + $0x3b0] sm:$0xff] }
 0x956   :  { %1897 = vmatpush.msrb.mxu3 %v7184_v31  ;;  %v7656_v31 = vld [vmem:[#allocation2 + $0x3d0] sm:$0xff] }
 0x957   :  { %1859 = vmatpush.msra.mxu1 %v7193_v35  ;;  %v7675_v35 = vld [vmem:[#allocation2 + $0x390] sm:$0xff] }
 0x958   :  { %1898 = vmatpush.msrb.mxu3 %v7190_v36  ;;  %v7667_v36 = vld [vmem:[#allocation2 + $0x3b8] sm:$0xff] }
 0x959   :  { %1860 = vmatpush.msra.mxu1 %v7199_v40  ;;  %v7685_v40 = vld [vmem:[#allocation2 + $0x370] sm:$0xff] }
 0x95a   :  { %1899 = vmatpush.msrb.mxu3 %v7196_v38  ;;  %v7677_v38 = vld [vmem:[#allocation2 + $0x398] sm:$0xff] }
 0x95b   :  { %1861 = vmatpush.msra.mxu1 %v7205_v23 }
 0x95c   :  { %1900 = vmatpush.msrb.mxu3 %v7202_v26  ;;  %v7687_v26 = vld [vmem:[#allocation2 + $0x378] sm:$0xff] }
 0x95d   :  { %1862 = vmatpush.msra.mxu1 %v7210_v0 }
 0x95e   :  { %1901 = vmatpush.msrb.mxu3 %v7208_v50 }
 0x95f   :  { %1863 = vmatpush.msra.mxu1 %v7217_v53 }
 0x960   :  { %1902 = vmatpush.msrb.mxu3 %v7214_v51  ;;  %v7721_v51 = vld [vmem:[#allocation2 + $0x330] sm:$0xff] }
 0x961   :  { %12594 = vst [vmem:[#allocation106_spill] sm:$0xff] %v7721_v51  ;;  %1864 = vmatpush.msra.mxu1 %v7225_v47 }
 0x962   :  { %1903 = vmatpush.msrb.mxu3 %v7222_v57 }
 0x963   :  { %1865 = vmatpush.msra.mxu1 %v7232_v61 }
 0x964   :  { %1904 = vmatpush.msrb.mxu3 %v7229_v59 }
 0x965   :  { %1866 = vmatpush.msra.mxu1 %v7238_v4 }
 0x966   :  { %1905 = vmatpush.msrb.mxu3 %v7235_v1 }
 0x967   :  { %1867 = vmatpush.msra.mxu1 %v7245_v12 }
 0x968   :  { %1906 = vmatpush.msrb.mxu3 %v7242_v8 }
 0x969   :  { %1868 = vmatpush.msra.mxu1 %v7252_v25 }
 0x96a   :  { %1907 = vmatpush.msrb.mxu3 %v7248_v20 }
 0x96b   :  { %2100 = vmatpush.msrb.mxu1 %v7264_v62 }
 0x96c   :  { %1908 = vmatpush.msrb.mxu3 %v7255_v32 }
 0x96d   :  { %2101 = vmatpush.msrb.mxu1 %v7272_v30 }
 0x96e   :  { %2140 = vmatpush.msra.mxu3 %v7266_v54 }
 0x96f   :  { %2102 = vmatpush.msrb.mxu1 %v7279_v5 }
 0x970   :  { %2141 = vmatpush.msra.mxu3 %v7274_v41 }
 0x971   :  { %2103 = vmatpush.msrb.mxu1 %v7287_v15 }
 0x972   :  { %2142 = vmatpush.msra.mxu3 %v7281_v6 }
 0x973   :  { %v7505_v7 = vpop.f32.mrf.mxu0  ;;  %v7507_v37 = vpop.f32.mrf.mxu1  ;;  %2104 = vmatpush.msrb.mxu1 %v7295_v17 }
 0x974   :  { %v7603_v44 = vadd.f32 %v7505_v7, %v1260_v48  ;;  %v7606_v60 = vadd.f32 %v7507_v37, %v1261_v52  ;;  %2143 = vmatpush.msra.mxu3 %v7289_v46 }
 0x975   :  { %2105 = vmatpush.msrb.mxu1 %v7301_v21  ;;  %v7938_v21 = vld [vmem:[#allocation2 + $0x1e0] sm:$0xff] }
 0x976   :  { %12584 = vst [vmem:[#allocation96_spill] sm:$0xff] %v7603_v44  ;;  %2144 = vmatpush.msra.mxu3 %v7297_v42 }
 0x977   :  { %12585 = vst [vmem:[#allocation97_spill] sm:$0xff] %v7606_v60  ;;  %2106 = vmatpush.msrb.mxu1 %v7309_v19  ;;  %v12606_v19 = vld [vmem:[#allocation9_spill] sm:$0xff] }
 0x978   :  { %2145 = vmatpush.msra.mxu3 %v7303_v56 }
 0x97a   :  { %v7558_v10 = vpop.f32.mrf.mxu2  ;;  %v7560_v3 = vpop.f32.mrf.mxu3  ;;  %2146 = vmatpush.msra.mxu3 %v7311_v34 }
 0x97b   :  { %v1294_v2 = vpop.f32.mrf.mxu0  ;;  %v1317_v63 = vpop.f32.mrf.mxu1 }
 0x97c   :  { %v7616_v13 = vadd.f32 %v1294_v2, %v1260_v48  ;;  %v7618_v14 = vadd.f32 %v1317_v63, %v1261_v52  ;;  %v7626_v48 = vld [vmem:[#allocation2 + $0x430] sm:$0xff]  ;;  %v7628_v63 = vld [vmem:[#allocation2 + $0x438] sm:$0xff]  ;;  %v1262_v52 = vperm.slane %v7556_v58, 2  ;;  %2147 = vmatpush.msra.mxu3 %v12606_v19 }
 0x97d   :  { %1694 = vmatpush.msra.mxu0 %v7626_v48  ;;  %1734 = vmatpush.msra.mxu2 %v7628_v63  ;;  %v12624_v19 = vld [vmem:[#allocation29_spill] sm:$0xff] }
 0x97e   :  { %12586 = vst [vmem:[#allocation98_spill] sm:$0xff] %v7616_v13 }
 0x97f   :  { %12587 = vst [vmem:[#allocation99_spill] sm:$0xff] %v7618_v14 }
 0x982   :  { %v1340_v9 = vpop.f32.mrf.mxu2  ;;  %v7608_v11 = vpop.f32.mrf.mxu3 }
 0x983   :  { %v1383_v7 = vpop.f32.mrf.mxu0  ;;  %v1403_v43 = vpop.f32.mrf.mxu1 }
 0x984   :  { %v1450_v37 = vrot.slane %v1383_v7, 1  ;;  %v1462_v39 = vadd.f32 %v1383_v7, %v7603_v44  ;;  %v1451_v55 = vrot.slane %v1403_v43, 1  ;;  %v1463_v28 = vadd.f32 %v1403_v43, %v7606_v60  ;;  %v7637_v7 = vld [vmem:[#allocation2 + $0x410] sm:$0xff]  ;;  %v7639_v44 = vld [vmem:[#allocation2 + $0x418] sm:$0xff] }
 0x985   :  { %1695 = vmatpush.msra.mxu0 %v7637_v7  ;;  %1735 = vmatpush.msra.mxu2 %v7639_v44 }
 0x986   :  { %v1466_v16 = vadd.f32 %v1450_v37, %v7616_v13  ;;  %v5546_v18 = vmul.f32 -1.442695, %v1462_v39  ;;  %v1467_v2 = vadd.f32 %v1451_v55, %v7618_v14  ;;  %v5547_v43 = vmul.f32 -1.442695, %v1463_v28  ;;  %v7645_v39 = vld [vmem:[#allocation2 + $0x3f0] sm:$0xff]  ;;  %v7647_v28 = vld [vmem:[#allocation2 + $0x3f8] sm:$0xff] }
 0x987   :  { %v7650_v55 = vadd.f32 %v7558_v10, %v1262_v52  ;;  %1696 = vmatpush.msra.mxu0 %v7645_v39  ;;  %1736 = vmatpush.msra.mxu2 %v7647_v28  ;;  %v7658_v37 = vld [vmem:[#allocation2 + $0x3d8] sm:$0xff] }
 0x988   :  { %5692 = vpow2.f32 %v5546_v18  ;;  %v5549_v29 = vmul.f32 -1.442695, %v1466_v16  ;;  %v5550_v22 = vmul.f32 -1.442695, %v1467_v2  ;;  %v7660_v16 = vadd.f32 %v1340_v9, %v1262_v52  ;;  %v7775_v14 = vld [vmem:[#allocation2 + $0x2d8] sm:$0xff] }
 0x989   :  { %12588 = vst [vmem:[#allocation100_spill] sm:$0xff] %v7650_v55  ;;  %5694 = vpow2.f32 %v5547_v43  ;;  %v1263_v2 = vperm.slane %v7556_v58, 3  ;;  %1697 = vmatpush.msra.mxu0 %v7656_v31  ;;  %1737 = vmatpush.msra.mxu2 %v7658_v37 }
 0x98a   :  { %5696 = vpow2.f32 %v5549_v29  ;;  %v1423_v27 = vpop.f32.mrf.mxu2  ;;  %12589 = vst [vmem:[#allocation101_spill] sm:$0xff] %v7660_v16  ;;  %v1443_v43 = vpop.f32.mrf.mxu3 }
 0x98b   :  { %5698 = vpow2.f32 %v5550_v22  ;;  %v1452_v10 = vrot.slane %v1423_v27, 1  ;;  %v1464_v18 = vadd.f32 %v1423_v27, %v7650_v55  ;;  %1698 = vmatpush.msra.mxu0 %v7665_v33  ;;  %1738 = vmatpush.msra.mxu2 %v7667_v36  ;;  %v1453_v27 = vrot.slane %v1443_v43, 1 }
 0x98d   :  { %v1468_v9 = vadd.f32 %v1452_v10, %v7660_v16  ;;  %v5548_v52 = vmul.f32 -1.442695, %v1464_v18  ;;  %v7690_v18 = vadd.f32 %v7560_v3, %v1263_v2  ;;  %1699 = vmatpush.msra.mxu0 %v7675_v35  ;;  %1739 = vmatpush.msra.mxu2 %v7677_v38  ;;  %v7704_v3 = vld [vmem:[#allocation2 + $0x350] sm:$0xff] }
 0x98e   :  { %v5693_v29 = vpop.eup %5692  ;;  %12592 = vst [vmem:[#allocation104_spill] sm:$0xff] %v7704_v3 }
 0x98f   :  { %v5695_v58 = vpop.eup %5694  ;;  %v7681_v22 = vadd.f32 1.0, %v5693_v29  ;;  %5700 = vpow2.f32 %v5548_v52  ;;  %12590 = vst [vmem:[#allocation102_spill] sm:$0xff] %v7690_v18  ;;  %v7697_v29 = vadd.f32 %v7608_v11, %v1263_v2  ;;  %v5551_v50 = vmul.f32 -1.442695, %v1468_v9  ;;  %1700 = vmatpush.msra.mxu0 %v7685_v40  ;;  %1740 = vmatpush.msra.mxu2 %v7687_v26  ;;  %v7723_v2 = vld [vmem:[#allocation2 + $0x338] sm:$0xff] }
 0x990   :  { %v5697_v10 = vpop.eup %5696  ;;  %v7692_v55 = vadd.f32 1.0, %v5695_v58  ;;  %v7706_v58 = vld [vmem:[#allocation2 + $0x358] sm:$0xff]  ;;  %v1465_v11 = vadd.f32 %v1443_v43, %v7690_v18  ;;  %12595 = vst [vmem:[#allocation107_spill] sm:$0xff] %v7723_v2 }
 0x991   :  { %v5699_v52 = vpop.eup %5698  ;;  %12591 = vst [vmem:[#allocation103_spill] sm:$0xff] %v7697_v29  ;;  %v7699_v23 = vadd.f32 1.0, %v5697_v10  ;;  %5702 = vrcp.f32 %v7681_v22  ;;  %v1469_v0 = vadd.f32 %v1453_v27, %v7697_v29  ;;  %1701 = vmatpush.msra.mxu0 %v7704_v3  ;;  %1741 = vmatpush.msra.mxu2 %v7706_v58  ;;  %v1503_v9 = vand.u32 2147483647, %v7681_v22  ;;  %v7733_v27 = vld [vmem:[#allocation2 + $0x310] sm:$0xff]  ;;  %v7735_v10 = vld [vmem:[#allocation2 + $0x318] sm:$0xff] }
 0x992   :  { %12593 = vst [vmem:[#allocation105_spill] sm:$0xff] %v7706_v58  ;;  %v7708_v16 = vadd.f32 1.0, %v5699_v52  ;;  %5704 = vrcp.f32 %v7692_v55  ;;  %v1520_v53 = vand.u32 2147483648, %v7692_v55  ;;  %v1518_v24 = vand.u32 2147483647, %v7692_v55 }
 0x993   :  { %5706 = vrcp.f32 %v7699_v23  ;;  %12596 = vst [vmem:[#allocation108_spill] sm:$0xff] %v7733_v27  ;;  %1702 = vmatpush.msra.mxu0 %v7721_v51  ;;  %1742 = vmatpush.msra.mxu2 %v7723_v2  ;;  %vm1514_vm1 = vweird.f32 %v7692_v55  ;;  %vm1499_vm14 = vweird.f32 %v7681_v22  ;;  %vm7760_vm3 = vcmp.eq.f32.partialorder %v1503_v9, 8.507059e+37  ;;  %v7773_v9 = vld [vmem:[#allocation2 + $0x2d0] sm:$0xff] }
 0x994   :  { %5708 = vrcp.f32 %v7708_v16  ;;  %12597 = vst [vmem:[#allocation109_spill] sm:$0xff] %v7735_v10  ;;  %v1521_v60 = vor.u32 1.1754944e-38, %v1520_v53  ;;  %vm1559_vm15 = vweird.f32 %v7708_v16  ;;  %vm7785_vm0 = vcmp.eq.f32.partialorder %v1518_v24, 8.507059e+37 }
 0x995   :  { %v5701_v43 = vpop.eup %5700  ;;  %5710 = vpow2.f32 %v5551_v50  ;;  %v1505_v50 = vand.u32 2147483648, %v7681_v22  ;;  %1703 = vmatpush.msra.mxu0 %v7733_v27  ;;  %1743 = vmatpush.msra.mxu2 %v7735_v10  ;;  %vm1544_vm6 = vweird.f32 %v7699_v23  ;;  %v1563_v12 = vand.u32 2147483647, %v7708_v16 }
 0x996   :  { %v7729_v57 = vadd.f32 1.0, %v5701_v43  ;;  %5712 = vtanh.f32 %v1465_v11  ;;  %v7750_v11 = vld [vmem:[#allocation2 + $0x2f0] sm:$0xff]  ;;  %v1548_v24 = vand.u32 2147483647, %v7699_v23 }
 0x997   :  { %v7737_v52 = vpop.eup %5702  ;;  %5714 = vtanh.f32 %v1469_v0  ;;  %12598 = vst [vmem:[#allocation110_spill] sm:$0xff] %v7750_v11  ;;  %v7752_v0 = vld [vmem:[#allocation2 + $0x2f8] sm:$0xff]  ;;  %v1506_v51 = vor.u32 1.1754944e-38, %v1505_v50  ;;  %1704 = vmatpush.msra.mxu0 %v7750_v11  ;;  %vm1564_vm13 = vcmp.eq.f32.partialorder %v1563_v12, 8.507059e+37 }
 0x998   :  { %v7742_v47 = vpop.eup %5704  ;;  %v1495_v59 = vmul.f32 %v7737_v52, %v7681_v22  ;;  %5716 = vrcp.f32 %v7729_v57  ;;  %1744 = vmatpush.msra.mxu2 %v7752_v0  ;;  %vm1500_vm4 = vweird.f32 %v7737_v52  ;;  %v1533_v56 = vand.u32 2147483647, %v7729_v57 }
 0x999   :  { %v7754_v43 = vpop.eup %5706  ;;  %v1510_v18 = vmul.f32 %v7742_v47, %v7692_v55  ;;  %1705 = vmatpush.msra.mxu0 %v7773_v9  ;;  %vm1515_vm5 = vweird.f32 %v7742_v47  ;;  %vm1501_vm8 = vmor %vm1499_vm14, %vm1500_vm4  ;;  %vm1529_vm4 = vweird.f32 %v7729_v57 }
 0x99a   :  { %v7766_v61 = vpop.eup %5708  ;;  %v1496_v1 = vsub.f32 1.0, %v1495_v59  ;;  %v1540_v13 = vmul.f32 %v7754_v43, %v7699_v23  ;;  %v1565_v59 = vand.u32 2147483648, %v7708_v16  ;;  %1745 = vmatpush.msra.mxu2 %v7775_v14  ;;  %vm1545_vm10 = vweird.f32 %v7754_v43  ;;  %vm1516_vm11 = vmor %vm1514_vm1, %vm1515_vm5 }
 0x99b   :  { %v5711_v27 = vpop.eup %5710  ;;  %v1511_v2 = vsub.f32 1.0, %v1510_v18  ;;  %v1555_v10 = vmul.f32 %v7766_v61, %v7708_v16  ;;  %vm1560_vm7 = vweird.f32 %v7766_v61  ;;  %vm1546_vm9 = vmor %vm1544_vm6, %vm1545_vm10  ;;  %vm1549_vm1 = vcmp.eq.f32.partialorder %v1548_v24, 8.507059e+37  ;;  %v12609_v24 = vld [vmem:[#allocation12_spill] sm:$0xff] }
 0x99c   :  { %v5713_v53 = vpop.eup %5712  ;;  %v1541_v4 = vsub.f32 1.0, %v1540_v13  ;;  %v7782_v58 = vadd.f32 1.0, %v5711_v27  ;;  %v1497_v8 = vmul.f32 %v7737_v52, %v1496_v1  ;;  %v1550_v13 = vand.u32 2147483648, %v7699_v23  ;;  %vm1561_vm12 = vmor %vm1559_vm15, %vm1560_vm7 }
 0x99d   :  { %v5715_v18 = vpop.eup %5714  ;;  %v1512_v50 = vmul.f32 %v7742_v47, %v1511_v2  ;;  %v1556_v11 = vsub.f32 1.0, %v1555_v10  ;;  %vm1534_vm7 = vcmp.eq.f32.partialorder %v1533_v56, 8.507059e+37  ;;  %v12622_v56 = vld [vmem:[#allocation25_spill] sm:$0xff] }
 0x99e   :  { %v7796_v27 = vpop.eup %5716  ;;  %5718 = vrcp.f32 %v7782_v58  ;;  %v1498_v10 = vadd.f32 %v7737_v52, %v1497_v8  ;;  %v1542_v32 = vmul.f32 %v7754_v43, %v1541_v4  ;;  %v1551_v62 = vor.u32 1.1754944e-38, %v1550_v13  ;;  %v12605_v13 = vld [vmem:[#allocation8_spill] sm:$0xff] }
 0x99f   :  { %v1557_v20 = vmul.f32 %v7766_v61, %v1556_v11  ;;  %v1525_v2 = vmul.f32 %v7796_v27, %v7729_v57  ;;  %v1513_v25 = vadd.f32 %v7742_v47, %v1512_v50  ;;  %v1566_v11 = vor.u32 1.1754944e-38, %v1565_v59  ;;  %2107 = vmatpush.msrb.mxu1 %v12605_v13  ;;  %v12623_v13 = vld [vmem:[#allocation28_spill] sm:$0xff] }
 0x9a0   :  { %v1502_v1 = vsel %vm1501_vm8, %v7737_v52, %v1498_v10  ;;  %v1543_v59 = vadd.f32 %v7754_v43, %v1542_v32  ;;  %v1580_v15 = vand.u32 2147483648, %v7782_v58  ;;  %vm1530_vm15 = vweird.f32 %v7796_v27  ;;  %v12608_v32 = vld [vmem:[#allocation11_spill] sm:$0xff] }
 0x9a1   :  { %v1558_v54 = vadd.f32 %v7766_v61, %v1557_v20  ;;  %v1507_v22 = vsel %vm7760_vm3, %v1506_v51, %v1502_v1  ;;  %v1517_v4 = vsel %vm1516_vm11, %v7742_v47, %v1513_v25  ;;  %v1526_v55 = vsub.f32 1.0, %v1525_v2  ;;  %vm1531_vm5 = vmor %vm1529_vm4, %vm1530_vm15  ;;  %v12607_v2 = vld [vmem:[#allocation10_spill] sm:$0xff]  ;;  %2148 = vmatpush.msra.mxu3 %v12608_v32  ;;  %v12610_v1 = vld [vmem:[#allocation13_spill] sm:$0xff] }
 0x9a2   :  { %v1522_v52 = vsel %vm7785_vm0, %v1521_v60, %v1517_v4  ;;  %v1588_v41 = vmul.f32 %v5713_v53, %v1507_v22  ;;  %v1547_v51 = vsel %vm1546_vm9, %v7754_v43, %v1543_v59  ;;  %vm1574_vm3 = vweird.f32 %v7782_v58  ;;  %2108 = vmatpush.msrb.mxu1 %v12607_v2  ;;  %v12611_v22 = vld [vmem:[#allocation14_spill] sm:$0xff]  ;;  %v12613_v59 = vld [vmem:[#allocation16_spill] sm:$0xff] }
 0x9a3   :  { %v1562_v30 = vsel %vm1561_vm12, %v7766_v61, %v1558_v54  ;;  %v1586_v47 = vmul.f32 0.0, %v1522_v52  ;;  %v1552_v3 = vsel %vm1549_vm1, %v1551_v62, %v1547_v51  ;;  %v1527_v5 = vmul.f32 %v7796_v27, %v1526_v55  ;;  %2149 = vmatpush.msra.mxu3 %v12610_v1  ;;  %v7890_v55 = vld [vmem:[#allocation2 + $0x2a0] sm:$0xff]  ;;  %v7894_v52 = vld [vmem:[#allocation2 + $0x2b0] sm:$0xff] }
 0x9a4   :  { %v5719_v29 = vpop.eup %5718  ;;  %v1567_v16 = vsel %vm1564_vm13, %v1566_v11, %v1562_v30  ;;  %v1589_v8 = vmul.f32 %v5715_v18, %v1552_v3  ;;  %v1578_v42 = vand.u32 2147483647, %v7782_v58  ;;  %v1535_v53 = vand.u32 2147483648, %v7729_v57  ;;  %2109 = vmatpush.msrb.mxu1 %v12609_v24  ;;  %v7898_v30 = vld [vmem:[#allocation2 + $0x280] sm:$0xff]  ;;  %v12615_v51 = vld [vmem:[#allocation18_spill] sm:$0xff] }
 0x9a5   :  { %v1570_v60 = vmul.f32 %v5719_v29, %v7782_v58  ;;  %v1587_v23 = vmul.f32 0.0, %v1567_v16  ;;  %v7847_v50 = vadd.f32 %v1588_v41, %v1586_v47  ;;  %vm1575_vm14 = vweird.f32 %v5719_v29  ;;  %v12614_v41 = vld [vmem:[#allocation17_spill] sm:$0xff]  ;;  %v7906_v16 = vld [vmem:[#allocation2 + $0x260] sm:$0xff] }
 0x9a6   :  { %v1528_v46 = vadd.f32 %v7796_v27, %v1527_v5  ;;  %vm7866_vm0 = vmor %vm1574_vm3, %vm1575_vm14  ;;  %v1581_v58 = vor.u32 1.1754944e-38, %v1580_v15  ;;  %vm1579_vm6 = vcmp.eq.f32.partialorder %v1578_v42, 8.507059e+37  ;;  %v1536_v10 = vor.u32 1.1754944e-38, %v1535_v53  ;;  %2110 = vmatpush.msrb.mxu1 %v12611_v22  ;;  %v12616_v47 = vld [vmem:[#allocation19_spill] sm:$0xff]  ;;  %v12617_v3 = vld [vmem:[#allocation20_spill] sm:$0xff] }
 0x9a7   :  { %v1571_v61 = vsub.f32 1.0, %v1570_v60  ;;  %v7852_v43 = vadd.f32 %v1589_v8, %v1587_v23  ;;  %5720 = vtanh.f32 %v7847_v50  ;;  %v7910_v60 = vld [vmem:[#allocation2 + $0x270] sm:$0xff]  ;;  %v7914_v23 = vld [vmem:[#allocation2 + $0x240] sm:$0xff] }
 0x9a8   :  { %v1532_v20 = vsel %vm1531_vm5, %v7796_v27, %v1528_v46  ;;  %v12612_v27 = vld [vmem:[#allocation15_spill] sm:$0xff]  ;;  %2111 = vmatpush.msrb.mxu1 %v12613_v59  ;;  %v12618_v8 = vld [vmem:[#allocation21_spill] sm:$0xff]  ;;  %v12619_v15 = vld [vmem:[#allocation22_spill] sm:$0xff] }
 0x9a9   :  { %v1572_v6 = vmul.f32 %v5719_v29, %v1571_v61  ;;  %5722 = vtanh.f32 %v7852_v43  ;;  %v1537_v11 = vsel %vm1534_vm7, %v1536_v10, %v1532_v20  ;;  %2150 = vmatpush.msra.mxu3 %v12612_v27  ;;  %v7918_v5 = vld [vmem:[#allocation2 + $0x250] sm:$0xff]  ;;  %v7923_v61 = vld [vmem:[#allocation2 + $0x220] sm:$0xff] }
 0x9aa   :  { %2112 = vmatpush.msrb.mxu1 %v12615_v51  ;;  %v7930_v46 = vld [vmem:[#allocation2 + $0x200] sm:$0xff]  ;;  %v7934_v42 = vld [vmem:[#allocation2 + $0x210] sm:$0xff] }
 0x9ab   :  { %v1573_v17 = vadd.f32 %v5719_v29, %v1572_v6  ;;  %2151 = vmatpush.msra.mxu3 %v12614_v41  ;;  %v7926_v6 = vld [vmem:[#allocation2 + $0x230] sm:$0xff]  ;;  %v12621_v53 = vld [vmem:[#allocation24_spill] sm:$0xff] }
 0x9ac   :  { %2113 = vmatpush.msrb.mxu1 %v12617_v3  ;;  %v12625_v20 = vld [vmem:[#allocation32_spill] sm:$0xff]  ;;  %v7958_v10 = vld [vmem:[#allocation2 + $0x1b0] sm:$0xff] }
 0x9ad   :  { %v1577_v18 = vsel %vm7866_vm0, %v5719_v29, %v1573_v17  ;;  %v5721_v12 = vpop.eup %5720  ;;  %v7902_v29 = vld [vmem:[#allocation2 + $0x290] sm:$0xff]  ;;  %2152 = vmatpush.msra.mxu3 %v12616_v47  ;;  %v12620_v17 = vld [vmem:[#allocation23_spill] sm:$0xff]  ;;  %v12631_v22 = vld [vmem:[#allocation44_spill] sm:$0xff] }
 0x9ae   :  { %v1582_v25 = vsel %vm1579_vm6, %v1581_v58, %v1577_v18  ;;  %v1594_v62 = vmul.f32 %v5721_v12, %v1537_v11  ;;  %2114 = vmatpush.msrb.mxu1 %v12619_v15  ;;  %v7942_v18 = vld [vmem:[#allocation2 + $0x1f0] sm:$0xff]  ;;  %v7946_v58 = vld [vmem:[#allocation2 + $0x1c0] sm:$0xff] }
 0x9af   :  { %v5723_v34 = vpop.eup %5722  ;;  %2153 = vmatpush.msra.mxu3 %v12618_v8  ;;  %v7950_v12 = vld [vmem:[#allocation2 + $0x1d0] sm:$0xff]  ;;  %v7954_v2 = vld [vmem:[#allocation2 + $0x1a0] sm:$0xff] }
 0x9b0   :  { %v1595_v57 = vmul.f32 %v5723_v34, %v1582_v25  ;;  %2115 = vmatpush.msrb.mxu1 %v12621_v53  ;;  %v12626_v34 = vld [vmem:[#allocation33_spill] sm:$0xff]  ;;  %v12627_v25 = vld [vmem:[#allocation36_spill] sm:$0xff] }
 0x9b1   :  { %2154 = vmatpush.msra.mxu3 %v12620_v17  ;;  %v7962_v32 = vld [vmem:[#allocation2 + $0x180] sm:$0xff]  ;;  %v7966_v24 = vld [vmem:[#allocation2 + $0x190] sm:$0xff] }
 0x9b2   :  { %v1598_v54 = vrot.slane %v1595_v57, 7  ;;  %v12628_v57 = vld [vmem:[#allocation37_spill] sm:$0xff]  ;;  %v12629_v11 = vld [vmem:[#allocation40_spill] sm:$0xff] }
 0x9b3   :  { %2155 = vmatpush.msra.mxu3 %v12622_v56  ;;  %v7970_v1 = vld [vmem:[#allocation2 + $0x160] sm:$0xff]  ;;  %v12632_v59 = vld [vmem:[#allocation45_spill] sm:$0xff] }
 0x9b4   :  { %v7885_v4 = vsel %vm115_vm2, %v1598_v54, %v1594_v62  ;;  %v12630_v62 = vld [vmem:[#allocation41_spill] sm:$0xff]  ;;  %v7978_v27 = vld [vmem:[#allocation2 + $0x140] sm:$0xff] }
 0x9b5   :  { %1626 = vmatmul.f32.vlgmr.msrb.gmra.mxu0 %v7885_v4  ;;  %1666 = vmatmul.f32.vlgmr.msrb.gmra.mxu2 %v7885_v4  ;;  %v7974_v54 = vld [vmem:[#allocation2 + $0x170] sm:$0xff]  ;;  %v12633_v51 = vld [vmem:[#allocation48_spill] sm:$0xff] }
 0x9b6   :  { %1833 = vmatpush.msrb.mxu0 %v7890_v55  ;;  %1869 = vmatmul.f32.vlgmr.msra.gmra.mxu1 %v7885_v4  ;;  %v7982_v41 = vld [vmem:[#allocation2 + $0x150] sm:$0xff]  ;;  %v7986_v47 = vld [vmem:[#allocation2 + $0x120] sm:$0xff] }
 0x9b7   :  { %1873 = vmatpush.msrb.mxu2 %v7894_v52  ;;  %1909 = vmatmul.f32.vlgmr.msrb.gmra.mxu3 %v7885_v4  ;;  %v12634_v3 = vld [vmem:[#allocation49_spill] sm:$0xff]  ;;  %v12635_v15 = vld [vmem:[#allocation52_spill] sm:$0xff] }
 0x9b8   :  { %1834 = vmatpush.msrb.mxu0 %v7898_v30  ;;  %2180 = vmatpush.msra.mxu1 %v12623_v13  ;;  %v7990_v8 = vld [vmem:[#allocation2 + $0x130] sm:$0xff]  ;;  %v7994_v17 = vld [vmem:[#allocation2 + $0x100] sm:$0xff] }
 0x9b9   :  { %1874 = vmatpush.msrb.mxu2 %v7902_v29  ;;  %2220 = vmatpush.msrb.mxu3 %v12624_v19  ;;  %v12636_v53 = vld [vmem:[#allocation53_spill] sm:$0xff]  ;;  %v12637_v13 = vld [vmem:[#allocation56_spill] sm:$0xff] }
 0x9ba   :  { %1835 = vmatpush.msrb.mxu0 %v7906_v16  ;;  %2181 = vmatpush.msra.mxu1 %v12625_v20  ;;  %v7998_v56 = vld [vmem:[#allocation2 + $0x110] sm:$0xff]  ;;  %v8002_v19 = vld [vmem:[#allocation2 + $0xe0] sm:$0xff] }
 0x9bb   :  { %1875 = vmatpush.msrb.mxu2 %v7910_v60  ;;  %2221 = vmatpush.msrb.mxu3 %v12626_v34  ;;  %v12638_v20 = vld [vmem:[#allocation57_spill] sm:$0xff] }
 0x9bc   :  { %1836 = vmatpush.msrb.mxu0 %v7914_v23  ;;  %2182 = vmatpush.msra.mxu1 %v12627_v25  ;;  %v8006_v34 = vld [vmem:[#allocation2 + $0xf0] sm:$0xff]  ;;  %v12639_v25 = vld [vmem:[#allocation60_spill] sm:$0xff] }
 0x9bd   :  { %1876 = vmatpush.msrb.mxu2 %v7918_v5  ;;  %1706 = vmatmul.f32.vlgmr.msra.gmra.mxu0 %v7885_v4 }
 0x9be   :  { %1746 = vmatmul.f32.vlgmr.msra.gmra.mxu2 %v7885_v4  ;;  %1837 = vmatpush.msrb.mxu0 %v7923_v61 }
 0x9bf   :  { %1877 = vmatpush.msrb.mxu2 %v7926_v6  ;;  %2222 = vmatpush.msrb.mxu3 %v12628_v57  ;;  %v8010_v57 = vld [vmem:[#allocation2 + $0xc0] sm:$0xff] }
 0x9c0   :  { %1838 = vmatpush.msrb.mxu0 %v7930_v46  ;;  %2183 = vmatpush.msra.mxu1 %v12629_v11  ;;  %v12640_v11 = vld [vmem:[#allocation61_spill] sm:$0xff] }
 0x9c1   :  { %1878 = vmatpush.msrb.mxu2 %v7934_v42  ;;  %2223 = vmatpush.msrb.mxu3 %v12630_v62  ;;  %v8014_v62 = vld [vmem:[#allocation2 + $0xd0] sm:$0xff] }
 0x9c2   :  { %1839 = vmatpush.msrb.mxu0 %v7938_v21  ;;  %2184 = vmatpush.msra.mxu1 %v12631_v22  ;;  %v12641_v22 = vld [vmem:[#allocation26_spill] sm:$0xff] }
 0x9c3   :  { %1879 = vmatpush.msrb.mxu2 %v7942_v18  ;;  %2224 = vmatpush.msrb.mxu3 %v12632_v59  ;;  %v12642_v59 = vld [vmem:[#allocation27_spill] sm:$0xff] }
 0x9c4   :  { %1840 = vmatpush.msrb.mxu0 %v7946_v58  ;;  %2185 = vmatpush.msra.mxu1 %v12633_v51  ;;  %v12643_v51 = vld [vmem:[#allocation64_spill] sm:$0xff] }
 0x9c5   :  { %1880 = vmatpush.msrb.mxu2 %v7950_v12  ;;  %2225 = vmatpush.msrb.mxu3 %v12634_v3  ;;  %v12644_v3 = vld [vmem:[#allocation30_spill] sm:$0xff] }
 0x9c6   :  { %1841 = vmatpush.msrb.mxu0 %v7954_v2  ;;  %2186 = vmatpush.msra.mxu1 %v12635_v15  ;;  %v12645_v15 = vld [vmem:[#allocation65_spill] sm:$0xff] }
 0x9c7   :  { %1881 = vmatpush.msrb.mxu2 %v7958_v10  ;;  %2226 = vmatpush.msrb.mxu3 %v12636_v53  ;;  %v12646_v53 = vld [vmem:[#allocation31_spill] sm:$0xff] }
 0x9c8   :  { %1842 = vmatpush.msrb.mxu0 %v7962_v32  ;;  %2187 = vmatpush.msra.mxu1 %v12637_v13  ;;  %v12647_v13 = vld [vmem:[#allocation68_spill] sm:$0xff] }
 0x9c9   :  { %1882 = vmatpush.msrb.mxu2 %v7966_v24  ;;  %2227 = vmatpush.msrb.mxu3 %v12638_v20  ;;  %v12648_v20 = vld [vmem:[#allocation34_spill] sm:$0xff] }
 0x9ca   :  { %1843 = vmatpush.msrb.mxu0 %v7970_v1  ;;  %2188 = vmatpush.msra.mxu1 %v12639_v25  ;;  %v12649_v25 = vld [vmem:[#allocation69_spill] sm:$0xff] }
 0x9cb   :  { %1883 = vmatpush.msrb.mxu2 %v7974_v54  ;;  %2228 = vmatpush.msrb.mxu3 %v12640_v11  ;;  %v12650_v11 = vld [vmem:[#allocation35_spill] sm:$0xff] }
 0x9cc   :  { %1844 = vmatpush.msrb.mxu0 %v7978_v27  ;;  %2189 = vmatpush.msra.mxu1 %v12643_v51  ;;  %v12654_v51 = vld [vmem:[#allocation39_spill] sm:$0xff] }
 0x9cd   :  { %1884 = vmatpush.msrb.mxu2 %v7982_v41  ;;  %2229 = vmatpush.msrb.mxu3 %v12645_v15  ;;  %v12656_v15 = vld [vmem:[#allocation42_spill] sm:$0xff] }
 0x9ce   :  { %1845 = vmatpush.msrb.mxu0 %v7986_v47  ;;  %2190 = vmatpush.msra.mxu1 %v12647_v13  ;;  %v12658_v13 = vld [vmem:[#allocation43_spill] sm:$0xff] }
 0x9cf   :  { %1885 = vmatpush.msrb.mxu2 %v7990_v8  ;;  %2230 = vmatpush.msrb.mxu3 %v12649_v25  ;;  %v12660_v25 = vld [vmem:[#allocation46_spill] sm:$0xff] }
 0x9d0   :  { %1846 = vmatpush.msrb.mxu0 %v7994_v17 }
 0x9d1   :  { %1886 = vmatpush.msrb.mxu2 %v7998_v56 }
 0x9d2   :  { %1847 = vmatpush.msrb.mxu0 %v8002_v19 }
 0x9d3   :  { %1887 = vmatpush.msrb.mxu2 %v8006_v34 }
 0x9d4   :  { %1848 = vmatpush.msrb.mxu0 %v8010_v57 }
 0x9d5   :  { %1888 = vmatpush.msrb.mxu2 %v8014_v62  ;;  %1849 = vmatmul.f32.vlgmr.msrb.gmra.mxu0 %v7885_v4 }
 0x9d6   :  { %1889 = vmatmul.f32.vlgmr.msrb.gmra.mxu2 %v7885_v4  ;;  %2080 = vmatpush.msra.mxu0 %v12641_v22  ;;  %v12651_v4 = vld [vmem:[#allocation72_spill] sm:$0xff]  ;;  %v12652_v22 = vld [vmem:[#allocation38_spill] sm:$0xff] }
 0x9d7   :  { %2120 = vmatpush.msra.mxu2 %v12642_v59  ;;  %2191 = vmatpush.msra.mxu1 %v12651_v4  ;;  %v12653_v59 = vld [vmem:[#allocation73_spill] sm:$0xff]  ;;  %v12662_v4 = vld [vmem:[#allocation47_spill] sm:$0xff] }
 0x9d8   :  { %2081 = vmatpush.msra.mxu0 %v12644_v3  ;;  %2231 = vmatpush.msrb.mxu3 %v12653_v59  ;;  %v12655_v3 = vld [vmem:[#allocation76_spill] sm:$0xff]  ;;  %v12664_v59 = vld [vmem:[#allocation50_spill] sm:$0xff] }
 0x9d9   :  { %2121 = vmatpush.msra.mxu2 %v12646_v53  ;;  %2192 = vmatpush.msra.mxu1 %v12655_v3  ;;  %v12657_v53 = vld [vmem:[#allocation77_spill] sm:$0xff]  ;;  %v12666_v3 = vld [vmem:[#allocation51_spill] sm:$0xff] }
 0x9da   :  { %2082 = vmatpush.msra.mxu0 %v12648_v20  ;;  %2232 = vmatpush.msrb.mxu3 %v12657_v53  ;;  %v12659_v20 = vld [vmem:[#allocation80_spill] sm:$0xff]  ;;  %v12668_v53 = vld [vmem:[#allocation54_spill] sm:$0xff] }
 0x9db   :  { %2122 = vmatpush.msra.mxu2 %v12650_v11  ;;  %2193 = vmatpush.msra.mxu1 %v12659_v20  ;;  %v12661_v11 = vld [vmem:[#allocation81_spill] sm:$0xff]  ;;  %v12670_v20 = vld [vmem:[#allocation55_spill] sm:$0xff] }
 0x9dc   :  { %2083 = vmatpush.msra.mxu0 %v12652_v22  ;;  %2233 = vmatpush.msrb.mxu3 %v12661_v11  ;;  %v12663_v22 = vld [vmem:[#allocation84_spill] sm:$0xff]  ;;  %v12672_v11 = vld [vmem:[#allocation59_spill] sm:$0xff] }
 0x9dd   :  { %2123 = vmatpush.msra.mxu2 %v12654_v51  ;;  %2194 = vmatpush.msra.mxu1 %v12663_v22  ;;  %v12665_v51 = vld [vmem:[#allocation85_spill] sm:$0xff]  ;;  %v12674_v22 = vld [vmem:[#allocation63_spill] sm:$0xff] }
 0x9de   :  { %2084 = vmatpush.msra.mxu0 %v12656_v15  ;;  %2234 = vmatpush.msrb.mxu3 %v12665_v51  ;;  %v12667_v15 = vld [vmem:[#allocation88_spill] sm:$0xff]  ;;  %v12676_v51 = vld [vmem:[#allocation67_spill] sm:$0xff] }
 0x9df   :  { %2124 = vmatpush.msra.mxu2 %v12658_v13  ;;  %2195 = vmatpush.msra.mxu1 %v12667_v15  ;;  %v12669_v13 = vld [vmem:[#allocation89_spill] sm:$0xff]  ;;  %v12678_v15 = vld [vmem:[#allocation71_spill] sm:$0xff] }
 0x9e0   :  { %2085 = vmatpush.msra.mxu0 %v12660_v25  ;;  %2235 = vmatpush.msrb.mxu3 %v12669_v13  ;;  %v12671_v25 = vld [vmem:[#allocation58_spill] sm:$0xff]  ;;  %v12680_v13 = vld [vmem:[#allocation75_spill] sm:$0xff] }
 0x9e1   :  { %2125 = vmatpush.msra.mxu2 %v12662_v4  ;;  %v12673_v4 = vld [vmem:[#allocation62_spill] sm:$0xff] }
 0x9e2   :  { %2086 = vmatpush.msra.mxu0 %v12664_v59  ;;  %v12675_v59 = vld [vmem:[#allocation66_spill] sm:$0xff] }
 0x9e3   :  { %2126 = vmatpush.msra.mxu2 %v12666_v3  ;;  %v12677_v3 = vld [vmem:[#allocation70_spill] sm:$0xff] }
 0x9e4   :  { %2087 = vmatpush.msra.mxu0 %v12668_v53  ;;  %v12679_v53 = vld [vmem:[#allocation74_spill] sm:$0xff] }
 0x9e5   :  { %2127 = vmatpush.msra.mxu2 %v12670_v20  ;;  %v12681_v20 = vld [vmem:[#allocation78_spill] sm:$0xff] }
 0x9e6   :  { %2088 = vmatpush.msra.mxu0 %v12671_v25  ;;  %v12682_v25 = vld [vmem:[#allocation79_spill] sm:$0xff] }
 0x9e7   :  { %2128 = vmatpush.msra.mxu2 %v12672_v11  ;;  %v12683_v11 = vld [vmem:[#allocation82_spill] sm:$0xff] }
 0x9e8   :  { %2089 = vmatpush.msra.mxu0 %v12673_v4  ;;  %v12684_v4 = vld [vmem:[#allocation83_spill] sm:$0xff] }
 0x9e9   :  { %2129 = vmatpush.msra.mxu2 %v12674_v22  ;;  %v12685_v22 = vld [vmem:[#allocation86_spill] sm:$0xff] }
 0x9ea   :  { %2090 = vmatpush.msra.mxu0 %v12675_v59  ;;  %v12686_v59 = vld [vmem:[#allocation87_spill] sm:$0xff] }
 0x9eb   :  { %2130 = vmatpush.msra.mxu2 %v12676_v51  ;;  %v12687_v51 = vld [vmem:[#allocation90_spill] sm:$0xff] }
 0x9ec   :  { %2091 = vmatpush.msra.mxu0 %v12677_v3  ;;  %v12688_v3 = vld [vmem:[#allocation91_spill] sm:$0xff] }
 0x9ed   :  { %2131 = vmatpush.msra.mxu2 %v12678_v15  ;;  %v12689_v15 = vld [vmem:[#allocation92_spill] sm:$0xff] }
 0x9ee   :  { %2092 = vmatpush.msra.mxu0 %v12679_v53  ;;  %v12690_v53 = vld [vmem:[#allocation93_spill] sm:$0xff] }
 0x9ef   :  { %2132 = vmatpush.msra.mxu2 %v12680_v13  ;;  %v12691_v13 = vld [vmem:[#allocation94_spill] sm:$0xff] }
 0x9f0   :  { %2093 = vmatpush.msra.mxu0 %v12681_v20  ;;  %v12692_v20 = vld [vmem:[#allocation95_spill] sm:$0xff] }
 0x9f1   :  { %2133 = vmatpush.msra.mxu2 %v12682_v25 }
 0x9f2   :  { %2094 = vmatpush.msra.mxu0 %v12683_v11  ;;  %v12703_v11 = vld [vmem:[#allocation99_spill] sm:$0xff] }
 0x9f3   :  { %2134 = vmatpush.msra.mxu2 %v12684_v4 }
 0x9f4   :  { %2095 = vmatpush.msra.mxu0 %v12685_v22 }
 0x9f5   :  { %2135 = vmatpush.msra.mxu2 %v12686_v59  ;;  %v1687_v59 = vpop.f32.mrf.mxu3 }
 0x9f6   :  { %2160 = vmatpush.msrb.mxu0 %v12687_v51 }
 0x9f7   :  { %2200 = vmatpush.msrb.mxu2 %v12688_v3  ;;  %v12704_v3 = vld [vmem:[#allocation97_spill] sm:$0xff] }
 0x9f8   :  { %2161 = vmatpush.msrb.mxu0 %v12689_v15 }
 0x9f9   :  { %2201 = vmatpush.msrb.mxu2 %v12690_v53 }
 0x9fa   :  { %2162 = vmatpush.msrb.mxu0 %v12691_v13 }
 0x9fb   :  { %2202 = vmatpush.msrb.mxu2 %v12692_v20 }
 0x9fc   :  { %2163 = vmatpush.msrb.mxu0 %v7612_v49  ;;  %v12694_v49 = vld [vmem:[#allocation105_spill] sm:$0xff] }
 0x9fd   :  { %2203 = vmatpush.msrb.mxu2 %v7614_v45  ;;  %v12695_v45 = vld [vmem:[#allocation106_spill] sm:$0xff] }
 0x9fe   :  { %2164 = vmatpush.msrb.mxu0 %v7626_v48  ;;  %v12696_v48 = vld [vmem:[#allocation107_spill] sm:$0xff] }
 0x9ff   :  { %2204 = vmatpush.msrb.mxu2 %v7628_v63  ;;  %v12697_v63 = vld [vmem:[#allocation108_spill] sm:$0xff] }
 0xa00   :  { %2165 = vmatpush.msrb.mxu0 %v7637_v7  ;;  %v12698_v7 = vld [vmem:[#allocation109_spill] sm:$0xff] }
 0xa01   :  { %2205 = vmatpush.msrb.mxu2 %v7639_v44  ;;  %v12693_v44 = vld [vmem:[#allocation104_spill] sm:$0xff] }
 0xa02   :  { %2166 = vmatpush.msrb.mxu0 %v7645_v39  ;;  %v12699_v39 = vld [vmem:[#allocation110_spill] sm:$0xff] }
 0xa03   :  { %2206 = vmatpush.msrb.mxu2 %v7647_v28  ;;  %v1647_v28 = vpop.f32.mrf.mxu1 }
 0xa04   :  { %2167 = vmatpush.msrb.mxu0 %v7656_v31 }
 0xa05   :  { %2207 = vmatpush.msrb.mxu2 %v7658_v37  ;;  %v5537_v37 = vld [vmem:[%s11953_s5 + $0x1] ss:$2 sm:$0xf] }
 0xa06   :  { %2168 = vmatpush.msrb.mxu0 %v7665_v33  ;;  %v8100_v33 = vperm.slane %v5537_v37, 0 }
 0xa07   :  { %2208 = vmatpush.msrb.mxu2 %v7667_v36 }
 0xa08   :  { %2169 = vmatpush.msrb.mxu0 %v7675_v35  ;;  %12700 = vst [vmem:[#allocation8_spill] sm:$0xff] %v8100_v33 }
 0xa09   :  { %2209 = vmatpush.msrb.mxu2 %v7677_v38 }
 0xa0a   :  { %2170 = vmatpush.msrb.mxu0 %v7685_v40 }
 0xa0b   :  { %2210 = vmatpush.msrb.mxu2 %v7687_v26  ;;  %v1727_v31 = vpop.f32.mrf.mxu1  ;;  %v8103_v26 = vperm.slane %v5537_v37, 1 }
 0xa0c   :  { %2171 = vmatpush.msrb.mxu0 %v12693_v44 }
 0xa0d   :  { %2211 = vmatpush.msrb.mxu2 %v12694_v49  ;;  %12701 = vst [vmem:[#allocation9_spill] sm:$0xff] %v8103_v26 }
 0xa0e   :  { %2172 = vmatpush.msrb.mxu0 %v12695_v45 }
 0xa0f   :  { %2212 = vmatpush.msrb.mxu2 %v12696_v48 }
 0xa10   :  { %2173 = vmatpush.msrb.mxu0 %v12697_v63 }
 0xa11   :  { %2213 = vmatpush.msrb.mxu2 %v12698_v7 }
 0xa12   :  { %2174 = vmatpush.msrb.mxu0 %v12699_v39 }
 0xa13   :  { %2214 = vmatpush.msrb.mxu2 %v7752_v0 }
 0xa14   :  { %2175 = vmatpush.msrb.mxu0 %v7773_v9  ;;  %v8105_v9 = vperm.slane %v5537_v37, 2 }
 0xa15   :  { %2215 = vmatpush.msrb.mxu2 %v7775_v14 }
 0xa16   :  { %12702 = vst [vmem:[#allocation10_spill] sm:$0xff] %v8105_v9 }
 0xa32   :  { %v1627_v36 = vpop.f32.mrf.mxu0 }
 0xa33   :  { %v1628_v35 = vadd.f32 %v1627_v36, %v8100_v33  ;;  %v1870_v38 = vpop.f32.mrf.mxu1  ;;  %v8111_v36 = vperm.slane %v5537_v37, 3 }
 0xa34   :  { %v1918_v25 = vrot.slane %v1870_v38, 7  ;;  %v1934_v4 = vadd.f32 %v1870_v38, %v12703_v11 }
 0xa35   :  { %v1648_v40 = vadd.f32 %v1647_v28, %v1628_v35  ;;  %12705 = vst [vmem:[#allocation11_spill] sm:$0xff] %v8111_v36 }
 0xa36   :  { %v1930_v15 = vadd.f32 %v1918_v25, %v12704_v3  ;;  %v5559_v20 = vmul.f32 -1.442695, %v1934_v4 }
 0xa37   :  { %v5552_v0 = vmul.f32 -1.442695, %v1648_v40 }
 0xa38   :  { %v1667_v14 = vpop.f32.mrf.mxu2  ;;  %v5556_v48 = vmul.f32 -1.442695, %v1930_v15 }
 0xa39   :  { %5724 = vpow2.f32 %v5552_v0  ;;  %v1668_v22 = vadd.f32 %v1667_v14, %v8103_v26 }
 0xa3a   :  { %v1707_v51 = vpop.f32.mrf.mxu0 }
 0xa3b   :  { %v1688_v53 = vadd.f32 %v1687_v59, %v1668_v22  ;;  %v1708_v13 = vadd.f32 %v1707_v51, %v8105_v9  ;;  %v1767_v51 = vpop.f32.mrf.mxu3 }
 0xa3d   :  { %v5553_v44 = vmul.f32 -1.442695, %v1688_v53  ;;  %v1728_v49 = vadd.f32 %v1727_v31, %v1708_v13 }
 0xa3f   :  { %v5725_v45 = vpop.eup %5724  ;;  %5726 = vpow2.f32 %v5553_v44  ;;  %v5554_v7 = vmul.f32 -1.442695, %v1728_v49 }
 0xa40   :  { %v1779_v63 = vadd.f32 1.0, %v5725_v45  ;;  %5728 = vpow2.f32 %v5559_v20 }
 0xa41   :  { %v1747_v38 = vpop.f32.mrf.mxu2 }
 0xa42   :  { %5730 = vrcp.f32 %v1779_v63  ;;  %v1748_v14 = vadd.f32 %v1747_v38, %v8111_v36  ;;  %v1793_v49 = vand.u32 2147483648, %v1779_v63  ;;  %vm1787_vm10 = vweird.f32 %v1779_v63  ;;  %v12709_v36 = vld [vmem:[#allocation96_spill] sm:$0xff] }
 0xa43   :  { %5732 = vpow2.f32 %v5556_v48  ;;  %v1791_v48 = vand.u32 2147483647, %v1779_v63 }
 0xa44   :  { %5734 = vpow2.f32 %v5554_v7  ;;  %v1768_v13 = vadd.f32 %v1767_v51, %v1748_v14  ;;  %v12708_v51 = vld [vmem:[#allocation98_spill] sm:$0xff] }
 0xa45   :  { %v5727_v39 = vpop.eup %5726  ;;  %vm1792_vm9 = vcmp.eq.f32.partialorder %v1791_v48, 8.507059e+37 }
 0xa46   :  { %v1780_v28 = vadd.f32 1.0, %v5727_v39  ;;  %v5729_v35 = vpop.eup %5728 }
 0xa47   :  { %v8116_v59 = vadd.f32 1.0, %v5729_v35 }
 0xa48   :  { %v5731_v40 = vpop.eup %5730  ;;  %5736 = vrcp.f32 %v1780_v28  ;;  %v1808_v7 = vand.u32 2147483648, %v1780_v28  ;;  %v1806_v35 = vand.u32 2147483647, %v1780_v28  ;;  %vm1802_vm13 = vweird.f32 %v1780_v28 }
 0xa49   :  { %v5733_v0 = vpop.eup %5732  ;;  %v1783_v25 = vmul.f32 %v5731_v40, %v1779_v63  ;;  %vm1788_vm8 = vweird.f32 %v5731_v40  ;;  %v1794_v63 = vor.u32 1.1754944e-38, %v1793_v49  ;;  %vm2026_vm7 = vweird.f32 %v8116_v59 }
 0xa4a   :  { %v5735_v31 = vpop.eup %5734  ;;  %v8118_v15 = vadd.f32 1.0, %v5733_v0  ;;  %vm8123_vm11 = vmor %vm1787_vm10, %vm1788_vm8  ;;  %v1809_v39 = vor.u32 1.1754944e-38, %v1808_v7  ;;  %vm1807_vm14 = vcmp.eq.f32.partialorder %v1806_v35, 8.507059e+37 }
 0xa4b   :  { %v1784_v4 = vsub.f32 1.0, %v1783_v25  ;;  %v8114_v22 = vadd.f32 1.0, %v5735_v31 }
 0xa4c   :  { %vm1981_vm8 = vweird.f32 %v8118_v15 }
 0xa4d   :  { %5738 = vrcp.f32 %v8114_v22  ;;  %v1785_v37 = vmul.f32 %v5731_v40, %v1784_v4  ;;  %vm1817_vm15 = vweird.f32 %v8114_v22 }
 0xa4e   :  { %v5737_v53 = vpop.eup %5736  ;;  %5740 = vrcp.f32 %v8116_v59 }
 0xa4f   :  { %v1798_v20 = vmul.f32 %v5737_v53, %v1780_v28  ;;  %v1786_v44 = vadd.f32 %v5731_v40, %v1785_v37  ;;  %5742 = vrcp.f32 %v8118_v15  ;;  %vm1803_vm12 = vweird.f32 %v5737_v53 }
 0xa50   :  { %5744 = vtanh.f32 %v1768_v13  ;;  %vm1804_vm1 = vmor %vm1802_vm13, %vm1803_vm12 }
 0xa51   :  { %v1799_v45 = vsub.f32 1.0, %v1798_v20  ;;  %v1790_v31 = vsel %vm8123_vm11, %v5731_v40, %v1786_v44 }
 0xa52   :  { %v1850_v38 = vpop.f32.mrf.mxu0 }
 0xa53   :  { %v8127_v0 = vpop.eup %5738  ;;  %v1800_v25 = vmul.f32 %v5737_v53, %v1799_v45  ;;  %v1917_v14 = vrot.slane %v1850_v38, 7  ;;  %v1933_v37 = vadd.f32 %v1850_v38, %v12708_v51  ;;  %v1795_v45 = vsel %vm1792_vm9, %v1794_v63, %v1790_v31  ;;  %v8222_v51 = vld [vmem:[#allocation2 + $0x2a8] sm:$0xff] }
 0xa54   :  { %v1813_v4 = vmul.f32 %v8127_v0, %v8114_v22  ;;  %v8135_v11 = vpop.eup %5740  ;;  %vm1818_vm3 = vweird.f32 %v8127_v0 }
 0xa55   :  { %v1801_v20 = vadd.f32 %v5737_v53, %v1800_v25  ;;  %v1929_v13 = vadd.f32 %v1917_v14, %v12709_v36  ;;  %v5558_v40 = vmul.f32 -1.442695, %v1933_v37  ;;  %v8137_v44 = vpop.eup %5742  ;;  %v2022_v48 = vmul.f32 %v8135_v11, %v8116_v59  ;;  %v1910_v14 = vpop.f32.mrf.mxu3  ;;  %vm1819_vm0 = vmor %vm1817_vm15, %vm1818_vm3 }
 0xa56   :  { %v1814_v3 = vsub.f32 1.0, %v1813_v4  ;;  %v5745_v49 = vpop.eup %5744  ;;  %v12710_v4 = vld [vmem:[#allocation101_spill] sm:$0xff]  ;;  %vm2027_vm5 = vweird.f32 %v8135_v11  ;;  %vm1982_vm6 = vweird.f32 %v8137_v44 }
 0xa57   :  { %v1805_v9 = vsel %vm1804_vm1, %v5737_v53, %v1801_v20  ;;  %v5555_v26 = vmul.f32 -1.442695, %v1929_v13  ;;  %5746 = vpow2.f32 %v5558_v40  ;;  %v1829_v25 = vmul.f32 %v5745_v49, %v1795_v45  ;;  %vm8193_vm10 = vmor %vm2026_vm7, %vm2027_vm5 }
 0xa58   :  { %v1810_v33 = vsel %vm1807_vm14, %v1809_v39, %v1805_v9  ;;  %v1815_v28 = vmul.f32 %v8127_v0, %v1814_v3  ;;  %v1977_v53 = vmul.f32 %v8137_v44, %v8118_v15  ;;  %v12712_v9 = vld [vmem:[#allocation100_spill] sm:$0xff]  ;;  %v1920_v13 = vrot.slane %v1910_v14, 7  ;;  %vm8204_vm12 = vmor %vm1981_vm8, %vm1982_vm6 }
 0xa59   :  { %v1828_v38 = vmul.f32 0.0, %v1810_v33  ;;  %5748 = vpow2.f32 %v5555_v26  ;;  %v1890_v31 = vpop.f32.mrf.mxu2  ;;  %v2023_v33 = vsub.f32 1.0, %v2022_v48  ;;  %v1823_v26 = vand.u32 2147483648, %v8114_v22 }
 0xa5a   :  { %v1919_v7 = vrot.slane %v1890_v31, 7  ;;  %v1935_v63 = vadd.f32 %v1890_v31, %v12710_v4  ;;  %v1816_v3 = vadd.f32 %v8127_v0, %v1815_v28  ;;  %v1821_v40 = vand.u32 2147483647, %v8114_v22  ;;  %v12713_v28 = vld [vmem:[#allocation103_spill] sm:$0xff] }
 0xa5b   :  { %v8145_v35 = vadd.f32 %v1829_v25, %v1828_v38  ;;  %v1978_v38 = vsub.f32 1.0, %v1977_v53  ;;  %v1936_v31 = vadd.f32 %v1910_v14, %v12713_v28 }
 0xa5c   :  { %v1931_v37 = vadd.f32 %v1919_v7, %v12712_v9  ;;  %v5560_v20 = vmul.f32 -1.442695, %v1935_v63  ;;  %v1820_v7 = vsel %vm1819_vm0, %v8127_v0, %v1816_v3  ;;  %v12714_v63 = vld [vmem:[#allocation102_spill] sm:$0xff]  ;;  %vm1822_vm4 = vcmp.eq.f32.partialorder %v1821_v40, 8.507059e+37 }
 0xa5d   :  { %12711 = vst [vmem:[#allocation12_spill] sm:$0xff] %v8145_v35  ;;  %5750 = vtanh.f32 %v8145_v35  ;;  %v5747_v45 = vpop.eup %5746  ;;  %v1932_v4 = vadd.f32 %v1920_v13, %v12714_v63  ;;  %v1979_v53 = vmul.f32 %v8137_v44, %v1978_v38  ;;  %v2030_v3 = vand.u32 2147483647, %v8116_v59 }
 0xa5e   :  { %v5557_v39 = vmul.f32 -1.442695, %v1931_v37  ;;  %5752 = vpow2.f32 %v5560_v20  ;;  %v8154_v25 = vadd.f32 1.0, %v5747_v45  ;;  %v1824_v37 = vor.u32 1.1754944e-38, %v1823_v26 }
 0xa5f   :  { %v5749_v49 = vpop.eup %5748  ;;  %v2024_v20 = vmul.f32 %v8135_v11, %v2023_v33  ;;  %v2032_v13 = vand.u32 2147483648, %v8116_v59  ;;  %v1985_v40 = vand.u32 2147483647, %v8118_v15  ;;  %vm8197_vm11 = vcmp.eq.f32.partialorder %v2030_v3, 8.507059e+37 }
 0xa60   :  { %v8157_v48 = vadd.f32 1.0, %v5749_v49  ;;  %5754 = vpow2.f32 %v5557_v39  ;;  %v1825_v45 = vsel %vm1822_vm4, %v1824_v37, %v1820_v7  ;;  %v2017_v35 = vand.u32 2147483648, %v8154_v25 }
 0xa61   :  { %5756 = vrcp.f32 %v8154_v25  ;;  %v2025_v38 = vadd.f32 %v8135_v11, %v2024_v20  ;;  %vm8208_vm13 = vcmp.eq.f32.partialorder %v1985_v40, 8.507059e+37  ;;  %v2015_v40 = vand.u32 2147483647, %v8154_v25 }
 0xa62   :  { %5758 = vrcp.f32 %v8157_v48  ;;  %vm2011_vm14 = vweird.f32 %v8154_v25  ;;  %vm1966_vm3 = vweird.f32 %v8157_v48 }
 0xa63   :  { %v5751_v22 = vpop.eup %5750  ;;  %5760 = vtanh.f32 %v1936_v31  ;;  %v1980_v31 = vadd.f32 %v8137_v44, %v1979_v53  ;;  %v2029_v3 = vsel %vm8193_vm10, %v8135_v11, %v2025_v38  ;;  %v8225_v11 = vld [vmem:[#allocation2 + $0x2b8] sm:$0xff]  ;;  %v1972_v38 = vand.u32 2147483648, %v8157_v48  ;;  %v8238_v53 = vld [vmem:[#allocation2 + $0x288] sm:$0xff] }
 0xa64   :  { %v5753_v14 = vpop.eup %5752  ;;  %v8167_v0 = vmul.f32 %v5751_v22, %v1825_v45  ;;  %5762 = vtanh.f32 %v1932_v4  ;;  %v1987_v45 = vand.u32 2147483648, %v8118_v15  ;;  %12724 = vst [vmem:[#allocation14_spill] sm:$0xff] %v8238_v53  ;;  %vm2016_vm0 = vcmp.eq.f32.partialorder %v2015_v40, 8.507059e+37  ;;  %v8260_v15 = vld [vmem:[#allocation2 + $0x268] sm:$0xff] }
 0xa65   :  { %v8171_v33 = vadd.f32 1.0, %v5753_v14  ;;  %v1984_v63 = vsel %vm8204_vm12, %v8137_v44, %v1980_v31  ;;  %v1970_v31 = vand.u32 2147483647, %v8157_v48  ;;  %12728 = vst [vmem:[#allocation16_spill] sm:$0xff] %v8260_v15 }
 0xa66   :  { %12715 = vst [vmem:[#allocation13_spill] sm:$0xff] %v8167_v0  ;;  %v5755_v26 = vpop.eup %5754  ;;  %v2075_v7 = vrot.slane %v8167_v0, 7 }
 0xa67   :  { %v8177_v37 = vpop.eup %5756  ;;  %v8181_v22 = vadd.f32 1.0, %v5755_v26  ;;  %5764 = vrcp.f32 %v8171_v33  ;;  %vm1971_vm5 = vcmp.eq.f32.partialorder %v1970_v31, 8.507059e+37  ;;  %v8287_v31 = vld [vmem:[#allocation2 + $0x228] sm:$0xff]  ;;  %vm2041_vm8 = vweird.f32 %v8171_v33 }
 0xa68   :  { %v8184_v4 = vpop.eup %5758  ;;  %v2007_v20 = vmul.f32 %v8177_v37, %v8154_v25  ;;  %v8190_v14 = vrot.slane %v2075_v7, 1  ;;  %v2033_v7 = vor.u32 1.1754944e-38, %v2032_v13  ;;  %v1988_v13 = vor.u32 1.1754944e-38, %v1987_v45  ;;  %v8241_v45 = vld [vmem:[#allocation2 + $0x298] sm:$0xff] }
 0xa69   :  { %v1962_v49 = vmul.f32 %v8184_v4, %v8157_v48  ;;  %5766 = vrcp.f32 %v8181_v22  ;;  %v5761_v59 = vpop.eup %5760  ;;  %vm2012_vm9 = vweird.f32 %v8177_v37  ;;  %vm1967_vm1 = vweird.f32 %v8184_v4  ;;  %12725 = vst [vmem:[#allocation15_spill] sm:$0xff] %v8241_v45  ;;  %v8263_v25 = vld [vmem:[#allocation2 + $0x278] sm:$0xff] }
 0xa6a   :  { %v2008_v0 = vsub.f32 1.0, %v2007_v20  ;;  %2116 = vmatmul.f32.vlgmr.msrb.gmra.mxu1 %v8190_v14  ;;  %2156 = vmatmul.f32.vlgmr.msra.gmra.mxu3 %v8190_v14  ;;  %v5763_v28 = vpop.eup %5762  ;;  %vm8256_vm15 = vmor %vm2011_vm14, %vm2012_vm9  ;;  %12729 = vst [vmem:[#allocation17_spill] sm:$0xff] %v8263_v25  ;;  %v1973_v48 = vor.u32 1.1754944e-38, %v1972_v38  ;;  %v8279_v38 = vld [vmem:[#allocation2 + $0x258] sm:$0xff] }
 0xa6b   :  { %v1963_v9 = vsub.f32 1.0, %v1962_v49  ;;  %2326 = vmatpush.msrb.mxu1 %v8222_v51  ;;  %2366 = vmatpush.msra.mxu3 %v8225_v11  ;;  %v2034_v49 = vsel %vm8197_vm11, %v2033_v7, %v2029_v3  ;;  %vm1968_vm4 = vmor %vm1966_vm3, %vm1967_vm1  ;;  %vm1996_vm11 = vweird.f32 %v8181_v22  ;;  %vm2072_vm1 = vcmask 1042434  }
 0xa6c   :  { %v2009_v20 = vmul.f32 %v8177_v37, %v2008_v0  ;;  %v1989_v0 = vsel %vm8208_vm13, %v1988_v13, %v1984_v63  ;;  %v2018_v63 = vor.u32 1.1754944e-38, %v2017_v35 }
 0xa6d   :  { %v8231_v44 = vpop.eup %5764  ;;  %v1964_v39 = vmul.f32 %v8184_v4, %v1963_v9  ;;  %2327 = vmatpush.msrb.mxu1 %v8238_v53  ;;  %2367 = vmatpush.msra.mxu3 %v8241_v45 }
 0xa6e   :  { %v2010_v26 = vadd.f32 %v8177_v37, %v2009_v20  ;;  %v2037_v9 = vmul.f32 %v8231_v44, %v8171_v33  ;;  %v12730_v20 = vrot.slane %v7852_v43, 7  ;;  %v12731_v43 = vrot.slane %v7847_v50, 7  ;;  %v8301_v50 = vld [vmem:[#allocation2 + $0x218] sm:$0xff] }
 0xa6f   :  { %v8250_v3 = vpop.eup %5766  ;;  %v1965_v7 = vadd.f32 %v8184_v4, %v1964_v39  ;;  %2328 = vmatpush.msrb.mxu1 %v8260_v15  ;;  %2368 = vmatpush.msra.mxu3 %v8263_v25  ;;  %v8276_v25 = vld [vmem:[#allocation2 + $0x248] sm:$0xff]  ;;  %vm2042_vm6 = vweird.f32 %v8231_v44 }
 0xa70   :  { %v2014_v13 = vsel %vm8256_vm15, %v8177_v37, %v2010_v26  ;;  %v1992_v40 = vmul.f32 %v8250_v3, %v8181_v22  ;;  %v2038_v35 = vsub.f32 1.0, %v2037_v9  ;;  %v2060_v39 = vmul.f32 %v12730_v20, %v2034_v49  ;;  %vm8322_vm10 = vmor %vm2041_vm8, %vm2042_vm6 }
 0xa71   :  { %v1969_v15 = vsel %vm1968_vm4, %v8184_v4, %v1965_v7  ;;  %v2019_v53 = vsel %vm2016_vm0, %v2018_v63, %v2014_v13  ;;  %2329 = vmatpush.msrb.mxu1 %v8276_v25  ;;  %2369 = vmatpush.msra.mxu3 %v8279_v38  ;;  %v2059_v4 = vmul.f32 %v12731_v43, %v1989_v0  ;;  %v8290_v7 = vld [vmem:[#allocation2 + $0x238] sm:$0xff]  ;;  %v2047_v0 = vand.u32 2147483648, %v8171_v33  ;;  %v8312_v13 = vld [vmem:[#allocation2 + $0x1e8] sm:$0xff] }
 0xa72   :  { %v1974_v37 = vsel %vm1971_vm5, %v1973_v48, %v1969_v15  ;;  %v2062_v45 = vmul.f32 %v5761_v59, %v2019_v53  ;;  %v1993_v26 = vsub.f32 1.0, %v1992_v40  ;;  %v2039_v9 = vmul.f32 %v8231_v44, %v2038_v35  ;;  %2196 = vmatmul.f32.vlgmr.msra.gmra.mxu1 %v8190_v14  ;;  %2236 = vmatmul.f32.vlgmr.msrb.gmra.mxu3 %v8190_v14  ;;  %v8298_v14 = vld [vmem:[#allocation2 + $0x208] sm:$0xff]  ;;  %v8315_v40 = vld [vmem:[#allocation2 + $0x1f8] sm:$0xff] }
 0xa73   :  { %v2061_v49 = vmul.f32 %v5763_v28, %v1974_v37  ;;  %2330 = vmatpush.msrb.mxu1 %v8287_v31  ;;  %2370 = vmatpush.msra.mxu3 %v8290_v7  ;;  %vm1997_vm7 = vweird.f32 %v8250_v3  ;;  %v2045_v48 = vand.u32 2147483647, %v8171_v33  ;;  %v2002_v35 = vand.u32 2147483648, %v8181_v22  ;;  %v8331_v37 = vld [vmem:[#allocation2 + $0x1d8] sm:$0xff]  ;;  %v8346_v43 = vld [vmem:[#allocation2 + $0x1a8] sm:$0xff] }
 0xa74   :  { %v8293_v59 = vadd.f32 %v2062_v45, %v2060_v39  ;;  %v1994_v53 = vmul.f32 %v8250_v3, %v1993_v26  ;;  %v2040_v63 = vadd.f32 %v8231_v44, %v2039_v9  ;;  %v2000_v33 = vand.u32 2147483647, %v8181_v22  ;;  %v8328_v39 = vld [vmem:[#allocation2 + $0x1c8] sm:$0xff]  ;;  %12734 = vst [vmem:[#allocation18_spill] sm:$0xff] %v8331_v37  ;;  %vm8336_vm12 = vmor %vm1996_vm11, %vm1997_vm7 }
 0xa75   :  { %2331 = vmatpush.msrb.mxu1 %v8298_v14  ;;  %2371 = vmatpush.msra.mxu3 %v8301_v50  ;;  %v8304_v28 = vadd.f32 %v2061_v49, %v2059_v4  ;;  %v2048_v9 = vor.u32 1.1754944e-38, %v2047_v0  ;;  %v8349_v4 = vld [vmem:[#allocation2 + $0x1b8] sm:$0xff]  ;;  %v2003_v49 = vor.u32 1.1754944e-38, %v2002_v35  ;;  %vm2046_vm13 = vcmp.eq.f32.partialorder %v2045_v48, 8.507059e+37  ;;  %v8358_v45 = vld [vmem:[#allocation2 + $0x168] sm:$0xff] }
 0xa76   :  { %v1995_v15 = vadd.f32 %v8250_v3, %v1994_v53  ;;  %5768 = vtanh.f32 %v8293_v59  ;;  %v2044_v26 = vsel %vm8322_vm10, %v8231_v44, %v2040_v63  ;;  %vm2001_vm9 = vcmp.eq.f32.partialorder %v2000_v33, 8.507059e+37  ;;  %v8352_v44 = vld [vmem:[#allocation2 + $0x188] sm:$0xff]  ;;  %v8355_v63 = vld [vmem:[#allocation2 + $0x198] sm:$0xff] }
 0xa77   :  { %2332 = vmatpush.msrb.mxu1 %v8312_v13  ;;  %2372 = vmatpush.msra.mxu3 %v8315_v40  ;;  %5770 = vtanh.f32 %v8304_v28  ;;  %v8361_v48 = vld [vmem:[#allocation2 + $0x178] sm:$0xff] }
 0xa78   :  { %v1999_v22 = vsel %vm8336_vm12, %v8250_v3, %v1995_v15 }
 0xa79   :  { %2333 = vmatpush.msrb.mxu1 %v8328_v39  ;;  %2373 = vmatpush.msra.mxu3 %v8331_v37  ;;  %v2049_v37 = vsel %vm2046_vm13, %v2048_v9, %v2044_v26  ;;  %v2004_v3 = vsel %vm2001_vm9, %v2003_v49, %v1999_v22  ;;  %v8364_v26 = vld [vmem:[#allocation2 + $0x148] sm:$0xff]  ;;  %v8367_v9 = vld [vmem:[#allocation2 + $0x158] sm:$0xff] }
 0xa7b   :  { %2334 = vmatpush.msrb.mxu1 %v8346_v43  ;;  %2374 = vmatpush.msra.mxu3 %v8349_v4 }
 0xa7c   :  { %v5769_v53 = vpop.eup %5768 }
 0xa7d   :  { %v5771_v20 = vpop.eup %5770  ;;  %2335 = vmatpush.msrb.mxu1 %v8352_v44  ;;  %2375 = vmatpush.msra.mxu3 %v8355_v63  ;;  %v2068_v0 = vmul.f32 %v5769_v53, %v2049_v37  ;;  %v8373_v53 = vld [vmem:[#allocation2 + $0x128] sm:$0xff] }
 0xa7e   :  { %v2067_v15 = vmul.f32 %v5771_v20, %v2004_v3  ;;  %v8376_v20 = vld [vmem:[#allocation2 + $0x138] sm:$0xff]  ;;  %v8381_v3 = vld [vmem:[#allocation2 + $0x108] sm:$0xff] }
 0xa7f   :  { %2336 = vmatpush.msrb.mxu1 %v8358_v45  ;;  %2376 = vmatpush.msra.mxu3 %v8361_v48  ;;  %v2071_v35 = vrot.slane %v2068_v0, 7 }
 0xa80   :  { %v2303_v33 = vrot.slane %v2067_v15, 1 }
 0xa81   :  { %2337 = vmatpush.msrb.mxu1 %v8364_v26  ;;  %2377 = vmatpush.msra.mxu3 %v8367_v9  ;;  %v2073_v37 = vsel %vm2072_vm1, %v2071_v35, %v2067_v15  ;;  %v8389_v15 = vld [vmem:[#allocation2 + $0xe8] sm:$0xff]  ;;  %v8392_v35 = vld [vmem:[#allocation2 + $0xf8] sm:$0xff] }
 0xa82   :  { %v2076_v22 = vrot.slane %v2073_v37, 1  ;;  %v8371_v49 = vsel %vm115_vm2, %v2068_v0, %v2303_v33  ;;  %v8384_v0 = vld [vmem:[#allocation2 + $0x118] sm:$0xff]  ;;  %v8523_v33 = vld [vmem:[#allocation2 + $0x500] sm:$0xff]  ;;  %v8526_v37 = vld [vmem:[#allocation2 + $0x508] sm:$0xff] }
 0xa83   :  { %2338 = vmatpush.msrb.mxu1 %v8373_v53  ;;  %2378 = vmatpush.msra.mxu3 %v8376_v20  ;;  %12762 = vst [vmem:[#allocation26_spill] sm:$0xff] %v8523_v33 }
 0xa84   :  { %2096 = vmatmul.f32.vlgmr.msra.gmra.mxu0 %v2076_v22  ;;  %2136 = vmatmul.f32.vlgmr.msra.gmra.mxu2 %v2076_v22  ;;  %12763 = vst [vmem:[#allocation27_spill] sm:$0xff] %v8526_v37 }
 0xa85   :  { %2306 = vmatpush.msra.mxu0 %v7890_v55  ;;  %2346 = vmatpush.msra.mxu2 %v7894_v52  ;;  %v8397_v55 = vld [vmem:[#allocation2 + $0xc8] sm:$0xff]  ;;  %v8400_v52 = vld [vmem:[#allocation2 + $0xd8] sm:$0xff] }
 0xa86   :  { %2339 = vmatpush.msrb.mxu1 %v8381_v3  ;;  %2379 = vmatpush.msra.mxu3 %v8384_v0 }
 0xa87   :  { %2307 = vmatpush.msra.mxu0 %v7898_v30  ;;  %2347 = vmatpush.msra.mxu2 %v7902_v29  ;;  %v8409_v30 = vld [vmem:[#allocation2 + $0x6a0] sm:$0xff]  ;;  %v8412_v29 = vld [vmem:[#allocation2 + $0x6a8] sm:$0xff] }
 0xa88   :  { %2340 = vmatpush.msrb.mxu1 %v8389_v15  ;;  %2380 = vmatpush.msra.mxu3 %v8392_v35 }
 0xa89   :  { %2308 = vmatpush.msra.mxu0 %v7906_v16  ;;  %2348 = vmatpush.msra.mxu2 %v7910_v60  ;;  %v8417_v16 = vld [vmem:[#allocation2 + $0x680] sm:$0xff]  ;;  %v8420_v60 = vld [vmem:[#allocation2 + $0x688] sm:$0xff] }
 0xa8a   :  { %2341 = vmatpush.msrb.mxu1 %v8397_v55  ;;  %2381 = vmatpush.msra.mxu3 %v8400_v52 }
 0xa8b   :  { %2309 = vmatpush.msra.mxu0 %v7914_v23  ;;  %2349 = vmatpush.msra.mxu2 %v7918_v5  ;;  %v8425_v23 = vld [vmem:[#allocation2 + $0x660] sm:$0xff]  ;;  %v8428_v5 = vld [vmem:[#allocation2 + $0x668] sm:$0xff] }
 0xa8c   :  { %2342 = vmatmul.f32.vlgmr.msrb.gmra.mxu1 %v8371_v49  ;;  %2382 = vmatmul.f32.vlgmr.msra.gmra.mxu3 %v8371_v49  ;;  %12737 = vst [vmem:[#allocation19_spill] sm:$0xff] %v8428_v5 }
 0xa8d   :  { %2176 = vmatmul.f32.vlgmr.msrb.gmra.mxu0 %v2076_v22  ;;  %2216 = vmatmul.f32.vlgmr.msrb.gmra.mxu2 %v2076_v22  ;;  %v8529_v22 = vld [vmem:[#allocation2 + $0x460] sm:$0xff] }
 0xa8e   :  { %2310 = vmatpush.msra.mxu0 %v7923_v61  ;;  %2350 = vmatpush.msra.mxu2 %v7926_v6  ;;  %v8433_v61 = vld [vmem:[#allocation2 + $0x640] sm:$0xff]  ;;  %v8436_v6 = vld [vmem:[#allocation2 + $0x648] sm:$0xff]  ;;  %12764 = vst [vmem:[#allocation64_spill] sm:$0xff] %v8529_v22 }
 0xa8f   :  { %2577 = vmatpush.msra.mxu1 %v8409_v30  ;;  %2617 = vmatpush.msrb.mxu3 %v8412_v29  ;;  %12738 = vst [vmem:[#allocation20_spill] sm:$0xff] %v8433_v61 }
 0xa90   :  { %2311 = vmatpush.msra.mxu0 %v7930_v46  ;;  %2351 = vmatpush.msra.mxu2 %v7934_v42  ;;  %12739 = vst [vmem:[#allocation21_spill] sm:$0xff] %v8436_v6  ;;  %v8441_v46 = vld [vmem:[#allocation2 + $0x620] sm:$0xff]  ;;  %v8444_v42 = vld [vmem:[#allocation2 + $0x628] sm:$0xff] }
 0xa91   :  { %2578 = vmatpush.msra.mxu1 %v8417_v16  ;;  %2618 = vmatpush.msrb.mxu3 %v8420_v60  ;;  %12740 = vst [vmem:[#allocation22_spill] sm:$0xff] %v8441_v46 }
 0xa92   :  { %2312 = vmatpush.msra.mxu0 %v7938_v21  ;;  %2352 = vmatpush.msra.mxu2 %v7942_v18  ;;  %12741 = vst [vmem:[#allocation23_spill] sm:$0xff] %v8444_v42  ;;  %v8449_v21 = vld [vmem:[#allocation2 + $0x600] sm:$0xff]  ;;  %v8452_v18 = vld [vmem:[#allocation2 + $0x608] sm:$0xff] }
 0xa93   :  { %2579 = vmatpush.msra.mxu1 %v8425_v23  ;;  %2619 = vmatpush.msrb.mxu3 %v8428_v5  ;;  %12742 = vst [vmem:[#allocation24_spill] sm:$0xff] %v8449_v21 }
 0xa94   :  { %2313 = vmatpush.msra.mxu0 %v7946_v58  ;;  %2353 = vmatpush.msra.mxu2 %v7950_v12  ;;  %12743 = vst [vmem:[#allocation25_spill] sm:$0xff] %v8452_v18  ;;  %v8457_v58 = vld [vmem:[#allocation2 + $0x5e0] sm:$0xff]  ;;  %v8460_v12 = vld [vmem:[#allocation2 + $0x5e8] sm:$0xff] }
 0xa95   :  { %2580 = vmatpush.msra.mxu1 %v8433_v61  ;;  %2620 = vmatpush.msrb.mxu3 %v8436_v6  ;;  %12744 = vst [vmem:[#allocation28_spill] sm:$0xff] %v8457_v58 }
 0xa96   :  { %2314 = vmatpush.msra.mxu0 %v7954_v2  ;;  %2354 = vmatpush.msra.mxu2 %v7958_v10  ;;  %12745 = vst [vmem:[#allocation29_spill] sm:$0xff] %v8460_v12  ;;  %v8465_v2 = vld [vmem:[#allocation2 + $0x5c0] sm:$0xff]  ;;  %v8468_v10 = vld [vmem:[#allocation2 + $0x5c8] sm:$0xff] }
 0xa97   :  { %2581 = vmatpush.msra.mxu1 %v8441_v46  ;;  %2621 = vmatpush.msrb.mxu3 %v8444_v42  ;;  %12746 = vst [vmem:[#allocation32_spill] sm:$0xff] %v8465_v2 }
 0xa98   :  { %2315 = vmatpush.msra.mxu0 %v7962_v32  ;;  %2355 = vmatpush.msra.mxu2 %v7966_v24  ;;  %12747 = vst [vmem:[#allocation33_spill] sm:$0xff] %v8468_v10  ;;  %v8473_v32 = vld [vmem:[#allocation2 + $0x5a0] sm:$0xff]  ;;  %v8476_v24 = vld [vmem:[#allocation2 + $0x5a8] sm:$0xff] }
 0xa99   :  { %2582 = vmatpush.msra.mxu1 %v8449_v21  ;;  %2622 = vmatpush.msrb.mxu3 %v8452_v18  ;;  %12748 = vst [vmem:[#allocation36_spill] sm:$0xff] %v8473_v32 }
 0xa9a   :  { %2316 = vmatpush.msra.mxu0 %v7970_v1  ;;  %2356 = vmatpush.msra.mxu2 %v7974_v54  ;;  %12749 = vst [vmem:[#allocation37_spill] sm:$0xff] %v8476_v24  ;;  %v8481_v1 = vld [vmem:[#allocation2 + $0x580] sm:$0xff]  ;;  %v8484_v54 = vld [vmem:[#allocation2 + $0x588] sm:$0xff] }
 0xa9b   :  { %2583 = vmatpush.msra.mxu1 %v8457_v58  ;;  %2623 = vmatpush.msrb.mxu3 %v8460_v12  ;;  %12750 = vst [vmem:[#allocation40_spill] sm:$0xff] %v8481_v1 }
 0xa9c   :  { %2317 = vmatpush.msra.mxu0 %v7978_v27  ;;  %2357 = vmatpush.msra.mxu2 %v7982_v41  ;;  %12751 = vst [vmem:[#allocation41_spill] sm:$0xff] %v8484_v54  ;;  %v8489_v27 = vld [vmem:[#allocation2 + $0x560] sm:$0xff]  ;;  %v8492_v41 = vld [vmem:[#allocation2 + $0x568] sm:$0xff] }
 0xa9d   :  { %2584 = vmatpush.msra.mxu1 %v8465_v2  ;;  %2624 = vmatpush.msrb.mxu3 %v8468_v10  ;;  %12752 = vst [vmem:[#allocation44_spill] sm:$0xff] %v8489_v27  ;;  %v12863_v2 = vld [vmem:[#allocation97_spill] sm:$0xff] }
 0xa9e   :  { %2318 = vmatpush.msra.mxu0 %v7986_v47  ;;  %2358 = vmatpush.msra.mxu2 %v7990_v8  ;;  %12753 = vst [vmem:[#allocation45_spill] sm:$0xff] %v8492_v41  ;;  %v8499_v47 = vld [vmem:[#allocation2 + $0x540] sm:$0xff]  ;;  %v8502_v8 = vld [vmem:[#allocation2 + $0x548] sm:$0xff] }
 0xa9f   :  { %2585 = vmatpush.msra.mxu1 %v8473_v32  ;;  %2625 = vmatpush.msrb.mxu3 %v8476_v24  ;;  %12754 = vst [vmem:[#allocation48_spill] sm:$0xff] %v8499_v47  ;;  %v12862_v32 = vld [vmem:[#allocation10_spill] sm:$0xff] }
 0xaa0   :  { %2319 = vmatpush.msra.mxu0 %v7994_v17  ;;  %2359 = vmatpush.msra.mxu2 %v7998_v56  ;;  %12755 = vst [vmem:[#allocation49_spill] sm:$0xff] %v8502_v8  ;;  %v8505_v17 = vld [vmem:[#allocation2 + $0x4a0] sm:$0xff]  ;;  %v8508_v56 = vld [vmem:[#allocation2 + $0x4a8] sm:$0xff] }
 0xaa1   :  { %2586 = vmatpush.msra.mxu1 %v8481_v1  ;;  %2626 = vmatpush.msrb.mxu3 %v8484_v54  ;;  %12756 = vst [vmem:[#allocation52_spill] sm:$0xff] %v8505_v17 }
 0xaa2   :  { %2320 = vmatpush.msra.mxu0 %v8002_v19  ;;  %2360 = vmatpush.msra.mxu2 %v8006_v34  ;;  %12757 = vst [vmem:[#allocation53_spill] sm:$0xff] %v8508_v56  ;;  %v8511_v19 = vld [vmem:[#allocation2 + $0x520] sm:$0xff]  ;;  %v8514_v34 = vld [vmem:[#allocation2 + $0x528] sm:$0xff] }
 0xaa3   :  { %2587 = vmatpush.msra.mxu1 %v8489_v27  ;;  %2627 = vmatpush.msrb.mxu3 %v8492_v41  ;;  %12758 = vst [vmem:[#allocation56_spill] sm:$0xff] %v8511_v19 }
 0xaa4   :  { %2321 = vmatpush.msra.mxu0 %v8010_v57  ;;  %2361 = vmatpush.msra.mxu2 %v8014_v62  ;;  %12759 = vst [vmem:[#allocation57_spill] sm:$0xff] %v8514_v34  ;;  %v8517_v57 = vld [vmem:[#allocation2 + $0x480] sm:$0xff]  ;;  %v8520_v62 = vld [vmem:[#allocation2 + $0x488] sm:$0xff] }
 0xaa5   :  { %2322 = vmatmul.f32.vlgmr.msra.gmra.mxu0 %v8371_v49  ;;  %2362 = vmatmul.f32.vlgmr.msra.gmra.mxu2 %v8371_v49  ;;  %12760 = vst [vmem:[#allocation60_spill] sm:$0xff] %v8517_v57  ;;  %v8532_v49 = vld [vmem:[#allocation2 + $0x468] sm:$0xff] }
 0xaa6   :  { %2588 = vmatpush.msra.mxu1 %v8499_v47  ;;  %2628 = vmatpush.msrb.mxu3 %v8502_v8  ;;  %12761 = vst [vmem:[#allocation61_spill] sm:$0xff] %v8520_v62  ;;  %v12861_v47 = vld [vmem:[#allocation9_spill] sm:$0xff] }
 0xaa7   :  { %2557 = vmatpush.msrb.mxu0 %v8505_v17  ;;  %2597 = vmatpush.msrb.mxu2 %v8508_v56  ;;  %12765 = vst [vmem:[#allocation30_spill] sm:$0xff] %v8532_v49 }
 0xaa8   :  { %2589 = vmatpush.msra.mxu1 %v8511_v19  ;;  %2629 = vmatpush.msrb.mxu3 %v8514_v34 }
 0xaa9   :  { %2558 = vmatpush.msrb.mxu0 %v8517_v57  ;;  %2598 = vmatpush.msrb.mxu2 %v8520_v62  ;;  %v8535_v57 = vld [vmem:[#allocation2 + $0x4e0] sm:$0xff]  ;;  %v8538_v62 = vld [vmem:[#allocation2 + $0x4e8] sm:$0xff] }
 0xaaa   :  { %2590 = vmatpush.msra.mxu1 %v8523_v33  ;;  %2630 = vmatpush.msrb.mxu3 %v8526_v37  ;;  %12766 = vst [vmem:[#allocation65_spill] sm:$0xff] %v8535_v57  ;;  %v8541_v33 = vld [vmem:[#allocation2 + $0x440] sm:$0xff]  ;;  %v8544_v37 = vld [vmem:[#allocation2 + $0x448] sm:$0xff] }
 0xaab   :  { %2559 = vmatpush.msrb.mxu0 %v8529_v22  ;;  %2599 = vmatpush.msrb.mxu2 %v8532_v49  ;;  %12767 = vst [vmem:[#allocation31_spill] sm:$0xff] %v8538_v62  ;;  %v8547_v22 = vld [vmem:[#allocation2 + $0x4c0] sm:$0xff]  ;;  %v8550_v49 = vld [vmem:[#allocation2 + $0x4c8] sm:$0xff] }
 0xaac   :  { %2591 = vmatpush.msra.mxu1 %v8535_v57  ;;  %2631 = vmatpush.msrb.mxu3 %v8538_v62  ;;  %12768 = vst [vmem:[#allocation68_spill] sm:$0xff] %v8541_v33  ;;  %v8553_v57 = vld [vmem:[#allocation2 + $0x6b0] sm:$0xff]  ;;  %v8556_v62 = vld [vmem:[#allocation2 + $0x6b8] sm:$0xff] }
 0xaad   :  { %2560 = vmatpush.msrb.mxu0 %v8541_v33  ;;  %12769 = vst [vmem:[#allocation34_spill] sm:$0xff] %v8544_v37  ;;  %2600 = vmatpush.msrb.mxu2 %v8544_v37  ;;  %v8559_v33 = vld [vmem:[#allocation2 + $0x420] sm:$0xff]  ;;  %v8562_v37 = vld [vmem:[#allocation2 + $0x428] sm:$0xff] }
 0xaae   :  { %12770 = vst [vmem:[#allocation69_spill] sm:$0xff] %v8547_v22  ;;  %2592 = vmatpush.msra.mxu1 %v8547_v22  ;;  %2632 = vmatpush.msrb.mxu3 %v8550_v49  ;;  %v8565_v22 = vld [vmem:[#allocation2 + $0x690] sm:$0xff] }
 0xaaf   :  { %12771 = vst [vmem:[#allocation35_spill] sm:$0xff] %v8550_v49  ;;  %2561 = vmatpush.msrb.mxu0 %v8559_v33  ;;  %2601 = vmatpush.msrb.mxu2 %v8562_v37  ;;  %v8568_v49 = vld [vmem:[#allocation2 + $0x698] sm:$0xff] }
 0xab0   :  { %12772 = vst [vmem:[#allocation72_spill] sm:$0xff] %v8553_v57  ;;  %2657 = vmatpush.msrb.mxu1 %v8553_v57  ;;  %2697 = vmatpush.msra.mxu3 %v8556_v62  ;;  %v8571_v57 = vld [vmem:[#allocation2 + $0x400] sm:$0xff] }
 0xab1   :  { %12773 = vst [vmem:[#allocation38_spill] sm:$0xff] %v8556_v62  ;;  %2562 = vmatpush.msrb.mxu0 %v8571_v57  ;;  %v8574_v62 = vld [vmem:[#allocation2 + $0x408] sm:$0xff] }
 0xab2   :  { %12774 = vst [vmem:[#allocation73_spill] sm:$0xff] %v8559_v33  ;;  %2658 = vmatpush.msrb.mxu1 %v8565_v22  ;;  %2698 = vmatpush.msra.mxu3 %v8568_v49  ;;  %v8577_v33 = vld [vmem:[#allocation2 + $0x670] sm:$0xff] }
 0xab3   :  { %12775 = vst [vmem:[#allocation39_spill] sm:$0xff] %v8562_v37  ;;  %2602 = vmatpush.msrb.mxu2 %v8574_v62  ;;  %v8580_v37 = vld [vmem:[#allocation2 + $0x678] sm:$0xff] }
 0xab4   :  { %12776 = vst [vmem:[#allocation76_spill] sm:$0xff] %v8565_v22  ;;  %2659 = vmatpush.msrb.mxu1 %v8577_v33  ;;  %2699 = vmatpush.msra.mxu3 %v8580_v37  ;;  %v8583_v22 = vld [vmem:[#allocation2 + $0x3e0] sm:$0xff] }
 0xab5   :  { %12777 = vst [vmem:[#allocation42_spill] sm:$0xff] %v8568_v49  ;;  %2563 = vmatpush.msrb.mxu0 %v8583_v22  ;;  %v8586_v49 = vld [vmem:[#allocation2 + $0x3e8] sm:$0xff] }
 0xab6   :  { %12778 = vst [vmem:[#allocation77_spill] sm:$0xff] %v8571_v57  ;;  %2603 = vmatpush.msrb.mxu2 %v8586_v49  ;;  %v8589_v57 = vld [vmem:[#allocation2 + $0x650] sm:$0xff] }
 0xab7   :  { %12779 = vst [vmem:[#allocation43_spill] sm:$0xff] %v8574_v62  ;;  %2660 = vmatpush.msrb.mxu1 %v8589_v57  ;;  %v8592_v62 = vld [vmem:[#allocation2 + $0x658] sm:$0xff] }
 0xab8   :  { %12780 = vst [vmem:[#allocation80_spill] sm:$0xff] %v8577_v33  ;;  %2700 = vmatpush.msra.mxu3 %v8592_v62  ;;  %v8595_v33 = vld [vmem:[#allocation2 + $0x3c0] sm:$0xff] }
 0xab9   :  { %12781 = vst [vmem:[#allocation46_spill] sm:$0xff] %v8580_v37  ;;  %2564 = vmatpush.msrb.mxu0 %v8595_v33  ;;  %v8598_v37 = vld [vmem:[#allocation2 + $0x3c8] sm:$0xff] }
 0xaba   :  { %12782 = vst [vmem:[#allocation81_spill] sm:$0xff] %v8583_v22  ;;  %2604 = vmatpush.msrb.mxu2 %v8598_v37  ;;  %v8601_v22 = vld [vmem:[#allocation2 + $0x630] sm:$0xff] }
 0xabb   :  { %12783 = vst [vmem:[#allocation47_spill] sm:$0xff] %v8586_v49  ;;  %2661 = vmatpush.msrb.mxu1 %v8601_v22  ;;  %v8604_v49 = vld [vmem:[#allocation2 + $0x638] sm:$0xff] }
 0xabc   :  { %12784 = vst [vmem:[#allocation84_spill] sm:$0xff] %v8589_v57  ;;  %2701 = vmatpush.msra.mxu3 %v8604_v49  ;;  %v8607_v57 = vld [vmem:[#allocation2 + $0x3a0] sm:$0xff] }
 0xabd   :  { %12785 = vst [vmem:[#allocation50_spill] sm:$0xff] %v8592_v62  ;;  %2565 = vmatpush.msrb.mxu0 %v8607_v57  ;;  %v8610_v62 = vld [vmem:[#allocation2 + $0x3a8] sm:$0xff] }
 0xabe   :  { %12786 = vst [vmem:[#allocation85_spill] sm:$0xff] %v8595_v33  ;;  %2605 = vmatpush.msrb.mxu2 %v8610_v62  ;;  %v8613_v33 = vld [vmem:[#allocation2 + $0x610] sm:$0xff] }
 0xabf   :  { %12787 = vst [vmem:[#allocation51_spill] sm:$0xff] %v8598_v37  ;;  %2662 = vmatpush.msrb.mxu1 %v8613_v33  ;;  %v8616_v37 = vld [vmem:[#allocation2 + $0x618] sm:$0xff] }
 0xac0   :  { %12788 = vst [vmem:[#allocation88_spill] sm:$0xff] %v8601_v22  ;;  %2702 = vmatpush.msra.mxu3 %v8616_v37  ;;  %v8619_v22 = vld [vmem:[#allocation2 + $0x380] sm:$0xff] }
 0xac1   :  { %12789 = vst [vmem:[#allocation54_spill] sm:$0xff] %v8604_v49  ;;  %2566 = vmatpush.msrb.mxu0 %v8619_v22  ;;  %v8622_v49 = vld [vmem:[#allocation2 + $0x388] sm:$0xff] }
 0xac2   :  { %12790 = vst [vmem:[#allocation89_spill] sm:$0xff] %v8607_v57  ;;  %2606 = vmatpush.msrb.mxu2 %v8622_v49  ;;  %v8625_v57 = vld [vmem:[#allocation2 + $0x5f0] sm:$0xff] }
 0xac3   :  { %12791 = vst [vmem:[#allocation55_spill] sm:$0xff] %v8610_v62  ;;  %2663 = vmatpush.msrb.mxu1 %v8625_v57  ;;  %v8628_v62 = vld [vmem:[#allocation2 + $0x5f8] sm:$0xff] }
 0xac4   :  { %12792 = vst [vmem:[#allocation58_spill] sm:$0xff] %v8613_v33  ;;  %2703 = vmatpush.msra.mxu3 %v8628_v62  ;;  %v8631_v33 = vld [vmem:[#allocation2 + $0x360] sm:$0xff] }
 0xac5   :  { %12793 = vst [vmem:[#allocation59_spill] sm:$0xff] %v8616_v37  ;;  %2567 = vmatpush.msrb.mxu0 %v8631_v33  ;;  %v8634_v37 = vld [vmem:[#allocation2 + $0x368] sm:$0xff] }
 0xac6   :  { %12794 = vst [vmem:[#allocation62_spill] sm:$0xff] %v8619_v22  ;;  %2607 = vmatpush.msrb.mxu2 %v8634_v37  ;;  %v8637_v22 = vld [vmem:[#allocation2 + $0x5d0] sm:$0xff] }
 0xac7   :  { %12795 = vst [vmem:[#allocation63_spill] sm:$0xff] %v8622_v49  ;;  %2664 = vmatpush.msrb.mxu1 %v8637_v22  ;;  %v8640_v49 = vld [vmem:[#allocation2 + $0x5d8] sm:$0xff] }
 0xac8   :  { %12796 = vst [vmem:[#allocation66_spill] sm:$0xff] %v8625_v57  ;;  %2704 = vmatpush.msra.mxu3 %v8640_v49  ;;  %v8643_v57 = vld [vmem:[#allocation2 + $0x340] sm:$0xff] }
 0xac9   :  { %12797 = vst [vmem:[#allocation67_spill] sm:$0xff] %v8628_v62  ;;  %2568 = vmatpush.msrb.mxu0 %v8643_v57  ;;  %v8646_v62 = vld [vmem:[#allocation2 + $0x348] sm:$0xff] }
 0xaca   :  { %12798 = vst [vmem:[#allocation70_spill] sm:$0xff] %v8631_v33  ;;  %2608 = vmatpush.msrb.mxu2 %v8646_v62  ;;  %v8649_v33 = vld [vmem:[#allocation2 + $0x5b0] sm:$0xff] }
 0xacb   :  { %12799 = vst [vmem:[#allocation71_spill] sm:$0xff] %v8634_v37  ;;  %2665 = vmatpush.msrb.mxu1 %v8649_v33  ;;  %v8652_v37 = vld [vmem:[#allocation2 + $0x5b8] sm:$0xff] }
 0xacc   :  { %12800 = vst [vmem:[#allocation74_spill] sm:$0xff] %v8637_v22  ;;  %2705 = vmatpush.msra.mxu3 %v8652_v37  ;;  %v8655_v22 = vld [vmem:[#allocation2 + $0x320] sm:$0xff] }
 0xacd   :  { %12801 = vst [vmem:[#allocation75_spill] sm:$0xff] %v8640_v49  ;;  %2569 = vmatpush.msrb.mxu0 %v8655_v22  ;;  %v8658_v49 = vld [vmem:[#allocation2 + $0x328] sm:$0xff] }
 0xace   :  { %12802 = vst [vmem:[#allocation78_spill] sm:$0xff] %v8643_v57  ;;  %2609 = vmatpush.msrb.mxu2 %v8658_v49  ;;  %v8661_v57 = vld [vmem:[#allocation2 + $0x590] sm:$0xff] }
 0xacf   :  { %12803 = vst [vmem:[#allocation79_spill] sm:$0xff] %v8646_v62  ;;  %2666 = vmatpush.msrb.mxu1 %v8661_v57  ;;  %v8664_v62 = vld [vmem:[#allocation2 + $0x598] sm:$0xff] }
 0xad0   :  { %12804 = vst [vmem:[#allocation82_spill] sm:$0xff] %v8649_v33  ;;  %2706 = vmatpush.msra.mxu3 %v8664_v62  ;;  %v8667_v33 = vld [vmem:[#allocation2 + $0x300] sm:$0xff] }
 0xad1   :  { %12805 = vst [vmem:[#allocation83_spill] sm:$0xff] %v8652_v37  ;;  %2570 = vmatpush.msrb.mxu0 %v8667_v33  ;;  %v8670_v37 = vld [vmem:[#allocation2 + $0x308] sm:$0xff] }
 0xad2   :  { %12806 = vst [vmem:[#allocation86_spill] sm:$0xff] %v8655_v22  ;;  %2610 = vmatpush.msrb.mxu2 %v8670_v37  ;;  %v8673_v22 = vld [vmem:[#allocation2 + $0x570] sm:$0xff] }
 0xad3   :  { %12807 = vst [vmem:[#allocation87_spill] sm:$0xff] %v8658_v49  ;;  %2667 = vmatpush.msrb.mxu1 %v8673_v22  ;;  %v8676_v49 = vld [vmem:[#allocation2 + $0x578] sm:$0xff] }
 0xad4   :  { %12808 = vst [vmem:[#allocation90_spill] sm:$0xff] %v8661_v57  ;;  %2707 = vmatpush.msra.mxu3 %v8676_v49  ;;  %v8679_v57 = vld [vmem:[#allocation2 + $0x2e0] sm:$0xff] }
 0xad5   :  { %12809 = vst [vmem:[#allocation91_spill] sm:$0xff] %v8664_v62  ;;  %2571 = vmatpush.msrb.mxu0 %v8679_v57  ;;  %v8682_v62 = vld [vmem:[#allocation2 + $0x2e8] sm:$0xff] }
 0xad6   :  { %12810 = vst [vmem:[#allocation92_spill] sm:$0xff] %v8667_v33  ;;  %2611 = vmatpush.msrb.mxu2 %v8682_v62  ;;  %v8685_v33 = vld [vmem:[#allocation2 + $0x550] sm:$0xff] }
 0xad7   :  { %12811 = vst [vmem:[#allocation93_spill] sm:$0xff] %v8670_v37  ;;  %2668 = vmatpush.msrb.mxu1 %v8685_v33  ;;  %v8688_v37 = vld [vmem:[#allocation2 + $0x558] sm:$0xff] }
 0xad8   :  { %12812 = vst [vmem:[#allocation94_spill] sm:$0xff] %v8673_v22  ;;  %2708 = vmatpush.msra.mxu3 %v8688_v37  ;;  %v8691_v22 = vld [vmem:[#allocation2 + $0x2c0] sm:$0xff] }
 0xad9   :  { %12813 = vst [vmem:[#allocation95_spill] sm:$0xff] %v8676_v49  ;;  %2572 = vmatpush.msrb.mxu0 %v8691_v22  ;;  %v8694_v49 = vld [vmem:[#allocation2 + $0x2c8] sm:$0xff] }
 0xada   :  { %12814 = vst [vmem:[#allocation104_spill] sm:$0xff] %v8679_v57  ;;  %2612 = vmatpush.msrb.mxu2 %v8694_v49  ;;  %v8697_v57 = vld [vmem:[#allocation2 + $0x530] sm:$0xff] }
 0xadb   :  { %12815 = vst [vmem:[#allocation105_spill] sm:$0xff] %v8682_v62  ;;  %2669 = vmatpush.msrb.mxu1 %v8697_v57  ;;  %v8700_v62 = vld [vmem:[#allocation2 + $0x538] sm:$0xff] }
 0xadc   :  { %12816 = vst [vmem:[#allocation106_spill] sm:$0xff] %v8685_v33  ;;  %2709 = vmatpush.msra.mxu3 %v8700_v62  ;;  %v8703_v33 = vld [vmem:[#allocation2 + $0x4b0] sm:$0xff] }
 0xadd   :  { %12817 = vst [vmem:[#allocation107_spill] sm:$0xff] %v8688_v37  ;;  %2637 = vmatpush.msra.mxu0 %v8703_v33  ;;  %v8706_v37 = vld [vmem:[#allocation2 + $0x4b8] sm:$0xff] }
 0xade   :  { %12818 = vst [vmem:[#allocation108_spill] sm:$0xff] %v8691_v22  ;;  %2677 = vmatpush.msra.mxu2 %v8706_v37  ;;  %v8709_v22 = vld [vmem:[#allocation2 + $0x510] sm:$0xff] }
 0xadf   :  { %12819 = vst [vmem:[#allocation109_spill] sm:$0xff] %v8694_v49  ;;  %2670 = vmatpush.msrb.mxu1 %v8709_v22  ;;  %v8712_v49 = vld [vmem:[#allocation2 + $0x518] sm:$0xff] }
 0xae0   :  { %12820 = vst [vmem:[#allocation110_spill] sm:$0xff] %v8697_v57  ;;  %2710 = vmatpush.msra.mxu3 %v8712_v49  ;;  %v8715_v57 = vld [vmem:[#allocation2 + $0x490] sm:$0xff] }
 0xae1   :  { %12821 = vst [vmem:[#allocation111_spill] sm:$0xff] %v8700_v62  ;;  %2638 = vmatpush.msra.mxu0 %v8715_v57  ;;  %v8718_v62 = vld [vmem:[#allocation2 + $0x498] sm:$0xff] }
 0xae2   :  { %12822 = vst [vmem:[#allocation112_spill] sm:$0xff] %v8703_v33  ;;  %2678 = vmatpush.msra.mxu2 %v8718_v62  ;;  %v8721_v33 = vld [vmem:[#allocation2 + $0x4f0] sm:$0xff] }
 0xae3   :  { %12823 = vst [vmem:[#allocation113_spill] sm:$0xff] %v8706_v37  ;;  %2671 = vmatpush.msrb.mxu1 %v8721_v33  ;;  %v8724_v37 = vld [vmem:[#allocation2 + $0x4f8] sm:$0xff] }
 0xae4   :  { %12824 = vst [vmem:[#allocation114_spill] sm:$0xff] %v8709_v22  ;;  %2711 = vmatpush.msra.mxu3 %v8724_v37  ;;  %v8727_v22 = vld [vmem:[#allocation2 + $0x470] sm:$0xff] }
 0xae5   :  { %12825 = vst [vmem:[#allocation115_spill] sm:$0xff] %v8712_v49  ;;  %2639 = vmatpush.msra.mxu0 %v8727_v22  ;;  %v8730_v49 = vld [vmem:[#allocation2 + $0x478] sm:$0xff] }
 0xae6   :  { %12826 = vst [vmem:[#allocation116_spill] sm:$0xff] %v8715_v57  ;;  %2679 = vmatpush.msra.mxu2 %v8730_v49  ;;  %v8733_v57 = vld [vmem:[#allocation2 + $0x4d0] sm:$0xff] }
 0xae7   :  { %12827 = vst [vmem:[#allocation117_spill] sm:$0xff] %v8718_v62  ;;  %2672 = vmatpush.msrb.mxu1 %v8733_v57  ;;  %v8736_v62 = vld [vmem:[#allocation2 + $0x4d8] sm:$0xff] }
 0xae8   :  { %12828 = vst [vmem:[#allocation118_spill] sm:$0xff] %v8721_v33  ;;  %2712 = vmatpush.msra.mxu3 %v8736_v62  ;;  %v8739_v33 = vld [vmem:[#allocation2 + $0x450] sm:$0xff] }
 0xae9   :  { %12829 = vst [vmem:[#allocation119_spill] sm:$0xff] %v8724_v37  ;;  %2640 = vmatpush.msra.mxu0 %v8739_v33  ;;  %v8742_v37 = vld [vmem:[#allocation2 + $0x458] sm:$0xff] }
 0xaea   :  { %12830 = vst [vmem:[#allocation120_spill] sm:$0xff] %v8727_v22  ;;  %2680 = vmatpush.msra.mxu2 %v8742_v37  ;;  %v8745_v22 = vld [vmem:[#allocation2 + $0x430] sm:$0xff] }
 0xaeb   :  { %12831 = vst [vmem:[#allocation121_spill] sm:$0xff] %v8730_v49  ;;  %2641 = vmatpush.msra.mxu0 %v8745_v22  ;;  %v8748_v49 = vld [vmem:[#allocation2 + $0x438] sm:$0xff] }
 0xaec   :  { %12832 = vst [vmem:[#allocation122_spill] sm:$0xff] %v8733_v57  ;;  %2681 = vmatpush.msra.mxu2 %v8748_v49  ;;  %v8751_v57 = vld [vmem:[#allocation2 + $0x410] sm:$0xff] }
 0xaed   :  { %12833 = vst [vmem:[#allocation123_spill] sm:$0xff] %v8736_v62  ;;  %2642 = vmatpush.msra.mxu0 %v8751_v57  ;;  %v8754_v62 = vld [vmem:[#allocation2 + $0x418] sm:$0xff] }
 0xaee   :  { %12834 = vst [vmem:[#allocation124_spill] sm:$0xff] %v8739_v33  ;;  %2682 = vmatpush.msra.mxu2 %v8754_v62  ;;  %v8757_v33 = vld [vmem:[#allocation2 + $0x3f0] sm:$0xff] }
 0xaef   :  { %12835 = vst [vmem:[#allocation125_spill] sm:$0xff] %v8742_v37  ;;  %2643 = vmatpush.msra.mxu0 %v8757_v33  ;;  %v8760_v37 = vld [vmem:[#allocation2 + $0x3f8] sm:$0xff] }
 0xaf0   :  { %12836 = vst [vmem:[#allocation126_spill] sm:$0xff] %v8745_v22  ;;  %2683 = vmatpush.msra.mxu2 %v8760_v37  ;;  %v8763_v22 = vld [vmem:[#allocation2 + $0x3d0] sm:$0xff] }
 0xaf1   :  { %12837 = vst [vmem:[#allocation127_spill] sm:$0xff] %v8748_v49  ;;  %2644 = vmatpush.msra.mxu0 %v8763_v22  ;;  %v8766_v49 = vld [vmem:[#allocation2 + $0x3d8] sm:$0xff] }
 0xaf2   :  { %12838 = vst [vmem:[#allocation128_spill] sm:$0xff] %v8751_v57  ;;  %2684 = vmatpush.msra.mxu2 %v8766_v49  ;;  %v8769_v57 = vld [vmem:[#allocation2 + $0x3b0] sm:$0xff] }
 0xaf3   :  { %12839 = vst [vmem:[#allocation129_spill] sm:$0xff] %v8754_v62  ;;  %2645 = vmatpush.msra.mxu0 %v8769_v57  ;;  %v8772_v62 = vld [vmem:[#allocation2 + $0x3b8] sm:$0xff] }
 0xaf4   :  { %12840 = vst [vmem:[#allocation130_spill] sm:$0xff] %v8757_v33  ;;  %2685 = vmatpush.msra.mxu2 %v8772_v62  ;;  %v8775_v33 = vld [vmem:[#allocation2 + $0x390] sm:$0xff] }
 0xaf5   :  { %12841 = vst [vmem:[#allocation131_spill] sm:$0xff] %v8760_v37  ;;  %2646 = vmatpush.msra.mxu0 %v8775_v33  ;;  %v8778_v37 = vld [vmem:[#allocation2 + $0x398] sm:$0xff] }
 0xaf6   :  { %12842 = vst [vmem:[#allocation132_spill] sm:$0xff] %v8763_v22  ;;  %2686 = vmatpush.msra.mxu2 %v8778_v37  ;;  %v8781_v22 = vld [vmem:[#allocation2 + $0x370] sm:$0xff] }
 0xaf7   :  { %12843 = vst [vmem:[#allocation133_spill] sm:$0xff] %v8766_v49  ;;  %2647 = vmatpush.msra.mxu0 %v8781_v22  ;;  %v8784_v49 = vld [vmem:[#allocation2 + $0x378] sm:$0xff] }
 0xaf8   :  { %12844 = vst [vmem:[#allocation134_spill] sm:$0xff] %v8769_v57  ;;  %2687 = vmatpush.msra.mxu2 %v8784_v49  ;;  %v8787_v57 = vld [vmem:[#allocation2 + $0x350] sm:$0xff] }
 0xaf9   :  { %12845 = vst [vmem:[#allocation135_spill] sm:$0xff] %v8772_v62  ;;  %2648 = vmatpush.msra.mxu0 %v8787_v57  ;;  %v8790_v62 = vld [vmem:[#allocation2 + $0x358] sm:$0xff] }
 0xafa   :  { %12846 = vst [vmem:[#allocation136_spill] sm:$0xff] %v8775_v33  ;;  %2688 = vmatpush.msra.mxu2 %v8790_v62  ;;  %v8793_v33 = vld [vmem:[#allocation2 + $0x330] sm:$0xff] }
 0xafb   :  { %12847 = vst [vmem:[#allocation137_spill] sm:$0xff] %v8778_v37  ;;  %2649 = vmatpush.msra.mxu0 %v8793_v33  ;;  %v8796_v37 = vld [vmem:[#allocation2 + $0x338] sm:$0xff] }
 0xafc   :  { %12848 = vst [vmem:[#allocation138_spill] sm:$0xff] %v8781_v22  ;;  %2689 = vmatpush.msra.mxu2 %v8796_v37  ;;  %v8799_v22 = vld [vmem:[#allocation2 + $0x310] sm:$0xff] }
 0xafd   :  { %12849 = vst [vmem:[#allocation139_spill] sm:$0xff] %v8784_v49  ;;  %2650 = vmatpush.msra.mxu0 %v8799_v22  ;;  %v8802_v49 = vld [vmem:[#allocation2 + $0x318] sm:$0xff] }
 0xafe   :  { %12850 = vst [vmem:[#allocation140_spill] sm:$0xff] %v8787_v57  ;;  %2690 = vmatpush.msra.mxu2 %v8802_v49  ;;  %v8805_v57 = vld [vmem:[#allocation2 + $0x2f0] sm:$0xff] }
 0xaff   :  { %12851 = vst [vmem:[#allocation141_spill] sm:$0xff] %v8790_v62  ;;  %2651 = vmatpush.msra.mxu0 %v8805_v57  ;;  %v8808_v62 = vld [vmem:[#allocation2 + $0x2f8] sm:$0xff] }
 0xb00   :  { %12852 = vst [vmem:[#allocation142_spill] sm:$0xff] %v8793_v33  ;;  %2691 = vmatpush.msra.mxu2 %v8808_v62  ;;  %v8811_v33 = vld [vmem:[#allocation2 + $0x2d0] sm:$0xff] }
 0xb01   :  { %12853 = vst [vmem:[#allocation143_spill] sm:$0xff] %v8796_v37  ;;  %2652 = vmatpush.msra.mxu0 %v8811_v33  ;;  %v8814_v37 = vld [vmem:[#allocation2 + $0x2d8] sm:$0xff]  ;;  %v2097_v19 = vpop.f32.mrf.mxu0 }
 0xb02   :  { %12854 = vst [vmem:[#allocation144_spill] sm:$0xff] %v8799_v22  ;;  %2692 = vmatpush.msra.mxu2 %v8814_v37  ;;  %v2117_v22 = vpop.f32.mrf.mxu1 }
 0xb03   :  { %12855 = vst [vmem:[#allocation145_spill] sm:$0xff] %v8802_v49  ;;  %v12860_v49 = vld [vmem:[#allocation8_spill] sm:$0xff] }
 0xb04   :  { %12856 = vst [vmem:[#allocation146_spill] sm:$0xff] %v8805_v57  ;;  %v2098_v56 = vadd.f32 %v2097_v19, %v12860_v49 }
 0xb05   :  { %12857 = vst [vmem:[#allocation147_spill] sm:$0xff] %v8808_v62  ;;  %v2157_v62 = vpop.f32.mrf.mxu3 }
 0xb06   :  { %12858 = vst [vmem:[#allocation148_spill] sm:$0xff] %v8811_v33  ;;  %v2118_v17 = vadd.f32 %v2117_v22, %v2098_v56  ;;  %v12864_v56 = vld [vmem:[#allocation99_spill] sm:$0xff] }
 0xb07   :  { %12859 = vst [vmem:[#allocation149_spill] sm:$0xff] %v8814_v37  ;;  %v2137_v57 = vpop.f32.mrf.mxu2 }
 0xb08   :  { %v5561_v8 = vmul.f32 -1.442695, %v2118_v17  ;;  %v2138_v41 = vadd.f32 %v2137_v57, %v12861_v47 }
 0xb0a   :  { %v2197_v34 = vpop.f32.mrf.mxu1  ;;  %5772 = vpow2.f32 %v5561_v8  ;;  %v2158_v54 = vadd.f32 %v2157_v62, %v2138_v41  ;;  %v2177_v24 = vpop.f32.mrf.mxu0 }
 0xb0b   :  { %v2178_v10 = vadd.f32 %v2177_v24, %v12862_v32 }
 0xb0c   :  { %v5562_v37 = vmul.f32 -1.442695, %v2158_v54 }
 0xb0d   :  { %v2198_v58 = vadd.f32 %v2197_v34, %v2178_v10  ;;  %v12865_v34 = vld [vmem:[#allocation11_spill] sm:$0xff] }
 0xb0e   :  { %5774 = vpow2.f32 %v5562_v37 }
 0xb0f   :  { %v5563_v22 = vmul.f32 -1.442695, %v2198_v58 }
 0xb10   :  { %v5773_v18 = vpop.eup %5772  ;;  %v2217_v24 = vpop.f32.mrf.mxu2 }
 0xb11   :  { %v2249_v8 = vadd.f32 1.0, %v5773_v18  ;;  %v2218_v37 = vadd.f32 %v2217_v24, %v12865_v34 }
 0xb12   :  { %v2343_v27 = vpop.f32.mrf.mxu1 }
 0xb13   :  { %v2391_v1 = vrot.slane %v2343_v27, 6  ;;  %v2395_v33 = vrot.slane %v2343_v27, 7  ;;  %vm2257_vm3 = vweird.f32 %v2249_v8 }
 0xb14   :  { %v5775_v41 = vpop.eup %5774 }
 0xb15   :  { %v2407_v12 = vadd.f32 %v2391_v1, %v12863_v2  ;;  %v2411_v17 = vadd.f32 %v2395_v33, %v12864_v56  ;;  %v2250_v27 = vadd.f32 1.0, %v5775_v41 }
 0xb17   :  { %v5565_v19 = vmul.f32 -1.442695, %v2407_v12  ;;  %v5568_v57 = vmul.f32 -1.442695, %v2411_v17  ;;  %v2237_v12 = vpop.f32.mrf.mxu3  ;;  %vm2272_vm4 = vweird.f32 %v2250_v27 }
 0xb19   :  { %5776 = vpow2.f32 %v5565_v19 }
 0xb1a   :  { %5778 = vrcp.f32 %v2249_v8 }
 0xb1b   :  { %5780 = vpow2.f32 %v5563_v22  ;;  %v2238_v22 = vadd.f32 %v2237_v12, %v2218_v37 }
 0xb1c   :  { %5782 = vpow2.f32 %v5568_v57  ;;  %v2263_v57 = vand.u32 2147483648, %v2249_v8 }
 0xb1d   :  { %5784 = vrcp.f32 %v2250_v27 }
 0xb1e   :  { %v2264_v34 = vor.u32 1.1754944e-38, %v2263_v57 }
 0xb1f   :  { %v5777_v62 = vpop.eup %5776 }
 0xb20   :  { %v5779_v54 = vpop.eup %5778  ;;  %v8823_v33 = vadd.f32 1.0, %v5777_v62  ;;  %v2278_v62 = vand.u32 2147483648, %v2250_v27 }
 0xb21   :  { %v2253_v1 = vmul.f32 %v5779_v54, %v2249_v8  ;;  %v5781_v10 = vpop.eup %5780  ;;  %vm2258_vm14 = vweird.f32 %v5779_v54 }
 0xb22   :  { %v8825_v18 = vadd.f32 1.0, %v5781_v10  ;;  %v5783_v58 = vpop.eup %5782  ;;  %vm8831_vm15 = vmor %vm2257_vm3, %vm2258_vm14  ;;  %vm2458_vm9 = vweird.f32 %v8823_v33 }
 0xb23   :  { %v2254_v2 = vsub.f32 1.0, %v2253_v1  ;;  %v5785_v19 = vpop.eup %5784  ;;  %v8829_v32 = vadd.f32 1.0, %v5783_v58  ;;  %v2261_v1 = vand.u32 2147483647, %v2249_v8  ;;  %v2323_v58 = vpop.f32.mrf.mxu0 }
 0xb24   :  { %5786 = vrcp.f32 %v8825_v18  ;;  %v2268_v41 = vmul.f32 %v5785_v19, %v2250_v27  ;;  %vm2273_vm0 = vweird.f32 %v5785_v19  ;;  %v2394_v47 = vrot.slane %v2323_v58, 7 }
 0xb25   :  { %v2255_v17 = vmul.f32 %v5779_v54, %v2254_v2  ;;  %5788 = vrcp.f32 %v8823_v33  ;;  %vm2262_vm5 = vcmp.eq.f32.partialorder %v2261_v1, 8.507059e+37  ;;  %vm2274_vm6 = vmor %vm2272_vm4, %vm2273_vm0  ;;  %vm2287_vm10 = vweird.f32 %v8825_v18 }
 0xb26   :  { %v2269_v24 = vsub.f32 1.0, %v2268_v41  ;;  %5790 = vtanh.f32 %v2238_v22  ;;  %v2390_v41 = vrot.slane %v2323_v58, 6  ;;  %v2279_v22 = vor.u32 1.1754944e-38, %v2278_v62 }
 0xb27   :  { %v2256_v56 = vadd.f32 %v5779_v54, %v2255_v17  ;;  %v2276_v17 = vand.u32 2147483647, %v2250_v27  ;;  %5792 = vrcp.f32 %v8829_v32  ;;  %v12869_v27 = vld [vmem:[#allocation12_spill] sm:$0xff] }
 0xb28   :  { %v2270_v37 = vmul.f32 %v5785_v19, %v2269_v24 }
 0xb29   :  { %v2260_v12 = vsel %vm8831_vm15, %v5779_v54, %v2256_v56  ;;  %v2406_v56 = vadd.f32 %v2390_v41, %v12709_v36  ;;  %v12868_v54 = vld [vmem:[#allocation98_spill] sm:$0xff]  ;;  %vm2277_vm7 = vcmp.eq.f32.partialorder %v2276_v17, 8.507059e+37  ;;  %v12871_v41 = vld [vmem:[#allocation100_spill] sm:$0xff]  ;;  %vm2503_vm15 = vweird.f32 %v8829_v32 }
 0xb2a   :  { %v8835_v2 = vpop.eup %5786  ;;  %v2271_v57 = vadd.f32 %v5785_v19, %v2270_v37  ;;  %v2265_v21 = vsel %vm2262_vm5, %v2264_v34, %v2260_v12  ;;  %v2410_v10 = vadd.f32 %v2394_v47, %v12868_v54  ;;  %v2363_v37 = vpop.f32.mrf.mxu2 }
 0xb2b   :  { %v2283_v8 = vmul.f32 %v8835_v2, %v8825_v18  ;;  %v8842_v49 = vpop.eup %5788  ;;  %v5564_v61 = vmul.f32 -1.442695, %v2406_v56  ;;  %v2392_v12 = vrot.slane %v2363_v37, 6  ;;  %v2396_v47 = vrot.slane %v2363_v37, 7 }
 0xb2c   :  { %v2275_v42 = vsel %vm2274_vm6, %v5785_v19, %v2271_v57  ;;  %v5791_v46 = vpop.eup %5790  ;;  %v2454_v6 = vmul.f32 %v8842_v49, %v8823_v33  ;;  %v5567_v5 = vmul.f32 -1.442695, %v2410_v10  ;;  %vm2288_vm8 = vweird.f32 %v8835_v2  ;;  %v2383_v10 = vpop.f32.mrf.mxu3 }
 0xb2d   :  { %v2284_v24 = vsub.f32 1.0, %v2283_v8  ;;  %v2280_v58 = vsel %vm2277_vm7, %v2279_v22, %v2275_v42  ;;  %v2299_v1 = vmul.f32 %v5791_v46, %v2265_v21  ;;  %v8850_v34 = vpop.eup %5792  ;;  %5794 = vpow2.f32 %v5564_v61  ;;  %v12872_v42 = vld [vmem:[#allocation101_spill] sm:$0xff]  ;;  %vm2289_vm11 = vmor %vm2287_vm10, %vm2288_vm8 }
 0xb2e   :  { %v2298_v62 = vmul.f32 %v2280_v58, %v12869_v27  ;;  %5796 = vpow2.f32 %v5567_v5  ;;  %v2455_v17 = vsub.f32 1.0, %v2454_v6  ;;  %v2408_v57 = vadd.f32 %v2392_v12, %v12871_v41 }
 0xb2f   :  { %v2285_v8 = vmul.f32 %v8835_v2, %v2284_v24  ;;  %v2412_v22 = vadd.f32 %v2396_v47, %v12872_v42  ;;  %v2499_v56 = vmul.f32 %v8850_v34, %v8829_v32  ;;  %v2293_v24 = vand.u32 2147483648, %v8825_v18 }
 0xb30   :  { %v8852_v19 = vadd.f32 %v2299_v1, %v2298_v62  ;;  %v5566_v61 = vmul.f32 -1.442695, %v2408_v57  ;;  %v2291_v5 = vand.u32 2147483647, %v8825_v18  ;;  %v2456_v58 = vmul.f32 %v8842_v49, %v2455_v17 }
 0xb31   :  { %v2286_v46 = vadd.f32 %v8835_v2, %v2285_v8  ;;  %v5569_v21 = vmul.f32 -1.442695, %v2412_v22  ;;  %v2500_v62 = vsub.f32 1.0, %v2499_v56  ;;  %v2393_v8 = vrot.slane %v2383_v10, 6 }
 0xb32   :  { %12870 = vst [vmem:[#allocation98_spill] sm:$0xff] %v8852_v19  ;;  %5798 = vtanh.f32 %v8852_v19  ;;  %v2397_v12 = vrot.slane %v2383_v10, 7  ;;  %v2294_v57 = vor.u32 1.1754944e-38, %v2293_v24  ;;  %vm2292_vm12 = vcmp.eq.f32.partialorder %v2291_v5, 8.507059e+37  ;;  %v12874_v24 = vld [vmem:[#allocation102_spill] sm:$0xff] }
 0xb33   :  { %v5795_v6 = vpop.eup %5794  ;;  %5800 = vpow2.f32 %v5566_v61  ;;  %v2290_v37 = vsel %vm2289_vm11, %v8835_v2, %v2286_v46  ;;  %v2457_v17 = vadd.f32 %v8842_v49, %v2456_v58  ;;  %vm2459_vm13 = vweird.f32 %v8842_v49 }
 0xb34   :  { %v5797_v27 = vpop.eup %5796  ;;  %v8865_v1 = vadd.f32 1.0, %v5795_v6  ;;  %5802 = vpow2.f32 %v5569_v21  ;;  %v2295_v18 = vsel %vm2292_vm12, %v2294_v57, %v2290_v37  ;;  %v2501_v56 = vmul.f32 %v8850_v34, %v2500_v62  ;;  %v12875_v6 = vld [vmem:[#allocation103_spill] sm:$0xff]  ;;  %vm8886_vm1 = vmor %vm2458_vm9, %vm2459_vm13 }
 0xb35   :  { %v8868_v47 = vadd.f32 1.0, %v5797_v27  ;;  %v2464_v46 = vand.u32 2147483648, %v8823_v33  ;;  %v2409_v10 = vadd.f32 %v2393_v8, %v12874_v24  ;;  %v2413_v5 = vadd.f32 %v2397_v12, %v12875_v6 }
 0xb36   :  { %5804 = vrcp.f32 %v8865_v1  ;;  %v2462_v58 = vand.u32 2147483647, %v8823_v33  ;;  %vm2504_vm14 = vweird.f32 %v8850_v34  ;;  %v2509_v8 = vand.u32 2147483648, %v8829_v32 }
 0xb37   :  { %5806 = vrcp.f32 %v8868_v47  ;;  %v2461_v33 = vsel %vm8886_vm1, %v8842_v49, %v2457_v17  ;;  %v2532_v6 = vrot.slane %v8304_v28, 7  ;;  %v2465_v24 = vor.u32 1.1754944e-38, %v2464_v46  ;;  %vm8907_vm0 = vmor %vm2503_vm15, %vm2504_vm14  ;;  %v12884_v17 = vld [vmem:[#allocation16_spill] sm:$0xff] }
 0xb38   :  { %v5799_v22 = vpop.eup %5798  ;;  %vm2463_vm3 = vcmp.eq.f32.partialorder %v2462_v58, 8.507059e+37  ;;  %v2510_v46 = vor.u32 1.1754944e-38, %v2509_v8  ;;  %v2494_v57 = vand.u32 2147483648, %v8868_v47  ;;  %vm2443_vm7 = vweird.f32 %v8865_v1 }
 0xb39   :  { %v8875_v61 = vmul.f32 %v5799_v22, %v2295_v18  ;;  %v5801_v2 = vpop.eup %5800  ;;  %v2507_v22 = vand.u32 2147483647, %v8829_v32  ;;  %v2466_v49 = vsel %vm2463_vm3, %v2465_v24, %v2461_v33  ;;  %v2449_v24 = vand.u32 2147483648, %v8865_v1 }
 0xb3a   :  { %v5803_v27 = vpop.eup %5802  ;;  %v8883_v37 = vadd.f32 1.0, %v5801_v2  ;;  %v2502_v2 = vadd.f32 %v8850_v34, %v2501_v56  ;;  %vm2488_vm10 = vweird.f32 %v8868_v47 }
 0xb3b   :  { %12873 = vst [vmem:[#allocation12_spill] sm:$0xff] %v8875_v61  ;;  %v2552_v62 = vrot.slane %v8875_v61, 6  ;;  %v8893_v12 = vadd.f32 1.0, %v5803_v27  ;;  %vm8911_vm4 = vcmp.eq.f32.partialorder %v2507_v22, 8.507059e+37 }
 0xb3c   :  { %v5805_v18 = vpop.eup %5804  ;;  %5808 = vrcp.f32 %v8883_v37  ;;  %v2506_v32 = vsel %vm8907_vm0, %v8850_v34, %v2502_v2  ;;  %v2492_v34 = vand.u32 2147483647, %v8868_v47  ;;  %vm2473_vm14 = vweird.f32 %v8883_v37 }
 0xb3d   :  { %v2554_v21 = vrot.slane %v2552_v62, 2  ;;  %v5807_v61 = vpop.eup %5806  ;;  %v2439_v19 = vmul.f32 %v5805_v18, %v8865_v1  ;;  %5810 = vrcp.f32 %v8893_v12  ;;  %vm2444_vm5 = vweird.f32 %v5805_v18 }
 0xb3e   :  { %5812 = vtanh.f32 %v2409_v10  ;;  %v2484_v27 = vmul.f32 %v5807_v61, %v8868_v47  ;;  %v2447_v62 = vand.u32 2147483647, %v8865_v1  ;;  %vm2489_vm6 = vweird.f32 %v5807_v61  ;;  %vm2445_vm8 = vmor %vm2443_vm7, %vm2444_vm5 }
 0xb3f   :  { %2593 = vmatmul.f32.vlgmr.msra.gmra.mxu1 %v2554_v21  ;;  %2633 = vmatmul.f32.vlgmr.msrb.gmra.mxu3 %v2554_v21  ;;  %5814 = vtanh.f32 %v2413_v5  ;;  %v2440_v56 = vsub.f32 1.0, %v2439_v19  ;;  %v12882_v5 = vld [vmem:[#allocation14_spill] sm:$0xff]  ;;  %v12883_v19 = vld [vmem:[#allocation15_spill] sm:$0xff]  ;;  %v2511_v33 = vsel %vm8911_vm4, %v2510_v46, %v2506_v32  ;;  %vm2490_vm12 = vmor %vm2488_vm10, %vm2489_vm6  ;;  %v2495_v1 = vor.u32 1.1754944e-38, %v2494_v57 }
 0xb40   :  { %2804 = vmatpush.msra.mxu1 %v8222_v51  ;;  %2844 = vmatpush.msrb.mxu3 %v8225_v11  ;;  %v2485_v10 = vsub.f32 1.0, %v2484_v27  ;;  %v2536_v11 = vmul.f32 %v2532_v6, %v2466_v49  ;;  %v2450_v49 = vor.u32 1.1754944e-38, %v2449_v24  ;;  %vm2448_vm11 = vcmp.eq.f32.partialorder %v2447_v62, 8.507059e+37 }
 0xb41   :  { %v2441_v58 = vmul.f32 %v5805_v18, %v2440_v56  ;;  %v12885_v56 = vld [vmem:[#allocation17_spill] sm:$0xff]  ;;  %vm2493_vm13 = vcmp.eq.f32.partialorder %v2492_v34, 8.507059e+37  ;;  %vm2518_vm3 = vweird.f32 %v8893_v12  ;;  %vm2549_vm6 = vcmask 1043459  }
 0xb42   :  { %2805 = vmatpush.msra.mxu1 %v12882_v5  ;;  %2845 = vmatpush.msrb.mxu3 %v12883_v19  ;;  %v8925_v51 = vpop.eup %5808  ;;  %v2486_v22 = vmul.f32 %v5807_v61, %v2485_v10 }
 0xb43   :  { %v8928_v8 = vpop.eup %5810  ;;  %v2442_v2 = vadd.f32 %v5805_v18, %v2441_v58  ;;  %v2469_v27 = vmul.f32 %v8925_v51, %v8883_v37  ;;  %vm2474_vm9 = vweird.f32 %v8925_v51 }
 0xb44   :  { %2806 = vmatpush.msra.mxu1 %v12884_v17  ;;  %2846 = vmatpush.msrb.mxu3 %v12885_v56  ;;  %v5813_v6 = vpop.eup %5812  ;;  %v2487_v10 = vadd.f32 %v5807_v61, %v2486_v22  ;;  %v2514_v28 = vmul.f32 %v8928_v8, %v8893_v12  ;;  %vm2519_vm1 = vweird.f32 %v8928_v8  ;;  %vm2475_vm15 = vmor %vm2473_vm14, %vm2474_vm9  ;;  %v9032_v56 = vld [vmem:[#allocation2 + $0x210] sm:$0xff] }
 0xb45   :  { %v5815_v32 = vpop.eup %5814  ;;  %v2446_v46 = vsel %vm2445_vm8, %v5805_v18, %v2442_v2  ;;  %v2470_v58 = vsub.f32 1.0, %v2469_v27  ;;  %v12886_v18 = vrot.slane %v8293_v59, 7  ;;  %v2524_v59 = vand.u32 2147483648, %v8893_v12  ;;  %vm2520_vm0 = vmor %vm2518_vm3, %vm2519_vm1 }
 0xb46   :  { %2807 = vmatpush.msra.mxu1 %v8276_v25  ;;  %2847 = vmatpush.msrb.mxu3 %v8279_v38  ;;  %v2451_v5 = vsel %vm2448_vm11, %v2450_v49, %v2446_v46  ;;  %v2491_v19 = vsel %vm2490_vm12, %v5807_v61, %v2487_v10  ;;  %v2515_v24 = vsub.f32 1.0, %v2514_v28  ;;  %v9040_v49 = vld [vmem:[#allocation2 + $0x1f0] sm:$0xff]  ;;  %v9053_v28 = vld [vmem:[#allocation2 + $0x1a0] sm:$0xff] }
 0xb47   :  { %2673 = vmatmul.f32.vlgmr.msrb.gmra.mxu1 %v2554_v21  ;;  %2713 = vmatmul.f32.vlgmr.msra.gmra.mxu3 %v2554_v21  ;;  %v2496_v47 = vsel %vm2493_vm13, %v2495_v1, %v2491_v19  ;;  %v2538_v22 = vmul.f32 %v5813_v6, %v2451_v5  ;;  %v2471_v17 = vmul.f32 %v8925_v51, %v2470_v58  ;;  %v2525_v34 = vor.u32 1.1754944e-38, %v2524_v59  ;;  %v9037_v6 = vld [vmem:[#allocation2 + $0x1e0] sm:$0xff]  ;;  %v9048_v10 = vld [vmem:[#allocation2 + $0x1d0] sm:$0xff] }
 0xb48   :  { %2808 = vmatpush.msra.mxu1 %v8287_v31  ;;  %2848 = vmatpush.msrb.mxu3 %v8290_v7  ;;  %v2537_v62 = vmul.f32 %v12886_v18, %v2511_v33  ;;  %v2539_v25 = vmul.f32 %v5815_v32, %v2496_v47  ;;  %v2516_v38 = vmul.f32 %v8928_v8, %v2515_v24  ;;  %v2479_v31 = vand.u32 2147483648, %v8883_v37  ;;  %v9056_v32 = vld [vmem:[#allocation2 + $0x1b0] sm:$0xff]  ;;  %v12892_v46 = vld [vmem:[#allocation23_spill] sm:$0xff]  ;;  %v12893_v5 = vld [vmem:[#allocation24_spill] sm:$0xff] }
 0xb49   :  { %v8952_v61 = vadd.f32 %v2538_v22, %v2536_v11  ;;  %v2472_v21 = vadd.f32 %v8925_v51, %v2471_v17  ;;  %v9061_v1 = vld [vmem:[#allocation2 + $0x180] sm:$0xff]  ;;  %v9064_v58 = vld [vmem:[#allocation2 + $0x190] sm:$0xff] }
 0xb4a   :  { %2809 = vmatpush.msra.mxu1 %v8298_v14  ;;  %2849 = vmatpush.msrb.mxu3 %v8301_v50  ;;  %v8956_v57 = vadd.f32 %v2539_v25, %v2537_v62  ;;  %v2517_v7 = vadd.f32 %v8928_v8, %v2516_v38  ;;  %v2477_v14 = vand.u32 2147483647, %v8883_v37  ;;  %v12887_v50 = vld [vmem:[#allocation18_spill] sm:$0xff]  ;;  %v2480_v37 = vor.u32 1.1754944e-38, %v2479_v31  ;;  %v12894_v19 = vld [vmem:[#allocation25_spill] sm:$0xff]  ;;  %v9069_v24 = vld [vmem:[#allocation2 + $0x160] sm:$0xff] }
 0xb4b   :  { %5816 = vtanh.f32 %v8952_v61  ;;  %v9072_v47 = vld [vmem:[#allocation2 + $0x170] sm:$0xff]  ;;  %v12895_v22 = vld [vmem:[#allocation28_spill] sm:$0xff] }
 0xb4c   :  { %2810 = vmatpush.msra.mxu1 %v8312_v13  ;;  %2850 = vmatpush.msrb.mxu3 %v8315_v40  ;;  %5818 = vtanh.f32 %v8956_v57  ;;  %v2522_v13 = vand.u32 2147483647, %v8893_v12  ;;  %v2476_v40 = vsel %vm2475_vm15, %v8925_v51, %v2472_v21  ;;  %v2521_v11 = vsel %vm2520_vm0, %v8928_v8, %v2517_v7  ;;  %v12896_v17 = vld [vmem:[#allocation29_spill] sm:$0xff]  ;;  %v9077_v18 = vld [vmem:[#allocation2 + $0x140] sm:$0xff] }
 0xb4d   :  { %vm2478_vm4 = vcmp.eq.f32.partialorder %v2477_v14, 8.507059e+37  ;;  %v9080_v62 = vld [vmem:[#allocation2 + $0x150] sm:$0xff]  ;;  %v12897_v25 = vld [vmem:[#allocation32_spill] sm:$0xff] }
 0xb4e   :  { %2811 = vmatpush.msra.mxu1 %v8328_v39  ;;  %2851 = vmatpush.msrb.mxu3 %v12887_v50  ;;  %v2481_v33 = vsel %vm2478_vm4, %v2480_v37, %v2476_v40  ;;  %vm2523_vm5 = vcmp.eq.f32.partialorder %v2522_v13, 8.507059e+37  ;;  %v12898_v38 = vld [vmem:[#allocation33_spill] sm:$0xff]  ;;  %v9085_v21 = vld [vmem:[#allocation2 + $0x120] sm:$0xff] }
 0xb4f   :  { %v2526_v2 = vsel %vm2523_vm5, %v2525_v34, %v2521_v11  ;;  %v9088_v31 = vld [vmem:[#allocation2 + $0x130] sm:$0xff]  ;;  %v12899_v7 = vld [vmem:[#allocation36_spill] sm:$0xff] }
 0xb50   :  { %2812 = vmatpush.msra.mxu1 %v8346_v43  ;;  %2852 = vmatpush.msrb.mxu3 %v8349_v4  ;;  %v12900_v59 = vld [vmem:[#allocation37_spill] sm:$0xff]  ;;  %v9093_v14 = vld [vmem:[#allocation2 + $0x100] sm:$0xff] }
 0xb51   :  { %v5817_v39 = vpop.eup %5816  ;;  %v9096_v50 = vld [vmem:[#allocation2 + $0x110] sm:$0xff]  ;;  %v12901_v13 = vld [vmem:[#allocation40_spill] sm:$0xff] }
 0xb52   :  { %2813 = vmatpush.msra.mxu1 %v8352_v44  ;;  %2853 = vmatpush.msrb.mxu3 %v8355_v63  ;;  %v5819_v12 = vpop.eup %5818  ;;  %v2544_v51 = vmul.f32 %v5817_v39, %v2481_v33  ;;  %v12902_v40 = vld [vmem:[#allocation41_spill] sm:$0xff]  ;;  %v9101_v37 = vld [vmem:[#allocation2 + $0xe0] sm:$0xff] }
 0xb53   :  { %v2545_v43 = vmul.f32 %v5819_v12, %v2526_v2  ;;  %12903 = vst [vmem:[#allocation100_spill] sm:$0xff] %v9101_v37  ;;  %v9104_v11 = vld [vmem:[#allocation2 + $0xf0] sm:$0xff]  ;;  %v12905_v34 = vld [vmem:[#allocation44_spill] sm:$0xff] }
 0xb54   :  { %2814 = vmatpush.msra.mxu1 %v8358_v45  ;;  %2854 = vmatpush.msrb.mxu3 %v8361_v48  ;;  %v2780_v4 = vrot.slane %v2544_v51, 2  ;;  %v8991_v48 = vld [vmem:[#allocation2 + $0x2a0] sm:$0xff]  ;;  %12904 = vst [vmem:[#allocation101_spill] sm:$0xff] %v9104_v11  ;;  %v12906_v39 = vld [vmem:[#allocation45_spill] sm:$0xff] }
 0xb55   :  { %v2548_v8 = vrot.slane %v2545_v43, 7  ;;  %v2781_v44 = vrot.slane %v2545_v43, 1  ;;  %v9109_v33 = vld [vmem:[#allocation2 + $0xc0] sm:$0xff]  ;;  %v9112_v12 = vld [vmem:[#allocation2 + $0xd0] sm:$0xff] }
 0xb56   :  { %2815 = vmatpush.msra.mxu1 %v8364_v26  ;;  %2855 = vmatpush.msrb.mxu3 %v8367_v9  ;;  %v8994_v26 = vld [vmem:[#allocation2 + $0x2b0] sm:$0xff]  ;;  %v8999_v9 = vld [vmem:[#allocation2 + $0x280] sm:$0xff]  ;;  %12907 = vst [vmem:[#allocation14_spill] sm:$0xff] %v9109_v33 }
 0xb57   :  { %v2550_v63 = vsel %vm2549_vm6, %v2548_v8, %v2544_v51  ;;  %v8987_v27 = vsel %vm115_vm2, %v2781_v44, %v2780_v4  ;;  %12908 = vst [vmem:[#allocation15_spill] sm:$0xff] %v9112_v12  ;;  %v12909_v2 = vld [vmem:[#allocation48_spill] sm:$0xff]  ;;  %v12910_v51 = vld [vmem:[#allocation49_spill] sm:$0xff] }
 0xb58   :  { %2816 = vmatpush.msra.mxu1 %v8373_v53  ;;  %2856 = vmatpush.msrb.mxu3 %v8376_v20  ;;  %v2553_v45 = vrot.slane %v2550_v63, 2  ;;  %v9002_v53 = vld [vmem:[#allocation2 + $0x290] sm:$0xff]  ;;  %v9007_v20 = vld [vmem:[#allocation2 + $0x260] sm:$0xff] }
 0xb59   :  { %v12911_v43 = vld [vmem:[#allocation52_spill] sm:$0xff]  ;;  %v12912_v4 = vld [vmem:[#allocation53_spill] sm:$0xff] }
 0xb5a   :  { %2817 = vmatpush.msra.mxu1 %v8381_v3  ;;  %2857 = vmatpush.msrb.mxu3 %v8384_v0  ;;  %v9010_v3 = vld [vmem:[#allocation2 + $0x270] sm:$0xff]  ;;  %v9015_v0 = vld [vmem:[#allocation2 + $0x240] sm:$0xff] }
 0xb5b   :  { %2573 = vmatmul.f32.vlgmr.msrb.gmra.mxu0 %v2553_v45  ;;  %2613 = vmatmul.f32.vlgmr.msrb.gmra.mxu2 %v2553_v45  ;;  %v12913_v8 = vld [vmem:[#allocation56_spill] sm:$0xff]  ;;  %v12914_v44 = vld [vmem:[#allocation57_spill] sm:$0xff] }
 0xb5c   :  { %2784 = vmatpush.msrb.mxu0 %v8991_v48  ;;  %2824 = vmatpush.msrb.mxu2 %v8994_v26  ;;  %v12915_v63 = vld [vmem:[#allocation60_spill] sm:$0xff] }
 0xb5d   :  { %2818 = vmatpush.msra.mxu1 %v8389_v15  ;;  %2858 = vmatpush.msrb.mxu3 %v8392_v35  ;;  %v9018_v15 = vld [vmem:[#allocation2 + $0x250] sm:$0xff]  ;;  %v9021_v35 = vld [vmem:[#allocation2 + $0x220] sm:$0xff] }
 0xb5e   :  { %2785 = vmatpush.msrb.mxu0 %v8999_v9  ;;  %2825 = vmatpush.msrb.mxu2 %v9002_v53 }
 0xb5f   :  { %2819 = vmatpush.msra.mxu1 %v8397_v55  ;;  %2859 = vmatpush.msrb.mxu3 %v8400_v52  ;;  %v9024_v55 = vld [vmem:[#allocation2 + $0x230] sm:$0xff]  ;;  %v9029_v52 = vld [vmem:[#allocation2 + $0x200] sm:$0xff] }
 0xb60   :  { %2786 = vmatpush.msrb.mxu0 %v9007_v20  ;;  %2826 = vmatpush.msrb.mxu2 %v9010_v3 }
 0xb61   :  { %2820 = vmatmul.f32.vlgmr.msra.gmra.mxu1 %v8987_v27  ;;  %2860 = vmatmul.f32.vlgmr.msrb.gmra.mxu3 %v8987_v27 }
 0xb62   :  { %2787 = vmatpush.msrb.mxu0 %v9015_v0  ;;  %2827 = vmatpush.msrb.mxu2 %v9018_v15 }
 0xb63   :  { %2653 = vmatmul.f32.vlgmr.msra.gmra.mxu0 %v2553_v45  ;;  %2693 = vmatmul.f32.vlgmr.msra.gmra.mxu2 %v2553_v45  ;;  %v12916_v45 = vld [vmem:[#allocation61_spill] sm:$0xff] }
 0xb64   :  { %2788 = vmatpush.msrb.mxu0 %v9021_v35  ;;  %2828 = vmatpush.msrb.mxu2 %v9024_v55 }
 0xb65   :  { %3055 = vmatpush.msrb.mxu1 %v8409_v30  ;;  %3095 = vmatpush.msra.mxu3 %v8412_v29  ;;  %v12888_v30 = vld [vmem:[#allocation19_spill] sm:$0xff] }
 0xb66   :  { %2789 = vmatpush.msrb.mxu0 %v9029_v52  ;;  %2829 = vmatpush.msrb.mxu2 %v9032_v56  ;;  %v9045_v29 = vld [vmem:[#allocation2 + $0x1c0] sm:$0xff] }
 0xb67   :  { %3056 = vmatpush.msrb.mxu1 %v8417_v16  ;;  %3096 = vmatpush.msra.mxu3 %v8420_v60  ;;  %v12889_v16 = vld [vmem:[#allocation20_spill] sm:$0xff]  ;;  %v12890_v60 = vld [vmem:[#allocation21_spill] sm:$0xff] }
 0xb68   :  { %2790 = vmatpush.msrb.mxu0 %v9037_v6  ;;  %2830 = vmatpush.msrb.mxu2 %v9040_v49 }
 0xb69   :  { %3057 = vmatpush.msrb.mxu1 %v8425_v23  ;;  %3097 = vmatpush.msra.mxu3 %v12888_v30  ;;  %v12891_v23 = vld [vmem:[#allocation22_spill] sm:$0xff] }
 0xb6a   :  { %2791 = vmatpush.msrb.mxu0 %v9045_v29  ;;  %2831 = vmatpush.msrb.mxu2 %v9048_v10  ;;  %v12917_v30 = vld [vmem:[#allocation26_spill] sm:$0xff] }
 0xb6b   :  { %3058 = vmatpush.msrb.mxu1 %v12889_v16  ;;  %3098 = vmatpush.msra.mxu3 %v12890_v60  ;;  %v12918_v16 = vld [vmem:[#allocation27_spill] sm:$0xff]  ;;  %v12920_v60 = vld [vmem:[#allocation30_spill] sm:$0xff] }
 0xb6c   :  { %2792 = vmatpush.msrb.mxu0 %v9053_v28  ;;  %2832 = vmatpush.msrb.mxu2 %v9056_v32 }
 0xb6d   :  { %3059 = vmatpush.msrb.mxu1 %v12891_v23  ;;  %3099 = vmatpush.msra.mxu3 %v12892_v46  ;;  %v12921_v23 = vld [vmem:[#allocation65_spill] sm:$0xff]  ;;  %v12922_v46 = vld [vmem:[#allocation31_spill] sm:$0xff] }
 0xb6e   :  { %2793 = vmatpush.msrb.mxu0 %v9061_v1  ;;  %2833 = vmatpush.msrb.mxu2 %v9064_v58 }
 0xb6f   :  { %3060 = vmatpush.msrb.mxu1 %v12893_v5  ;;  %3100 = vmatpush.msra.mxu3 %v12894_v19  ;;  %v12923_v5 = vld [vmem:[#allocation68_spill] sm:$0xff]  ;;  %v12924_v19 = vld [vmem:[#allocation34_spill] sm:$0xff] }
 0xb70   :  { %2794 = vmatpush.msrb.mxu0 %v9069_v24  ;;  %2834 = vmatpush.msrb.mxu2 %v9072_v47 }
 0xb71   :  { %3061 = vmatpush.msrb.mxu1 %v12895_v22  ;;  %3101 = vmatpush.msra.mxu3 %v12896_v17  ;;  %v12925_v22 = vld [vmem:[#allocation69_spill] sm:$0xff]  ;;  %v12926_v17 = vld [vmem:[#allocation35_spill] sm:$0xff] }
 0xb72   :  { %2795 = vmatpush.msrb.mxu0 %v9077_v18  ;;  %2835 = vmatpush.msrb.mxu2 %v9080_v62 }
 0xb73   :  { %3062 = vmatpush.msrb.mxu1 %v12897_v25  ;;  %3102 = vmatpush.msra.mxu3 %v12898_v38  ;;  %v12927_v25 = vld [vmem:[#allocation72_spill] sm:$0xff]  ;;  %v12928_v38 = vld [vmem:[#allocation38_spill] sm:$0xff] }
 0xb74   :  { %2796 = vmatpush.msrb.mxu0 %v9085_v21  ;;  %2836 = vmatpush.msrb.mxu2 %v9088_v31 }
 0xb75   :  { %3063 = vmatpush.msrb.mxu1 %v12899_v7  ;;  %3103 = vmatpush.msra.mxu3 %v12900_v59  ;;  %v12929_v7 = vld [vmem:[#allocation73_spill] sm:$0xff]  ;;  %v12930_v59 = vld [vmem:[#allocation39_spill] sm:$0xff] }
 0xb76   :  { %2797 = vmatpush.msrb.mxu0 %v9093_v14  ;;  %2837 = vmatpush.msrb.mxu2 %v9096_v50 }
 0xb77   :  { %3064 = vmatpush.msrb.mxu1 %v12901_v13  ;;  %3104 = vmatpush.msra.mxu3 %v12902_v40  ;;  %v12931_v13 = vld [vmem:[#allocation76_spill] sm:$0xff]  ;;  %v12932_v40 = vld [vmem:[#allocation42_spill] sm:$0xff] }
 0xb78   :  { %2798 = vmatpush.msrb.mxu0 %v9101_v37  ;;  %2838 = vmatpush.msrb.mxu2 %v9104_v11 }
 0xb79   :  { %3065 = vmatpush.msrb.mxu1 %v12905_v34  ;;  %3105 = vmatpush.msra.mxu3 %v12906_v39  ;;  %v12933_v34 = vld [vmem:[#allocation77_spill] sm:$0xff]  ;;  %v12934_v39 = vld [vmem:[#allocation43_spill] sm:$0xff] }
 0xb7a   :  { %2799 = vmatpush.msrb.mxu0 %v9109_v33  ;;  %2839 = vmatpush.msrb.mxu2 %v9112_v12 }
 0xb7b   :  { %2800 = vmatmul.f32.vlgmr.msrb.gmra.mxu0 %v8987_v27  ;;  %2840 = vmatmul.f32.vlgmr.msrb.gmra.mxu2 %v8987_v27  ;;  %v12919_v27 = vld [vmem:[#allocation64_spill] sm:$0xff] }
 0xb7c   :  { %3066 = vmatpush.msrb.mxu1 %v12909_v2  ;;  %3106 = vmatpush.msra.mxu3 %v12910_v51  ;;  %v12935_v2 = vld [vmem:[#allocation80_spill] sm:$0xff]  ;;  %v12936_v51 = vld [vmem:[#allocation46_spill] sm:$0xff] }
 0xb7d   :  { %3035 = vmatpush.msra.mxu0 %v12911_v43  ;;  %3075 = vmatpush.msra.mxu2 %v12912_v4  ;;  %v12937_v43 = vld [vmem:[#allocation81_spill] sm:$0xff]  ;;  %v12938_v4 = vld [vmem:[#allocation47_spill] sm:$0xff] }
 0xb7e   :  { %3067 = vmatpush.msrb.mxu1 %v12913_v8  ;;  %3107 = vmatpush.msra.mxu3 %v12914_v44  ;;  %v12939_v8 = vld [vmem:[#allocation84_spill] sm:$0xff]  ;;  %v12940_v44 = vld [vmem:[#allocation50_spill] sm:$0xff] }
 0xb7f   :  { %3036 = vmatpush.msra.mxu0 %v12915_v63  ;;  %3076 = vmatpush.msra.mxu2 %v12916_v45  ;;  %v12941_v63 = vld [vmem:[#allocation85_spill] sm:$0xff]  ;;  %v12942_v45 = vld [vmem:[#allocation51_spill] sm:$0xff] }
 0xb80   :  { %3068 = vmatpush.msrb.mxu1 %v12917_v30  ;;  %3108 = vmatpush.msra.mxu3 %v12918_v16  ;;  %v12943_v30 = vld [vmem:[#allocation88_spill] sm:$0xff]  ;;  %v12944_v16 = vld [vmem:[#allocation54_spill] sm:$0xff] }
 0xb81   :  { %3037 = vmatpush.msra.mxu0 %v12919_v27  ;;  %3077 = vmatpush.msra.mxu2 %v12920_v60  ;;  %v12945_v27 = vld [vmem:[#allocation89_spill] sm:$0xff]  ;;  %v12946_v60 = vld [vmem:[#allocation55_spill] sm:$0xff] }
 0xb82   :  { %3069 = vmatpush.msrb.mxu1 %v12921_v23  ;;  %3109 = vmatpush.msra.mxu3 %v12922_v46  ;;  %v12947_v23 = vld [vmem:[#allocation58_spill] sm:$0xff]  ;;  %v12948_v46 = vld [vmem:[#allocation59_spill] sm:$0xff] }
 0xb83   :  { %3038 = vmatpush.msra.mxu0 %v12923_v5  ;;  %3078 = vmatpush.msra.mxu2 %v12924_v19  ;;  %v12949_v5 = vld [vmem:[#allocation62_spill] sm:$0xff]  ;;  %v12950_v19 = vld [vmem:[#allocation63_spill] sm:$0xff] }
 0xb84   :  { %3070 = vmatpush.msrb.mxu1 %v12925_v22  ;;  %3110 = vmatpush.msra.mxu3 %v12926_v17  ;;  %v12951_v22 = vld [vmem:[#allocation66_spill] sm:$0xff]  ;;  %v12952_v17 = vld [vmem:[#allocation67_spill] sm:$0xff] }
 0xb85   :  { %3039 = vmatpush.msra.mxu0 %v12929_v7  ;;  %3079 = vmatpush.msra.mxu2 %v12930_v59  ;;  %v12955_v7 = vld [vmem:[#allocation74_spill] sm:$0xff]  ;;  %v12956_v59 = vld [vmem:[#allocation75_spill] sm:$0xff] }
 0xb86   :  { %3135 = vmatpush.msra.mxu1 %v12927_v25  ;;  %3175 = vmatpush.msrb.mxu3 %v12928_v38  ;;  %v12953_v25 = vld [vmem:[#allocation70_spill] sm:$0xff]  ;;  %v12954_v38 = vld [vmem:[#allocation71_spill] sm:$0xff] }
 0xb87   :  { %3040 = vmatpush.msra.mxu0 %v12933_v34  ;;  %3080 = vmatpush.msra.mxu2 %v12934_v39  ;;  %v12959_v34 = vld [vmem:[#allocation82_spill] sm:$0xff]  ;;  %v12960_v39 = vld [vmem:[#allocation83_spill] sm:$0xff] }
 0xb88   :  { %3136 = vmatpush.msra.mxu1 %v12931_v13  ;;  %3176 = vmatpush.msrb.mxu3 %v12932_v40  ;;  %v12957_v13 = vld [vmem:[#allocation78_spill] sm:$0xff]  ;;  %v12958_v40 = vld [vmem:[#allocation79_spill] sm:$0xff] }
 0xb89   :  { %3041 = vmatpush.msra.mxu0 %v12937_v43  ;;  %3081 = vmatpush.msra.mxu2 %v12938_v4  ;;  %v12963_v43 = vld [vmem:[#allocation90_spill] sm:$0xff]  ;;  %v12964_v4 = vld [vmem:[#allocation91_spill] sm:$0xff] }
 0xb8a   :  { %3137 = vmatpush.msra.mxu1 %v12935_v2  ;;  %3177 = vmatpush.msrb.mxu3 %v12936_v51  ;;  %v12961_v2 = vld [vmem:[#allocation86_spill] sm:$0xff]  ;;  %v12962_v51 = vld [vmem:[#allocation87_spill] sm:$0xff] }
 0xb8b   :  { %3042 = vmatpush.msra.mxu0 %v12941_v63  ;;  %3082 = vmatpush.msra.mxu2 %v12942_v45  ;;  %v12967_v63 = vld [vmem:[#allocation94_spill] sm:$0xff]  ;;  %v12968_v45 = vld [vmem:[#allocation95_spill] sm:$0xff] }
 0xb8c   :  { %3138 = vmatpush.msra.mxu1 %v12939_v8  ;;  %3178 = vmatpush.msrb.mxu3 %v12940_v44  ;;  %v12965_v8 = vld [vmem:[#allocation92_spill] sm:$0xff]  ;;  %v12966_v44 = vld [vmem:[#allocation93_spill] sm:$0xff] }
 0xb8d   :  { %3043 = vmatpush.msra.mxu0 %v12945_v27  ;;  %3083 = vmatpush.msra.mxu2 %v12946_v60  ;;  %v12971_v27 = vld [vmem:[#allocation106_spill] sm:$0xff]  ;;  %v12972_v60 = vld [vmem:[#allocation107_spill] sm:$0xff] }
 0xb8e   :  { %3139 = vmatpush.msra.mxu1 %v12943_v30  ;;  %3179 = vmatpush.msrb.mxu3 %v12944_v16  ;;  %v12969_v30 = vld [vmem:[#allocation104_spill] sm:$0xff]  ;;  %v12970_v16 = vld [vmem:[#allocation105_spill] sm:$0xff] }
 0xb8f   :  { %3044 = vmatpush.msra.mxu0 %v12949_v5  ;;  %3084 = vmatpush.msra.mxu2 %v12950_v19  ;;  %v12975_v5 = vld [vmem:[#allocation110_spill] sm:$0xff]  ;;  %v12976_v19 = vld [vmem:[#allocation111_spill] sm:$0xff] }
 0xb90   :  { %3140 = vmatpush.msra.mxu1 %v12947_v23  ;;  %3180 = vmatpush.msrb.mxu3 %v12948_v46  ;;  %v12973_v23 = vld [vmem:[#allocation108_spill] sm:$0xff]  ;;  %v12974_v46 = vld [vmem:[#allocation109_spill] sm:$0xff] }
 0xb91   :  { %3045 = vmatpush.msra.mxu0 %v12953_v25  ;;  %3085 = vmatpush.msra.mxu2 %v12954_v38  ;;  %v12979_v25 = vld [vmem:[#allocation114_spill] sm:$0xff]  ;;  %v12980_v38 = vld [vmem:[#allocation115_spill] sm:$0xff] }
 0xb92   :  { %3141 = vmatpush.msra.mxu1 %v12951_v22  ;;  %3181 = vmatpush.msrb.mxu3 %v12952_v17  ;;  %v12977_v22 = vld [vmem:[#allocation112_spill] sm:$0xff]  ;;  %v12978_v17 = vld [vmem:[#allocation113_spill] sm:$0xff] }
 0xb93   :  { %3046 = vmatpush.msra.mxu0 %v12957_v13  ;;  %3086 = vmatpush.msra.mxu2 %v12958_v40  ;;  %v12983_v13 = vld [vmem:[#allocation118_spill] sm:$0xff]  ;;  %v12984_v40 = vld [vmem:[#allocation119_spill] sm:$0xff] }
 0xb94   :  { %3142 = vmatpush.msra.mxu1 %v12955_v7  ;;  %3182 = vmatpush.msrb.mxu3 %v12956_v59  ;;  %v12981_v7 = vld [vmem:[#allocation116_spill] sm:$0xff]  ;;  %v12982_v59 = vld [vmem:[#allocation117_spill] sm:$0xff] }
 0xb95   :  { %3047 = vmatpush.msra.mxu0 %v12961_v2  ;;  %3087 = vmatpush.msra.mxu2 %v12962_v51  ;;  %v12987_v2 = vld [vmem:[#allocation122_spill] sm:$0xff]  ;;  %v12988_v51 = vld [vmem:[#allocation123_spill] sm:$0xff] }
 0xb96   :  { %3143 = vmatpush.msra.mxu1 %v12959_v34  ;;  %3183 = vmatpush.msrb.mxu3 %v12960_v39  ;;  %v12985_v34 = vld [vmem:[#allocation120_spill] sm:$0xff]  ;;  %v12986_v39 = vld [vmem:[#allocation121_spill] sm:$0xff] }
 0xb97   :  { %3048 = vmatpush.msra.mxu0 %v12965_v8  ;;  %3088 = vmatpush.msra.mxu2 %v12966_v44  ;;  %v12991_v8 = vld [vmem:[#allocation126_spill] sm:$0xff]  ;;  %v12992_v44 = vld [vmem:[#allocation127_spill] sm:$0xff] }
 0xb98   :  { %3144 = vmatpush.msra.mxu1 %v12963_v43  ;;  %3184 = vmatpush.msrb.mxu3 %v12964_v4  ;;  %v12989_v43 = vld [vmem:[#allocation124_spill] sm:$0xff]  ;;  %v12990_v4 = vld [vmem:[#allocation125_spill] sm:$0xff] }
 0xb99   :  { %3049 = vmatpush.msra.mxu0 %v12969_v30  ;;  %3089 = vmatpush.msra.mxu2 %v12970_v16  ;;  %v12995_v30 = vld [vmem:[#allocation130_spill] sm:$0xff]  ;;  %v12996_v16 = vld [vmem:[#allocation131_spill] sm:$0xff] }
 0xb9a   :  { %3145 = vmatpush.msra.mxu1 %v12967_v63  ;;  %3185 = vmatpush.msrb.mxu3 %v12968_v45  ;;  %v12993_v63 = vld [vmem:[#allocation128_spill] sm:$0xff]  ;;  %v12994_v45 = vld [vmem:[#allocation129_spill] sm:$0xff] }
 0xb9b   :  { %3050 = vmatpush.msra.mxu0 %v12973_v23  ;;  %3090 = vmatpush.msra.mxu2 %v12974_v46  ;;  %v12999_v23 = vld [vmem:[#allocation134_spill] sm:$0xff]  ;;  %v13000_v46 = vld [vmem:[#allocation135_spill] sm:$0xff] }
 0xb9c   :  { %3146 = vmatpush.msra.mxu1 %v12971_v27  ;;  %3186 = vmatpush.msrb.mxu3 %v12972_v60  ;;  %v12997_v27 = vld [vmem:[#allocation132_spill] sm:$0xff]  ;;  %v12998_v60 = vld [vmem:[#allocation133_spill] sm:$0xff] }
 0xb9d   :  { %3115 = vmatpush.msrb.mxu0 %v12977_v22  ;;  %3155 = vmatpush.msrb.mxu2 %v12978_v17  ;;  %v13003_v22 = vld [vmem:[#allocation138_spill] sm:$0xff]  ;;  %v13004_v17 = vld [vmem:[#allocation139_spill] sm:$0xff] }
 0xb9e   :  { %3147 = vmatpush.msra.mxu1 %v12975_v5  ;;  %3187 = vmatpush.msrb.mxu3 %v12976_v19  ;;  %v13001_v5 = vld [vmem:[#allocation136_spill] sm:$0xff]  ;;  %v13002_v19 = vld [vmem:[#allocation137_spill] sm:$0xff] }
 0xb9f   :  { %3116 = vmatpush.msrb.mxu0 %v12981_v7  ;;  %3156 = vmatpush.msrb.mxu2 %v12982_v59  ;;  %v13007_v7 = vld [vmem:[#allocation142_spill] sm:$0xff]  ;;  %v13008_v59 = vld [vmem:[#allocation143_spill] sm:$0xff] }
 0xba0   :  { %3148 = vmatpush.msra.mxu1 %v12979_v25  ;;  %3188 = vmatpush.msrb.mxu3 %v12980_v38  ;;  %v13005_v25 = vld [vmem:[#allocation140_spill] sm:$0xff]  ;;  %v13006_v38 = vld [vmem:[#allocation141_spill] sm:$0xff] }
 0xba1   :  { %3117 = vmatpush.msrb.mxu0 %v12985_v34  ;;  %3157 = vmatpush.msrb.mxu2 %v12986_v39  ;;  %v13011_v34 = vld [vmem:[#allocation146_spill] sm:$0xff]  ;;  %v13012_v39 = vld [vmem:[#allocation147_spill] sm:$0xff] }
 0xba2   :  { %3149 = vmatpush.msra.mxu1 %v12983_v13  ;;  %3189 = vmatpush.msrb.mxu3 %v12984_v40  ;;  %v13009_v13 = vld [vmem:[#allocation144_spill] sm:$0xff]  ;;  %v13010_v40 = vld [vmem:[#allocation145_spill] sm:$0xff] }
 0xba3   :  { %3118 = vmatpush.msrb.mxu0 %v12989_v43  ;;  %3158 = vmatpush.msrb.mxu2 %v12990_v4 }
 0xba4   :  { %3150 = vmatpush.msra.mxu1 %v12987_v2  ;;  %3190 = vmatpush.msrb.mxu3 %v12988_v51  ;;  %v13013_v2 = vld [vmem:[#allocation148_spill] sm:$0xff]  ;;  %v13014_v51 = vld [vmem:[#allocation149_spill] sm:$0xff] }
 0xba5   :  { %3119 = vmatpush.msrb.mxu0 %v12991_v8  ;;  %3159 = vmatpush.msrb.mxu2 %v12992_v44  ;;  %v13015_v44 = vld [vmem:[#allocation8_spill] sm:$0xff] }
 0xba7   :  { %3120 = vmatpush.msrb.mxu0 %v12993_v63  ;;  %3160 = vmatpush.msrb.mxu2 %v12994_v45 }
 0xba9   :  { %3121 = vmatpush.msrb.mxu0 %v12995_v30  ;;  %3161 = vmatpush.msrb.mxu2 %v12996_v16 }
 0xbab   :  { %3122 = vmatpush.msrb.mxu0 %v12997_v27  ;;  %3162 = vmatpush.msrb.mxu2 %v12998_v60 }
 0xbad   :  { %3123 = vmatpush.msrb.mxu0 %v12999_v23  ;;  %3163 = vmatpush.msrb.mxu2 %v13000_v46  ;;  %v13016_v23 = vld [vmem:[#allocation9_spill] sm:$0xff] }
 0xbaf   :  { %3124 = vmatpush.msrb.mxu0 %v13001_v5  ;;  %3164 = vmatpush.msrb.mxu2 %v13002_v19 }
 0xbb1   :  { %3125 = vmatpush.msrb.mxu0 %v13003_v22  ;;  %3165 = vmatpush.msrb.mxu2 %v13004_v17 }
 0xbb3   :  { %3126 = vmatpush.msrb.mxu0 %v13005_v25  ;;  %3166 = vmatpush.msrb.mxu2 %v13006_v38  ;;  %v13017_v25 = vld [vmem:[#allocation10_spill] sm:$0xff] }
 0xbb5   :  { %3127 = vmatpush.msrb.mxu0 %v13007_v7  ;;  %3167 = vmatpush.msrb.mxu2 %v13008_v59  ;;  %v13018_v7 = vld [vmem:[#allocation97_spill] sm:$0xff] }
 0xbb7   :  { %3128 = vmatpush.msrb.mxu0 %v13009_v13  ;;  %3168 = vmatpush.msrb.mxu2 %v13010_v40 }
 0xbb9   :  { %3129 = vmatpush.msrb.mxu0 %v13011_v34  ;;  %3169 = vmatpush.msrb.mxu2 %v13012_v39  ;;  %v13019_v39 = vld [vmem:[#allocation99_spill] sm:$0xff] }
 0xbbb   :  { %3130 = vmatpush.msrb.mxu0 %v13013_v2  ;;  %3170 = vmatpush.msrb.mxu2 %v13014_v51 }
 0xbbc   :  { %v2594_v43 = vpop.f32.mrf.mxu1 }
 0xbc2   :  { %v2634_v5 = vpop.f32.mrf.mxu3 }
 0xbc4   :  { %v2674_v4 = vpop.f32.mrf.mxu1 }
 0xbd8   :  { %v2574_v8 = vpop.f32.mrf.mxu0 }
 0xbd9   :  { %v2575_v63 = vadd.f32 %v2574_v8, %v13015_v44 }
 0xbdb   :  { %v2595_v45 = vadd.f32 %v2594_v43, %v2575_v63 }
 0xbdd   :  { %v5570_v30 = vmul.f32 -1.442695, %v2595_v45 }
 0xbde   :  { %v2821_v16 = vpop.f32.mrf.mxu1  ;;  %v2614_v27 = vpop.f32.mrf.mxu2 }
 0xbdf   :  { %5820 = vpow2.f32 %v5570_v30  ;;  %v2869_v60 = vrot.slane %v2821_v16, 5  ;;  %v2615_v46 = vadd.f32 %v2614_v27, %v13016_v23  ;;  %v2873_v22 = vrot.slane %v2821_v16, 6 }
 0xbe0   :  { %v2654_v19 = vpop.f32.mrf.mxu0 }
 0xbe1   :  { %v2635_v17 = vadd.f32 %v2634_v5, %v2615_v46  ;;  %v2655_v38 = vadd.f32 %v2654_v19, %v13017_v25  ;;  %v2885_v59 = vadd.f32 %v2869_v60, %v13018_v7  ;;  %v2889_v2 = vadd.f32 %v2873_v22, %v13019_v39 }
 0xbe3   :  { %v5571_v13 = vmul.f32 -1.442695, %v2635_v17  ;;  %v2675_v40 = vadd.f32 %v2674_v4, %v2655_v38  ;;  %v5574_v8 = vmul.f32 -1.442695, %v2885_v59  ;;  %v5577_v63 = vmul.f32 -1.442695, %v2889_v2 }
 0xbe4   :  { %v13020_v38 = vld [vmem:[#allocation11_spill] sm:$0xff] }
 0xbe5   :  { %v5821_v34 = vpop.eup %5820  ;;  %v5572_v51 = vmul.f32 -1.442695, %v2675_v40  ;;  %5822 = vpow2.f32 %v5571_v13 }
 0xbe6   :  { %v2726_v43 = vadd.f32 1.0, %v5821_v34  ;;  %v2694_v19 = vpop.f32.mrf.mxu2  ;;  %v2714_v34 = vpop.f32.mrf.mxu3 }
 0xbe7   :  { %v2695_v59 = vadd.f32 %v2694_v19, %v13020_v38 }
 0xbe8   :  { %5824 = vrcp.f32 %v2726_v43  ;;  %vm2734_vm8 = vweird.f32 %v2726_v43 }
 0xbe9   :  { %5826 = vpow2.f32 %v5572_v51  ;;  %v2715_v51 = vadd.f32 %v2714_v34, %v2695_v59 }
 0xbea   :  { %5828 = vpow2.f32 %v5574_v8  ;;  %v2738_v8 = vand.u32 2147483647, %v2726_v43 }
 0xbeb   :  { %v5823_v45 = vpop.eup %5822  ;;  %5830 = vpow2.f32 %v5577_v63 }
 0xbec   :  { %v2727_v60 = vadd.f32 1.0, %v5823_v45  ;;  %vm9246_vm11 = vcmp.eq.f32.partialorder %v2738_v8, 8.507059e+37 }
 0xbee   :  { %v5825_v30 = vpop.eup %5824  ;;  %5832 = vrcp.f32 %v2727_v60  ;;  %v2755_v39 = vand.u32 2147483648, %v2727_v60  ;;  %vm2749_vm13 = vweird.f32 %v2727_v60 }
 0xbef   :  { %v5827_v16 = vpop.eup %5826  ;;  %v2730_v27 = vmul.f32 %v5825_v30, %v2726_v43  ;;  %vm2735_vm7 = vweird.f32 %v5825_v30 }
 0xbf0   :  { %v5829_v46 = vpop.eup %5828  ;;  %v9228_v4 = vadd.f32 1.0, %v5827_v16  ;;  %vm9242_vm10 = vmor %vm2734_vm8, %vm2735_vm7  ;;  %v2756_v11 = vor.u32 1.1754944e-38, %v2755_v39 }
 0xbf1   :  { %v2731_v5 = vsub.f32 1.0, %v2730_v27  ;;  %v5831_v22 = vpop.eup %5830  ;;  %v9230_v17 = vadd.f32 1.0, %v5829_v46  ;;  %v2740_v46 = vand.u32 2147483648, %v2726_v43 }
 0xbf2   :  { %5834 = vrcp.f32 %v9228_v4  ;;  %v9234_v40 = vadd.f32 1.0, %v5831_v22  ;;  %vm2764_vm3 = vweird.f32 %v9228_v4 }
 0xbf3   :  { %v2732_v13 = vmul.f32 %v5825_v30, %v2731_v5  ;;  %5836 = vrcp.f32 %v9230_v17  ;;  %v2741_v44 = vor.u32 1.1754944e-38, %v2740_v46  ;;  %vm2936_vm0 = vweird.f32 %v9230_v17 }
 0xbf4   :  { %v5833_v2 = vpop.eup %5832  ;;  %5838 = vrcp.f32 %v9234_v40 }
 0xbf5   :  { %v2745_v16 = vmul.f32 %v5833_v2, %v2727_v60  ;;  %v2733_v27 = vadd.f32 %v5825_v30, %v2732_v13  ;;  %5840 = vtanh.f32 %v2715_v51  ;;  %vm2750_vm12 = vweird.f32 %v5833_v2  ;;  %v2861_v51 = vpop.f32.mrf.mxu3 }
 0xbf6   :  { %vm2751_vm9 = vmor %vm2749_vm13, %vm2750_vm12 }
 0xbf7   :  { %v2746_v38 = vsub.f32 1.0, %v2745_v16  ;;  %v2737_v43 = vsel %vm9242_vm10, %v5825_v30, %v2733_v27  ;;  %vm2981_vm10 = vweird.f32 %v9234_v40 }
 0xbf8   :  { %v2801_v63 = vpop.f32.mrf.mxu0  ;;  %v9237_v45 = vpop.eup %5834  ;;  %v2742_v30 = vsel %vm9246_vm11, %v2741_v44, %v2737_v43 }
 0xbf9   :  { %v2760_v5 = vmul.f32 %v9237_v45, %v9228_v4  ;;  %v2868_v19 = vrot.slane %v2801_v63, 5  ;;  %v2872_v22 = vrot.slane %v2801_v63, 6  ;;  %v9252_v7 = vpop.eup %5836  ;;  %v2747_v23 = vmul.f32 %v5833_v2, %v2746_v38 }
 0xbfa   :  { %v2753_v63 = vand.u32 2147483647, %v2727_v60  ;;  %v2932_v38 = vmul.f32 %v9252_v7, %v9230_v17  ;;  %vm2765_vm14 = vweird.f32 %v9237_v45  ;;  %vm2937_vm4 = vweird.f32 %v9252_v7 }
 0xbfb   :  { %v2884_v13 = vadd.f32 %v2868_v19, %v12709_v36  ;;  %v2888_v25 = vadd.f32 %v2872_v22, %v12868_v54  ;;  %v2761_v16 = vsub.f32 1.0, %v2760_v5  ;;  %v2748_v37 = vadd.f32 %v5833_v2, %v2747_v23  ;;  %v9256_v36 = vpop.eup %5838  ;;  %vm9284_vm15 = vmor %vm2764_vm3, %vm2765_vm14 }
 0xbfc   :  { %vm2754_vm1 = vcmp.eq.f32.partialorder %v2753_v63, 8.507059e+37  ;;  %v5841_v39 = vpop.eup %5840  ;;  %v2871_v23 = vrot.slane %v2861_v51, 5  ;;  %v2977_v59 = vmul.f32 %v9256_v36, %v9234_v40  ;;  %vm9311_vm6 = vmor %vm2936_vm0, %vm2937_vm4  ;;  %vm2982_vm7 = vweird.f32 %v9256_v36 }
 0xbfd   :  { %v5573_v12 = vmul.f32 -1.442695, %v2884_v13  ;;  %v5576_v8 = vmul.f32 -1.442695, %v2888_v25  ;;  %v2752_v46 = vsel %vm2751_vm9, %v5833_v2, %v2748_v37  ;;  %v2762_v22 = vmul.f32 %v9237_v45, %v2761_v16  ;;  %v13025_v13 = vld [vmem:[#allocation98_spill] sm:$0xff]  ;;  %vm9329_vm11 = vmor %vm2981_vm10, %vm2982_vm7 }
 0xbfe   :  { %v2841_v33 = vpop.f32.mrf.mxu2  ;;  %v2757_v60 = vsel %vm2754_vm1, %v2756_v11, %v2752_v46  ;;  %v2776_v44 = vmul.f32 %v5841_v39, %v2742_v30  ;;  %v2875_v2 = vrot.slane %v2861_v51, 6 }
 0xbff   :  { %v2870_v19 = vrot.slane %v2841_v33, 5  ;;  %5842 = vpow2.f32 %v5573_v12  ;;  %v2874_v27 = vrot.slane %v2841_v33, 6  ;;  %v2775_v34 = vmul.f32 %v2757_v60, %v13025_v13  ;;  %v13029_v60 = vld [vmem:[#allocation103_spill] sm:$0xff] }
 0xc00   :  { %5844 = vpow2.f32 %v5576_v8  ;;  %v2933_v33 = vsub.f32 1.0, %v2932_v38  ;;  %v13026_v8 = vld [vmem:[#allocation102_spill] sm:$0xff]  ;;  %v2770_v38 = vand.u32 2147483648, %v9228_v4 }
 0xc01   :  { %v2886_v25 = vadd.f32 %v2870_v19, %v12871_v41  ;;  %v2890_v5 = vadd.f32 %v2874_v27, %v12872_v42  ;;  %v9269_v43 = vadd.f32 %v2776_v44, %v2775_v34  ;;  %v2887_v11 = vadd.f32 %v2871_v23, %v13026_v8  ;;  %v9366_v8 = vld [vmem:[#allocation2 + $0x288] sm:$0xff] }
 0xc02   :  { %v2763_v19 = vadd.f32 %v9237_v45, %v2762_v22  ;;  %v2978_v27 = vsub.f32 1.0, %v2977_v59  ;;  %v2934_v51 = vmul.f32 %v9252_v7, %v2933_v33  ;;  %v2771_v13 = vor.u32 1.1754944e-38, %v2770_v38 }
 0xc03   :  { %v5575_v12 = vmul.f32 -1.442695, %v2886_v25  ;;  %v5578_v37 = vmul.f32 -1.442695, %v2890_v5  ;;  %v2768_v25 = vand.u32 2147483647, %v9228_v4  ;;  %v2891_v5 = vadd.f32 %v2875_v2, %v13029_v60 }
 0xc04   :  { %v2767_v22 = vsel %vm9284_vm15, %v9237_v45, %v2763_v19  ;;  %v2979_v4 = vmul.f32 %v9256_v36, %v2978_v27  ;;  %v2935_v44 = vadd.f32 %v9252_v7, %v2934_v51  ;;  %v2942_v45 = vand.u32 2147483648, %v9230_v17 }
 0xc05   :  { %5846 = vpow2.f32 %v5575_v12  ;;  %v5843_v63 = vpop.eup %5842  ;;  %vm2769_vm5 = vcmp.eq.f32.partialorder %v2768_v25, 8.507059e+37  ;;  %v2985_v19 = vand.u32 2147483647, %v9234_v40 }
 0xc06   :  { %5848 = vpow2.f32 %v5578_v37  ;;  %v5845_v16 = vpop.eup %5844  ;;  %v9275_v30 = vadd.f32 1.0, %v5843_v63  ;;  %v2940_v37 = vand.u32 2147483647, %v9230_v17  ;;  %v2772_v63 = vsel %vm2769_vm5, %v2771_v13, %v2767_v22 }
 0xc07   :  { %5850 = vtanh.f32 %v9269_v43  ;;  %v9279_v46 = vadd.f32 1.0, %v5845_v16  ;;  %v2980_v51 = vadd.f32 %v9256_v36, %v2979_v4  ;;  %v2939_v22 = vsel %vm9311_vm6, %v9252_v7, %v2935_v44 }
 0xc08   :  { %5852 = vrcp.f32 %v9275_v30  ;;  %vm2941_vm8 = vcmp.eq.f32.partialorder %v2940_v37, 8.507059e+37  ;;  %v2943_v4 = vor.u32 1.1754944e-38, %v2942_v45  ;;  %vm9333_vm12 = vcmp.eq.f32.partialorder %v2985_v19, 8.507059e+37 }
 0xc09   :  { %5854 = vrcp.f32 %v9279_v46  ;;  %v2984_v37 = vsel %vm9329_vm11, %v9256_v36, %v2980_v51  ;;  %v2925_v19 = vand.u32 2147483647, %v9275_v30  ;;  %v2970_v36 = vand.u32 2147483647, %v9279_v46 }
 0xc0a   :  { %5856 = vtanh.f32 %v2887_v11  ;;  %v2987_v11 = vand.u32 2147483648, %v9234_v40  ;;  %v2944_v38 = vsel %vm2941_vm8, %v2943_v4, %v2939_v22  ;;  %v2927_v40 = vand.u32 2147483648, %v9275_v30 }
 0xc0b   :  { %v5847_v59 = vpop.eup %5846  ;;  %vm2921_vm1 = vweird.f32 %v9275_v30  ;;  %vm2966_vm3 = vweird.f32 %v9279_v46  ;;  %vm2926_vm15 = vcmp.eq.f32.partialorder %v2925_v19, 8.507059e+37  ;;  %vm2971_vm4 = vcmp.eq.f32.partialorder %v2970_v36, 8.507059e+37 }
 0xc0c   :  { %v5849_v34 = vpop.eup %5848  ;;  %v9298_v12 = vadd.f32 1.0, %v5847_v59  ;;  %v2988_v7 = vor.u32 1.1754944e-38, %v2987_v11 }
 0xc0d   :  { %v5851_v33 = vpop.eup %5850  ;;  %v9302_v2 = vadd.f32 1.0, %v5849_v34 }
 0xc0e   :  { %5858 = vrcp.f32 %v9298_v12  ;;  %v9307_v16 = vmul.f32 %v5851_v33, %v2772_v63  ;;  %v5853_v27 = vpop.eup %5852  ;;  %v9369_v63 = vld [vmem:[#allocation2 + $0x298] sm:$0xff]  ;;  %vm2951_vm7 = vweird.f32 %v9298_v12 }
 0xc0f   :  { %5860 = vrcp.f32 %v9302_v2  ;;  %v9319_v39 = vpop.eup %5854  ;;  %v2917_v17 = vmul.f32 %v5853_v27, %v9275_v30  ;;  %vm2922_vm13 = vweird.f32 %v5853_v27  ;;  %vm2996_vm8 = vweird.f32 %v9302_v2 }
 0xc10   :  { %13030 = vst [vmem:[#allocation16_spill] sm:$0xff] %v9307_v16  ;;  %5862 = vtanh.f32 %v2891_v5  ;;  %v3030_v59 = vrot.slane %v9307_v16, 5  ;;  %v5857_v13 = vpop.eup %5856  ;;  %v2962_v34 = vmul.f32 %v9319_v39, %v9279_v46  ;;  %v2972_v16 = vand.u32 2147483648, %v9279_v46  ;;  %vm2923_vm14 = vmor %vm2921_vm1, %vm2922_vm13 }
 0xc11   :  { %v2918_v5 = vsub.f32 1.0, %v2917_v17  ;;  %vm2967_vm9 = vweird.f32 %v9319_v39  ;;  %v9352_v17 = vld [vmem:[#allocation2 + $0x2a8] sm:$0xff] }
 0xc12   :  { %v3032_v44 = vrot.slane %v3030_v59, 3  ;;  %v2963_v45 = vsub.f32 1.0, %v2962_v34  ;;  %13037 = vst [vmem:[#allocation17_spill] sm:$0xff] %v9352_v17  ;;  %v9355_v59 = vld [vmem:[#allocation2 + $0x2b8] sm:$0xff]  ;;  %v2989_v34 = vsel %vm9333_vm12, %v2988_v7, %v2984_v37  ;;  %vm2968_vm0 = vmor %vm2966_vm3, %vm2967_vm9  ;;  %vm3027_vm9 = vcmask 1044484  }
 0xc13   :  { %v2919_v23 = vmul.f32 %v5853_v27, %v2918_v5 }
 0xc14   :  { %v9341_v25 = vpop.eup %5858  ;;  %3071 = vmatmul.f32.vlgmr.msrb.gmra.mxu1 %v3032_v44  ;;  %3111 = vmatmul.f32.vlgmr.msra.gmra.mxu3 %v3032_v44  ;;  %v2964_v22 = vmul.f32 %v9319_v39, %v2963_v45  ;;  %v2928_v45 = vor.u32 1.1754944e-38, %v2927_v40 }
 0xc15   :  { %v9345_v11 = vpop.eup %5860  ;;  %v2947_v51 = vmul.f32 %v9341_v25, %v9298_v12  ;;  %3282 = vmatpush.msrb.mxu1 %v9352_v17  ;;  %3322 = vmatpush.msra.mxu3 %v9355_v59  ;;  %v2920_v33 = vadd.f32 %v5853_v27, %v2919_v23  ;;  %v2973_v23 = vor.u32 1.1754944e-38, %v2972_v16  ;;  %vm2952_vm5 = vweird.f32 %v9341_v25 }
 0xc16   :  { %v5863_v4 = vpop.eup %5862  ;;  %v2992_v5 = vmul.f32 %v9345_v11, %v9302_v2  ;;  %v2965_v60 = vadd.f32 %v9319_v39, %v2964_v22  ;;  %v9376_v22 = vld [vmem:[#allocation2 + $0x268] sm:$0xff]  ;;  %vm2997_vm6 = vweird.f32 %v9345_v11  ;;  %vm9422_vm10 = vmor %vm2951_vm7, %vm2952_vm5 }
 0xc17   :  { %v2948_v17 = vsub.f32 1.0, %v2947_v51  ;;  %3283 = vmatpush.msrb.mxu1 %v9366_v8  ;;  %3323 = vmatpush.msra.mxu3 %v9369_v63  ;;  %v2924_v30 = vsel %vm2923_vm14, %v5853_v27, %v2920_v33  ;;  %v9379_v51 = vld [vmem:[#allocation2 + $0x278] sm:$0xff]  ;;  %v13038_v27 = vrot.slane %v8952_v61, 7  ;;  %vm9438_vm11 = vmor %vm2996_vm8, %vm2997_vm6 }
 0xc18   :  { %v2993_v7 = vsub.f32 1.0, %v2992_v5  ;;  %v2929_v37 = vsel %vm2926_vm15, %v2928_v45, %v2924_v30  ;;  %v2969_v40 = vsel %vm2968_vm0, %v9319_v39, %v2965_v60  ;;  %v13039_v60 = vrot.slane %v8956_v57, 7  ;;  %v9390_v45 = vld [vmem:[#allocation2 + $0x258] sm:$0xff] }
 0xc19   :  { %v2949_v46 = vmul.f32 %v9341_v25, %v2948_v17  ;;  %3284 = vmatpush.msrb.mxu1 %v9376_v22  ;;  %3324 = vmatpush.msra.mxu3 %v9379_v51  ;;  %v3014_v19 = vmul.f32 %v13038_v27, %v2944_v38  ;;  %v2974_v33 = vsel %vm2971_vm4, %v2973_v23, %v2969_v40  ;;  %v9387_v17 = vld [vmem:[#allocation2 + $0x248] sm:$0xff]  ;;  %v3002_v30 = vand.u32 2147483648, %v9302_v2 }
 0xc1a   :  { %v3016_v16 = vmul.f32 %v5857_v13, %v2929_v37  ;;  %v2994_v5 = vmul.f32 %v9345_v11, %v2993_v7  ;;  %v3015_v39 = vmul.f32 %v13039_v60, %v2989_v34  ;;  %v3017_v36 = vmul.f32 %v5863_v4, %v2974_v33  ;;  %v9395_v38 = vld [vmem:[#allocation2 + $0x228] sm:$0xff]  ;;  %v9398_v13 = vld [vmem:[#allocation2 + $0x238] sm:$0xff] }
 0xc1b   :  { %3285 = vmatpush.msrb.mxu1 %v9387_v17  ;;  %3325 = vmatpush.msra.mxu3 %v9390_v45  ;;  %v2950_v57 = vadd.f32 %v9341_v25, %v2949_v46  ;;  %v2957_v34 = vand.u32 2147483648, %v9298_v12  ;;  %v9410_v23 = vld [vmem:[#allocation2 + $0x208] sm:$0xff]  ;;  %v9413_v7 = vld [vmem:[#allocation2 + $0x218] sm:$0xff]  ;;  %v2955_v37 = vand.u32 2147483647, %v9298_v12 }
 0xc1c   :  { %3151 = vmatmul.f32.vlgmr.msra.gmra.mxu1 %v3032_v44  ;;  %3191 = vmatmul.f32.vlgmr.msrb.gmra.mxu3 %v3032_v44  ;;  %v9393_v61 = vadd.f32 %v3016_v16, %v3014_v19  ;;  %v9403_v4 = vadd.f32 %v3017_v36, %v3015_v39  ;;  %v2995_v44 = vadd.f32 %v9345_v11, %v2994_v5  ;;  %v3000_v46 = vand.u32 2147483647, %v9302_v2  ;;  %v9427_v27 = vld [vmem:[#allocation2 + $0x1e8] sm:$0xff]  ;;  %v9430_v19 = vld [vmem:[#allocation2 + $0x1f8] sm:$0xff] }
 0xc1d   :  { %3286 = vmatpush.msrb.mxu1 %v9395_v38  ;;  %3326 = vmatpush.msra.mxu3 %v9398_v13  ;;  %v2954_v12 = vsel %vm9422_vm10, %v9341_v25, %v2950_v57  ;;  %v2958_v16 = vor.u32 1.1754944e-38, %v2957_v34  ;;  %v3003_v5 = vor.u32 1.1754944e-38, %v3002_v30  ;;  %v9445_v60 = vld [vmem:[#allocation2 + $0x1c8] sm:$0xff]  ;;  %v9448_v39 = vld [vmem:[#allocation2 + $0x1d8] sm:$0xff]  ;;  %vm2956_vm12 = vcmp.eq.f32.partialorder %v2955_v37, 8.507059e+37 }
 0xc1e   :  { %5864 = vtanh.f32 %v9393_v61  ;;  %v2999_v2 = vsel %vm9438_vm11, %v9345_v11, %v2995_v44  ;;  %vm3001_vm13 = vcmp.eq.f32.partialorder %v3000_v46, 8.507059e+37  ;;  %v9451_v40 = vld [vmem:[#allocation2 + $0x1a8] sm:$0xff]  ;;  %v9454_v34 = vld [vmem:[#allocation2 + $0x1b8] sm:$0xff] }
 0xc1f   :  { %3287 = vmatpush.msrb.mxu1 %v9410_v23  ;;  %3327 = vmatpush.msra.mxu3 %v9413_v7  ;;  %5866 = vtanh.f32 %v9403_v4  ;;  %v2959_v36 = vsel %vm2956_vm12, %v2958_v16, %v2954_v12  ;;  %13044 = vst [vmem:[#allocation18_spill] sm:$0xff] %v9451_v40  ;;  %v3004_v11 = vsel %vm3001_vm13, %v3003_v5, %v2999_v2  ;;  %v9457_v33 = vld [vmem:[#allocation2 + $0x188] sm:$0xff]  ;;  %v9460_v37 = vld [vmem:[#allocation2 + $0x198] sm:$0xff] }
 0xc20   :  { %13045 = vst [vmem:[#allocation19_spill] sm:$0xff] %v9454_v34 }
 0xc21   :  { %3288 = vmatpush.msrb.mxu1 %v9427_v27  ;;  %3328 = vmatpush.msra.mxu3 %v9430_v19 }
 0xc23   :  { %3289 = vmatpush.msrb.mxu1 %v9445_v60  ;;  %3329 = vmatpush.msra.mxu3 %v9448_v39 }
 0xc24   :  { %v5865_v25 = vpop.eup %5864 }
 0xc25   :  { %v5867_v57 = vpop.eup %5866  ;;  %3290 = vmatpush.msrb.mxu1 %v9451_v40  ;;  %3330 = vmatpush.msra.mxu3 %v9454_v34  ;;  %v3022_v44 = vmul.f32 %v5865_v25, %v2959_v36  ;;  %v9463_v40 = vld [vmem:[#allocation2 + $0x168] sm:$0xff]  ;;  %v9466_v34 = vld [vmem:[#allocation2 + $0x178] sm:$0xff] }
 0xc26   :  { %v3023_v30 = vmul.f32 %v5867_v57, %v3004_v11  ;;  %v9472_v25 = vld [vmem:[#allocation2 + $0x148] sm:$0xff]  ;;  %v9475_v36 = vld [vmem:[#allocation2 + $0x158] sm:$0xff] }
 0xc27   :  { %3291 = vmatpush.msrb.mxu1 %v9457_v33  ;;  %3331 = vmatpush.msra.mxu3 %v9460_v37  ;;  %v3258_v46 = vrot.slane %v3022_v44, 3  ;;  %v9478_v11 = vld [vmem:[#allocation2 + $0x128] sm:$0xff] }
 0xc28   :  { %v3026_v12 = vrot.slane %v3023_v30, 7  ;;  %v3259_v16 = vrot.slane %v3023_v30, 2  ;;  %v9481_v30 = vld [vmem:[#allocation2 + $0x138] sm:$0xff] }
 0xc29   :  { %3292 = vmatpush.msrb.mxu1 %v9463_v40  ;;  %3332 = vmatpush.msra.mxu3 %v9466_v34 }
 0xc2a   :  { %v3028_v2 = vsel %vm3027_vm9, %v3026_v12, %v3022_v44  ;;  %v9470_v5 = vsel %vm115_vm2, %v3259_v16, %v3258_v46  ;;  %v9485_v44 = vld [vmem:[#allocation2 + $0x108] sm:$0xff]  ;;  %v9489_v46 = vld [vmem:[#allocation2 + $0x118] sm:$0xff] }
 0xc2b   :  { %3293 = vmatpush.msrb.mxu1 %v9472_v25  ;;  %3333 = vmatpush.msra.mxu3 %v9475_v36  ;;  %v3031_v57 = vrot.slane %v3028_v2, 3  ;;  %v9493_v12 = vld [vmem:[#allocation2 + $0xe8] sm:$0xff]  ;;  %v9497_v16 = vld [vmem:[#allocation2 + $0xf8] sm:$0xff]  ;;  %v9604_v2 = vld [vmem:[#allocation2 + $0x540] sm:$0xff] }
 0xc2c   :  { %13072 = vst [vmem:[#allocation60_spill] sm:$0xff] %v9604_v2 }
 0xc2d   :  { %3294 = vmatpush.msrb.mxu1 %v9478_v11  ;;  %3334 = vmatpush.msra.mxu3 %v9481_v30 }
 0xc2e   :  { %3051 = vmatmul.f32.vlgmr.msra.gmra.mxu0 %v3031_v57  ;;  %3091 = vmatmul.f32.vlgmr.msra.gmra.mxu2 %v3031_v57 }
 0xc2f   :  { %3262 = vmatpush.msra.mxu0 %v8991_v48  ;;  %3295 = vmatpush.msrb.mxu1 %v9485_v44  ;;  %v9501_v48 = vld [vmem:[#allocation2 + $0xc8] sm:$0xff] }
 0xc30   :  { %3302 = vmatpush.msra.mxu2 %v8994_v26  ;;  %3335 = vmatpush.msra.mxu3 %v9489_v46  ;;  %v9505_v26 = vld [vmem:[#allocation2 + $0xd8] sm:$0xff] }
 0xc31   :  { %3263 = vmatpush.msra.mxu0 %v8999_v9  ;;  %3296 = vmatpush.msrb.mxu1 %v9493_v12  ;;  %v9514_v9 = vld [vmem:[#allocation2 + $0x6a0] sm:$0xff] }
 0xc32   :  { %3303 = vmatpush.msra.mxu2 %v9002_v53  ;;  %3336 = vmatpush.msra.mxu3 %v9497_v16  ;;  %13046 = vst [vmem:[#allocation20_spill] sm:$0xff] %v9514_v9  ;;  %v9517_v53 = vld [vmem:[#allocation2 + $0x6a8] sm:$0xff] }
 0xc33   :  { %3264 = vmatpush.msra.mxu0 %v9007_v20  ;;  %3297 = vmatpush.msrb.mxu1 %v9501_v48  ;;  %13047 = vst [vmem:[#allocation21_spill] sm:$0xff] %v9517_v53  ;;  %v9522_v20 = vld [vmem:[#allocation2 + $0x680] sm:$0xff] }
 0xc34   :  { %3304 = vmatpush.msra.mxu2 %v9010_v3  ;;  %3337 = vmatpush.msra.mxu3 %v9505_v26  ;;  %13048 = vst [vmem:[#allocation22_spill] sm:$0xff] %v9522_v20  ;;  %v9525_v3 = vld [vmem:[#allocation2 + $0x688] sm:$0xff] }
 0xc35   :  { %3298 = vmatmul.f32.vlgmr.msrb.gmra.mxu1 %v9470_v5  ;;  %3338 = vmatmul.f32.vlgmr.msra.gmra.mxu3 %v9470_v5  ;;  %13049 = vst [vmem:[#allocation23_spill] sm:$0xff] %v9525_v3 }
 0xc36   :  { %3265 = vmatpush.msra.mxu0 %v9015_v0  ;;  %3305 = vmatpush.msra.mxu2 %v9018_v15  ;;  %v9530_v0 = vld [vmem:[#allocation2 + $0x660] sm:$0xff]  ;;  %v9533_v15 = vld [vmem:[#allocation2 + $0x668] sm:$0xff] }
 0xc37   :  { %3131 = vmatmul.f32.vlgmr.msrb.gmra.mxu0 %v3031_v57  ;;  %3171 = vmatmul.f32.vlgmr.msrb.gmra.mxu2 %v3031_v57  ;;  %13050 = vst [vmem:[#allocation24_spill] sm:$0xff] %v9530_v0  ;;  %v9607_v57 = vld [vmem:[#allocation2 + $0x548] sm:$0xff] }
 0xc38   :  { %3266 = vmatpush.msra.mxu0 %v9021_v35  ;;  %3306 = vmatpush.msra.mxu2 %v9024_v55  ;;  %13051 = vst [vmem:[#allocation25_spill] sm:$0xff] %v9533_v15  ;;  %v9538_v35 = vld [vmem:[#allocation2 + $0x640] sm:$0xff]  ;;  %v9541_v55 = vld [vmem:[#allocation2 + $0x648] sm:$0xff] }
 0xc39   :  { %3533 = vmatpush.msra.mxu1 %v9514_v9  ;;  %3573 = vmatpush.msrb.mxu3 %v9517_v53  ;;  %13052 = vst [vmem:[#allocation28_spill] sm:$0xff] %v9538_v35 }
 0xc3a   :  { %3267 = vmatpush.msra.mxu0 %v9029_v52  ;;  %3307 = vmatpush.msra.mxu2 %v9032_v56  ;;  %13053 = vst [vmem:[#allocation29_spill] sm:$0xff] %v9541_v55  ;;  %v9546_v52 = vld [vmem:[#allocation2 + $0x620] sm:$0xff]  ;;  %v9549_v56 = vld [vmem:[#allocation2 + $0x628] sm:$0xff] }
 0xc3b   :  { %3534 = vmatpush.msra.mxu1 %v9522_v20  ;;  %3574 = vmatpush.msrb.mxu3 %v9525_v3  ;;  %13054 = vst [vmem:[#allocation32_spill] sm:$0xff] %v9546_v52 }
 0xc3c   :  { %3268 = vmatpush.msra.mxu0 %v9037_v6  ;;  %3308 = vmatpush.msra.mxu2 %v9040_v49  ;;  %13055 = vst [vmem:[#allocation33_spill] sm:$0xff] %v9549_v56  ;;  %v9554_v6 = vld [vmem:[#allocation2 + $0x600] sm:$0xff]  ;;  %v9557_v49 = vld [vmem:[#allocation2 + $0x608] sm:$0xff] }
 0xc3d   :  { %3535 = vmatpush.msra.mxu1 %v9530_v0  ;;  %3575 = vmatpush.msrb.mxu3 %v9533_v15  ;;  %13056 = vst [vmem:[#allocation36_spill] sm:$0xff] %v9554_v6  ;;  %v13186_v0 = vld [vmem:[#allocation96_spill] sm:$0xff] }
 0xc3e   :  { %3269 = vmatpush.msra.mxu0 %v9045_v29  ;;  %3309 = vmatpush.msra.mxu2 %v9048_v10  ;;  %13057 = vst [vmem:[#allocation37_spill] sm:$0xff] %v9557_v49  ;;  %v9562_v29 = vld [vmem:[#allocation2 + $0x5e0] sm:$0xff]  ;;  %v9565_v10 = vld [vmem:[#allocation2 + $0x5e8] sm:$0xff] }
 0xc3f   :  { %3536 = vmatpush.msra.mxu1 %v9538_v35  ;;  %3576 = vmatpush.msrb.mxu3 %v9541_v55  ;;  %13058 = vst [vmem:[#allocation40_spill] sm:$0xff] %v9562_v29 }
 0xc40   :  { %3270 = vmatpush.msra.mxu0 %v9053_v28  ;;  %3310 = vmatpush.msra.mxu2 %v9056_v32  ;;  %13059 = vst [vmem:[#allocation41_spill] sm:$0xff] %v9565_v10  ;;  %v9570_v28 = vld [vmem:[#allocation2 + $0x5c0] sm:$0xff]  ;;  %v9573_v32 = vld [vmem:[#allocation2 + $0x5c8] sm:$0xff] }
 0xc41   :  { %3537 = vmatpush.msra.mxu1 %v9546_v52  ;;  %3577 = vmatpush.msrb.mxu3 %v9549_v56  ;;  %13060 = vst [vmem:[#allocation44_spill] sm:$0xff] %v9570_v28  ;;  %v13182_v52 = vld [vmem:[#allocation99_spill] sm:$0xff] }
 0xc42   :  { %3271 = vmatpush.msra.mxu0 %v9061_v1  ;;  %3311 = vmatpush.msra.mxu2 %v9064_v58  ;;  %13061 = vst [vmem:[#allocation45_spill] sm:$0xff] %v9573_v32  ;;  %v9578_v1 = vld [vmem:[#allocation2 + $0x5a0] sm:$0xff]  ;;  %v9581_v58 = vld [vmem:[#allocation2 + $0x5a8] sm:$0xff] }
 0xc43   :  { %3538 = vmatpush.msra.mxu1 %v9554_v6  ;;  %3578 = vmatpush.msrb.mxu3 %v9557_v49  ;;  %13062 = vst [vmem:[#allocation48_spill] sm:$0xff] %v9578_v1  ;;  %v13180_v49 = vld [vmem:[#allocation97_spill] sm:$0xff] }
 0xc44   :  { %3272 = vmatpush.msra.mxu0 %v9069_v24  ;;  %3312 = vmatpush.msra.mxu2 %v9072_v47  ;;  %13063 = vst [vmem:[#allocation49_spill] sm:$0xff] %v9581_v58  ;;  %v9586_v24 = vld [vmem:[#allocation2 + $0x580] sm:$0xff]  ;;  %v9589_v47 = vld [vmem:[#allocation2 + $0x588] sm:$0xff] }
 0xc45   :  { %3539 = vmatpush.msra.mxu1 %v9562_v29  ;;  %3579 = vmatpush.msrb.mxu3 %v9565_v10  ;;  %13064 = vst [vmem:[#allocation52_spill] sm:$0xff] %v9586_v24 }
 0xc46   :  { %3273 = vmatpush.msra.mxu0 %v9077_v18  ;;  %3313 = vmatpush.msra.mxu2 %v9080_v62  ;;  %13065 = vst [vmem:[#allocation53_spill] sm:$0xff] %v9589_v47  ;;  %v13066_v18 = vld [vmem:[#allocation100_spill] sm:$0xff]  ;;  %v13067_v62 = vld [vmem:[#allocation101_spill] sm:$0xff] }
 0xc47   :  { %3540 = vmatpush.msra.mxu1 %v9570_v28  ;;  %3580 = vmatpush.msrb.mxu3 %v9573_v32  ;;  %13073 = vst [vmem:[#allocation61_spill] sm:$0xff] %v9607_v57 }
 0xc48   :  { %3274 = vmatpush.msra.mxu0 %v9085_v21  ;;  %3314 = vmatpush.msra.mxu2 %v9088_v31  ;;  %v9594_v21 = vld [vmem:[#allocation2 + $0x560] sm:$0xff]  ;;  %v9597_v31 = vld [vmem:[#allocation2 + $0x568] sm:$0xff] }
 0xc49   :  { %3541 = vmatpush.msra.mxu1 %v9578_v1  ;;  %3581 = vmatpush.msrb.mxu3 %v9581_v58  ;;  %13068 = vst [vmem:[#allocation56_spill] sm:$0xff] %v9594_v21  ;;  %v13179_v1 = vld [vmem:[#allocation9_spill] sm:$0xff] }
 0xc4a   :  { %3275 = vmatpush.msra.mxu0 %v9093_v14  ;;  %3315 = vmatpush.msra.mxu2 %v9096_v50  ;;  %13069 = vst [vmem:[#allocation57_spill] sm:$0xff] %v9597_v31  ;;  %v13070_v14 = vld [vmem:[#allocation14_spill] sm:$0xff]  ;;  %v13071_v50 = vld [vmem:[#allocation15_spill] sm:$0xff] }
 0xc4b   :  { %3542 = vmatpush.msra.mxu1 %v9586_v24  ;;  %3582 = vmatpush.msrb.mxu3 %v9589_v47 }
 0xc4c   :  { %3276 = vmatpush.msra.mxu0 %v13066_v18  ;;  %3316 = vmatpush.msra.mxu2 %v13067_v62  ;;  %v9610_v18 = vld [vmem:[#allocation2 + $0x4a0] sm:$0xff]  ;;  %v9613_v62 = vld [vmem:[#allocation2 + $0x4a8] sm:$0xff] }
 0xc4d   :  { %3543 = vmatpush.msra.mxu1 %v9594_v21  ;;  %3583 = vmatpush.msrb.mxu3 %v9597_v31  ;;  %13074 = vst [vmem:[#allocation26_spill] sm:$0xff] %v9610_v18 }
 0xc4e   :  { %3277 = vmatpush.msra.mxu0 %v13070_v14  ;;  %3317 = vmatpush.msra.mxu2 %v13071_v50  ;;  %13075 = vst [vmem:[#allocation27_spill] sm:$0xff] %v9613_v62  ;;  %v9616_v14 = vld [vmem:[#allocation2 + $0x520] sm:$0xff] }
 0xc4f   :  { %3278 = vmatmul.f32.vlgmr.msra.gmra.mxu0 %v9470_v5  ;;  %3318 = vmatmul.f32.vlgmr.msra.gmra.mxu2 %v9470_v5  ;;  %13076 = vst [vmem:[#allocation64_spill] sm:$0xff] %v9616_v14  ;;  %v9619_v5 = vld [vmem:[#allocation2 + $0x528] sm:$0xff]  ;;  %v9622_v50 = vld [vmem:[#allocation2 + $0x480] sm:$0xff] }
 0xc50   :  { %3544 = vmatpush.msra.mxu1 %v9604_v2  ;;  %3584 = vmatpush.msrb.mxu3 %v9607_v57  ;;  %13077 = vst [vmem:[#allocation30_spill] sm:$0xff] %v9619_v5  ;;  %v9625_v57 = vld [vmem:[#allocation2 + $0x488] sm:$0xff] }
 0xc51   :  { %3513 = vmatpush.msrb.mxu0 %v9610_v18  ;;  %3553 = vmatpush.msrb.mxu2 %v9613_v62  ;;  %13078 = vst [vmem:[#allocation65_spill] sm:$0xff] %v9622_v50  ;;  %v9628_v18 = vld [vmem:[#allocation2 + $0x500] sm:$0xff]  ;;  %v9631_v62 = vld [vmem:[#allocation2 + $0x508] sm:$0xff] }
 0xc52   :  { %3545 = vmatpush.msra.mxu1 %v9616_v14  ;;  %3585 = vmatpush.msrb.mxu3 %v9619_v5  ;;  %13079 = vst [vmem:[#allocation31_spill] sm:$0xff] %v9625_v57  ;;  %v9634_v14 = vld [vmem:[#allocation2 + $0x460] sm:$0xff]  ;;  %v9637_v5 = vld [vmem:[#allocation2 + $0x468] sm:$0xff] }
 0xc53   :  { %3514 = vmatpush.msrb.mxu0 %v9622_v50  ;;  %3554 = vmatpush.msrb.mxu2 %v9625_v57  ;;  %13080 = vst [vmem:[#allocation68_spill] sm:$0xff] %v9628_v18  ;;  %v9640_v50 = vld [vmem:[#allocation2 + $0x4e0] sm:$0xff]  ;;  %v9643_v57 = vld [vmem:[#allocation2 + $0x4e8] sm:$0xff] }
 0xc54   :  { %3546 = vmatpush.msra.mxu1 %v9628_v18  ;;  %13081 = vst [vmem:[#allocation34_spill] sm:$0xff] %v9631_v62  ;;  %3586 = vmatpush.msrb.mxu3 %v9631_v62  ;;  %v9646_v18 = vld [vmem:[#allocation2 + $0x440] sm:$0xff]  ;;  %v9649_v62 = vld [vmem:[#allocation2 + $0x448] sm:$0xff] }
 0xc55   :  { %13082 = vst [vmem:[#allocation69_spill] sm:$0xff] %v9634_v14  ;;  %3515 = vmatpush.msrb.mxu0 %v9634_v14  ;;  %3555 = vmatpush.msrb.mxu2 %v9637_v5  ;;  %v9652_v14 = vld [vmem:[#allocation2 + $0x4c0] sm:$0xff] }
 0xc56   :  { %13083 = vst [vmem:[#allocation35_spill] sm:$0xff] %v9637_v5  ;;  %3547 = vmatpush.msra.mxu1 %v9640_v50  ;;  %3587 = vmatpush.msrb.mxu3 %v9643_v57  ;;  %v9655_v5 = vld [vmem:[#allocation2 + $0x4c8] sm:$0xff] }
 0xc57   :  { %13084 = vst [vmem:[#allocation72_spill] sm:$0xff] %v9640_v50  ;;  %3516 = vmatpush.msrb.mxu0 %v9646_v18  ;;  %3556 = vmatpush.msrb.mxu2 %v9649_v62  ;;  %v9658_v50 = vld [vmem:[#allocation2 + $0x6b0] sm:$0xff] }
 0xc58   :  { %13085 = vst [vmem:[#allocation38_spill] sm:$0xff] %v9643_v57  ;;  %3548 = vmatpush.msra.mxu1 %v9652_v14  ;;  %3588 = vmatpush.msrb.mxu3 %v9655_v5  ;;  %v9661_v57 = vld [vmem:[#allocation2 + $0x6b8] sm:$0xff] }
 0xc59   :  { %13086 = vst [vmem:[#allocation73_spill] sm:$0xff] %v9646_v18  ;;  %v9664_v18 = vld [vmem:[#allocation2 + $0x420] sm:$0xff] }
 0xc5a   :  { %13087 = vst [vmem:[#allocation39_spill] sm:$0xff] %v9649_v62  ;;  %3613 = vmatpush.msrb.mxu1 %v9658_v50  ;;  %3653 = vmatpush.msra.mxu3 %v9661_v57  ;;  %v9667_v62 = vld [vmem:[#allocation2 + $0x428] sm:$0xff] }
 0xc5b   :  { %13088 = vst [vmem:[#allocation76_spill] sm:$0xff] %v9652_v14  ;;  %3517 = vmatpush.msrb.mxu0 %v9664_v18  ;;  %3557 = vmatpush.msrb.mxu2 %v9667_v62  ;;  %v9670_v14 = vld [vmem:[#allocation2 + $0x690] sm:$0xff] }
 0xc5c   :  { %13089 = vst [vmem:[#allocation42_spill] sm:$0xff] %v9655_v5  ;;  %3614 = vmatpush.msrb.mxu1 %v9670_v14  ;;  %v9673_v5 = vld [vmem:[#allocation2 + $0x698] sm:$0xff] }
 0xc5d   :  { %13090 = vst [vmem:[#allocation77_spill] sm:$0xff] %v9658_v50  ;;  %3654 = vmatpush.msra.mxu3 %v9673_v5  ;;  %v9676_v50 = vld [vmem:[#allocation2 + $0x400] sm:$0xff] }
 0xc5e   :  { %13091 = vst [vmem:[#allocation43_spill] sm:$0xff] %v9661_v57  ;;  %3518 = vmatpush.msrb.mxu0 %v9676_v50  ;;  %v9679_v57 = vld [vmem:[#allocation2 + $0x408] sm:$0xff] }
 0xc5f   :  { %13092 = vst [vmem:[#allocation80_spill] sm:$0xff] %v9664_v18  ;;  %3558 = vmatpush.msrb.mxu2 %v9679_v57  ;;  %v9682_v18 = vld [vmem:[#allocation2 + $0x670] sm:$0xff] }
 0xc60   :  { %13093 = vst [vmem:[#allocation46_spill] sm:$0xff] %v9667_v62  ;;  %3615 = vmatpush.msrb.mxu1 %v9682_v18  ;;  %v9685_v62 = vld [vmem:[#allocation2 + $0x678] sm:$0xff] }
 0xc61   :  { %13094 = vst [vmem:[#allocation81_spill] sm:$0xff] %v9670_v14  ;;  %3655 = vmatpush.msra.mxu3 %v9685_v62  ;;  %v9688_v14 = vld [vmem:[#allocation2 + $0x3e0] sm:$0xff] }
 0xc62   :  { %13095 = vst [vmem:[#allocation47_spill] sm:$0xff] %v9673_v5  ;;  %3519 = vmatpush.msrb.mxu0 %v9688_v14  ;;  %v9691_v5 = vld [vmem:[#allocation2 + $0x3e8] sm:$0xff] }
 0xc63   :  { %13096 = vst [vmem:[#allocation84_spill] sm:$0xff] %v9676_v50  ;;  %3559 = vmatpush.msrb.mxu2 %v9691_v5  ;;  %v9694_v50 = vld [vmem:[#allocation2 + $0x650] sm:$0xff] }
 0xc64   :  { %13097 = vst [vmem:[#allocation50_spill] sm:$0xff] %v9679_v57  ;;  %3616 = vmatpush.msrb.mxu1 %v9694_v50  ;;  %v9697_v57 = vld [vmem:[#allocation2 + $0x658] sm:$0xff] }
 0xc65   :  { %13098 = vst [vmem:[#allocation85_spill] sm:$0xff] %v9682_v18  ;;  %3656 = vmatpush.msra.mxu3 %v9697_v57  ;;  %v9700_v18 = vld [vmem:[#allocation2 + $0x3c0] sm:$0xff] }
 0xc66   :  { %13099 = vst [vmem:[#allocation51_spill] sm:$0xff] %v9685_v62  ;;  %3520 = vmatpush.msrb.mxu0 %v9700_v18  ;;  %v9703_v62 = vld [vmem:[#allocation2 + $0x3c8] sm:$0xff] }
 0xc67   :  { %13100 = vst [vmem:[#allocation88_spill] sm:$0xff] %v9688_v14  ;;  %3560 = vmatpush.msrb.mxu2 %v9703_v62  ;;  %v9706_v14 = vld [vmem:[#allocation2 + $0x630] sm:$0xff] }
 0xc68   :  { %13101 = vst [vmem:[#allocation54_spill] sm:$0xff] %v9691_v5  ;;  %3617 = vmatpush.msrb.mxu1 %v9706_v14  ;;  %v9709_v5 = vld [vmem:[#allocation2 + $0x638] sm:$0xff] }
 0xc69   :  { %13102 = vst [vmem:[#allocation89_spill] sm:$0xff] %v9694_v50  ;;  %3657 = vmatpush.msra.mxu3 %v9709_v5  ;;  %v9712_v50 = vld [vmem:[#allocation2 + $0x3a0] sm:$0xff] }
 0xc6a   :  { %13103 = vst [vmem:[#allocation55_spill] sm:$0xff] %v9697_v57  ;;  %3521 = vmatpush.msrb.mxu0 %v9712_v50  ;;  %v9715_v57 = vld [vmem:[#allocation2 + $0x3a8] sm:$0xff] }
 0xc6b   :  { %13104 = vst [vmem:[#allocation58_spill] sm:$0xff] %v9700_v18  ;;  %3561 = vmatpush.msrb.mxu2 %v9715_v57  ;;  %v9718_v18 = vld [vmem:[#allocation2 + $0x610] sm:$0xff] }
 0xc6c   :  { %13105 = vst [vmem:[#allocation59_spill] sm:$0xff] %v9703_v62  ;;  %3618 = vmatpush.msrb.mxu1 %v9718_v18  ;;  %v9721_v62 = vld [vmem:[#allocation2 + $0x618] sm:$0xff] }
 0xc6d   :  { %13106 = vst [vmem:[#allocation62_spill] sm:$0xff] %v9706_v14  ;;  %3658 = vmatpush.msra.mxu3 %v9721_v62  ;;  %v9724_v14 = vld [vmem:[#allocation2 + $0x380] sm:$0xff] }
 0xc6e   :  { %13107 = vst [vmem:[#allocation63_spill] sm:$0xff] %v9709_v5  ;;  %3522 = vmatpush.msrb.mxu0 %v9724_v14  ;;  %v9727_v5 = vld [vmem:[#allocation2 + $0x388] sm:$0xff] }
 0xc6f   :  { %13108 = vst [vmem:[#allocation66_spill] sm:$0xff] %v9712_v50  ;;  %3562 = vmatpush.msrb.mxu2 %v9727_v5  ;;  %v9730_v50 = vld [vmem:[#allocation2 + $0x5f0] sm:$0xff] }
 0xc70   :  { %13109 = vst [vmem:[#allocation67_spill] sm:$0xff] %v9715_v57  ;;  %3619 = vmatpush.msrb.mxu1 %v9730_v50  ;;  %v9733_v57 = vld [vmem:[#allocation2 + $0x5f8] sm:$0xff] }
 0xc71   :  { %13110 = vst [vmem:[#allocation70_spill] sm:$0xff] %v9718_v18  ;;  %3659 = vmatpush.msra.mxu3 %v9733_v57  ;;  %v9736_v18 = vld [vmem:[#allocation2 + $0x360] sm:$0xff] }
 0xc72   :  { %13111 = vst [vmem:[#allocation71_spill] sm:$0xff] %v9721_v62  ;;  %3523 = vmatpush.msrb.mxu0 %v9736_v18  ;;  %v9739_v62 = vld [vmem:[#allocation2 + $0x368] sm:$0xff] }
 0xc73   :  { %13112 = vst [vmem:[#allocation74_spill] sm:$0xff] %v9724_v14  ;;  %3563 = vmatpush.msrb.mxu2 %v9739_v62  ;;  %v9742_v14 = vld [vmem:[#allocation2 + $0x5d0] sm:$0xff] }
 0xc74   :  { %13113 = vst [vmem:[#allocation75_spill] sm:$0xff] %v9727_v5  ;;  %3620 = vmatpush.msrb.mxu1 %v9742_v14  ;;  %v9745_v5 = vld [vmem:[#allocation2 + $0x5d8] sm:$0xff] }
 0xc75   :  { %13114 = vst [vmem:[#allocation78_spill] sm:$0xff] %v9730_v50  ;;  %3660 = vmatpush.msra.mxu3 %v9745_v5  ;;  %v9748_v50 = vld [vmem:[#allocation2 + $0x340] sm:$0xff] }
 0xc76   :  { %13115 = vst [vmem:[#allocation79_spill] sm:$0xff] %v9733_v57  ;;  %3524 = vmatpush.msrb.mxu0 %v9748_v50  ;;  %v9751_v57 = vld [vmem:[#allocation2 + $0x348] sm:$0xff] }
 0xc77   :  { %13116 = vst [vmem:[#allocation82_spill] sm:$0xff] %v9736_v18  ;;  %3564 = vmatpush.msrb.mxu2 %v9751_v57  ;;  %v9754_v18 = vld [vmem:[#allocation2 + $0x5b0] sm:$0xff] }
 0xc78   :  { %13117 = vst [vmem:[#allocation83_spill] sm:$0xff] %v9739_v62  ;;  %3621 = vmatpush.msrb.mxu1 %v9754_v18  ;;  %v9757_v62 = vld [vmem:[#allocation2 + $0x5b8] sm:$0xff] }
 0xc79   :  { %13118 = vst [vmem:[#allocation86_spill] sm:$0xff] %v9742_v14  ;;  %3661 = vmatpush.msra.mxu3 %v9757_v62  ;;  %v9760_v14 = vld [vmem:[#allocation2 + $0x320] sm:$0xff] }
 0xc7a   :  { %13119 = vst [vmem:[#allocation87_spill] sm:$0xff] %v9745_v5  ;;  %3525 = vmatpush.msrb.mxu0 %v9760_v14  ;;  %v9763_v5 = vld [vmem:[#allocation2 + $0x328] sm:$0xff] }
 0xc7b   :  { %13120 = vst [vmem:[#allocation90_spill] sm:$0xff] %v9748_v50  ;;  %3565 = vmatpush.msrb.mxu2 %v9763_v5  ;;  %v9766_v50 = vld [vmem:[#allocation2 + $0x590] sm:$0xff] }
 0xc7c   :  { %13121 = vst [vmem:[#allocation91_spill] sm:$0xff] %v9751_v57  ;;  %3622 = vmatpush.msrb.mxu1 %v9766_v50  ;;  %v9769_v57 = vld [vmem:[#allocation2 + $0x598] sm:$0xff] }
 0xc7d   :  { %13122 = vst [vmem:[#allocation92_spill] sm:$0xff] %v9754_v18  ;;  %3662 = vmatpush.msra.mxu3 %v9769_v57  ;;  %v9772_v18 = vld [vmem:[#allocation2 + $0x300] sm:$0xff] }
 0xc7e   :  { %13123 = vst [vmem:[#allocation93_spill] sm:$0xff] %v9757_v62  ;;  %3526 = vmatpush.msrb.mxu0 %v9772_v18  ;;  %v9775_v62 = vld [vmem:[#allocation2 + $0x308] sm:$0xff] }
 0xc7f   :  { %13124 = vst [vmem:[#allocation94_spill] sm:$0xff] %v9760_v14  ;;  %3566 = vmatpush.msrb.mxu2 %v9775_v62  ;;  %v9778_v14 = vld [vmem:[#allocation2 + $0x570] sm:$0xff] }
 0xc80   :  { %13125 = vst [vmem:[#allocation95_spill] sm:$0xff] %v9763_v5  ;;  %3623 = vmatpush.msrb.mxu1 %v9778_v14  ;;  %v9781_v5 = vld [vmem:[#allocation2 + $0x578] sm:$0xff] }
 0xc81   :  { %13126 = vst [vmem:[#allocation104_spill] sm:$0xff] %v9766_v50  ;;  %3663 = vmatpush.msra.mxu3 %v9781_v5  ;;  %v9784_v50 = vld [vmem:[#allocation2 + $0x2e0] sm:$0xff] }
 0xc82   :  { %13127 = vst [vmem:[#allocation105_spill] sm:$0xff] %v9769_v57  ;;  %3527 = vmatpush.msrb.mxu0 %v9784_v50  ;;  %v9787_v57 = vld [vmem:[#allocation2 + $0x2e8] sm:$0xff] }
 0xc83   :  { %13128 = vst [vmem:[#allocation106_spill] sm:$0xff] %v9772_v18  ;;  %3567 = vmatpush.msrb.mxu2 %v9787_v57  ;;  %v9790_v18 = vld [vmem:[#allocation2 + $0x550] sm:$0xff] }
 0xc84   :  { %13129 = vst [vmem:[#allocation107_spill] sm:$0xff] %v9775_v62  ;;  %3624 = vmatpush.msrb.mxu1 %v9790_v18  ;;  %v9793_v62 = vld [vmem:[#allocation2 + $0x558] sm:$0xff] }
 0xc85   :  { %13130 = vst [vmem:[#allocation108_spill] sm:$0xff] %v9778_v14  ;;  %3664 = vmatpush.msra.mxu3 %v9793_v62  ;;  %v9796_v14 = vld [vmem:[#allocation2 + $0x2c0] sm:$0xff] }
 0xc86   :  { %13131 = vst [vmem:[#allocation109_spill] sm:$0xff] %v9781_v5  ;;  %3528 = vmatpush.msrb.mxu0 %v9796_v14  ;;  %v9799_v5 = vld [vmem:[#allocation2 + $0x2c8] sm:$0xff] }
 0xc87   :  { %13132 = vst [vmem:[#allocation110_spill] sm:$0xff] %v9784_v50  ;;  %3568 = vmatpush.msrb.mxu2 %v9799_v5  ;;  %v9802_v50 = vld [vmem:[#allocation2 + $0x530] sm:$0xff] }
 0xc88   :  { %13133 = vst [vmem:[#allocation111_spill] sm:$0xff] %v9787_v57  ;;  %3625 = vmatpush.msrb.mxu1 %v9802_v50  ;;  %v9805_v57 = vld [vmem:[#allocation2 + $0x538] sm:$0xff] }
 0xc89   :  { %13134 = vst [vmem:[#allocation112_spill] sm:$0xff] %v9790_v18  ;;  %3665 = vmatpush.msra.mxu3 %v9805_v57  ;;  %v9808_v18 = vld [vmem:[#allocation2 + $0x4b0] sm:$0xff] }
 0xc8a   :  { %13135 = vst [vmem:[#allocation113_spill] sm:$0xff] %v9793_v62  ;;  %3593 = vmatpush.msra.mxu0 %v9808_v18  ;;  %v9811_v62 = vld [vmem:[#allocation2 + $0x4b8] sm:$0xff] }
 0xc8b   :  { %13136 = vst [vmem:[#allocation114_spill] sm:$0xff] %v9796_v14  ;;  %3633 = vmatpush.msra.mxu2 %v9811_v62  ;;  %v9814_v14 = vld [vmem:[#allocation2 + $0x510] sm:$0xff] }
 0xc8c   :  { %13137 = vst [vmem:[#allocation115_spill] sm:$0xff] %v9799_v5  ;;  %3626 = vmatpush.msrb.mxu1 %v9814_v14  ;;  %v9817_v5 = vld [vmem:[#allocation2 + $0x518] sm:$0xff] }
 0xc8d   :  { %13138 = vst [vmem:[#allocation116_spill] sm:$0xff] %v9802_v50  ;;  %3666 = vmatpush.msra.mxu3 %v9817_v5  ;;  %v9820_v50 = vld [vmem:[#allocation2 + $0x490] sm:$0xff] }
 0xc8e   :  { %13139 = vst [vmem:[#allocation117_spill] sm:$0xff] %v9805_v57  ;;  %3594 = vmatpush.msra.mxu0 %v9820_v50  ;;  %v9823_v57 = vld [vmem:[#allocation2 + $0x498] sm:$0xff] }
 0xc8f   :  { %13140 = vst [vmem:[#allocation118_spill] sm:$0xff] %v9808_v18  ;;  %3634 = vmatpush.msra.mxu2 %v9823_v57  ;;  %v9826_v18 = vld [vmem:[#allocation2 + $0x4f0] sm:$0xff] }
 0xc90   :  { %13141 = vst [vmem:[#allocation119_spill] sm:$0xff] %v9811_v62  ;;  %3627 = vmatpush.msrb.mxu1 %v9826_v18  ;;  %v9829_v62 = vld [vmem:[#allocation2 + $0x4f8] sm:$0xff] }
 0xc91   :  { %13142 = vst [vmem:[#allocation120_spill] sm:$0xff] %v9814_v14  ;;  %3667 = vmatpush.msra.mxu3 %v9829_v62  ;;  %v9832_v14 = vld [vmem:[#allocation2 + $0x470] sm:$0xff] }
 0xc92   :  { %13143 = vst [vmem:[#allocation121_spill] sm:$0xff] %v9817_v5  ;;  %3595 = vmatpush.msra.mxu0 %v9832_v14  ;;  %v9835_v5 = vld [vmem:[#allocation2 + $0x478] sm:$0xff] }
 0xc93   :  { %13144 = vst [vmem:[#allocation122_spill] sm:$0xff] %v9820_v50  ;;  %3635 = vmatpush.msra.mxu2 %v9835_v5  ;;  %v9838_v50 = vld [vmem:[#allocation2 + $0x4d0] sm:$0xff] }
 0xc94   :  { %13145 = vst [vmem:[#allocation123_spill] sm:$0xff] %v9823_v57  ;;  %3628 = vmatpush.msrb.mxu1 %v9838_v50  ;;  %v9841_v57 = vld [vmem:[#allocation2 + $0x4d8] sm:$0xff] }
 0xc95   :  { %13146 = vst [vmem:[#allocation124_spill] sm:$0xff] %v9826_v18  ;;  %3668 = vmatpush.msra.mxu3 %v9841_v57  ;;  %v9844_v18 = vld [vmem:[#allocation2 + $0x450] sm:$0xff] }
 0xc96   :  { %13147 = vst [vmem:[#allocation125_spill] sm:$0xff] %v9829_v62  ;;  %3596 = vmatpush.msra.mxu0 %v9844_v18  ;;  %v9847_v62 = vld [vmem:[#allocation2 + $0x458] sm:$0xff] }
 0xc97   :  { %13148 = vst [vmem:[#allocation126_spill] sm:$0xff] %v9832_v14  ;;  %3636 = vmatpush.msra.mxu2 %v9847_v62  ;;  %v9850_v14 = vld [vmem:[#allocation2 + $0x430] sm:$0xff]  ;;  %v3112_v32 = vpop.f32.mrf.mxu3 }
 0xc98   :  { %13149 = vst [vmem:[#allocation127_spill] sm:$0xff] %v9835_v5  ;;  %3597 = vmatpush.msra.mxu0 %v9850_v14  ;;  %v9853_v5 = vld [vmem:[#allocation2 + $0x438] sm:$0xff] }
 0xc99   :  { %13150 = vst [vmem:[#allocation128_spill] sm:$0xff] %v9838_v50  ;;  %3637 = vmatpush.msra.mxu2 %v9853_v5  ;;  %v9856_v50 = vld [vmem:[#allocation2 + $0x410] sm:$0xff] }
 0xc9a   :  { %13151 = vst [vmem:[#allocation129_spill] sm:$0xff] %v9841_v57  ;;  %3598 = vmatpush.msra.mxu0 %v9856_v50  ;;  %v9859_v57 = vld [vmem:[#allocation2 + $0x418] sm:$0xff] }
 0xc9b   :  { %13152 = vst [vmem:[#allocation130_spill] sm:$0xff] %v9844_v18  ;;  %3638 = vmatpush.msra.mxu2 %v9859_v57  ;;  %v9862_v18 = vld [vmem:[#allocation2 + $0x3f0] sm:$0xff] }
 0xc9c   :  { %13153 = vst [vmem:[#allocation131_spill] sm:$0xff] %v9847_v62  ;;  %3599 = vmatpush.msra.mxu0 %v9862_v18  ;;  %v9865_v62 = vld [vmem:[#allocation2 + $0x3f8] sm:$0xff] }
 0xc9d   :  { %13154 = vst [vmem:[#allocation132_spill] sm:$0xff] %v9850_v14  ;;  %3639 = vmatpush.msra.mxu2 %v9865_v62  ;;  %v9868_v14 = vld [vmem:[#allocation2 + $0x3d0] sm:$0xff] }
 0xc9e   :  { %13155 = vst [vmem:[#allocation133_spill] sm:$0xff] %v9853_v5  ;;  %3600 = vmatpush.msra.mxu0 %v9868_v14  ;;  %v9871_v5 = vld [vmem:[#allocation2 + $0x3d8] sm:$0xff] }
 0xc9f   :  { %13156 = vst [vmem:[#allocation134_spill] sm:$0xff] %v9856_v50  ;;  %3640 = vmatpush.msra.mxu2 %v9871_v5  ;;  %v9874_v50 = vld [vmem:[#allocation2 + $0x3b0] sm:$0xff] }
 0xca0   :  { %13157 = vst [vmem:[#allocation135_spill] sm:$0xff] %v9859_v57  ;;  %3601 = vmatpush.msra.mxu0 %v9874_v50  ;;  %v9877_v57 = vld [vmem:[#allocation2 + $0x3b8] sm:$0xff] }
 0xca1   :  { %13158 = vst [vmem:[#allocation136_spill] sm:$0xff] %v9862_v18  ;;  %3641 = vmatpush.msra.mxu2 %v9877_v57  ;;  %v9880_v18 = vld [vmem:[#allocation2 + $0x390] sm:$0xff] }
 0xca2   :  { %13159 = vst [vmem:[#allocation137_spill] sm:$0xff] %v9865_v62  ;;  %3602 = vmatpush.msra.mxu0 %v9880_v18  ;;  %v9883_v62 = vld [vmem:[#allocation2 + $0x398] sm:$0xff] }
 0xca3   :  { %13160 = vst [vmem:[#allocation138_spill] sm:$0xff] %v9868_v14  ;;  %3642 = vmatpush.msra.mxu2 %v9883_v62  ;;  %v9886_v14 = vld [vmem:[#allocation2 + $0x370] sm:$0xff] }
 0xca4   :  { %13161 = vst [vmem:[#allocation139_spill] sm:$0xff] %v9871_v5  ;;  %3603 = vmatpush.msra.mxu0 %v9886_v14  ;;  %v9889_v5 = vld [vmem:[#allocation2 + $0x378] sm:$0xff] }
 0xca5   :  { %13162 = vst [vmem:[#allocation140_spill] sm:$0xff] %v9874_v50  ;;  %3643 = vmatpush.msra.mxu2 %v9889_v5  ;;  %v9892_v50 = vld [vmem:[#allocation2 + $0x350] sm:$0xff] }
 0xca6   :  { %13163 = vst [vmem:[#allocation141_spill] sm:$0xff] %v9877_v57  ;;  %3604 = vmatpush.msra.mxu0 %v9892_v50  ;;  %v9895_v57 = vld [vmem:[#allocation2 + $0x358] sm:$0xff] }
 0xca7   :  { %13164 = vst [vmem:[#allocation142_spill] sm:$0xff] %v9880_v18  ;;  %3644 = vmatpush.msra.mxu2 %v9895_v57  ;;  %v9898_v18 = vld [vmem:[#allocation2 + $0x330] sm:$0xff] }
 0xca8   :  { %13165 = vst [vmem:[#allocation143_spill] sm:$0xff] %v9883_v62  ;;  %3605 = vmatpush.msra.mxu0 %v9898_v18  ;;  %v9901_v62 = vld [vmem:[#allocation2 + $0x338] sm:$0xff] }
 0xca9   :  { %13166 = vst [vmem:[#allocation144_spill] sm:$0xff] %v9886_v14  ;;  %3645 = vmatpush.msra.mxu2 %v9901_v62  ;;  %v9904_v14 = vld [vmem:[#allocation2 + $0x310] sm:$0xff] }
 0xcaa   :  { %13167 = vst [vmem:[#allocation145_spill] sm:$0xff] %v9889_v5  ;;  %3606 = vmatpush.msra.mxu0 %v9904_v14  ;;  %v9907_v5 = vld [vmem:[#allocation2 + $0x318] sm:$0xff] }
 0xcab   :  { %13168 = vst [vmem:[#allocation146_spill] sm:$0xff] %v9892_v50  ;;  %3646 = vmatpush.msra.mxu2 %v9907_v5  ;;  %v9910_v50 = vld [vmem:[#allocation2 + $0x2f0] sm:$0xff]  ;;  %v3052_v31 = vpop.f32.mrf.mxu0 }
 0xcac   :  { %13169 = vst [vmem:[#allocation147_spill] sm:$0xff] %v9895_v57  ;;  %3607 = vmatpush.msra.mxu0 %v9910_v50  ;;  %v9913_v57 = vld [vmem:[#allocation2 + $0x2f8] sm:$0xff] }
 0xcad   :  { %13170 = vst [vmem:[#allocation148_spill] sm:$0xff] %v9898_v18  ;;  %3647 = vmatpush.msra.mxu2 %v9913_v57  ;;  %v9916_v18 = vld [vmem:[#allocation2 + $0x2d0] sm:$0xff] }
 0xcae   :  { %13171 = vst [vmem:[#allocation149_spill] sm:$0xff] %v9901_v62  ;;  %3608 = vmatpush.msra.mxu0 %v9916_v18  ;;  %v9919_v62 = vld [vmem:[#allocation2 + $0x2d8] sm:$0xff] }
 0xcaf   :  { %13172 = vst [vmem:[#allocation98_spill] sm:$0xff] %v9904_v14  ;;  %3648 = vmatpush.msra.mxu2 %v9919_v62  ;;  %v3072_v14 = vpop.f32.mrf.mxu1 }
 0xcb0   :  { %13173 = vst [vmem:[#allocation100_spill] sm:$0xff] %v9907_v5  ;;  %v13178_v5 = vld [vmem:[#allocation8_spill] sm:$0xff] }
 0xcb1   :  { %13174 = vst [vmem:[#allocation101_spill] sm:$0xff] %v9910_v50  ;;  %v3053_v21 = vadd.f32 %v3052_v31, %v13178_v5  ;;  %v3092_v50 = vpop.f32.mrf.mxu2 }
 0xcb2   :  { %13175 = vst [vmem:[#allocation14_spill] sm:$0xff] %v9913_v57  ;;  %v3093_v57 = vadd.f32 %v3092_v50, %v13179_v1 }
 0xcb3   :  { %13176 = vst [vmem:[#allocation15_spill] sm:$0xff] %v9916_v18  ;;  %v3073_v47 = vadd.f32 %v3072_v14, %v3053_v21 }
 0xcb4   :  { %13177 = vst [vmem:[#allocation150_spill] sm:$0xff] %v9919_v62  ;;  %v3113_v18 = vadd.f32 %v3112_v32, %v3093_v57  ;;  %v3132_v29 = vpop.f32.mrf.mxu0  ;;  %v13181_v62 = vld [vmem:[#allocation10_spill] sm:$0xff] }
 0xcb5   :  { %v5579_v24 = vmul.f32 -1.442695, %v3073_v47  ;;  %v3133_v56 = vadd.f32 %v3132_v29, %v13181_v62  ;;  %v13183_v29 = vld [vmem:[#allocation11_spill] sm:$0xff] }
 0xcb6   :  { %v5580_v35 = vmul.f32 -1.442695, %v3113_v18 }
 0xcb7   :  { %v3152_v2 = vpop.f32.mrf.mxu1  ;;  %5868 = vpow2.f32 %v5579_v24 }
 0xcb8   :  { %v3153_v31 = vadd.f32 %v3152_v2, %v3133_v56  ;;  %5870 = vpow2.f32 %v5580_v35  ;;  %v3192_v35 = vpop.f32.mrf.mxu3 }
 0xcba   :  { %v5581_v14 = vmul.f32 -1.442695, %v3153_v31  ;;  %v3172_v32 = vpop.f32.mrf.mxu2 }
 0xcbb   :  { %v3173_v50 = vadd.f32 %v3172_v32, %v13183_v29 }
 0xcbd   :  { %v5869_v21 = vpop.eup %5868 }
 0xcbe   :  { %v3204_v47 = vadd.f32 1.0, %v5869_v21 }
 0xcbf   :  { %v3299_v58 = vpop.f32.mrf.mxu1 }
 0xcc0   :  { %v3347_v28 = vrot.slane %v3299_v58, 4  ;;  %v3351_v10 = vrot.slane %v3299_v58, 5  ;;  %5872 = vrcp.f32 %v3204_v47  ;;  %v5871_v58 = vpop.eup %5870  ;;  %v3218_v32 = vand.u32 2147483648, %v3204_v47 }
 0xcc1   :  { %5874 = vpow2.f32 %v5581_v14  ;;  %v3205_v57 = vadd.f32 1.0, %v5871_v58  ;;  %vm3212_vm14 = vweird.f32 %v3204_v47 }
 0xcc2   :  { %v3363_v6 = vadd.f32 %v3347_v28, %v13180_v49  ;;  %v3367_v55 = vadd.f32 %v3351_v10, %v13182_v52 }
 0xcc3   :  { %vm3227_vm0 = vweird.f32 %v3205_v57 }
 0xcc4   :  { %v5583_v24 = vmul.f32 -1.442695, %v3363_v6  ;;  %v5586_v5 = vmul.f32 -1.442695, %v3367_v55  ;;  %v3193_v55 = vadd.f32 %v3192_v35, %v3173_v50  ;;  %v3233_v50 = vand.u32 2147483648, %v3205_v57 }
 0xcc5   :  { %v3231_v35 = vand.u32 2147483647, %v3205_v57 }
 0xcc6   :  { %5876 = vpow2.f32 %v5583_v24  ;;  %v5873_v28 = vpop.eup %5872 }
 0xcc7   :  { %5878 = vpow2.f32 %v5586_v5  ;;  %v5875_v10 = vpop.eup %5874  ;;  %v3208_v18 = vmul.f32 %v5873_v28, %v3204_v47  ;;  %vm3213_vm1 = vweird.f32 %v5873_v28  ;;  %vm3232_vm6 = vcmp.eq.f32.partialorder %v3231_v35, 8.507059e+37 }
 0xcc8   :  { %5880 = vrcp.f32 %v3205_v57  ;;  %v9928_v6 = vadd.f32 1.0, %v5875_v10  ;;  %v3216_v10 = vand.u32 2147483647, %v3204_v47  ;;  %vm9937_vm3 = vmor %vm3212_vm14, %vm3213_vm1 }
 0xcc9   :  { %v3209_v21 = vsub.f32 1.0, %v3208_v18 }
 0xcca   :  { %5882 = vrcp.f32 %v9928_v6  ;;  %vm3217_vm4 = vcmp.eq.f32.partialorder %v3216_v10, 8.507059e+37  ;;  %vm3242_vm8 = vweird.f32 %v9928_v6 }
 0xccb   :  { %v3210_v24 = vmul.f32 %v5873_v28, %v3209_v21  ;;  %5884 = vtanh.f32 %v3193_v55 }
 0xccc   :  { %v5877_v56 = vpop.eup %5876  ;;  %v3279_v21 = vpop.f32.mrf.mxu0 }
 0xccd   :  { %v5879_v2 = vpop.eup %5878  ;;  %v9930_v31 = vadd.f32 1.0, %v5877_v56  ;;  %v3211_v52 = vadd.f32 %v5873_v28, %v3210_v24  ;;  %v3219_v24 = vor.u32 1.1754944e-38, %v3218_v32  ;;  %v3350_v49 = vrot.slane %v3279_v21, 5 }
 0xcce   :  { %v5881_v14 = vpop.eup %5880  ;;  %v9932_v5 = vadd.f32 1.0, %v5879_v2 }
 0xccf   :  { %v3223_v58 = vmul.f32 %v5881_v14, %v3205_v57  ;;  %5886 = vrcp.f32 %v9930_v31  ;;  %vm3228_vm15 = vweird.f32 %v5881_v14  ;;  %v3215_v2 = vsel %vm9937_vm3, %v5873_v28, %v3211_v52 }
 0xcd0   :  { %5888 = vrcp.f32 %v9932_v5  ;;  %v9943_v55 = vpop.eup %5882  ;;  %vm3229_vm5 = vmor %vm3227_vm0, %vm3228_vm15  ;;  %v3220_v15 = vsel %vm3217_vm4, %v3219_v24, %v3215_v2  ;;  %v3366_v52 = vadd.f32 %v3350_v49, %v12868_v54  ;;  %v3339_v24 = vpop.f32.mrf.mxu3  ;;  %vm3414_vm12 = vweird.f32 %v9930_v31 }
 0xcd1   :  { %v3224_v29 = vsub.f32 1.0, %v3223_v58  ;;  %v3346_v58 = vrot.slane %v3279_v21, 4  ;;  %v3238_v47 = vmul.f32 %v9943_v55, %v9928_v6  ;;  %v5885_v1 = vpop.eup %5884  ;;  %vm3243_vm7 = vweird.f32 %v9943_v55 }
 0xcd2   :  { %v5585_v53 = vmul.f32 -1.442695, %v3366_v52  ;;  %v3319_v9 = vpop.f32.mrf.mxu2  ;;  %vm9969_vm10 = vmor %vm3242_vm8, %vm3243_vm7  ;;  %v3463_v52 = vand.u32 2147483647, %v9932_v5  ;;  %vm3459_vm14 = vweird.f32 %v9932_v5 }
 0xcd3   :  { %v3225_v56 = vmul.f32 %v5881_v14, %v3224_v29  ;;  %v3234_v29 = vor.u32 1.1754944e-38, %v3233_v50  ;;  %v3362_v18 = vadd.f32 %v3346_v58, %v13186_v0  ;;  %v3239_v3 = vsub.f32 1.0, %v3238_v47 }
 0xcd4   :  { %v3348_v49 = vrot.slane %v3319_v9, 4  ;;  %v3248_v47 = vand.u32 2147483648, %v9928_v6  ;;  %vm3464_vm0 = vcmp.eq.f32.partialorder %v3463_v52, 8.507059e+37 }
 0xcd5   :  { %v3226_v62 = vadd.f32 %v5881_v14, %v3225_v56  ;;  %v9949_v28 = vpop.eup %5886  ;;  %v5582_v20 = vmul.f32 -1.442695, %v3362_v18  ;;  %v3254_v56 = vmul.f32 %v5885_v1, %v3220_v15  ;;  %v3240_v50 = vmul.f32 %v9943_v55, %v3239_v3 }
 0xcd6   :  { %v9951_v21 = vpop.eup %5888  ;;  %v3410_v2 = vmul.f32 %v9949_v28, %v9930_v31  ;;  %v3364_v35 = vadd.f32 %v3348_v49, %v12871_v41  ;;  %v3349_v15 = vrot.slane %v3339_v24, 4  ;;  %vm3415_vm13 = vweird.f32 %v9949_v28 }
 0xcd7   :  { %v3230_v32 = vsel %vm3229_vm5, %v5881_v14, %v3226_v62  ;;  %5890 = vpow2.f32 %v5582_v20  ;;  %v3352_v62 = vrot.slane %v3319_v9, 5  ;;  %v3455_v14 = vmul.f32 %v9951_v21, %v9932_v5  ;;  %vm10002_vm1 = vmor %vm3414_vm12, %vm3415_vm13 }
 0xcd8   :  { %v3235_v57 = vsel %vm3232_vm6, %v3234_v29, %v3230_v32  ;;  %5892 = vpow2.f32 %v5585_v53  ;;  %v3241_v3 = vadd.f32 %v9943_v55, %v3240_v50  ;;  %v3411_v20 = vsub.f32 1.0, %v3410_v2  ;;  %v13189_v2 = vld [vmem:[#allocation102_spill] sm:$0xff] }
 0xcd9   :  { %v3253_v10 = vmul.f32 %v3235_v57, %v9269_v43  ;;  %v3368_v43 = vadd.f32 %v3352_v62, %v12872_v42  ;;  %v5584_v1 = vmul.f32 -1.442695, %v3364_v35  ;;  %v3246_v9 = vand.u32 2147483647, %v9928_v6 }
 0xcda   :  { %v3456_v18 = vsub.f32 1.0, %v3455_v14  ;;  %v3353_v57 = vrot.slane %v3339_v24, 5  ;;  %v3412_v50 = vmul.f32 %v9949_v28, %v3411_v20  ;;  %v3365_v6 = vadd.f32 %v3349_v15, %v13189_v2 }
 0xcdb   :  { %v9957_v58 = vadd.f32 %v3254_v56, %v3253_v10  ;;  %v5587_v53 = vmul.f32 -1.442695, %v3368_v43  ;;  %v3245_v56 = vsel %vm9969_vm10, %v9943_v55, %v3241_v3  ;;  %v3249_v62 = vor.u32 1.1754944e-38, %v3248_v47  ;;  %v13190_v43 = vld [vmem:[#allocation103_spill] sm:$0xff] }
 0xcdc   :  { %vm3247_vm11 = vcmp.eq.f32.partialorder %v3246_v9, 8.507059e+37  ;;  %v3457_v24 = vmul.f32 %v9951_v21, %v3456_v18  ;;  %v3413_v3 = vadd.f32 %v9949_v28, %v3412_v50  ;;  %v3418_v15 = vand.u32 2147483647, %v9930_v31 }
 0xcdd   :  { %5894 = vtanh.f32 %v9957_v58  ;;  %v5891_v29 = vpop.eup %5890  ;;  %v3250_v35 = vsel %vm3247_vm11, %v3249_v62, %v3245_v56  ;;  %v3420_v47 = vand.u32 2147483648, %v9930_v31  ;;  %vm3460_vm9 = vweird.f32 %v9951_v21 }
 0xcde   :  { %5896 = vpow2.f32 %v5584_v1  ;;  %v5893_v32 = vpop.eup %5892  ;;  %v9973_v10 = vadd.f32 1.0, %v5891_v29  ;;  %v3369_v1 = vadd.f32 %v3353_v57, %v13190_v43  ;;  %v3458_v18 = vadd.f32 %v9951_v21, %v3457_v24  ;;  %vm10016_vm3 = vmor %vm3459_vm14, %vm3460_vm9 }
 0xcdf   :  { %5898 = vpow2.f32 %v5587_v53  ;;  %v9980_v49 = vadd.f32 1.0, %v5893_v32  ;;  %v3488_v56 = vrot.slane %v9393_v61, 7  ;;  %v3465_v31 = vand.u32 2147483648, %v9932_v5 }
 0xce0   :  { %5900 = vrcp.f32 %v9973_v10  ;;  %v3421_v61 = vor.u32 1.1754944e-38, %v3420_v47  ;;  %vm3419_vm15 = vcmp.eq.f32.partialorder %v3418_v15, 8.507059e+37  ;;  %v3462_v5 = vsel %vm10016_vm3, %v9951_v21, %v3458_v18  ;;  %v13196_v47 = vld [vmem:[#allocation17_spill] sm:$0xff] }
 0xce1   :  { %5902 = vrcp.f32 %v9980_v49  ;;  %v3466_v50 = vor.u32 1.1754944e-38, %v3465_v31  ;;  %v3403_v43 = vand.u32 2147483647, %v9973_v10  ;;  %v3450_v15 = vand.u32 2147483648, %v9980_v49 }
 0xce2   :  { %5904 = vtanh.f32 %v3365_v6  ;;  %vm3399_vm6 = vweird.f32 %v9973_v10  ;;  %vm3444_vm8 = vweird.f32 %v9980_v49 }
 0xce3   :  { %v5895_v14 = vpop.eup %5894  ;;  %v3467_v18 = vsel %vm3464_vm0, %v3466_v50, %v3462_v5  ;;  %vm3404_vm10 = vcmp.eq.f32.partialorder %v3403_v43, 8.507059e+37 }
 0xce4   :  { %v9986_v53 = vmul.f32 %v5895_v14, %v3250_v35  ;;  %v5897_v55 = vpop.eup %5896  ;;  %v3417_v14 = vsel %vm10002_vm1, %v9949_v28, %v3413_v3 }
 0xce5   :  { %v5899_v20 = vpop.eup %5898  ;;  %v9993_v9 = vadd.f32 1.0, %v5897_v55  ;;  %v3489_v55 = vrot.slane %v9403_v4, 7  ;;  %v3405_v4 = vand.u32 2147483648, %v9973_v10 }
 0xce6   :  { %13191 = vst [vmem:[#allocation96_spill] sm:$0xff] %v9986_v53  ;;  %v3508_v29 = vrot.slane %v9986_v53, 4  ;;  %v9999_v32 = vadd.f32 1.0, %v5899_v20  ;;  %v5901_v57 = vpop.eup %5900 }
 0xce7   :  { %5906 = vrcp.f32 %v9993_v9  ;;  %v5903_v62 = vpop.eup %5902  ;;  %v3395_v24 = vmul.f32 %v5901_v57, %v9973_v10  ;;  %vm3400_vm4 = vweird.f32 %v5901_v57  ;;  %v3451_v10 = vor.u32 1.1754944e-38, %v3450_v15 }
 0xce8   :  { %v3510_v6 = vrot.slane %v3508_v29, 4  ;;  %5908 = vrcp.f32 %v9999_v32  ;;  %v3440_v20 = vmul.f32 %v5903_v62, %v9980_v49  ;;  %v5905_v28 = vpop.eup %5904  ;;  %v3422_v29 = vsel %vm3419_vm15, %v3421_v61, %v3417_v14  ;;  %vm3401_vm7 = vmor %vm3399_vm6, %vm3400_vm4 }
 0xce9   :  { %5910 = vtanh.f32 %v3369_v1  ;;  %v3396_v3 = vsub.f32 1.0, %v3395_v24  ;;  %vm3445_vm5 = vweird.f32 %v5903_v62  ;;  %v3492_v14 = vmul.f32 %v3488_v56, %v3422_v29 }
 0xcea   :  { %3549 = vmatmul.f32.vlgmr.msra.gmra.mxu1 %v3510_v6  ;;  %3589 = vmatmul.f32.vlgmr.msrb.gmra.mxu3 %v3510_v6  ;;  %v3441_v1 = vsub.f32 1.0, %v3440_v20  ;;  %vm3446_vm11 = vmor %vm3444_vm8, %vm3445_vm5  ;;  %v3493_v43 = vmul.f32 %v3489_v55, %v3467_v18  ;;  %vm3429_vm1 = vweird.f32 %v9993_v9  ;;  %vm3474_vm14 = vweird.f32 %v9999_v32  ;;  %v13197_v55 = vld [vmem:[#allocation18_spill] sm:$0xff] }
 0xceb   :  { %3760 = vmatpush.msra.mxu1 %v13196_v47  ;;  %3800 = vmatpush.msrb.mxu3 %v9355_v59  ;;  %v3397_v53 = vmul.f32 %v5901_v57, %v3396_v3  ;;  %v3448_v59 = vand.u32 2147483647, %v9980_v49  ;;  %vm3505_vm5 = vcmask 1045509  }
 0xcec   :  { %v3442_v52 = vmul.f32 %v5903_v62, %v3441_v1 }
 0xced   :  { %3761 = vmatpush.msra.mxu1 %v9366_v8  ;;  %3801 = vmatpush.msrb.mxu3 %v9369_v63  ;;  %v10032_v21 = vpop.eup %5906  ;;  %v3398_v24 = vadd.f32 %v5901_v57, %v3397_v53  ;;  %v3406_v63 = vor.u32 1.1754944e-38, %v3405_v4  ;;  %vm3449_vm12 = vcmp.eq.f32.partialorder %v3448_v59, 8.507059e+37  ;;  %v13200_v59 = vld [vmem:[#allocation21_spill] sm:$0xff] }
 0xcee   :  { %v10035_v31 = vpop.eup %5908  ;;  %v3425_v61 = vmul.f32 %v10032_v21, %v9993_v9  ;;  %v3443_v35 = vadd.f32 %v5903_v62, %v3442_v52  ;;  %vm3430_vm13 = vweird.f32 %v10032_v21 }
 0xcef   :  { %3762 = vmatpush.msra.mxu1 %v9376_v22  ;;  %3802 = vmatpush.msrb.mxu3 %v9379_v51  ;;  %v5911_v8 = vpop.eup %5910  ;;  %v3470_v56 = vmul.f32 %v10035_v31, %v9999_v32  ;;  %v3402_v53 = vsel %vm3401_vm7, %v5901_v57, %v3398_v24  ;;  %vm3475_vm9 = vweird.f32 %v10035_v31  ;;  %vm3431_vm3 = vmor %vm3429_vm1, %vm3430_vm13  ;;  %v13201_v24 = vld [vmem:[#allocation22_spill] sm:$0xff] }
 0xcf0   :  { %v3426_v20 = vsub.f32 1.0, %v3425_v61  ;;  %v3407_v22 = vsel %vm3404_vm10, %v3406_v63, %v3402_v53  ;;  %v3447_v51 = vsel %vm3446_vm11, %v5903_v62, %v3443_v35  ;;  %vm3476_vm15 = vmor %vm3474_vm14, %vm3475_vm9  ;;  %v13202_v61 = vld [vmem:[#allocation23_spill] sm:$0xff]  ;;  %v10143_v63 = vld [vmem:[#allocation2 + $0x1f0] sm:$0xff] }
 0xcf1   :  { %3763 = vmatpush.msra.mxu1 %v9387_v17  ;;  %3803 = vmatpush.msrb.mxu3 %v9390_v45  ;;  %v3471_v5 = vsub.f32 1.0, %v3470_v56  ;;  %v3452_v49 = vsel %vm3449_vm12, %v3451_v10, %v3447_v51  ;;  %v3494_v3 = vmul.f32 %v5905_v28, %v3407_v22  ;;  %v13198_v28 = vld [vmem:[#allocation19_spill] sm:$0xff]  ;;  %v13203_v35 = vld [vmem:[#allocation24_spill] sm:$0xff]  ;;  %v13204_v56 = vld [vmem:[#allocation25_spill] sm:$0xff] }
 0xcf2   :  { %3629 = vmatmul.f32.vlgmr.msrb.gmra.mxu1 %v3510_v6  ;;  %3669 = vmatmul.f32.vlgmr.msra.gmra.mxu3 %v3510_v6  ;;  %v3427_v47 = vmul.f32 %v10032_v21, %v3426_v20  ;;  %v3495_v57 = vmul.f32 %v5911_v8, %v3452_v49  ;;  %v10140_v8 = vld [vmem:[#allocation2 + $0x1e0] sm:$0xff]  ;;  %v10151_v10 = vld [vmem:[#allocation2 + $0x1d0] sm:$0xff] }
 0xcf3   :  { %3764 = vmatpush.msra.mxu1 %v9395_v38  ;;  %3804 = vmatpush.msrb.mxu3 %v9398_v13  ;;  %v3472_v17 = vmul.f32 %v10035_v31, %v3471_v5  ;;  %v10055_v45 = vadd.f32 %v3494_v3, %v3492_v14  ;;  %v3435_v38 = vand.u32 2147483648, %v9993_v9  ;;  %v10135_v14 = vld [vmem:[#allocation2 + $0x210] sm:$0xff]  ;;  %v10148_v53 = vld [vmem:[#allocation2 + $0x1c0] sm:$0xff] }
 0xcf4   :  { %v3428_v6 = vadd.f32 %v10032_v21, %v3427_v47  ;;  %v10059_v62 = vadd.f32 %v3495_v57, %v3493_v43  ;;  %v13205_v20 = vld [vmem:[#allocation28_spill] sm:$0xff]  ;;  %v13206_v22 = vld [vmem:[#allocation29_spill] sm:$0xff] }
 0xcf5   :  { %3765 = vmatpush.msra.mxu1 %v9410_v23  ;;  %3805 = vmatpush.msrb.mxu3 %v9413_v7  ;;  %v3473_v13 = vadd.f32 %v10035_v31, %v3472_v17  ;;  %5912 = vtanh.f32 %v10055_v45  ;;  %v3480_v23 = vand.u32 2147483648, %v9999_v32  ;;  %v3433_v7 = vand.u32 2147483647, %v9993_v9  ;;  %v10156_v51 = vld [vmem:[#allocation2 + $0x1a0] sm:$0xff]  ;;  %v10159_v5 = vld [vmem:[#allocation2 + $0x1b0] sm:$0xff] }
 0xcf6   :  { %5914 = vtanh.f32 %v10059_v62  ;;  %v3436_v9 = vor.u32 1.1754944e-38, %v3435_v38  ;;  %v13207_v49 = vld [vmem:[#allocation32_spill] sm:$0xff]  ;;  %v13208_v3 = vld [vmem:[#allocation33_spill] sm:$0xff] }
 0xcf7   :  { %3766 = vmatpush.msra.mxu1 %v9427_v27  ;;  %3806 = vmatpush.msrb.mxu3 %v9430_v19  ;;  %v3478_v27 = vand.u32 2147483647, %v9999_v32  ;;  %v3432_v19 = vsel %vm3431_vm3, %v10032_v21, %v3428_v6  ;;  %v3477_v29 = vsel %vm3476_vm15, %v10035_v31, %v3473_v13  ;;  %v3481_v50 = vor.u32 1.1754944e-38, %v3480_v23  ;;  %v10132_v31 = vld [vmem:[#allocation2 + $0x200] sm:$0xff]  ;;  %v10167_v43 = vld [vmem:[#allocation2 + $0x190] sm:$0xff] }
 0xcf8   :  { %vm3434_vm0 = vcmp.eq.f32.partialorder %v3433_v7, 8.507059e+37  ;;  %v10164_v47 = vld [vmem:[#allocation2 + $0x180] sm:$0xff]  ;;  %v13210_v17 = vld [vmem:[#allocation37_spill] sm:$0xff] }
 0xcf9   :  { %3767 = vmatpush.msra.mxu1 %v9445_v60  ;;  %3807 = vmatpush.msrb.mxu3 %v9448_v39  ;;  %v3437_v39 = vsel %vm3434_vm0, %v3436_v9, %v3432_v19  ;;  %vm3479_vm4 = vcmp.eq.f32.partialorder %v3478_v27, 8.507059e+37  ;;  %v13209_v57 = vld [vmem:[#allocation36_spill] sm:$0xff]  ;;  %v10175_v38 = vld [vmem:[#allocation2 + $0x170] sm:$0xff] }
 0xcfa   :  { %v3482_v4 = vsel %vm3479_vm4, %v3481_v50, %v3477_v29  ;;  %v10172_v6 = vld [vmem:[#allocation2 + $0x160] sm:$0xff]  ;;  %v13212_v23 = vld [vmem:[#allocation41_spill] sm:$0xff] }
 0xcfb   :  { %3768 = vmatpush.msra.mxu1 %v13197_v55  ;;  %3808 = vmatpush.msrb.mxu3 %v13198_v28  ;;  %v5913_v60 = vpop.eup %5912  ;;  %v13211_v13 = vld [vmem:[#allocation40_spill] sm:$0xff]  ;;  %v10183_v27 = vld [vmem:[#allocation2 + $0x150] sm:$0xff] }
 0xcfc   :  { %v5915_v32 = vpop.eup %5914  ;;  %v3500_v1 = vmul.f32 %v5913_v60, %v3437_v39  ;;  %v10180_v7 = vld [vmem:[#allocation2 + $0x140] sm:$0xff]  ;;  %v13214_v55 = vld [vmem:[#allocation45_spill] sm:$0xff] }
 0xcfd   :  { %3769 = vmatpush.msra.mxu1 %v9457_v33  ;;  %3809 = vmatpush.msrb.mxu3 %v9460_v37  ;;  %v3501_v15 = vmul.f32 %v5915_v32, %v3482_v4  ;;  %v13213_v19 = vld [vmem:[#allocation44_spill] sm:$0xff]  ;;  %v10191_v9 = vld [vmem:[#allocation2 + $0x130] sm:$0xff] }
 0xcfe   :  { %v3736_v21 = vrot.slane %v3500_v1, 4  ;;  %v10188_v28 = vld [vmem:[#allocation2 + $0x120] sm:$0xff]  ;;  %v13216_v50 = vld [vmem:[#allocation49_spill] sm:$0xff] }
 0xcff   :  { %3770 = vmatpush.msra.mxu1 %v9463_v40  ;;  %3810 = vmatpush.msrb.mxu3 %v9466_v34  ;;  %v3504_v18 = vrot.slane %v3501_v15, 7  ;;  %v3737_v33 = vrot.slane %v3501_v15, 3  ;;  %v10094_v34 = vld [vmem:[#allocation2 + $0x2a0] sm:$0xff]  ;;  %v10199_v39 = vld [vmem:[#allocation2 + $0x110] sm:$0xff] }
 0xd00   :  { %v13215_v29 = vld [vmem:[#allocation48_spill] sm:$0xff]  ;;  %13218 = vst [vmem:[#allocation18_spill] sm:$0xff] %v10199_v39  ;;  %v13220_v4 = vld [vmem:[#allocation53_spill] sm:$0xff] }
 0xd01   :  { %3771 = vmatpush.msra.mxu1 %v9472_v25  ;;  %3811 = vmatpush.msrb.mxu3 %v9475_v36  ;;  %v3506_v37 = vsel %vm3505_vm5, %v3504_v18, %v3500_v1  ;;  %v10090_v52 = vsel %vm115_vm2, %v3737_v33, %v3736_v21  ;;  %v10097_v25 = vld [vmem:[#allocation2 + $0x2b0] sm:$0xff]  ;;  %v10102_v36 = vld [vmem:[#allocation2 + $0x280] sm:$0xff] }
 0xd02   :  { %v3509_v40 = vrot.slane %v3506_v37, 4  ;;  %v10196_v60 = vld [vmem:[#allocation2 + $0x100] sm:$0xff]  ;;  %v10207_v15 = vld [vmem:[#allocation2 + $0xf0] sm:$0xff] }
 0xd03   :  { %3772 = vmatpush.msra.mxu1 %v9478_v11  ;;  %3812 = vmatpush.msrb.mxu3 %v9481_v30  ;;  %v10105_v11 = vld [vmem:[#allocation2 + $0x290] sm:$0xff]  ;;  %v10110_v30 = vld [vmem:[#allocation2 + $0x260] sm:$0xff]  ;;  %13217 = vst [vmem:[#allocation17_spill] sm:$0xff] %v10196_v60 }
 0xd04   :  { %3529 = vmatmul.f32.vlgmr.msrb.gmra.mxu0 %v3509_v40  ;;  %3569 = vmatmul.f32.vlgmr.msrb.gmra.mxu2 %v3509_v40  ;;  %v13219_v32 = vld [vmem:[#allocation52_spill] sm:$0xff]  ;;  %v13224_v18 = vld [vmem:[#allocation57_spill] sm:$0xff] }
 0xd05   :  { %3773 = vmatpush.msra.mxu1 %v9485_v44  ;;  %3813 = vmatpush.msrb.mxu3 %v9489_v46  ;;  %v10113_v44 = vld [vmem:[#allocation2 + $0x270] sm:$0xff]  ;;  %v10118_v46 = vld [vmem:[#allocation2 + $0x240] sm:$0xff] }
 0xd06   :  { %3740 = vmatpush.msrb.mxu0 %v10094_v34  ;;  %3780 = vmatpush.msrb.mxu2 %v10097_v25  ;;  %v10204_v1 = vld [vmem:[#allocation2 + $0xe0] sm:$0xff]  ;;  %v10215_v37 = vld [vmem:[#allocation2 + $0xd0] sm:$0xff] }
 0xd07   :  { %3774 = vmatpush.msra.mxu1 %v9493_v12  ;;  %3814 = vmatpush.msrb.mxu3 %v9497_v16  ;;  %v10121_v12 = vld [vmem:[#allocation2 + $0x250] sm:$0xff]  ;;  %v10124_v16 = vld [vmem:[#allocation2 + $0x220] sm:$0xff]  ;;  %13221 = vst [vmem:[#allocation19_spill] sm:$0xff] %v10204_v1 }
 0xd08   :  { %3741 = vmatpush.msrb.mxu0 %v10102_v36  ;;  %3781 = vmatpush.msrb.mxu2 %v10105_v11  ;;  %v13223_v21 = vld [vmem:[#allocation56_spill] sm:$0xff]  ;;  %13226 = vst [vmem:[#allocation22_spill] sm:$0xff] %v10215_v37 }
 0xd09   :  { %3775 = vmatpush.msra.mxu1 %v9501_v48  ;;  %3815 = vmatpush.msrb.mxu3 %v9505_v26  ;;  %v10127_v48 = vld [vmem:[#allocation2 + $0x230] sm:$0xff]  ;;  %v13199_v26 = vld [vmem:[#allocation20_spill] sm:$0xff] }
 0xd0a   :  { %3742 = vmatpush.msrb.mxu0 %v10110_v30  ;;  %3782 = vmatpush.msrb.mxu2 %v10113_v44  ;;  %13222 = vst [vmem:[#allocation20_spill] sm:$0xff] %v10207_v15  ;;  %v10212_v33 = vld [vmem:[#allocation2 + $0xc0] sm:$0xff] }
 0xd0b   :  { %3776 = vmatmul.f32.vlgmr.msra.gmra.mxu1 %v10090_v52  ;;  %3816 = vmatmul.f32.vlgmr.msrb.gmra.mxu3 %v10090_v52  ;;  %13225 = vst [vmem:[#allocation21_spill] sm:$0xff] %v10212_v33 }
 0xd0c   :  { %3743 = vmatpush.msrb.mxu0 %v10118_v46  ;;  %3783 = vmatpush.msrb.mxu2 %v10121_v12 }
 0xd0d   :  { %3609 = vmatmul.f32.vlgmr.msra.gmra.mxu0 %v3509_v40  ;;  %3649 = vmatmul.f32.vlgmr.msra.gmra.mxu2 %v3509_v40  ;;  %v13227_v40 = vld [vmem:[#allocation60_spill] sm:$0xff] }
 0xd0e   :  { %3744 = vmatpush.msrb.mxu0 %v10124_v16  ;;  %3784 = vmatpush.msrb.mxu2 %v10127_v48 }
 0xd0f   :  { %4011 = vmatpush.msrb.mxu1 %v13199_v26  ;;  %4051 = vmatpush.msra.mxu3 %v13200_v59  ;;  %v13228_v26 = vld [vmem:[#allocation61_spill] sm:$0xff]  ;;  %v13229_v59 = vld [vmem:[#allocation26_spill] sm:$0xff] }
 0xd10   :  { %3745 = vmatpush.msrb.mxu0 %v10132_v31  ;;  %3785 = vmatpush.msrb.mxu2 %v10135_v14 }
 0xd11   :  { %4012 = vmatpush.msrb.mxu1 %v13201_v24  ;;  %4052 = vmatpush.msra.mxu3 %v13202_v61  ;;  %v13230_v24 = vld [vmem:[#allocation27_spill] sm:$0xff]  ;;  %v13231_v61 = vld [vmem:[#allocation64_spill] sm:$0xff] }
 0xd12   :  { %3746 = vmatpush.msrb.mxu0 %v10140_v8  ;;  %3786 = vmatpush.msrb.mxu2 %v10143_v63 }
 0xd13   :  { %4013 = vmatpush.msrb.mxu1 %v13203_v35  ;;  %4053 = vmatpush.msra.mxu3 %v13204_v56  ;;  %v13232_v35 = vld [vmem:[#allocation30_spill] sm:$0xff]  ;;  %v13233_v56 = vld [vmem:[#allocation65_spill] sm:$0xff] }
 0xd14   :  { %3747 = vmatpush.msrb.mxu0 %v10148_v53  ;;  %3787 = vmatpush.msrb.mxu2 %v10151_v10 }
 0xd15   :  { %4014 = vmatpush.msrb.mxu1 %v13205_v20  ;;  %4054 = vmatpush.msra.mxu3 %v13206_v22  ;;  %v13234_v20 = vld [vmem:[#allocation31_spill] sm:$0xff]  ;;  %v13235_v22 = vld [vmem:[#allocation68_spill] sm:$0xff] }
 0xd16   :  { %3748 = vmatpush.msrb.mxu0 %v10156_v51  ;;  %3788 = vmatpush.msrb.mxu2 %v10159_v5 }
 0xd17   :  { %4015 = vmatpush.msrb.mxu1 %v13207_v49  ;;  %4055 = vmatpush.msra.mxu3 %v13208_v3  ;;  %v13236_v49 = vld [vmem:[#allocation34_spill] sm:$0xff]  ;;  %v13238_v3 = vld [vmem:[#allocation35_spill] sm:$0xff] }
 0xd18   :  { %3749 = vmatpush.msrb.mxu0 %v10164_v47  ;;  %3789 = vmatpush.msrb.mxu2 %v10167_v43 }
 0xd19   :  { %4016 = vmatpush.msrb.mxu1 %v13209_v57  ;;  %4056 = vmatpush.msra.mxu3 %v13210_v17  ;;  %v13239_v57 = vld [vmem:[#allocation72_spill] sm:$0xff]  ;;  %v13240_v17 = vld [vmem:[#allocation38_spill] sm:$0xff] }
 0xd1a   :  { %3750 = vmatpush.msrb.mxu0 %v10172_v6  ;;  %3790 = vmatpush.msrb.mxu2 %v10175_v38 }
 0xd1b   :  { %4017 = vmatpush.msrb.mxu1 %v13211_v13  ;;  %4057 = vmatpush.msra.mxu3 %v13212_v23  ;;  %v13241_v13 = vld [vmem:[#allocation73_spill] sm:$0xff]  ;;  %v13242_v23 = vld [vmem:[#allocation39_spill] sm:$0xff] }
 0xd1c   :  { %3751 = vmatpush.msrb.mxu0 %v10180_v7  ;;  %3791 = vmatpush.msrb.mxu2 %v10183_v27 }
 0xd1d   :  { %4018 = vmatpush.msrb.mxu1 %v13213_v19  ;;  %4058 = vmatpush.msra.mxu3 %v13214_v55  ;;  %v13243_v19 = vld [vmem:[#allocation76_spill] sm:$0xff]  ;;  %v13244_v55 = vld [vmem:[#allocation42_spill] sm:$0xff] }
 0xd1e   :  { %3752 = vmatpush.msrb.mxu0 %v10188_v28  ;;  %3792 = vmatpush.msrb.mxu2 %v10191_v9 }
 0xd1f   :  { %4019 = vmatpush.msrb.mxu1 %v13215_v29  ;;  %4059 = vmatpush.msra.mxu3 %v13216_v50  ;;  %v13245_v29 = vld [vmem:[#allocation77_spill] sm:$0xff]  ;;  %v13246_v50 = vld [vmem:[#allocation43_spill] sm:$0xff] }
 0xd20   :  { %3753 = vmatpush.msrb.mxu0 %v10196_v60  ;;  %3793 = vmatpush.msrb.mxu2 %v10199_v39 }
 0xd21   :  { %4020 = vmatpush.msrb.mxu1 %v13219_v32  ;;  %4060 = vmatpush.msra.mxu3 %v13220_v4  ;;  %v13247_v32 = vld [vmem:[#allocation80_spill] sm:$0xff]  ;;  %v13248_v4 = vld [vmem:[#allocation46_spill] sm:$0xff] }
 0xd22   :  { %3754 = vmatpush.msrb.mxu0 %v10204_v1  ;;  %3794 = vmatpush.msrb.mxu2 %v10207_v15 }
 0xd23   :  { %4021 = vmatpush.msrb.mxu1 %v13223_v21  ;;  %4061 = vmatpush.msra.mxu3 %v13224_v18  ;;  %v13249_v21 = vld [vmem:[#allocation81_spill] sm:$0xff]  ;;  %v13250_v18 = vld [vmem:[#allocation47_spill] sm:$0xff] }
 0xd24   :  { %3755 = vmatpush.msrb.mxu0 %v10212_v33  ;;  %3795 = vmatpush.msrb.mxu2 %v10215_v37 }
 0xd25   :  { %3756 = vmatmul.f32.vlgmr.msrb.gmra.mxu0 %v10090_v52  ;;  %3796 = vmatmul.f32.vlgmr.msrb.gmra.mxu2 %v10090_v52  ;;  %v13237_v52 = vld [vmem:[#allocation69_spill] sm:$0xff] }
 0xd26   :  { %4022 = vmatpush.msrb.mxu1 %v13227_v40  ;;  %4062 = vmatpush.msra.mxu3 %v13228_v26  ;;  %v13251_v40 = vld [vmem:[#allocation84_spill] sm:$0xff]  ;;  %v13252_v26 = vld [vmem:[#allocation50_spill] sm:$0xff] }
 0xd27   :  { %3991 = vmatpush.msra.mxu0 %v13229_v59  ;;  %4031 = vmatpush.msra.mxu2 %v13230_v24  ;;  %v13253_v59 = vld [vmem:[#allocation85_spill] sm:$0xff]  ;;  %v13254_v24 = vld [vmem:[#allocation51_spill] sm:$0xff] }
 0xd28   :  { %4023 = vmatpush.msrb.mxu1 %v13231_v61  ;;  %4063 = vmatpush.msra.mxu3 %v13232_v35  ;;  %v13255_v61 = vld [vmem:[#allocation88_spill] sm:$0xff]  ;;  %v13256_v35 = vld [vmem:[#allocation54_spill] sm:$0xff] }
 0xd29   :  { %3992 = vmatpush.msra.mxu0 %v13233_v56  ;;  %4032 = vmatpush.msra.mxu2 %v13234_v20  ;;  %v13257_v56 = vld [vmem:[#allocation89_spill] sm:$0xff]  ;;  %v13258_v20 = vld [vmem:[#allocation55_spill] sm:$0xff] }
 0xd2a   :  { %4024 = vmatpush.msrb.mxu1 %v13235_v22  ;;  %4064 = vmatpush.msra.mxu3 %v13236_v49  ;;  %v13259_v22 = vld [vmem:[#allocation58_spill] sm:$0xff]  ;;  %v13260_v49 = vld [vmem:[#allocation59_spill] sm:$0xff] }
 0xd2b   :  { %3993 = vmatpush.msra.mxu0 %v13237_v52  ;;  %4033 = vmatpush.msra.mxu2 %v13238_v3  ;;  %v13261_v52 = vld [vmem:[#allocation62_spill] sm:$0xff]  ;;  %v13262_v3 = vld [vmem:[#allocation63_spill] sm:$0xff] }
 0xd2c   :  { %4025 = vmatpush.msrb.mxu1 %v13239_v57  ;;  %4065 = vmatpush.msra.mxu3 %v13240_v17  ;;  %v13263_v57 = vld [vmem:[#allocation66_spill] sm:$0xff]  ;;  %v13264_v17 = vld [vmem:[#allocation67_spill] sm:$0xff] }
 0xd2d   :  { %3994 = vmatpush.msra.mxu0 %v13241_v13  ;;  %4034 = vmatpush.msra.mxu2 %v13242_v23  ;;  %v13265_v13 = vld [vmem:[#allocation70_spill] sm:$0xff]  ;;  %v13266_v23 = vld [vmem:[#allocation71_spill] sm:$0xff] }
 0xd2e   :  { %4026 = vmatpush.msrb.mxu1 %v13243_v19  ;;  %4066 = vmatpush.msra.mxu3 %v13244_v55  ;;  %v13267_v19 = vld [vmem:[#allocation74_spill] sm:$0xff]  ;;  %v13268_v55 = vld [vmem:[#allocation75_spill] sm:$0xff] }
 0xd2f   :  { %3995 = vmatpush.msra.mxu0 %v13247_v32  ;;  %4035 = vmatpush.msra.mxu2 %v13248_v4  ;;  %v13271_v32 = vld [vmem:[#allocation82_spill] sm:$0xff]  ;;  %v13272_v4 = vld [vmem:[#allocation83_spill] sm:$0xff] }
 0xd30   :  { %4091 = vmatpush.msra.mxu1 %v13245_v29  ;;  %4131 = vmatpush.msrb.mxu3 %v13246_v50  ;;  %v13269_v29 = vld [vmem:[#allocation78_spill] sm:$0xff]  ;;  %v13270_v50 = vld [vmem:[#allocation79_spill] sm:$0xff] }
 0xd31   :  { %3996 = vmatpush.msra.mxu0 %v13251_v40  ;;  %4036 = vmatpush.msra.mxu2 %v13252_v26  ;;  %v13275_v40 = vld [vmem:[#allocation90_spill] sm:$0xff]  ;;  %v13276_v26 = vld [vmem:[#allocation91_spill] sm:$0xff] }
 0xd32   :  { %4092 = vmatpush.msra.mxu1 %v13249_v21  ;;  %4132 = vmatpush.msrb.mxu3 %v13250_v18  ;;  %v13273_v21 = vld [vmem:[#allocation86_spill] sm:$0xff]  ;;  %v13274_v18 = vld [vmem:[#allocation87_spill] sm:$0xff] }
 0xd33   :  { %3997 = vmatpush.msra.mxu0 %v13255_v61  ;;  %4037 = vmatpush.msra.mxu2 %v13256_v35  ;;  %v13279_v61 = vld [vmem:[#allocation94_spill] sm:$0xff]  ;;  %v13280_v35 = vld [vmem:[#allocation95_spill] sm:$0xff] }
 0xd34   :  { %4093 = vmatpush.msra.mxu1 %v13253_v59  ;;  %4133 = vmatpush.msrb.mxu3 %v13254_v24  ;;  %v13277_v59 = vld [vmem:[#allocation92_spill] sm:$0xff]  ;;  %v13278_v24 = vld [vmem:[#allocation93_spill] sm:$0xff] }
 0xd35   :  { %3998 = vmatpush.msra.mxu0 %v13259_v22  ;;  %4038 = vmatpush.msra.mxu2 %v13260_v49  ;;  %v13283_v22 = vld [vmem:[#allocation106_spill] sm:$0xff]  ;;  %v13284_v49 = vld [vmem:[#allocation107_spill] sm:$0xff] }
 0xd36   :  { %4094 = vmatpush.msra.mxu1 %v13257_v56  ;;  %4134 = vmatpush.msrb.mxu3 %v13258_v20  ;;  %v13281_v56 = vld [vmem:[#allocation104_spill] sm:$0xff]  ;;  %v13282_v20 = vld [vmem:[#allocation105_spill] sm:$0xff] }
 0xd37   :  { %3999 = vmatpush.msra.mxu0 %v13263_v57  ;;  %4039 = vmatpush.msra.mxu2 %v13264_v17  ;;  %v13287_v57 = vld [vmem:[#allocation110_spill] sm:$0xff]  ;;  %v13288_v17 = vld [vmem:[#allocation111_spill] sm:$0xff] }
 0xd38   :  { %4095 = vmatpush.msra.mxu1 %v13261_v52  ;;  %4135 = vmatpush.msrb.mxu3 %v13262_v3  ;;  %v13285_v52 = vld [vmem:[#allocation108_spill] sm:$0xff]  ;;  %v13286_v3 = vld [vmem:[#allocation109_spill] sm:$0xff] }
 0xd39   :  { %4000 = vmatpush.msra.mxu0 %v13267_v19  ;;  %4040 = vmatpush.msra.mxu2 %v13268_v55  ;;  %v13291_v19 = vld [vmem:[#allocation114_spill] sm:$0xff]  ;;  %v13292_v55 = vld [vmem:[#allocation115_spill] sm:$0xff] }
 0xd3a   :  { %4096 = vmatpush.msra.mxu1 %v13265_v13  ;;  %4136 = vmatpush.msrb.mxu3 %v13266_v23  ;;  %v13289_v13 = vld [vmem:[#allocation112_spill] sm:$0xff]  ;;  %v13290_v23 = vld [vmem:[#allocation113_spill] sm:$0xff] }
 0xd3b   :  { %4001 = vmatpush.msra.mxu0 %v13271_v32  ;;  %4041 = vmatpush.msra.mxu2 %v13272_v4  ;;  %v13295_v32 = vld [vmem:[#allocation118_spill] sm:$0xff]  ;;  %v13296_v4 = vld [vmem:[#allocation119_spill] sm:$0xff] }
 0xd3c   :  { %4097 = vmatpush.msra.mxu1 %v13269_v29  ;;  %4137 = vmatpush.msrb.mxu3 %v13270_v50  ;;  %v13293_v29 = vld [vmem:[#allocation116_spill] sm:$0xff]  ;;  %v13294_v50 = vld [vmem:[#allocation117_spill] sm:$0xff] }
 0xd3d   :  { %4002 = vmatpush.msra.mxu0 %v13275_v40  ;;  %4042 = vmatpush.msra.mxu2 %v13276_v26  ;;  %v13299_v40 = vld [vmem:[#allocation122_spill] sm:$0xff]  ;;  %v13300_v26 = vld [vmem:[#allocation123_spill] sm:$0xff] }
 0xd3e   :  { %4098 = vmatpush.msra.mxu1 %v13273_v21  ;;  %4138 = vmatpush.msrb.mxu3 %v13274_v18  ;;  %v13297_v21 = vld [vmem:[#allocation120_spill] sm:$0xff]  ;;  %v13298_v18 = vld [vmem:[#allocation121_spill] sm:$0xff] }
 0xd3f   :  { %4003 = vmatpush.msra.mxu0 %v13279_v61  ;;  %4043 = vmatpush.msra.mxu2 %v13280_v35  ;;  %v13303_v61 = vld [vmem:[#allocation126_spill] sm:$0xff]  ;;  %v13304_v35 = vld [vmem:[#allocation127_spill] sm:$0xff] }
 0xd40   :  { %4099 = vmatpush.msra.mxu1 %v13277_v59  ;;  %4139 = vmatpush.msrb.mxu3 %v13278_v24  ;;  %v13301_v59 = vld [vmem:[#allocation124_spill] sm:$0xff]  ;;  %v13302_v24 = vld [vmem:[#allocation125_spill] sm:$0xff] }
 0xd41   :  { %4004 = vmatpush.msra.mxu0 %v13283_v22  ;;  %4044 = vmatpush.msra.mxu2 %v13284_v49  ;;  %v13307_v22 = vld [vmem:[#allocation130_spill] sm:$0xff]  ;;  %v13308_v49 = vld [vmem:[#allocation131_spill] sm:$0xff] }
 0xd42   :  { %4100 = vmatpush.msra.mxu1 %v13281_v56  ;;  %4140 = vmatpush.msrb.mxu3 %v13282_v20  ;;  %v13305_v56 = vld [vmem:[#allocation128_spill] sm:$0xff]  ;;  %v13306_v20 = vld [vmem:[#allocation129_spill] sm:$0xff] }
 0xd43   :  { %4005 = vmatpush.msra.mxu0 %v13287_v57  ;;  %4045 = vmatpush.msra.mxu2 %v13288_v17  ;;  %v13311_v57 = vld [vmem:[#allocation134_spill] sm:$0xff]  ;;  %v13312_v17 = vld [vmem:[#allocation135_spill] sm:$0xff] }
 0xd44   :  { %4101 = vmatpush.msra.mxu1 %v13285_v52  ;;  %4141 = vmatpush.msrb.mxu3 %v13286_v3  ;;  %v13309_v52 = vld [vmem:[#allocation132_spill] sm:$0xff]  ;;  %v13310_v3 = vld [vmem:[#allocation133_spill] sm:$0xff] }
 0xd45   :  { %4006 = vmatpush.msra.mxu0 %v13291_v19  ;;  %4046 = vmatpush.msra.mxu2 %v13292_v55  ;;  %v13315_v19 = vld [vmem:[#allocation138_spill] sm:$0xff]  ;;  %v13316_v55 = vld [vmem:[#allocation139_spill] sm:$0xff] }
 0xd46   :  { %4102 = vmatpush.msra.mxu1 %v13289_v13  ;;  %4142 = vmatpush.msrb.mxu3 %v13290_v23  ;;  %v13313_v13 = vld [vmem:[#allocation136_spill] sm:$0xff]  ;;  %v13314_v23 = vld [vmem:[#allocation137_spill] sm:$0xff] }
 0xd47   :  { %4071 = vmatpush.msrb.mxu0 %v13295_v32  ;;  %4111 = vmatpush.msrb.mxu2 %v13296_v4  ;;  %v13319_v32 = vld [vmem:[#allocation142_spill] sm:$0xff]  ;;  %v13320_v4 = vld [vmem:[#allocation143_spill] sm:$0xff] }
 0xd48   :  { %4103 = vmatpush.msra.mxu1 %v13293_v29  ;;  %4143 = vmatpush.msrb.mxu3 %v13294_v50  ;;  %v13317_v29 = vld [vmem:[#allocation140_spill] sm:$0xff]  ;;  %v13318_v50 = vld [vmem:[#allocation141_spill] sm:$0xff] }
 0xd49   :  { %4072 = vmatpush.msrb.mxu0 %v13299_v40  ;;  %4112 = vmatpush.msrb.mxu2 %v13300_v26  ;;  %v13323_v40 = vld [vmem:[#allocation146_spill] sm:$0xff]  ;;  %v13324_v26 = vld [vmem:[#allocation147_spill] sm:$0xff] }
 0xd4a   :  { %4104 = vmatpush.msra.mxu1 %v13297_v21  ;;  %4144 = vmatpush.msrb.mxu3 %v13298_v18  ;;  %v13321_v21 = vld [vmem:[#allocation144_spill] sm:$0xff]  ;;  %v13322_v18 = vld [vmem:[#allocation145_spill] sm:$0xff] }
 0xd4b   :  { %4073 = vmatpush.msrb.mxu0 %v13303_v61  ;;  %4113 = vmatpush.msrb.mxu2 %v13304_v35  ;;  %v13327_v61 = vld [vmem:[#allocation98_spill] sm:$0xff]  ;;  %v13328_v35 = vld [vmem:[#allocation100_spill] sm:$0xff] }
 0xd4c   :  { %4105 = vmatpush.msra.mxu1 %v13301_v59  ;;  %4145 = vmatpush.msrb.mxu3 %v13302_v24  ;;  %v13325_v59 = vld [vmem:[#allocation148_spill] sm:$0xff]  ;;  %v13326_v24 = vld [vmem:[#allocation149_spill] sm:$0xff] }
 0xd4d   :  { %4074 = vmatpush.msrb.mxu0 %v13307_v22  ;;  %4114 = vmatpush.msrb.mxu2 %v13308_v49  ;;  %v13331_v22 = vld [vmem:[#allocation15_spill] sm:$0xff]  ;;  %v13332_v49 = vld [vmem:[#allocation150_spill] sm:$0xff] }
 0xd4e   :  { %4106 = vmatpush.msra.mxu1 %v13305_v56  ;;  %4146 = vmatpush.msrb.mxu3 %v13306_v20  ;;  %v13329_v56 = vld [vmem:[#allocation101_spill] sm:$0xff]  ;;  %v13330_v20 = vld [vmem:[#allocation14_spill] sm:$0xff] }
 0xd4f   :  { %4075 = vmatpush.msrb.mxu0 %v13309_v52  ;;  %4115 = vmatpush.msrb.mxu2 %v13310_v3 }
 0xd51   :  { %4076 = vmatpush.msrb.mxu0 %v13311_v57  ;;  %4116 = vmatpush.msrb.mxu2 %v13312_v17  ;;  %v13333_v17 = vld [vmem:[#allocation8_spill] sm:$0xff] }
 0xd53   :  { %4077 = vmatpush.msrb.mxu0 %v13313_v13  ;;  %4117 = vmatpush.msrb.mxu2 %v13314_v23 }
 0xd55   :  { %4078 = vmatpush.msrb.mxu0 %v13315_v19  ;;  %4118 = vmatpush.msrb.mxu2 %v13316_v55 }
 0xd57   :  { %4079 = vmatpush.msrb.mxu0 %v13317_v29  ;;  %4119 = vmatpush.msrb.mxu2 %v13318_v50  ;;  %v13334_v50 = vld [vmem:[#allocation9_spill] sm:$0xff] }
 0xd59   :  { %4080 = vmatpush.msrb.mxu0 %v13319_v32  ;;  %4120 = vmatpush.msrb.mxu2 %v13320_v4 }
 0xd5b   :  { %4081 = vmatpush.msrb.mxu0 %v13321_v21  ;;  %4121 = vmatpush.msrb.mxu2 %v13322_v18 }
 0xd5d   :  { %4082 = vmatpush.msrb.mxu0 %v13323_v40  ;;  %4122 = vmatpush.msrb.mxu2 %v13324_v26 }
 0xd5f   :  { %4083 = vmatpush.msrb.mxu0 %v13325_v59  ;;  %4123 = vmatpush.msrb.mxu2 %v13326_v24  ;;  %v13335_v59 = vld [vmem:[#allocation10_spill] sm:$0xff] }
 0xd61   :  { %4084 = vmatpush.msrb.mxu0 %v13327_v61  ;;  %4124 = vmatpush.msrb.mxu2 %v13328_v35 }
 0xd63   :  { %4085 = vmatpush.msrb.mxu0 %v13329_v56  ;;  %4125 = vmatpush.msrb.mxu2 %v13330_v20  ;;  %v13336_v56 = vld [vmem:[#allocation97_spill] sm:$0xff] }
 0xd65   :  { %4086 = vmatpush.msrb.mxu0 %v13331_v22  ;;  %4126 = vmatpush.msrb.mxu2 %v13332_v49  ;;  %v13337_v49 = vld [vmem:[#allocation99_spill] sm:$0xff] }
 0xd67   :  { %v3550_v52 = vpop.f32.mrf.mxu1 }
 0xd6d   :  { %v3590_v4 = vpop.f32.mrf.mxu3 }
 0xd6f   :  { %v3630_v3 = vpop.f32.mrf.mxu1 }
 0xd81   :  { %v3530_v57 = vpop.f32.mrf.mxu0 }
 0xd82   :  { %v3531_v13 = vadd.f32 %v3530_v57, %v13333_v17 }
 0xd84   :  { %v3551_v23 = vadd.f32 %v3550_v52, %v3531_v13 }
 0xd86   :  { %v5588_v19 = vmul.f32 -1.442695, %v3551_v23 }
 0xd87   :  { %v3570_v29 = vpop.f32.mrf.mxu2 }
 0xd88   :  { %v3777_v55 = vpop.f32.mrf.mxu1  ;;  %5916 = vpow2.f32 %v5588_v19  ;;  %v3571_v32 = vadd.f32 %v3570_v29, %v13334_v50 }
 0xd89   :  { %v3825_v21 = vrot.slane %v3777_v55, 3  ;;  %v3829_v40 = vrot.slane %v3777_v55, 4 }
 0xd8a   :  { %v3610_v18 = vpop.f32.mrf.mxu0  ;;  %v3591_v26 = vadd.f32 %v3590_v4, %v3571_v32 }
 0xd8b   :  { %v3611_v24 = vadd.f32 %v3610_v18, %v13335_v59  ;;  %v3841_v20 = vadd.f32 %v3825_v21, %v13336_v56  ;;  %v3845_v52 = vadd.f32 %v3829_v40, %v13337_v49 }
 0xd8c   :  { %v5589_v61 = vmul.f32 -1.442695, %v3591_v26 }
 0xd8d   :  { %v3631_v35 = vadd.f32 %v3630_v3, %v3611_v24  ;;  %v5592_v23 = vmul.f32 -1.442695, %v3841_v20  ;;  %v5595_v19 = vmul.f32 -1.442695, %v3845_v52 }
 0xd8e   :  { %v5917_v22 = vpop.eup %5916  ;;  %5918 = vpow2.f32 %v5589_v61  ;;  %v13338_v61 = vld [vmem:[#allocation11_spill] sm:$0xff] }
 0xd8f   :  { %v5590_v57 = vmul.f32 -1.442695, %v3631_v35  ;;  %v3682_v13 = vadd.f32 1.0, %v5917_v22 }
 0xd90   :  { %v3650_v21 = vpop.f32.mrf.mxu2 }
 0xd91   :  { %5920 = vrcp.f32 %v3682_v13  ;;  %v3651_v35 = vadd.f32 %v3650_v21, %v13338_v61  ;;  %vm3690_vm7 = vweird.f32 %v3682_v13  ;;  %v3694_v21 = vand.u32 2147483647, %v3682_v13 }
 0xd92   :  { %5922 = vpow2.f32 %v5590_v57  ;;  %v3670_v57 = vpop.f32.mrf.mxu3 }
 0xd93   :  { %5924 = vpow2.f32 %v5592_v23  ;;  %vm3695_vm11 = vcmp.eq.f32.partialorder %v3694_v21, 8.507059e+37 }
 0xd94   :  { %v5919_v29 = vpop.eup %5918  ;;  %5926 = vpow2.f32 %v5595_v19  ;;  %v3671_v19 = vadd.f32 %v3670_v57, %v3651_v35 }
 0xd95   :  { %v3683_v18 = vadd.f32 1.0, %v5919_v29 }
 0xd97   :  { %v5921_v55 = vpop.eup %5920  ;;  %5928 = vrcp.f32 %v3683_v18  ;;  %v3711_v61 = vand.u32 2147483648, %v3683_v18  ;;  %v3709_v56 = vand.u32 2147483647, %v3683_v18  ;;  %vm3705_vm12 = vweird.f32 %v3683_v18 }
 0xd98   :  { %v5923_v32 = vpop.eup %5922  ;;  %v3686_v4 = vmul.f32 %v5921_v55, %v3682_v13  ;;  %vm3691_vm6 = vweird.f32 %v5921_v55 }
 0xd99   :  { %v10331_v26 = vadd.f32 1.0, %v5923_v32  ;;  %v5925_v24 = vpop.eup %5924  ;;  %vm10345_vm8 = vmor %vm3690_vm7, %vm3691_vm6  ;;  %v3712_v1 = vor.u32 1.1754944e-38, %v3711_v61  ;;  %vm3710_vm9 = vcmp.eq.f32.partialorder %v3709_v56, 8.507059e+37 }
 0xd9a   :  { %v3687_v3 = vsub.f32 1.0, %v3686_v4  ;;  %v5927_v40 = vpop.eup %5926  ;;  %v10335_v22 = vadd.f32 1.0, %v5925_v24  ;;  %v3696_v24 = vand.u32 2147483648, %v3682_v13 }
 0xd9b   :  { %5930 = vrcp.f32 %v10331_v26  ;;  %v10337_v52 = vadd.f32 1.0, %v5927_v40  ;;  %vm3720_vm14 = vweird.f32 %v10331_v26 }
 0xd9c   :  { %v3688_v20 = vmul.f32 %v5921_v55, %v3687_v3  ;;  %5932 = vrcp.f32 %v10335_v22  ;;  %vm3892_vm5 = vweird.f32 %v10335_v22 }
 0xd9d   :  { %v5929_v23 = vpop.eup %5928  ;;  %5934 = vrcp.f32 %v10337_v52  ;;  %vm3937_vm6 = vweird.f32 %v10337_v52 }
 0xd9e   :  { %v3689_v29 = vadd.f32 %v5921_v55, %v3688_v20  ;;  %v3701_v49 = vmul.f32 %v5929_v23, %v3683_v18  ;;  %vm3706_vm10 = vweird.f32 %v5929_v23  ;;  %5936 = vtanh.f32 %v3671_v19 }
 0xd9f   :  { %vm3707_vm13 = vmor %vm3705_vm12, %vm3706_vm10 }
 0xda0   :  { %v3702_v40 = vsub.f32 1.0, %v3701_v49  ;;  %v3693_v59 = vsel %vm10345_vm8, %v5921_v55, %v3689_v29  ;;  %v3697_v49 = vor.u32 1.1754944e-38, %v3696_v24  ;;  %v3817_v24 = vpop.f32.mrf.mxu3 }
 0xda1   :  { %v10339_v4 = vpop.eup %5930 }
 0xda2   :  { %v3757_v32 = vpop.f32.mrf.mxu0  ;;  %v3716_v3 = vmul.f32 %v10339_v4, %v10331_v26  ;;  %v3703_v50 = vmul.f32 %v5929_v23, %v3702_v40  ;;  %v10353_v15 = vpop.eup %5932  ;;  %v3698_v55 = vsel %vm3695_vm11, %v3697_v49, %v3693_v59  ;;  %vm3721_vm1 = vweird.f32 %v10339_v4 }
 0xda3   :  { %v3824_v20 = vrot.slane %v3757_v32, 3  ;;  %v3828_v57 = vrot.slane %v3757_v32, 4  ;;  %v10355_v60 = vpop.eup %5934  ;;  %v3888_v18 = vmul.f32 %v10353_v15, %v10335_v22  ;;  %vm10376_vm3 = vmor %vm3720_vm14, %vm3721_vm1  ;;  %vm3893_vm0 = vweird.f32 %v10353_v15 }
 0xda4   :  { %v3717_v17 = vsub.f32 1.0, %v3716_v3  ;;  %v3704_v32 = vadd.f32 %v5929_v23, %v3703_v50  ;;  %v5937_v21 = vpop.eup %5936  ;;  %vm3938_vm4 = vweird.f32 %v10355_v60  ;;  %vm10415_vm7 = vmor %vm3892_vm5, %vm3893_vm0 }
 0xda5   :  { %v3840_v37 = vadd.f32 %v3824_v20, %v13186_v0  ;;  %v3844_v13 = vadd.f32 %v3828_v57, %v12868_v54  ;;  %v3732_v61 = vmul.f32 %v5937_v21, %v3698_v55  ;;  %v3889_v49 = vsub.f32 1.0, %v3888_v18  ;;  %vm10434_vm11 = vmor %vm3937_vm6, %vm3938_vm4 }
 0xda6   :  { %v3718_v40 = vmul.f32 %v10339_v4, %v3717_v17  ;;  %v3708_v35 = vsel %vm3707_vm13, %v5929_v23, %v3704_v32 }
 0xda7   :  { %v5591_v39 = vmul.f32 -1.442695, %v3840_v37  ;;  %v5594_v19 = vmul.f32 -1.442695, %v3844_v13  ;;  %v3713_v20 = vsel %vm3710_vm9, %v3712_v1, %v3708_v35  ;;  %v3831_v1 = vrot.slane %v3817_v24, 4 }
 0xda8   :  { %v3797_v33 = vpop.f32.mrf.mxu2  ;;  %v3731_v59 = vmul.f32 %v3713_v20, %v9957_v58  ;;  %v3719_v57 = vadd.f32 %v10339_v4, %v3718_v40  ;;  %v3726_v58 = vand.u32 2147483648, %v10331_v26 }
 0xda9   :  { %v3826_v29 = vrot.slane %v3797_v33, 3  ;;  %v3830_v3 = vrot.slane %v3797_v33, 4  ;;  %5938 = vpow2.f32 %v5591_v39  ;;  %v3933_v33 = vmul.f32 %v10355_v60, %v10337_v52 }
 0xdaa   :  { %5940 = vpow2.f32 %v5594_v19  ;;  %v3827_v39 = vrot.slane %v3817_v24, 3  ;;  %v10366_v23 = vadd.f32 %v3732_v61, %v3731_v59  ;;  %v3724_v19 = vand.u32 2147483647, %v10331_v26  ;;  %v13343_v59 = vld [vmem:[#allocation103_spill] sm:$0xff] }
 0xdab   :  { %v3842_v50 = vadd.f32 %v3826_v29, %v12871_v41  ;;  %v3846_v37 = vadd.f32 %v3830_v3, %v12872_v42  ;;  %v3934_v55 = vsub.f32 1.0, %v3933_v33  ;;  %v3723_v21 = vsel %vm10376_vm3, %v10339_v4, %v3719_v57 }
 0xdac   :  { %v3843_v40 = vadd.f32 %v3827_v39, %v13189_v2  ;;  %v3890_v26 = vmul.f32 %v10353_v15, %v3889_v49  ;;  %v3727_v20 = vor.u32 1.1754944e-38, %v3726_v58  ;;  %v3847_v61 = vadd.f32 %v3831_v1, %v13343_v59 }
 0xdad   :  { %v5593_v17 = vmul.f32 -1.442695, %v3842_v50  ;;  %v5596_v56 = vmul.f32 -1.442695, %v3846_v37  ;;  %v3935_v37 = vmul.f32 %v10355_v60, %v3934_v55  ;;  %vm3725_vm15 = vcmp.eq.f32.partialorder %v3724_v19, 8.507059e+37 }
 0xdae   :  { %v3898_v57 = vand.u32 2147483648, %v10335_v22  ;;  %v3943_v49 = vand.u32 2147483648, %v10337_v52 }
 0xdaf   :  { %5942 = vpow2.f32 %v5593_v17  ;;  %v5939_v13 = vpop.eup %5938  ;;  %v3896_v17 = vand.u32 2147483647, %v10335_v22  ;;  %v3936_v19 = vadd.f32 %v10355_v60, %v3935_v37  ;;  %v10472_v37 = vld [vmem:[#allocation2 + $0x298] sm:$0xff] }
 0xdb0   :  { %5944 = vtanh.f32 %v10366_v23  ;;  %v5941_v32 = vpop.eup %5940  ;;  %v10374_v29 = vadd.f32 1.0, %v5939_v13  ;;  %v3941_v13 = vand.u32 2147483647, %v10337_v52 }
 0xdb1   :  { %5946 = vpow2.f32 %v5596_v56  ;;  %v10381_v35 = vadd.f32 1.0, %v5941_v32  ;;  %v3728_v56 = vsel %vm3725_vm15, %v3727_v20, %v3723_v21  ;;  %v3891_v32 = vadd.f32 %v10353_v15, %v3890_v26 }
 0xdb2   :  { %5948 = vrcp.f32 %v10374_v29  ;;  %vm10419_vm8 = vcmp.eq.f32.partialorder %v3896_v17, 8.507059e+37  ;;  %vm10423_vm10 = vcmp.eq.f32.partialorder %v3941_v13, 8.507059e+37  ;;  %v3944_v17 = vor.u32 1.1754944e-38, %v3943_v49 }
 0xdb3   :  { %5950 = vrcp.f32 %v10381_v35  ;;  %v3881_v13 = vand.u32 2147483647, %v10374_v29  ;;  %v3883_v18 = vand.u32 2147483648, %v10374_v29  ;;  %vm3877_vm9 = vweird.f32 %v10374_v29 }
 0xdb4   :  { %5952 = vtanh.f32 %v3843_v40  ;;  %vm3922_vm1 = vweird.f32 %v10381_v35 }
 0xdb5   :  { %v5943_v50 = vpop.eup %5942  ;;  %vm3882_vm3 = vcmp.eq.f32.partialorder %v3881_v13, 8.507059e+37 }
 0xdb6   :  { %v5945_v33 = vpop.eup %5944  ;;  %v10394_v4 = vadd.f32 1.0, %v5943_v50  ;;  %v3899_v50 = vor.u32 1.1754944e-38, %v3898_v57  ;;  %v3940_v57 = vsel %vm10434_vm11, %v10355_v60, %v3936_v19 }
 0xdb7   :  { %v5947_v39 = vpop.eup %5946  ;;  %v10399_v58 = vmul.f32 %v5945_v33, %v3728_v56  ;;  %v3945_v20 = vsel %vm10423_vm10, %v3944_v17, %v3940_v57 }
 0xdb8   :  { %v10403_v1 = vadd.f32 1.0, %v5947_v39  ;;  %5954 = vrcp.f32 %v10394_v4  ;;  %v5949_v55 = vpop.eup %5948  ;;  %vm3907_vm6 = vweird.f32 %v10394_v4 }
 0xdb9   :  { %13344 = vst [vmem:[#allocation23_spill] sm:$0xff] %v10399_v58  ;;  %5956 = vtanh.f32 %v3847_v61  ;;  %v3986_v3 = vrot.slane %v10399_v58, 3  ;;  %v10409_v40 = vpop.eup %5950  ;;  %v3873_v21 = vmul.f32 %v5949_v55, %v10374_v29  ;;  %v3895_v61 = vsel %vm10415_vm7, %v10353_v15, %v3891_v32 }
 0xdba   :  { %5958 = vrcp.f32 %v10403_v1  ;;  %v3918_v22 = vmul.f32 %v10409_v40, %v10381_v35  ;;  %v5953_v52 = vpop.eup %5952  ;;  %vm3878_vm12 = vweird.f32 %v5949_v55  ;;  %v3926_v32 = vand.u32 2147483647, %v10381_v35 }
 0xdbb   :  { %v3874_v56 = vsub.f32 1.0, %v3873_v21  ;;  %v3988_v39 = vrot.slane %v3986_v3, 5  ;;  %v3928_v58 = vand.u32 2147483648, %v10381_v35  ;;  %v3900_v3 = vsel %vm10419_vm8, %v3899_v50, %v3895_v61  ;;  %v10453_v21 = vld [vmem:[#allocation2 + $0x2a8] sm:$0xff]  ;;  %vm3879_vm14 = vmor %vm3877_vm9, %vm3878_vm12 }
 0xdbc   :  { %v3919_v24 = vsub.f32 1.0, %v3918_v22  ;;  %vm3923_vm13 = vweird.f32 %v10409_v40  ;;  %13353 = vst [vmem:[#allocation24_spill] sm:$0xff] %v10453_v21  ;;  %v10456_v22 = vld [vmem:[#allocation2 + $0x2b8] sm:$0xff]  ;;  %vm3927_vm0 = vcmp.eq.f32.partialorder %v3926_v32, 8.507059e+37  ;;  %vm3952_vm8 = vweird.f32 %v10403_v1 }
 0xdbd   :  { %v3875_v15 = vmul.f32 %v5949_v55, %v3874_v56  ;;  %4027 = vmatmul.f32.vlgmr.msrb.gmra.mxu1 %v3988_v39  ;;  %4067 = vmatmul.f32.vlgmr.msra.gmra.mxu3 %v3988_v39  ;;  %13354 = vst [vmem:[#allocation25_spill] sm:$0xff] %v10456_v22  ;;  %vm3924_vm15 = vmor %vm3922_vm1, %vm3923_vm13  ;;  %v3929_v35 = vor.u32 1.1754944e-38, %v3928_v58  ;;  %v13356_v58 = vrot.slane %v10059_v62, 7  ;;  %vm3983_vm13 = vcmask 1046534  }
 0xdbe   :  { %v10443_v26 = vpop.eup %5954  ;;  %v3920_v60 = vmul.f32 %v10409_v40, %v3919_v24  ;;  %4238 = vmatpush.msrb.mxu1 %v10453_v21  ;;  %4278 = vmatpush.msra.mxu3 %v10456_v22  ;;  %v3884_v24 = vor.u32 1.1754944e-38, %v3883_v18  ;;  %v10469_v22 = vld [vmem:[#allocation2 + $0x288] sm:$0xff] }
 0xdbf   :  { %v5957_v49 = vpop.eup %5956  ;;  %v3903_v19 = vmul.f32 %v10443_v26, %v10394_v4  ;;  %v3876_v50 = vadd.f32 %v5949_v55, %v3875_v15  ;;  %vm3908_vm4 = vweird.f32 %v10443_v26 }
 0xdc0   :  { %v10459_v33 = vpop.eup %5958  ;;  %v3921_v61 = vadd.f32 %v10409_v40, %v3920_v60  ;;  %4239 = vmatpush.msrb.mxu1 %v10469_v22  ;;  %4279 = vmatpush.msra.mxu3 %v10472_v37  ;;  %v10479_v60 = vld [vmem:[#allocation2 + $0x268] sm:$0xff]  ;;  %vm10524_vm7 = vmor %vm3907_vm6, %vm3908_vm4 }
 0xdc1   :  { %v3904_v56 = vsub.f32 1.0, %v3903_v19  ;;  %v3948_v21 = vmul.f32 %v10459_v33, %v10403_v1  ;;  %v3880_v29 = vsel %vm3879_vm14, %v5949_v55, %v3876_v50  ;;  %v10482_v19 = vld [vmem:[#allocation2 + $0x278] sm:$0xff]  ;;  %v13355_v55 = vrot.slane %v10055_v45, 7 }
 0xdc2   :  { %v3885_v18 = vsel %vm3882_vm3, %v3884_v24, %v3880_v29  ;;  %v3925_v17 = vsel %vm3924_vm15, %v10409_v40, %v3921_v61  ;;  %4240 = vmatpush.msrb.mxu1 %v10479_v60  ;;  %4280 = vmatpush.msra.mxu3 %v10482_v19  ;;  %v3971_v24 = vmul.f32 %v13356_v58, %v3945_v20  ;;  %vm3953_vm5 = vweird.f32 %v10459_v33 }
 0xdc3   :  { %v3905_v57 = vmul.f32 %v10443_v26, %v3904_v56  ;;  %v3949_v15 = vsub.f32 1.0, %v3948_v21  ;;  %v3970_v13 = vmul.f32 %v13355_v55, %v3900_v3  ;;  %v3930_v50 = vsel %vm3927_vm0, %v3929_v35, %v3925_v17  ;;  %v10490_v21 = vld [vmem:[#allocation2 + $0x248] sm:$0xff]  ;;  %v10493_v56 = vld [vmem:[#allocation2 + $0x258] sm:$0xff]  ;;  %vm10530_vm10 = vmor %vm3952_vm8, %vm3953_vm5 }
 0xdc4   :  { %v3972_v32 = vmul.f32 %v5953_v52, %v3885_v18  ;;  %v3973_v40 = vmul.f32 %v5957_v49, %v3930_v50  ;;  %4241 = vmatpush.msrb.mxu1 %v10490_v21  ;;  %4281 = vmatpush.msra.mxu3 %v10493_v56  ;;  %v10502_v52 = vld [vmem:[#allocation2 + $0x228] sm:$0xff]  ;;  %v10505_v49 = vld [vmem:[#allocation2 + $0x238] sm:$0xff]  ;;  %v3913_v3 = vand.u32 2147483648, %v10394_v4  ;;  %v3958_v35 = vand.u32 2147483648, %v10403_v1 }
 0xdc5   :  { %v3950_v61 = vmul.f32 %v10459_v33, %v3949_v15  ;;  %4107 = vmatmul.f32.vlgmr.msra.gmra.mxu1 %v3988_v39  ;;  %4147 = vmatmul.f32.vlgmr.msrb.gmra.mxu3 %v3988_v39  ;;  %v3906_v62 = vadd.f32 %v10443_v26, %v3905_v57  ;;  %v3911_v39 = vand.u32 2147483647, %v10394_v4  ;;  %v10515_v18 = vld [vmem:[#allocation2 + $0x208] sm:$0xff]  ;;  %v10518_v17 = vld [vmem:[#allocation2 + $0x218] sm:$0xff]  ;;  %v3956_v4 = vand.u32 2147483647, %v10403_v1 }
 0xdc6   :  { %v10496_v29 = vadd.f32 %v3972_v32, %v3970_v13  ;;  %v10498_v45 = vadd.f32 %v3973_v40, %v3971_v24  ;;  %4242 = vmatpush.msrb.mxu1 %v10502_v52  ;;  %4282 = vmatpush.msra.mxu3 %v10505_v49  ;;  %v10534_v55 = vld [vmem:[#allocation2 + $0x1e8] sm:$0xff]  ;;  %v10537_v13 = vld [vmem:[#allocation2 + $0x1f8] sm:$0xff]  ;;  %v3914_v32 = vor.u32 1.1754944e-38, %v3913_v3  ;;  %v3959_v58 = vor.u32 1.1754944e-38, %v3958_v35 }
 0xdc7   :  { %v3951_v20 = vadd.f32 %v10459_v33, %v3950_v61  ;;  %13361 = vst [vmem:[#allocation28_spill] sm:$0xff] %v10537_v13  ;;  %v3910_v50 = vsel %vm10524_vm7, %v10443_v26, %v3906_v62  ;;  %vm3912_vm11 = vcmp.eq.f32.partialorder %v3911_v39, 8.507059e+37  ;;  %v10546_v24 = vld [vmem:[#allocation2 + $0x1c8] sm:$0xff]  ;;  %v10549_v40 = vld [vmem:[#allocation2 + $0x1d8] sm:$0xff]  ;;  %vm3957_vm12 = vcmp.eq.f32.partialorder %v3956_v4, 8.507059e+37 }
 0xdc8   :  { %5960 = vtanh.f32 %v10496_v29  ;;  %4243 = vmatpush.msrb.mxu1 %v10515_v18  ;;  %4283 = vmatpush.msra.mxu3 %v10518_v17  ;;  %v10552_v26 = vld [vmem:[#allocation2 + $0x1a8] sm:$0xff]  ;;  %v10555_v62 = vld [vmem:[#allocation2 + $0x1b8] sm:$0xff] }
 0xdc9   :  { %5962 = vtanh.f32 %v10498_v45  ;;  %v3955_v1 = vsel %vm10530_vm10, %v10459_v33, %v3951_v20  ;;  %13362 = vst [vmem:[#allocation29_spill] sm:$0xff] %v10555_v62  ;;  %v10558_v39 = vld [vmem:[#allocation2 + $0x188] sm:$0xff]  ;;  %v10561_v35 = vld [vmem:[#allocation2 + $0x198] sm:$0xff] }
 0xdca   :  { %4244 = vmatpush.msrb.mxu1 %v10534_v55  ;;  %4284 = vmatpush.msra.mxu3 %v10537_v13  ;;  %v3915_v13 = vsel %vm3912_vm11, %v3914_v32, %v3910_v50  ;;  %v3960_v33 = vsel %vm3957_vm12, %v3959_v58, %v3955_v1  ;;  %v10564_v32 = vld [vmem:[#allocation2 + $0x168] sm:$0xff] }
 0xdcb   :  { %v10573_v58 = vld [vmem:[#allocation2 + $0x148] sm:$0xff] }
 0xdcc   :  { %4245 = vmatpush.msrb.mxu1 %v10546_v24  ;;  %4285 = vmatpush.msra.mxu3 %v10549_v40 }
 0xdce   :  { %v5961_v61 = vpop.eup %5960  ;;  %4246 = vmatpush.msrb.mxu1 %v10552_v26  ;;  %4286 = vmatpush.msra.mxu3 %v10555_v62  ;;  %v10567_v62 = vld [vmem:[#allocation2 + $0x178] sm:$0xff] }
 0xdcf   :  { %v5963_v57 = vpop.eup %5962  ;;  %v3978_v3 = vmul.f32 %v5961_v61, %v3915_v13  ;;  %v10576_v61 = vld [vmem:[#allocation2 + $0x158] sm:$0xff] }
 0xdd0   :  { %v3979_v20 = vmul.f32 %v5963_v57, %v3960_v33  ;;  %4247 = vmatpush.msrb.mxu1 %v10558_v39  ;;  %4287 = vmatpush.msra.mxu3 %v10561_v35  ;;  %v10579_v33 = vld [vmem:[#allocation2 + $0x128] sm:$0xff] }
 0xdd1   :  { %v4214_v4 = vrot.slane %v3978_v3, 5 }
 0xdd2   :  { %v3982_v15 = vrot.slane %v3979_v20, 7  ;;  %v4215_v50 = vrot.slane %v3979_v20, 4  ;;  %4248 = vmatpush.msrb.mxu1 %v10564_v32  ;;  %4288 = vmatpush.msra.mxu3 %v10567_v62  ;;  %v10582_v20 = vld [vmem:[#allocation2 + $0x138] sm:$0xff] }
 0xdd4   :  { %v3984_v13 = vsel %vm3983_vm13, %v3982_v15, %v3978_v3  ;;  %v10571_v1 = vsel %vm115_vm2, %v4215_v50, %v4214_v4  ;;  %4249 = vmatpush.msrb.mxu1 %v10573_v58  ;;  %4289 = vmatpush.msra.mxu3 %v10576_v61  ;;  %v10586_v3 = vld [vmem:[#allocation2 + $0x108] sm:$0xff]  ;;  %v10590_v4 = vld [vmem:[#allocation2 + $0x118] sm:$0xff] }
 0xdd5   :  { %v3987_v57 = vrot.slane %v3984_v13, 5  ;;  %v10594_v15 = vld [vmem:[#allocation2 + $0xe8] sm:$0xff]  ;;  %v10598_v50 = vld [vmem:[#allocation2 + $0xf8] sm:$0xff]  ;;  %v10695_v13 = vld [vmem:[#allocation2 + $0x560] sm:$0xff] }
 0xdd6   :  { %4250 = vmatpush.msrb.mxu1 %v10579_v33  ;;  %4290 = vmatpush.msra.mxu3 %v10582_v20  ;;  %13387 = vst [vmem:[#allocation65_spill] sm:$0xff] %v10695_v13 }
 0xdd7   :  { %4007 = vmatmul.f32.vlgmr.msra.gmra.mxu0 %v3987_v57  ;;  %4047 = vmatmul.f32.vlgmr.msra.gmra.mxu2 %v3987_v57 }
 0xdd8   :  { %4218 = vmatpush.msra.mxu0 %v10094_v34  ;;  %4251 = vmatpush.msrb.mxu1 %v10586_v3  ;;  %v10602_v34 = vld [vmem:[#allocation2 + $0xc8] sm:$0xff] }
 0xdd9   :  { %4258 = vmatpush.msra.mxu2 %v10097_v25  ;;  %4291 = vmatpush.msra.mxu3 %v10590_v4  ;;  %v10606_v25 = vld [vmem:[#allocation2 + $0xd8] sm:$0xff] }
 0xdda   :  { %4219 = vmatpush.msra.mxu0 %v10102_v36  ;;  %4252 = vmatpush.msrb.mxu1 %v10594_v15  ;;  %v10615_v36 = vld [vmem:[#allocation2 + $0x6a0] sm:$0xff] }
 0xddb   :  { %4259 = vmatpush.msra.mxu2 %v10105_v11  ;;  %4292 = vmatpush.msra.mxu3 %v10598_v50  ;;  %13363 = vst [vmem:[#allocation32_spill] sm:$0xff] %v10615_v36  ;;  %v10618_v11 = vld [vmem:[#allocation2 + $0x6a8] sm:$0xff] }
 0xddc   :  { %4220 = vmatpush.msra.mxu0 %v10110_v30  ;;  %4253 = vmatpush.msrb.mxu1 %v10602_v34  ;;  %13364 = vst [vmem:[#allocation33_spill] sm:$0xff] %v10618_v11  ;;  %v10623_v30 = vld [vmem:[#allocation2 + $0x680] sm:$0xff] }
 0xddd   :  { %4260 = vmatpush.msra.mxu2 %v10113_v44  ;;  %4293 = vmatpush.msra.mxu3 %v10606_v25  ;;  %13365 = vst [vmem:[#allocation36_spill] sm:$0xff] %v10623_v30  ;;  %v10626_v44 = vld [vmem:[#allocation2 + $0x688] sm:$0xff] }
 0xdde   :  { %4254 = vmatmul.f32.vlgmr.msrb.gmra.mxu1 %v10571_v1  ;;  %4294 = vmatmul.f32.vlgmr.msra.gmra.mxu3 %v10571_v1  ;;  %13366 = vst [vmem:[#allocation37_spill] sm:$0xff] %v10626_v44 }
 0xddf   :  { %4221 = vmatpush.msra.mxu0 %v10118_v46  ;;  %4261 = vmatpush.msra.mxu2 %v10121_v12  ;;  %v10631_v46 = vld [vmem:[#allocation2 + $0x660] sm:$0xff]  ;;  %v10634_v12 = vld [vmem:[#allocation2 + $0x668] sm:$0xff] }
 0xde0   :  { %4087 = vmatmul.f32.vlgmr.msrb.gmra.mxu0 %v3987_v57  ;;  %4127 = vmatmul.f32.vlgmr.msrb.gmra.mxu2 %v3987_v57  ;;  %13367 = vst [vmem:[#allocation40_spill] sm:$0xff] %v10631_v46  ;;  %v10698_v57 = vld [vmem:[#allocation2 + $0x568] sm:$0xff] }
 0xde1   :  { %4222 = vmatpush.msra.mxu0 %v10124_v16  ;;  %4262 = vmatpush.msra.mxu2 %v10127_v48  ;;  %13368 = vst [vmem:[#allocation41_spill] sm:$0xff] %v10634_v12  ;;  %v10639_v16 = vld [vmem:[#allocation2 + $0x640] sm:$0xff]  ;;  %v10642_v48 = vld [vmem:[#allocation2 + $0x648] sm:$0xff] }
 0xde2   :  { %4489 = vmatpush.msra.mxu1 %v10615_v36  ;;  %4529 = vmatpush.msrb.mxu3 %v10618_v11  ;;  %13369 = vst [vmem:[#allocation44_spill] sm:$0xff] %v10639_v16 }
 0xde3   :  { %4223 = vmatpush.msra.mxu0 %v10132_v31  ;;  %4263 = vmatpush.msra.mxu2 %v10135_v14  ;;  %13370 = vst [vmem:[#allocation45_spill] sm:$0xff] %v10642_v48  ;;  %v10647_v31 = vld [vmem:[#allocation2 + $0x620] sm:$0xff]  ;;  %v10650_v14 = vld [vmem:[#allocation2 + $0x628] sm:$0xff] }
 0xde4   :  { %4490 = vmatpush.msra.mxu1 %v10623_v30  ;;  %4530 = vmatpush.msrb.mxu3 %v10626_v44  ;;  %13371 = vst [vmem:[#allocation48_spill] sm:$0xff] %v10647_v31 }
 0xde5   :  { %4224 = vmatpush.msra.mxu0 %v10140_v8  ;;  %4264 = vmatpush.msra.mxu2 %v10143_v63  ;;  %13372 = vst [vmem:[#allocation49_spill] sm:$0xff] %v10650_v14  ;;  %v10655_v8 = vld [vmem:[#allocation2 + $0x600] sm:$0xff]  ;;  %v10658_v63 = vld [vmem:[#allocation2 + $0x608] sm:$0xff] }
 0xde6   :  { %4491 = vmatpush.msra.mxu1 %v10631_v46  ;;  %4531 = vmatpush.msrb.mxu3 %v10634_v12  ;;  %13373 = vst [vmem:[#allocation52_spill] sm:$0xff] %v10655_v8 }
 0xde7   :  { %4225 = vmatpush.msra.mxu0 %v10148_v53  ;;  %4265 = vmatpush.msra.mxu2 %v10151_v10  ;;  %13374 = vst [vmem:[#allocation53_spill] sm:$0xff] %v10658_v63  ;;  %v10663_v53 = vld [vmem:[#allocation2 + $0x5e0] sm:$0xff]  ;;  %v10666_v10 = vld [vmem:[#allocation2 + $0x5e8] sm:$0xff] }
 0xde8   :  { %4492 = vmatpush.msra.mxu1 %v10639_v16  ;;  %4532 = vmatpush.msrb.mxu3 %v10642_v48  ;;  %13375 = vst [vmem:[#allocation56_spill] sm:$0xff] %v10663_v53  ;;  %v13501_v16 = vld [vmem:[#allocation99_spill] sm:$0xff] }
 0xde9   :  { %4226 = vmatpush.msra.mxu0 %v10156_v51  ;;  %4266 = vmatpush.msra.mxu2 %v10159_v5  ;;  %13376 = vst [vmem:[#allocation57_spill] sm:$0xff] %v10666_v10  ;;  %v10671_v51 = vld [vmem:[#allocation2 + $0x5c0] sm:$0xff]  ;;  %v10674_v5 = vld [vmem:[#allocation2 + $0x5c8] sm:$0xff] }
 0xdea   :  { %4493 = vmatpush.msra.mxu1 %v10647_v31  ;;  %4533 = vmatpush.msrb.mxu3 %v10650_v14  ;;  %13377 = vst [vmem:[#allocation60_spill] sm:$0xff] %v10671_v51  ;;  %v13499_v14 = vld [vmem:[#allocation97_spill] sm:$0xff] }
 0xdeb   :  { %4227 = vmatpush.msra.mxu0 %v10164_v47  ;;  %4267 = vmatpush.msra.mxu2 %v10167_v43  ;;  %13378 = vst [vmem:[#allocation61_spill] sm:$0xff] %v10674_v5  ;;  %v10679_v47 = vld [vmem:[#allocation2 + $0x5a0] sm:$0xff]  ;;  %v10682_v43 = vld [vmem:[#allocation2 + $0x5a8] sm:$0xff] }
 0xdec   :  { %4494 = vmatpush.msra.mxu1 %v10655_v8  ;;  %4534 = vmatpush.msrb.mxu3 %v10658_v63  ;;  %13379 = vst [vmem:[#allocation26_spill] sm:$0xff] %v10679_v47 }
 0xded   :  { %4228 = vmatpush.msra.mxu0 %v10172_v6  ;;  %4268 = vmatpush.msra.mxu2 %v10175_v38  ;;  %13380 = vst [vmem:[#allocation27_spill] sm:$0xff] %v10682_v43  ;;  %v13381_v6 = vld [vmem:[#allocation17_spill] sm:$0xff]  ;;  %v13382_v38 = vld [vmem:[#allocation18_spill] sm:$0xff] }
 0xdee   :  { %4495 = vmatpush.msra.mxu1 %v10663_v53  ;;  %4535 = vmatpush.msrb.mxu3 %v10666_v10  ;;  %13388 = vst [vmem:[#allocation31_spill] sm:$0xff] %v10698_v57 }
 0xdef   :  { %4229 = vmatpush.msra.mxu0 %v10180_v7  ;;  %4269 = vmatpush.msra.mxu2 %v10183_v27  ;;  %v10687_v7 = vld [vmem:[#allocation2 + $0x580] sm:$0xff]  ;;  %v10690_v27 = vld [vmem:[#allocation2 + $0x588] sm:$0xff] }
 0xdf0   :  { %4496 = vmatpush.msra.mxu1 %v10671_v51  ;;  %4536 = vmatpush.msrb.mxu3 %v10674_v5  ;;  %13383 = vst [vmem:[#allocation64_spill] sm:$0xff] %v10687_v7  ;;  %v13498_v51 = vld [vmem:[#allocation9_spill] sm:$0xff] }
 0xdf1   :  { %4230 = vmatpush.msra.mxu0 %v10188_v28  ;;  %4270 = vmatpush.msra.mxu2 %v10191_v9  ;;  %13384 = vst [vmem:[#allocation30_spill] sm:$0xff] %v10690_v27  ;;  %v13385_v28 = vld [vmem:[#allocation19_spill] sm:$0xff]  ;;  %v13386_v9 = vld [vmem:[#allocation20_spill] sm:$0xff] }
 0xdf2   :  { %4497 = vmatpush.msra.mxu1 %v10679_v47  ;;  %4537 = vmatpush.msrb.mxu3 %v10682_v43 }
 0xdf3   :  { %4231 = vmatpush.msra.mxu0 %v13381_v6  ;;  %4271 = vmatpush.msra.mxu2 %v13382_v38  ;;  %v13389_v6 = vld [vmem:[#allocation21_spill] sm:$0xff]  ;;  %v13390_v38 = vld [vmem:[#allocation22_spill] sm:$0xff] }
 0xdf4   :  { %4498 = vmatpush.msra.mxu1 %v10687_v7  ;;  %4538 = vmatpush.msrb.mxu3 %v10690_v27  ;;  %v10705_v27 = vld [vmem:[#allocation2 + $0x540] sm:$0xff] }
 0xdf5   :  { %4232 = vmatpush.msra.mxu0 %v13385_v28  ;;  %4272 = vmatpush.msra.mxu2 %v13386_v9  ;;  %13391 = vst [vmem:[#allocation68_spill] sm:$0xff] %v10705_v27  ;;  %v10708_v28 = vld [vmem:[#allocation2 + $0x548] sm:$0xff]  ;;  %v10711_v9 = vld [vmem:[#allocation2 + $0x4a0] sm:$0xff] }
 0xdf6   :  { %4499 = vmatpush.msra.mxu1 %v10695_v13  ;;  %4539 = vmatpush.msrb.mxu3 %v10698_v57  ;;  %13392 = vst [vmem:[#allocation34_spill] sm:$0xff] %v10708_v28  ;;  %v10714_v57 = vld [vmem:[#allocation2 + $0x4a8] sm:$0xff] }
 0xdf7   :  { %4233 = vmatpush.msra.mxu0 %v13389_v6  ;;  %4273 = vmatpush.msra.mxu2 %v13390_v38  ;;  %13393 = vst [vmem:[#allocation69_spill] sm:$0xff] %v10711_v9  ;;  %v10717_v6 = vld [vmem:[#allocation2 + $0x520] sm:$0xff] }
 0xdf8   :  { %4234 = vmatmul.f32.vlgmr.msra.gmra.mxu0 %v10571_v1  ;;  %4274 = vmatmul.f32.vlgmr.msra.gmra.mxu2 %v10571_v1  ;;  %13394 = vst [vmem:[#allocation35_spill] sm:$0xff] %v10714_v57  ;;  %v10720_v1 = vld [vmem:[#allocation2 + $0x528] sm:$0xff]  ;;  %v10723_v38 = vld [vmem:[#allocation2 + $0x480] sm:$0xff] }
 0xdf9   :  { %4500 = vmatpush.msra.mxu1 %v10705_v27  ;;  %4540 = vmatpush.msrb.mxu3 %v10708_v28  ;;  %13395 = vst [vmem:[#allocation72_spill] sm:$0xff] %v10717_v6  ;;  %v10726_v28 = vld [vmem:[#allocation2 + $0x488] sm:$0xff] }
 0xdfa   :  { %4469 = vmatpush.msrb.mxu0 %v10711_v9  ;;  %4509 = vmatpush.msrb.mxu2 %v10714_v57  ;;  %13396 = vst [vmem:[#allocation38_spill] sm:$0xff] %v10720_v1  ;;  %v10729_v9 = vld [vmem:[#allocation2 + $0x500] sm:$0xff]  ;;  %v10732_v57 = vld [vmem:[#allocation2 + $0x508] sm:$0xff] }
 0xdfb   :  { %4501 = vmatpush.msra.mxu1 %v10717_v6  ;;  %4541 = vmatpush.msrb.mxu3 %v10720_v1  ;;  %13397 = vst [vmem:[#allocation73_spill] sm:$0xff] %v10723_v38  ;;  %v10735_v6 = vld [vmem:[#allocation2 + $0x460] sm:$0xff]  ;;  %v10738_v1 = vld [vmem:[#allocation2 + $0x468] sm:$0xff] }
 0xdfc   :  { %4470 = vmatpush.msrb.mxu0 %v10723_v38  ;;  %13398 = vst [vmem:[#allocation39_spill] sm:$0xff] %v10726_v28  ;;  %4510 = vmatpush.msrb.mxu2 %v10726_v28  ;;  %v10741_v38 = vld [vmem:[#allocation2 + $0x4e0] sm:$0xff]  ;;  %v10744_v28 = vld [vmem:[#allocation2 + $0x4e8] sm:$0xff] }
 0xdfd   :  { %13399 = vst [vmem:[#allocation76_spill] sm:$0xff] %v10729_v9  ;;  %4502 = vmatpush.msra.mxu1 %v10729_v9  ;;  %4542 = vmatpush.msrb.mxu3 %v10732_v57  ;;  %v10747_v9 = vld [vmem:[#allocation2 + $0x440] sm:$0xff] }
 0xdfe   :  { %13400 = vst [vmem:[#allocation42_spill] sm:$0xff] %v10732_v57  ;;  %4471 = vmatpush.msrb.mxu0 %v10735_v6  ;;  %4511 = vmatpush.msrb.mxu2 %v10738_v1  ;;  %v10750_v57 = vld [vmem:[#allocation2 + $0x448] sm:$0xff] }
 0xdff   :  { %13401 = vst [vmem:[#allocation77_spill] sm:$0xff] %v10735_v6  ;;  %4503 = vmatpush.msra.mxu1 %v10741_v38  ;;  %4543 = vmatpush.msrb.mxu3 %v10744_v28  ;;  %v10753_v6 = vld [vmem:[#allocation2 + $0x4c0] sm:$0xff] }
 0xe00   :  { %13402 = vst [vmem:[#allocation43_spill] sm:$0xff] %v10738_v1  ;;  %4472 = vmatpush.msrb.mxu0 %v10747_v9  ;;  %4512 = vmatpush.msrb.mxu2 %v10750_v57  ;;  %v10756_v1 = vld [vmem:[#allocation2 + $0x4c8] sm:$0xff] }
 0xe01   :  { %13403 = vst [vmem:[#allocation80_spill] sm:$0xff] %v10741_v38  ;;  %4504 = vmatpush.msra.mxu1 %v10753_v6  ;;  %4544 = vmatpush.msrb.mxu3 %v10756_v1  ;;  %v10759_v38 = vld [vmem:[#allocation2 + $0x6b0] sm:$0xff] }
 0xe02   :  { %13404 = vst [vmem:[#allocation46_spill] sm:$0xff] %v10744_v28  ;;  %v10762_v28 = vld [vmem:[#allocation2 + $0x6b8] sm:$0xff] }
 0xe03   :  { %13405 = vst [vmem:[#allocation81_spill] sm:$0xff] %v10747_v9  ;;  %4569 = vmatpush.msrb.mxu1 %v10759_v38  ;;  %4609 = vmatpush.msra.mxu3 %v10762_v28  ;;  %v10765_v9 = vld [vmem:[#allocation2 + $0x420] sm:$0xff] }
 0xe04   :  { %13406 = vst [vmem:[#allocation47_spill] sm:$0xff] %v10750_v57  ;;  %4473 = vmatpush.msrb.mxu0 %v10765_v9  ;;  %v10768_v57 = vld [vmem:[#allocation2 + $0x428] sm:$0xff] }
 0xe05   :  { %13407 = vst [vmem:[#allocation84_spill] sm:$0xff] %v10753_v6  ;;  %4513 = vmatpush.msrb.mxu2 %v10768_v57  ;;  %v10771_v6 = vld [vmem:[#allocation2 + $0x690] sm:$0xff] }
 0xe06   :  { %13408 = vst [vmem:[#allocation50_spill] sm:$0xff] %v10756_v1  ;;  %4570 = vmatpush.msrb.mxu1 %v10771_v6  ;;  %v10774_v1 = vld [vmem:[#allocation2 + $0x698] sm:$0xff] }
 0xe07   :  { %13409 = vst [vmem:[#allocation85_spill] sm:$0xff] %v10759_v38  ;;  %4610 = vmatpush.msra.mxu3 %v10774_v1  ;;  %v10777_v38 = vld [vmem:[#allocation2 + $0x400] sm:$0xff] }
 0xe08   :  { %13410 = vst [vmem:[#allocation51_spill] sm:$0xff] %v10762_v28  ;;  %4474 = vmatpush.msrb.mxu0 %v10777_v38  ;;  %v10780_v28 = vld [vmem:[#allocation2 + $0x408] sm:$0xff] }
 0xe09   :  { %13411 = vst [vmem:[#allocation88_spill] sm:$0xff] %v10765_v9  ;;  %4514 = vmatpush.msrb.mxu2 %v10780_v28  ;;  %v10783_v9 = vld [vmem:[#allocation2 + $0x670] sm:$0xff] }
 0xe0a   :  { %13412 = vst [vmem:[#allocation54_spill] sm:$0xff] %v10768_v57  ;;  %4571 = vmatpush.msrb.mxu1 %v10783_v9  ;;  %v10786_v57 = vld [vmem:[#allocation2 + $0x678] sm:$0xff] }
 0xe0b   :  { %13413 = vst [vmem:[#allocation89_spill] sm:$0xff] %v10771_v6  ;;  %4611 = vmatpush.msra.mxu3 %v10786_v57  ;;  %v10789_v6 = vld [vmem:[#allocation2 + $0x3e0] sm:$0xff] }
 0xe0c   :  { %13414 = vst [vmem:[#allocation55_spill] sm:$0xff] %v10774_v1  ;;  %4475 = vmatpush.msrb.mxu0 %v10789_v6  ;;  %v10792_v1 = vld [vmem:[#allocation2 + $0x3e8] sm:$0xff] }
 0xe0d   :  { %13415 = vst [vmem:[#allocation58_spill] sm:$0xff] %v10777_v38  ;;  %4515 = vmatpush.msrb.mxu2 %v10792_v1  ;;  %v10795_v38 = vld [vmem:[#allocation2 + $0x650] sm:$0xff] }
 0xe0e   :  { %13416 = vst [vmem:[#allocation59_spill] sm:$0xff] %v10780_v28  ;;  %4572 = vmatpush.msrb.mxu1 %v10795_v38  ;;  %v10798_v28 = vld [vmem:[#allocation2 + $0x658] sm:$0xff] }
 0xe0f   :  { %13417 = vst [vmem:[#allocation62_spill] sm:$0xff] %v10783_v9  ;;  %4612 = vmatpush.msra.mxu3 %v10798_v28  ;;  %v10801_v9 = vld [vmem:[#allocation2 + $0x3c0] sm:$0xff] }
 0xe10   :  { %13418 = vst [vmem:[#allocation63_spill] sm:$0xff] %v10786_v57  ;;  %4476 = vmatpush.msrb.mxu0 %v10801_v9  ;;  %v10804_v57 = vld [vmem:[#allocation2 + $0x3c8] sm:$0xff] }
 0xe11   :  { %13419 = vst [vmem:[#allocation66_spill] sm:$0xff] %v10789_v6  ;;  %4516 = vmatpush.msrb.mxu2 %v10804_v57  ;;  %v10807_v6 = vld [vmem:[#allocation2 + $0x630] sm:$0xff] }
 0xe12   :  { %13420 = vst [vmem:[#allocation67_spill] sm:$0xff] %v10792_v1  ;;  %4573 = vmatpush.msrb.mxu1 %v10807_v6  ;;  %v10810_v1 = vld [vmem:[#allocation2 + $0x638] sm:$0xff] }
 0xe13   :  { %13421 = vst [vmem:[#allocation70_spill] sm:$0xff] %v10795_v38  ;;  %4613 = vmatpush.msra.mxu3 %v10810_v1  ;;  %v10813_v38 = vld [vmem:[#allocation2 + $0x3a0] sm:$0xff] }
 0xe14   :  { %13422 = vst [vmem:[#allocation71_spill] sm:$0xff] %v10798_v28  ;;  %4477 = vmatpush.msrb.mxu0 %v10813_v38  ;;  %v10816_v28 = vld [vmem:[#allocation2 + $0x3a8] sm:$0xff] }
 0xe15   :  { %13423 = vst [vmem:[#allocation74_spill] sm:$0xff] %v10801_v9  ;;  %4517 = vmatpush.msrb.mxu2 %v10816_v28  ;;  %v10819_v9 = vld [vmem:[#allocation2 + $0x610] sm:$0xff] }
 0xe16   :  { %13424 = vst [vmem:[#allocation75_spill] sm:$0xff] %v10804_v57  ;;  %4574 = vmatpush.msrb.mxu1 %v10819_v9  ;;  %v10822_v57 = vld [vmem:[#allocation2 + $0x618] sm:$0xff] }
 0xe17   :  { %13425 = vst [vmem:[#allocation78_spill] sm:$0xff] %v10807_v6  ;;  %4614 = vmatpush.msra.mxu3 %v10822_v57  ;;  %v10825_v6 = vld [vmem:[#allocation2 + $0x380] sm:$0xff] }
 0xe18   :  { %13426 = vst [vmem:[#allocation79_spill] sm:$0xff] %v10810_v1  ;;  %4478 = vmatpush.msrb.mxu0 %v10825_v6  ;;  %v10828_v1 = vld [vmem:[#allocation2 + $0x388] sm:$0xff] }
 0xe19   :  { %13427 = vst [vmem:[#allocation82_spill] sm:$0xff] %v10813_v38  ;;  %4518 = vmatpush.msrb.mxu2 %v10828_v1  ;;  %v10831_v38 = vld [vmem:[#allocation2 + $0x5f0] sm:$0xff] }
 0xe1a   :  { %13428 = vst [vmem:[#allocation83_spill] sm:$0xff] %v10816_v28  ;;  %4575 = vmatpush.msrb.mxu1 %v10831_v38  ;;  %v10834_v28 = vld [vmem:[#allocation2 + $0x5f8] sm:$0xff] }
 0xe1b   :  { %13429 = vst [vmem:[#allocation86_spill] sm:$0xff] %v10819_v9  ;;  %4615 = vmatpush.msra.mxu3 %v10834_v28  ;;  %v10837_v9 = vld [vmem:[#allocation2 + $0x360] sm:$0xff] }
 0xe1c   :  { %13430 = vst [vmem:[#allocation87_spill] sm:$0xff] %v10822_v57  ;;  %4479 = vmatpush.msrb.mxu0 %v10837_v9  ;;  %v10840_v57 = vld [vmem:[#allocation2 + $0x368] sm:$0xff] }
 0xe1d   :  { %13431 = vst [vmem:[#allocation90_spill] sm:$0xff] %v10825_v6  ;;  %4519 = vmatpush.msrb.mxu2 %v10840_v57  ;;  %v10843_v6 = vld [vmem:[#allocation2 + $0x5d0] sm:$0xff] }
 0xe1e   :  { %13432 = vst [vmem:[#allocation91_spill] sm:$0xff] %v10828_v1  ;;  %4576 = vmatpush.msrb.mxu1 %v10843_v6  ;;  %v10846_v1 = vld [vmem:[#allocation2 + $0x5d8] sm:$0xff] }
 0xe1f   :  { %13433 = vst [vmem:[#allocation92_spill] sm:$0xff] %v10831_v38  ;;  %4616 = vmatpush.msra.mxu3 %v10846_v1  ;;  %v10849_v38 = vld [vmem:[#allocation2 + $0x340] sm:$0xff] }
 0xe20   :  { %13434 = vst [vmem:[#allocation93_spill] sm:$0xff] %v10834_v28  ;;  %4480 = vmatpush.msrb.mxu0 %v10849_v38  ;;  %v10852_v28 = vld [vmem:[#allocation2 + $0x348] sm:$0xff] }
 0xe21   :  { %13435 = vst [vmem:[#allocation94_spill] sm:$0xff] %v10837_v9  ;;  %4520 = vmatpush.msrb.mxu2 %v10852_v28  ;;  %v10855_v9 = vld [vmem:[#allocation2 + $0x5b0] sm:$0xff] }
 0xe22   :  { %13436 = vst [vmem:[#allocation95_spill] sm:$0xff] %v10840_v57  ;;  %4577 = vmatpush.msrb.mxu1 %v10855_v9  ;;  %v10858_v57 = vld [vmem:[#allocation2 + $0x5b8] sm:$0xff] }
 0xe23   :  { %13437 = vst [vmem:[#allocation104_spill] sm:$0xff] %v10843_v6  ;;  %4617 = vmatpush.msra.mxu3 %v10858_v57  ;;  %v10861_v6 = vld [vmem:[#allocation2 + $0x320] sm:$0xff] }
 0xe24   :  { %13438 = vst [vmem:[#allocation105_spill] sm:$0xff] %v10846_v1  ;;  %4481 = vmatpush.msrb.mxu0 %v10861_v6  ;;  %v10864_v1 = vld [vmem:[#allocation2 + $0x328] sm:$0xff] }
 0xe25   :  { %13439 = vst [vmem:[#allocation106_spill] sm:$0xff] %v10849_v38  ;;  %4521 = vmatpush.msrb.mxu2 %v10864_v1  ;;  %v10867_v38 = vld [vmem:[#allocation2 + $0x590] sm:$0xff] }
 0xe26   :  { %13440 = vst [vmem:[#allocation107_spill] sm:$0xff] %v10852_v28  ;;  %4578 = vmatpush.msrb.mxu1 %v10867_v38  ;;  %v10870_v28 = vld [vmem:[#allocation2 + $0x598] sm:$0xff] }
 0xe27   :  { %13441 = vst [vmem:[#allocation108_spill] sm:$0xff] %v10855_v9  ;;  %4618 = vmatpush.msra.mxu3 %v10870_v28  ;;  %v10873_v9 = vld [vmem:[#allocation2 + $0x300] sm:$0xff] }
 0xe28   :  { %13442 = vst [vmem:[#allocation109_spill] sm:$0xff] %v10858_v57  ;;  %4482 = vmatpush.msrb.mxu0 %v10873_v9  ;;  %v10876_v57 = vld [vmem:[#allocation2 + $0x308] sm:$0xff] }
 0xe29   :  { %13443 = vst [vmem:[#allocation110_spill] sm:$0xff] %v10861_v6  ;;  %4522 = vmatpush.msrb.mxu2 %v10876_v57  ;;  %v10879_v6 = vld [vmem:[#allocation2 + $0x570] sm:$0xff] }
 0xe2a   :  { %13444 = vst [vmem:[#allocation111_spill] sm:$0xff] %v10864_v1  ;;  %4579 = vmatpush.msrb.mxu1 %v10879_v6  ;;  %v10882_v1 = vld [vmem:[#allocation2 + $0x578] sm:$0xff] }
 0xe2b   :  { %13445 = vst [vmem:[#allocation112_spill] sm:$0xff] %v10867_v38  ;;  %4619 = vmatpush.msra.mxu3 %v10882_v1  ;;  %v10885_v38 = vld [vmem:[#allocation2 + $0x2e0] sm:$0xff] }
 0xe2c   :  { %13446 = vst [vmem:[#allocation113_spill] sm:$0xff] %v10870_v28  ;;  %4483 = vmatpush.msrb.mxu0 %v10885_v38  ;;  %v10888_v28 = vld [vmem:[#allocation2 + $0x2e8] sm:$0xff] }
 0xe2d   :  { %13447 = vst [vmem:[#allocation114_spill] sm:$0xff] %v10873_v9  ;;  %4523 = vmatpush.msrb.mxu2 %v10888_v28  ;;  %v10891_v9 = vld [vmem:[#allocation2 + $0x550] sm:$0xff] }
 0xe2e   :  { %13448 = vst [vmem:[#allocation115_spill] sm:$0xff] %v10876_v57  ;;  %4580 = vmatpush.msrb.mxu1 %v10891_v9  ;;  %v10894_v57 = vld [vmem:[#allocation2 + $0x558] sm:$0xff] }
 0xe2f   :  { %13449 = vst [vmem:[#allocation116_spill] sm:$0xff] %v10879_v6  ;;  %4620 = vmatpush.msra.mxu3 %v10894_v57  ;;  %v10897_v6 = vld [vmem:[#allocation2 + $0x2c0] sm:$0xff] }
 0xe30   :  { %13450 = vst [vmem:[#allocation117_spill] sm:$0xff] %v10882_v1  ;;  %4484 = vmatpush.msrb.mxu0 %v10897_v6  ;;  %v10900_v1 = vld [vmem:[#allocation2 + $0x2c8] sm:$0xff] }
 0xe31   :  { %13451 = vst [vmem:[#allocation118_spill] sm:$0xff] %v10885_v38  ;;  %4524 = vmatpush.msrb.mxu2 %v10900_v1  ;;  %v10903_v38 = vld [vmem:[#allocation2 + $0x530] sm:$0xff] }
 0xe32   :  { %13452 = vst [vmem:[#allocation119_spill] sm:$0xff] %v10888_v28  ;;  %4581 = vmatpush.msrb.mxu1 %v10903_v38  ;;  %v10906_v28 = vld [vmem:[#allocation2 + $0x538] sm:$0xff] }
 0xe33   :  { %13453 = vst [vmem:[#allocation120_spill] sm:$0xff] %v10891_v9  ;;  %4621 = vmatpush.msra.mxu3 %v10906_v28  ;;  %v10909_v9 = vld [vmem:[#allocation2 + $0x4b0] sm:$0xff] }
 0xe34   :  { %13454 = vst [vmem:[#allocation121_spill] sm:$0xff] %v10894_v57  ;;  %4549 = vmatpush.msra.mxu0 %v10909_v9  ;;  %v10912_v57 = vld [vmem:[#allocation2 + $0x4b8] sm:$0xff] }
 0xe35   :  { %13455 = vst [vmem:[#allocation122_spill] sm:$0xff] %v10897_v6  ;;  %4589 = vmatpush.msra.mxu2 %v10912_v57  ;;  %v10915_v6 = vld [vmem:[#allocation2 + $0x510] sm:$0xff] }
 0xe36   :  { %13456 = vst [vmem:[#allocation123_spill] sm:$0xff] %v10900_v1  ;;  %4582 = vmatpush.msrb.mxu1 %v10915_v6  ;;  %v10918_v1 = vld [vmem:[#allocation2 + $0x518] sm:$0xff] }
 0xe37   :  { %13457 = vst [vmem:[#allocation124_spill] sm:$0xff] %v10903_v38  ;;  %4622 = vmatpush.msra.mxu3 %v10918_v1  ;;  %v10921_v38 = vld [vmem:[#allocation2 + $0x490] sm:$0xff] }
 0xe38   :  { %13458 = vst [vmem:[#allocation125_spill] sm:$0xff] %v10906_v28  ;;  %4550 = vmatpush.msra.mxu0 %v10921_v38  ;;  %v10924_v28 = vld [vmem:[#allocation2 + $0x498] sm:$0xff] }
 0xe39   :  { %13459 = vst [vmem:[#allocation126_spill] sm:$0xff] %v10909_v9  ;;  %4590 = vmatpush.msra.mxu2 %v10924_v28  ;;  %v10927_v9 = vld [vmem:[#allocation2 + $0x4f0] sm:$0xff] }
 0xe3a   :  { %13460 = vst [vmem:[#allocation127_spill] sm:$0xff] %v10912_v57  ;;  %4583 = vmatpush.msrb.mxu1 %v10927_v9  ;;  %v10930_v57 = vld [vmem:[#allocation2 + $0x4f8] sm:$0xff] }
 0xe3b   :  { %13461 = vst [vmem:[#allocation128_spill] sm:$0xff] %v10915_v6  ;;  %4623 = vmatpush.msra.mxu3 %v10930_v57  ;;  %v10933_v6 = vld [vmem:[#allocation2 + $0x470] sm:$0xff] }
 0xe3c   :  { %13462 = vst [vmem:[#allocation129_spill] sm:$0xff] %v10918_v1  ;;  %4551 = vmatpush.msra.mxu0 %v10933_v6  ;;  %v10936_v1 = vld [vmem:[#allocation2 + $0x478] sm:$0xff] }
 0xe3d   :  { %13463 = vst [vmem:[#allocation130_spill] sm:$0xff] %v10921_v38  ;;  %4591 = vmatpush.msra.mxu2 %v10936_v1  ;;  %v10939_v38 = vld [vmem:[#allocation2 + $0x4d0] sm:$0xff] }
 0xe3e   :  { %13464 = vst [vmem:[#allocation131_spill] sm:$0xff] %v10924_v28  ;;  %4584 = vmatpush.msrb.mxu1 %v10939_v38  ;;  %v10942_v28 = vld [vmem:[#allocation2 + $0x4d8] sm:$0xff] }
 0xe3f   :  { %13465 = vst [vmem:[#allocation132_spill] sm:$0xff] %v10927_v9  ;;  %4624 = vmatpush.msra.mxu3 %v10942_v28  ;;  %v10945_v9 = vld [vmem:[#allocation2 + $0x450] sm:$0xff] }
 0xe40   :  { %13466 = vst [vmem:[#allocation133_spill] sm:$0xff] %v10930_v57  ;;  %4552 = vmatpush.msra.mxu0 %v10945_v9  ;;  %v10948_v57 = vld [vmem:[#allocation2 + $0x458] sm:$0xff]  ;;  %v4068_v10 = vpop.f32.mrf.mxu3 }
 0xe41   :  { %13467 = vst [vmem:[#allocation134_spill] sm:$0xff] %v10933_v6  ;;  %4592 = vmatpush.msra.mxu2 %v10948_v57  ;;  %v10951_v6 = vld [vmem:[#allocation2 + $0x430] sm:$0xff] }
 0xe42   :  { %13468 = vst [vmem:[#allocation135_spill] sm:$0xff] %v10936_v1  ;;  %4553 = vmatpush.msra.mxu0 %v10951_v6  ;;  %v10954_v1 = vld [vmem:[#allocation2 + $0x438] sm:$0xff] }
 0xe43   :  { %13469 = vst [vmem:[#allocation136_spill] sm:$0xff] %v10939_v38  ;;  %4593 = vmatpush.msra.mxu2 %v10954_v1  ;;  %v10957_v38 = vld [vmem:[#allocation2 + $0x410] sm:$0xff] }
 0xe44   :  { %13470 = vst [vmem:[#allocation137_spill] sm:$0xff] %v10942_v28  ;;  %4554 = vmatpush.msra.mxu0 %v10957_v38  ;;  %v10960_v28 = vld [vmem:[#allocation2 + $0x418] sm:$0xff] }
 0xe45   :  { %13471 = vst [vmem:[#allocation138_spill] sm:$0xff] %v10945_v9  ;;  %4594 = vmatpush.msra.mxu2 %v10960_v28  ;;  %v10963_v9 = vld [vmem:[#allocation2 + $0x3f0] sm:$0xff] }
 0xe46   :  { %13472 = vst [vmem:[#allocation139_spill] sm:$0xff] %v10948_v57  ;;  %4555 = vmatpush.msra.mxu0 %v10963_v9  ;;  %v10966_v57 = vld [vmem:[#allocation2 + $0x3f8] sm:$0xff] }
 0xe47   :  { %13473 = vst [vmem:[#allocation140_spill] sm:$0xff] %v10951_v6  ;;  %4595 = vmatpush.msra.mxu2 %v10966_v57  ;;  %v10969_v6 = vld [vmem:[#allocation2 + $0x3d0] sm:$0xff] }
 0xe48   :  { %13474 = vst [vmem:[#allocation141_spill] sm:$0xff] %v10954_v1  ;;  %4556 = vmatpush.msra.mxu0 %v10969_v6  ;;  %v10972_v1 = vld [vmem:[#allocation2 + $0x3d8] sm:$0xff] }
 0xe49   :  { %13475 = vst [vmem:[#allocation142_spill] sm:$0xff] %v10957_v38  ;;  %4596 = vmatpush.msra.mxu2 %v10972_v1  ;;  %v10975_v38 = vld [vmem:[#allocation2 + $0x3b0] sm:$0xff] }
 0xe4a   :  { %13476 = vst [vmem:[#allocation143_spill] sm:$0xff] %v10960_v28  ;;  %4557 = vmatpush.msra.mxu0 %v10975_v38  ;;  %v10978_v28 = vld [vmem:[#allocation2 + $0x3b8] sm:$0xff] }
 0xe4b   :  { %13477 = vst [vmem:[#allocation144_spill] sm:$0xff] %v10963_v9  ;;  %4597 = vmatpush.msra.mxu2 %v10978_v28  ;;  %v10981_v9 = vld [vmem:[#allocation2 + $0x390] sm:$0xff] }
 0xe4c   :  { %13478 = vst [vmem:[#allocation145_spill] sm:$0xff] %v10966_v57  ;;  %4558 = vmatpush.msra.mxu0 %v10981_v9  ;;  %v10984_v57 = vld [vmem:[#allocation2 + $0x398] sm:$0xff] }
 0xe4d   :  { %13479 = vst [vmem:[#allocation146_spill] sm:$0xff] %v10969_v6  ;;  %4598 = vmatpush.msra.mxu2 %v10984_v57  ;;  %v10987_v6 = vld [vmem:[#allocation2 + $0x370] sm:$0xff] }
 0xe4e   :  { %13480 = vst [vmem:[#allocation147_spill] sm:$0xff] %v10972_v1  ;;  %4559 = vmatpush.msra.mxu0 %v10987_v6  ;;  %v10990_v1 = vld [vmem:[#allocation2 + $0x378] sm:$0xff] }
 0xe4f   :  { %13481 = vst [vmem:[#allocation148_spill] sm:$0xff] %v10975_v38  ;;  %4599 = vmatpush.msra.mxu2 %v10990_v1  ;;  %v10993_v38 = vld [vmem:[#allocation2 + $0x350] sm:$0xff] }
 0xe50   :  { %13482 = vst [vmem:[#allocation149_spill] sm:$0xff] %v10978_v28  ;;  %4560 = vmatpush.msra.mxu0 %v10993_v38  ;;  %v10996_v28 = vld [vmem:[#allocation2 + $0x358] sm:$0xff] }
 0xe51   :  { %13483 = vst [vmem:[#allocation98_spill] sm:$0xff] %v10981_v9  ;;  %4600 = vmatpush.msra.mxu2 %v10996_v28  ;;  %v10999_v9 = vld [vmem:[#allocation2 + $0x330] sm:$0xff] }
 0xe52   :  { %13484 = vst [vmem:[#allocation100_spill] sm:$0xff] %v10984_v57  ;;  %4561 = vmatpush.msra.mxu0 %v10999_v9  ;;  %v11002_v57 = vld [vmem:[#allocation2 + $0x338] sm:$0xff] }
 0xe53   :  { %13485 = vst [vmem:[#allocation101_spill] sm:$0xff] %v10987_v6  ;;  %4601 = vmatpush.msra.mxu2 %v11002_v57  ;;  %v11005_v6 = vld [vmem:[#allocation2 + $0x310] sm:$0xff] }
 0xe54   :  { %13486 = vst [vmem:[#allocation14_spill] sm:$0xff] %v10990_v1  ;;  %4562 = vmatpush.msra.mxu0 %v11005_v6  ;;  %v11008_v1 = vld [vmem:[#allocation2 + $0x318] sm:$0xff]  ;;  %v4008_v13 = vpop.f32.mrf.mxu0 }
 0xe55   :  { %13487 = vst [vmem:[#allocation15_spill] sm:$0xff] %v10993_v38  ;;  %4602 = vmatpush.msra.mxu2 %v11008_v1  ;;  %v11011_v38 = vld [vmem:[#allocation2 + $0x2f0] sm:$0xff] }
 0xe56   :  { %13488 = vst [vmem:[#allocation150_spill] sm:$0xff] %v10996_v28  ;;  %4563 = vmatpush.msra.mxu0 %v11011_v38  ;;  %v11014_v28 = vld [vmem:[#allocation2 + $0x2f8] sm:$0xff] }
 0xe57   :  { %13489 = vst [vmem:[#allocation17_spill] sm:$0xff] %v10999_v9  ;;  %4603 = vmatpush.msra.mxu2 %v11014_v28  ;;  %v11017_v9 = vld [vmem:[#allocation2 + $0x2d0] sm:$0xff] }
 0xe58   :  { %13490 = vst [vmem:[#allocation18_spill] sm:$0xff] %v11002_v57  ;;  %4564 = vmatpush.msra.mxu0 %v11017_v9  ;;  %v11020_v57 = vld [vmem:[#allocation2 + $0x2d8] sm:$0xff] }
 0xe59   :  { %13491 = vst [vmem:[#allocation19_spill] sm:$0xff] %v11005_v6  ;;  %4604 = vmatpush.msra.mxu2 %v11020_v57  ;;  %v4028_v6 = vpop.f32.mrf.mxu1 }
 0xe5a   :  { %13492 = vst [vmem:[#allocation20_spill] sm:$0xff] %v11008_v1  ;;  %v13497_v1 = vld [vmem:[#allocation8_spill] sm:$0xff] }
 0xe5b   :  { %13493 = vst [vmem:[#allocation21_spill] sm:$0xff] %v11011_v38  ;;  %v4009_v7 = vadd.f32 %v4008_v13, %v13497_v1  ;;  %v4048_v38 = vpop.f32.mrf.mxu2 }
 0xe5c   :  { %13494 = vst [vmem:[#allocation22_spill] sm:$0xff] %v11014_v28  ;;  %v4049_v28 = vadd.f32 %v4048_v38, %v13498_v51 }
 0xe5d   :  { %13495 = vst [vmem:[#allocation151_spill] sm:$0xff] %v11017_v9  ;;  %v4029_v43 = vadd.f32 %v4028_v6, %v4009_v7  ;;  %v4088_v8 = vpop.f32.mrf.mxu0 }
 0xe5e   :  { %13496 = vst [vmem:[#allocation152_spill] sm:$0xff] %v11020_v57  ;;  %v4069_v9 = vadd.f32 %v4068_v10, %v4049_v28  ;;  %v13500_v57 = vld [vmem:[#allocation10_spill] sm:$0xff] }
 0xe5f   :  { %v5597_v47 = vmul.f32 -1.442695, %v4029_v43  ;;  %v4089_v48 = vadd.f32 %v4088_v8, %v13500_v57  ;;  %v13502_v8 = vld [vmem:[#allocation11_spill] sm:$0xff] }
 0xe60   :  { %v5598_v46 = vmul.f32 -1.442695, %v4069_v9 }
 0xe61   :  { %v4108_v27 = vpop.f32.mrf.mxu1  ;;  %5964 = vpow2.f32 %v5597_v47 }
 0xe62   :  { %v4109_v13 = vadd.f32 %v4108_v27, %v4089_v48  ;;  %5966 = vpow2.f32 %v5598_v46  ;;  %v4148_v46 = vpop.f32.mrf.mxu3 }
 0xe63   :  { %v4128_v10 = vpop.f32.mrf.mxu2 }
 0xe64   :  { %v5599_v6 = vmul.f32 -1.442695, %v4109_v13  ;;  %v4129_v38 = vadd.f32 %v4128_v10, %v13502_v8 }
 0xe67   :  { %v5965_v7 = vpop.eup %5964 }
 0xe68   :  { %v4160_v43 = vadd.f32 1.0, %v5965_v7 }
 0xe69   :  { %v4255_v5 = vpop.f32.mrf.mxu1 }
 0xe6a   :  { %v4303_v53 = vrot.slane %v4255_v5, 2  ;;  %v4307_v63 = vrot.slane %v4255_v5, 3  ;;  %5968 = vrcp.f32 %v4160_v43  ;;  %v5967_v5 = vpop.eup %5966  ;;  %v4174_v10 = vand.u32 2147483648, %v4160_v43 }
 0xe6b   :  { %5970 = vpow2.f32 %v5599_v6  ;;  %v4161_v28 = vadd.f32 1.0, %v5967_v5  ;;  %vm4168_vm1 = vweird.f32 %v4160_v43 }
 0xe6c   :  { %v4319_v31 = vadd.f32 %v4303_v53, %v13499_v14  ;;  %v4323_v12 = vadd.f32 %v4307_v63, %v13501_v16 }
 0xe6d   :  { %vm4183_vm15 = vweird.f32 %v4161_v28 }
 0xe6e   :  { %v5601_v47 = vmul.f32 -1.442695, %v4319_v31  ;;  %v5604_v1 = vmul.f32 -1.442695, %v4323_v12  ;;  %v4149_v12 = vadd.f32 %v4148_v46, %v4129_v38  ;;  %v4189_v38 = vand.u32 2147483648, %v4161_v28 }
 0xe6f   :  { %v4187_v46 = vand.u32 2147483647, %v4161_v28 }
 0xe70   :  { %5972 = vpow2.f32 %v5601_v47  ;;  %v5969_v53 = vpop.eup %5968 }
 0xe71   :  { %5974 = vpow2.f32 %v5604_v1  ;;  %v5971_v63 = vpop.eup %5970  ;;  %v4164_v9 = vmul.f32 %v5969_v53, %v4160_v43  ;;  %vm4169_vm9 = vweird.f32 %v5969_v53  ;;  %vm4188_vm5 = vcmp.eq.f32.partialorder %v4187_v46, 8.507059e+37 }
 0xe72   :  { %5976 = vrcp.f32 %v4161_v28  ;;  %v11029_v31 = vadd.f32 1.0, %v5971_v63  ;;  %v4172_v63 = vand.u32 2147483647, %v4160_v43  ;;  %vm11038_vm14 = vmor %vm4168_vm1, %vm4169_vm9 }
 0xe73   :  { %v4165_v7 = vsub.f32 1.0, %v4164_v9 }
 0xe74   :  { %5978 = vrcp.f32 %v11029_v31  ;;  %vm4173_vm0 = vcmp.eq.f32.partialorder %v4172_v63, 8.507059e+37  ;;  %vm4198_vm7 = vweird.f32 %v11029_v31 }
 0xe75   :  { %v4166_v47 = vmul.f32 %v5969_v53, %v4165_v7  ;;  %5980 = vtanh.f32 %v4149_v12  ;;  %v4235_v7 = vpop.f32.mrf.mxu0 }
 0xe76   :  { %v5973_v48 = vpop.eup %5972  ;;  %v4306_v57 = vrot.slane %v4235_v7, 3 }
 0xe77   :  { %v5975_v27 = vpop.eup %5974  ;;  %v11031_v13 = vadd.f32 1.0, %v5973_v48  ;;  %v4167_v16 = vadd.f32 %v5969_v53, %v4166_v47  ;;  %v4175_v47 = vor.u32 1.1754944e-38, %v4174_v10 }
 0xe78   :  { %v5977_v6 = vpop.eup %5976  ;;  %v11033_v1 = vadd.f32 1.0, %v5975_v27 }
 0xe79   :  { %v4179_v5 = vmul.f32 %v5977_v6, %v4161_v28  ;;  %5982 = vrcp.f32 %v11031_v13  ;;  %vm4184_vm3 = vweird.f32 %v5977_v6  ;;  %v4171_v27 = vsel %vm11038_vm14, %v5969_v53, %v4167_v16 }
 0xe7a   :  { %5984 = vrcp.f32 %v11033_v1  ;;  %v11044_v12 = vpop.eup %5978  ;;  %vm4185_vm4 = vmor %vm4183_vm15, %vm4184_vm3  ;;  %v4176_v44 = vsel %vm4173_vm0, %v4175_v47, %v4171_v27  ;;  %v4322_v16 = vadd.f32 %v4306_v57, %v12868_v54  ;;  %vm4370_vm13 = vweird.f32 %v11031_v13 }
 0xe7b   :  { %v4180_v8 = vsub.f32 1.0, %v4179_v5  ;;  %v4302_v5 = vrot.slane %v4235_v7, 2  ;;  %v4194_v43 = vmul.f32 %v11044_v12, %v11029_v31  ;;  %v5981_v51 = vpop.eup %5980  ;;  %v4275_v47 = vpop.f32.mrf.mxu2  ;;  %vm4199_vm6 = vweird.f32 %v11044_v12 }
 0xe7c   :  { %v5603_v36 = vmul.f32 -1.442695, %v4322_v16  ;;  %v4210_v27 = vmul.f32 %v5981_v51, %v4176_v44  ;;  %vm11070_vm8 = vmor %vm4198_vm7, %vm4199_vm6  ;;  %vm4415_vm14 = vweird.f32 %v11033_v1 }
 0xe7d   :  { %v4181_v48 = vmul.f32 %v5977_v6, %v4180_v8  ;;  %v4190_v8 = vor.u32 1.1754944e-38, %v4189_v38  ;;  %v4318_v9 = vadd.f32 %v4302_v5, %v13186_v0  ;;  %v4195_v30 = vsub.f32 1.0, %v4194_v43 }
 0xe7e   :  { %v4304_v5 = vrot.slane %v4275_v47, 2  ;;  %v4308_v43 = vrot.slane %v4275_v47, 3 }
 0xe7f   :  { %v4182_v14 = vadd.f32 %v5977_v6, %v4181_v48  ;;  %v11050_v53 = vpop.eup %5982  ;;  %v5600_v11 = vmul.f32 -1.442695, %v4318_v9  ;;  %v4196_v63 = vmul.f32 %v11044_v12, %v4195_v30  ;;  %v4295_v48 = vpop.f32.mrf.mxu3 }
 0xe80   :  { %v11052_v7 = vpop.eup %5984  ;;  %v4305_v46 = vrot.slane %v4295_v48, 2  ;;  %v4320_v30 = vadd.f32 %v4304_v5, %v12871_v41  ;;  %v4309_v44 = vrot.slane %v4295_v48, 3  ;;  %vm4371_vm11 = vweird.f32 %v11050_v53 }
 0xe81   :  { %v4186_v10 = vsel %vm4185_vm4, %v5977_v6, %v4182_v14  ;;  %5986 = vpow2.f32 %v5600_v11  ;;  %v4366_v14 = vmul.f32 %v11050_v53, %v11031_v13  ;;  %v4411_v6 = vmul.f32 %v11052_v7, %v11033_v1  ;;  %vm11108_vm9 = vmor %vm4370_vm13, %vm4371_vm11 }
 0xe82   :  { %v4191_v28 = vsel %vm4188_vm5, %v4190_v8, %v4186_v10  ;;  %5988 = vpow2.f32 %v5603_v36  ;;  %v4197_v11 = vadd.f32 %v11044_v12, %v4196_v63  ;;  %v4204_v36 = vand.u32 2147483648, %v11029_v31 }
 0xe83   :  { %v4209_v38 = vmul.f32 %v4191_v28, %v10366_v23  ;;  %v4324_v23 = vadd.f32 %v4308_v43, %v12872_v42  ;;  %v5602_v51 = vmul.f32 -1.442695, %v4320_v30  ;;  %v4202_v8 = vand.u32 2147483647, %v11029_v31 }
 0xe84   :  { %v4367_v10 = vsub.f32 1.0, %v4366_v14  ;;  %v4412_v63 = vsub.f32 1.0, %v4411_v6  ;;  %v4201_v48 = vsel %vm11070_vm8, %v11044_v12, %v4197_v11  ;;  %v4205_v31 = vor.u32 1.1754944e-38, %v4204_v36 }
 0xe85   :  { %v11056_v57 = vadd.f32 %v4210_v27, %v4209_v38  ;;  %v5605_v9 = vmul.f32 -1.442695, %v4324_v23  ;;  %v4321_v38 = vadd.f32 %v4305_v46, %v13189_v2  ;;  %v4325_v5 = vadd.f32 %v4309_v44, %v13343_v59 }
 0xe86   :  { %vm4203_vm10 = vcmp.eq.f32.partialorder %v4202_v8, 8.507059e+37  ;;  %v4368_v46 = vmul.f32 %v11050_v53, %v4367_v10  ;;  %v4413_v30 = vmul.f32 %v11052_v7, %v4412_v63  ;;  %v4374_v44 = vand.u32 2147483647, %v11031_v13 }
 0xe87   :  { %5990 = vtanh.f32 %v11056_v57  ;;  %v5987_v16 = vpop.eup %5986  ;;  %v4206_v6 = vsel %vm4203_vm10, %v4205_v31, %v4201_v48  ;;  %v4419_v8 = vand.u32 2147483647, %v11033_v1  ;;  %vm4416_vm12 = vweird.f32 %v11052_v7 }
 0xe88   :  { %5992 = vpow2.f32 %v5602_v51  ;;  %v5989_v27 = vpop.eup %5988  ;;  %v11075_v47 = vadd.f32 1.0, %v5987_v16  ;;  %v4376_v51 = vand.u32 2147483648, %v11031_v13  ;;  %v4369_v16 = vadd.f32 %v11050_v53, %v4368_v46  ;;  %vm11123_vm3 = vmor %vm4415_vm14, %vm4416_vm12 }
 0xe89   :  { %5994 = vpow2.f32 %v5605_v9  ;;  %v11081_v43 = vadd.f32 1.0, %v5989_v27  ;;  %v4414_v27 = vadd.f32 %v11052_v7, %v4413_v30  ;;  %v4421_v63 = vand.u32 2147483648, %v11033_v1 }
 0xe8a   :  { %5996 = vrcp.f32 %v11075_v47  ;;  %v4445_v31 = vrot.slane %v10498_v45, 7  ;;  %vm11112_vm1 = vcmp.eq.f32.partialorder %v4374_v44, 8.507059e+37  ;;  %v4377_v30 = vor.u32 1.1754944e-38, %v4376_v51 }
 0xe8b   :  { %5998 = vrcp.f32 %v11081_v43  ;;  %v4373_v45 = vsel %vm11108_vm9, %v11050_v53, %v4369_v16  ;;  %vm11127_vm15 = vcmp.eq.f32.partialorder %v4419_v8, 8.507059e+37  ;;  %v4418_v1 = vsel %vm11123_vm3, %v11052_v7, %v4414_v27  ;;  %v13516_v27 = vld [vmem:[#allocation24_spill] sm:$0xff] }
 0xe8c   :  { %6000 = vtanh.f32 %v4321_v38  ;;  %v4361_v46 = vand.u32 2147483648, %v11075_v47  ;;  %v4359_v59 = vand.u32 2147483647, %v11075_v47  ;;  %v4406_v2 = vand.u32 2147483648, %v11081_v43 }
 0xe8d   :  { %v5991_v14 = vpop.eup %5990  ;;  %6002 = vtanh.f32 %v4325_v5  ;;  %v4404_v7 = vand.u32 2147483647, %v11081_v43  ;;  %vm4355_vm5 = vweird.f32 %v11075_v47  ;;  %vm4400_vm7 = vweird.f32 %v11081_v43 }
 0xe8e   :  { %v11087_v23 = vmul.f32 %v5991_v14, %v4206_v6  ;;  %v5993_v12 = vpop.eup %5992  ;;  %vm4360_vm8 = vcmp.eq.f32.partialorder %v4359_v59, 8.507059e+37 }
 0xe8f   :  { %v5995_v36 = vpop.eup %5994  ;;  %v11093_v9 = vadd.f32 1.0, %v5993_v12  ;;  %vm4405_vm11 = vcmp.eq.f32.partialorder %v4404_v7, 8.507059e+37  ;;  %v13524_v7 = vld [vmem:[#allocation29_spill] sm:$0xff] }
 0xe90   :  { %13507 = vst [vmem:[#allocation153_spill] sm:$0xff] %v11087_v23  ;;  %v11097_v10 = vadd.f32 1.0, %v5995_v36  ;;  %v4464_v28 = vrot.slane %v11087_v23, 2  ;;  %v5997_v38 = vpop.eup %5996  ;;  %v4422_v23 = vor.u32 1.1754944e-38, %v4421_v63  ;;  %v13517_v63 = vld [vmem:[#allocation25_spill] sm:$0xff] }
 0xe91   :  { %6004 = vrcp.f32 %v11093_v9  ;;  %v5999_v48 = vpop.eup %5998  ;;  %v4351_v5 = vmul.f32 %v5997_v38, %v11075_v47  ;;  %vm4356_vm0 = vweird.f32 %v5997_v38  ;;  %v4407_v47 = vor.u32 1.1754944e-38, %v4406_v2 }
 0xe92   :  { %6006 = vrcp.f32 %v11097_v10  ;;  %v6001_v14 = vpop.eup %6000  ;;  %v4396_v13 = vmul.f32 %v5999_v48, %v11081_v43  ;;  %v4466_v11 = vrot.slane %v4464_v28, 6  ;;  %v4378_v28 = vsel %vm11112_vm1, %v4377_v30, %v4373_v45  ;;  %vm4357_vm6 = vmor %vm4355_vm5, %vm4356_vm0 }
 0xe93   :  { %v6003_v12 = vpop.eup %6002  ;;  %v4352_v51 = vsub.f32 1.0, %v4351_v5  ;;  %vm4401_vm4 = vweird.f32 %v5999_v48  ;;  %v4423_v36 = vsel %vm11127_vm15, %v4422_v23, %v4418_v1  ;;  %v4362_v30 = vor.u32 1.1754944e-38, %v4361_v46 }
 0xe94   :  { %v4397_v53 = vsub.f32 1.0, %v4396_v13  ;;  %4505 = vmatmul.f32.vlgmr.msra.gmra.mxu1 %v4466_v11  ;;  %4545 = vmatmul.f32.vlgmr.msrb.gmra.mxu3 %v4466_v11  ;;  %vm4402_vm10 = vmor %vm4400_vm7, %vm4401_vm4  ;;  %v13518_v43 = vrot.slane %v10496_v29, 7  ;;  %v4449_v59 = vmul.f32 %v4445_v31, %v4423_v36  ;;  %v4391_v29 = vand.u32 2147483648, %v11093_v9  ;;  %v13539_v31 = vld [vmem:[#allocation60_spill] sm:$0xff] }
 0xe95   :  { %v4353_v16 = vmul.f32 %v5997_v38, %v4352_v51  ;;  %4716 = vmatpush.msra.mxu1 %v13516_v27  ;;  %4756 = vmatpush.msrb.mxu3 %v13517_v63  ;;  %vm4385_vm9 = vweird.f32 %v11093_v9  ;;  %vm4430_vm14 = vweird.f32 %v11097_v10  ;;  %vm4461_vm4 = vcmask 1047559  }
 0xe96   :  { %v4398_v5 = vmul.f32 %v5999_v48, %v4397_v53 }
 0xe97   :  { %v11137_v8 = vpop.eup %6004  ;;  %v4354_v51 = vadd.f32 %v5997_v38, %v4353_v16  ;;  %4717 = vmatpush.msra.mxu1 %v10469_v22  ;;  %4757 = vmatpush.msrb.mxu3 %v10472_v37 }
 0xe98   :  { %v11144_v13 = vpop.eup %6006  ;;  %v4381_v6 = vmul.f32 %v11137_v8, %v11093_v9  ;;  %v4399_v45 = vadd.f32 %v5999_v48, %v4398_v5  ;;  %v4448_v5 = vmul.f32 %v13518_v43, %v4378_v28  ;;  %vm4386_vm12 = vweird.f32 %v11137_v8  ;;  %v13532_v43 = vld [vmem:[#allocation45_spill] sm:$0xff] }
 0xe99   :  { %v4426_v53 = vmul.f32 %v11144_v13, %v11097_v10  ;;  %v4358_v23 = vsel %vm4357_vm6, %v5997_v38, %v4354_v51  ;;  %4718 = vmatpush.msra.mxu1 %v10479_v60  ;;  %4758 = vmatpush.msrb.mxu3 %v10482_v19  ;;  %vm4431_vm13 = vweird.f32 %v11144_v13  ;;  %vm11184_vm1 = vmor %vm4385_vm9, %vm4386_vm12 }
 0xe9a   :  { %v4382_v44 = vsub.f32 1.0, %v4381_v6  ;;  %v4363_v1 = vsel %vm4360_vm8, %v4362_v30, %v4358_v23  ;;  %v4403_v16 = vsel %vm4402_vm10, %v5999_v48, %v4399_v45  ;;  %vm11190_vm3 = vmor %vm4430_vm14, %vm4431_vm13  ;;  %v13527_v30 = vld [vmem:[#allocation36_spill] sm:$0xff]  ;;  %v13528_v45 = vld [vmem:[#allocation37_spill] sm:$0xff] }
 0xe9b   :  { %v4427_v46 = vsub.f32 1.0, %v4426_v53  ;;  %v4408_v22 = vsel %vm4405_vm11, %v4407_v47, %v4403_v16  ;;  %v4450_v27 = vmul.f32 %v6001_v14, %v4363_v1  ;;  %4719 = vmatpush.msra.mxu1 %v10490_v21  ;;  %4759 = vmatpush.msrb.mxu3 %v10493_v56  ;;  %v4389_v56 = vand.u32 2147483647, %v11093_v9  ;;  %v13523_v9 = vld [vmem:[#allocation28_spill] sm:$0xff]  ;;  %v6669_v23 = vld [vmem:[#allocation2 + $0x1f0] sm:$0xff] }
 0xe9c   :  { %v4383_v37 = vmul.f32 %v11137_v8, %v4382_v44  ;;  %v4451_v38 = vmul.f32 %v6003_v12, %v4408_v22  ;;  %4585 = vmatmul.f32.vlgmr.msrb.gmra.mxu1 %v4466_v11  ;;  %4625 = vmatmul.f32.vlgmr.msra.gmra.mxu3 %v4466_v11  ;;  %v4436_v11 = vand.u32 2147483648, %v11097_v10  ;;  %v6668_v53 = vld [vmem:[#allocation2 + $0x1e0] sm:$0xff]  ;;  %v13530_v44 = vld [vmem:[#allocation41_spill] sm:$0xff] }
 0xe9d   :  { %v4428_v2 = vmul.f32 %v11144_v13, %v4427_v46  ;;  %v11166_v48 = vadd.f32 %v4450_v27, %v4448_v5  ;;  %4720 = vmatpush.msra.mxu1 %v10502_v52  ;;  %4760 = vmatpush.msrb.mxu3 %v10505_v49  ;;  %v4434_v49 = vand.u32 2147483647, %v11097_v10  ;;  %vm4390_vm15 = vcmp.eq.f32.partialorder %v4389_v56, 8.507059e+37  ;;  %v13529_v47 = vld [vmem:[#allocation40_spill] sm:$0xff]  ;;  %v6671_v16 = vld [vmem:[#allocation2 + $0x1d0] sm:$0xff] }
 0xe9e   :  { %v11168_v60 = vadd.f32 %v4451_v38, %v4449_v59  ;;  %v4384_v19 = vadd.f32 %v11137_v8, %v4383_v37  ;;  %v4437_v12 = vor.u32 1.1754944e-38, %v4436_v11  ;;  %v6670_v1 = vld [vmem:[#allocation2 + $0x1c0] sm:$0xff]  ;;  %v6673_v22 = vld [vmem:[#allocation2 + $0x1b0] sm:$0xff] }
 0xe9f   :  { %v4429_v21 = vadd.f32 %v11144_v13, %v4428_v2  ;;  %6008 = vtanh.f32 %v11166_v48  ;;  %4721 = vmatpush.msra.mxu1 %v10515_v18  ;;  %4761 = vmatpush.msrb.mxu3 %v10518_v17  ;;  %v4392_v17 = vor.u32 1.1754944e-38, %v4391_v29  ;;  %vm4435_vm0 = vcmp.eq.f32.partialorder %v4434_v49, 8.507059e+37  ;;  %v13531_v46 = vld [vmem:[#allocation44_spill] sm:$0xff]  ;;  %v13534_v37 = vld [vmem:[#allocation49_spill] sm:$0xff] }
 0xea0   :  { %6010 = vtanh.f32 %v11168_v60  ;;  %v4388_v18 = vsel %vm11184_vm1, %v11137_v8, %v4384_v19  ;;  %v6672_v5 = vld [vmem:[#allocation2 + $0x1a0] sm:$0xff]  ;;  %v6675_v38 = vld [vmem:[#allocation2 + $0x190] sm:$0xff] }
 0xea1   :  { %4722 = vmatpush.msra.mxu1 %v10534_v55  ;;  %4762 = vmatpush.msrb.mxu3 %v13523_v9  ;;  %v4433_v14 = vsel %vm11190_vm3, %v11144_v13, %v4429_v21  ;;  %v4393_v55 = vsel %vm4390_vm15, %v4392_v17, %v4388_v18  ;;  %v13533_v27 = vld [vmem:[#allocation48_spill] sm:$0xff]  ;;  %v13536_v19 = vld [vmem:[#allocation53_spill] sm:$0xff] }
 0xea2   :  { %v4438_v8 = vsel %vm4435_vm0, %v4437_v12, %v4433_v14  ;;  %v6674_v59 = vld [vmem:[#allocation2 + $0x180] sm:$0xff]  ;;  %v6677_v21 = vld [vmem:[#allocation2 + $0x170] sm:$0xff] }
 0xea3   :  { %4723 = vmatpush.msra.mxu1 %v10546_v24  ;;  %4763 = vmatpush.msrb.mxu3 %v10549_v40  ;;  %v13535_v2 = vld [vmem:[#allocation52_spill] sm:$0xff]  ;;  %v13538_v11 = vld [vmem:[#allocation57_spill] sm:$0xff]  ;;  %v13541_v14 = vld [vmem:[#allocation26_spill] sm:$0xff] }
 0xea4   :  { %v6676_v29 = vld [vmem:[#allocation2 + $0x160] sm:$0xff]  ;;  %v6679_v49 = vld [vmem:[#allocation2 + $0x150] sm:$0xff] }
 0xea5   :  { %v6009_v10 = vpop.eup %6008  ;;  %4724 = vmatpush.msra.mxu1 %v10552_v26  ;;  %4764 = vmatpush.msrb.mxu3 %v13524_v7  ;;  %v13537_v56 = vld [vmem:[#allocation56_spill] sm:$0xff]  ;;  %v13540_v9 = vld [vmem:[#allocation61_spill] sm:$0xff]  ;;  %v13542_v12 = vld [vmem:[#allocation27_spill] sm:$0xff] }
 0xea6   :  { %v6011_v28 = vpop.eup %6010  ;;  %v4456_v63 = vmul.f32 %v6009_v10, %v4393_v55  ;;  %v6678_v52 = vld [vmem:[#allocation2 + $0x140] sm:$0xff]  ;;  %v6681_v17 = vld [vmem:[#allocation2 + $0x130] sm:$0xff] }
 0xea7   :  { %v4457_v36 = vmul.f32 %v6011_v28, %v4438_v8  ;;  %4725 = vmatpush.msra.mxu1 %v10558_v39  ;;  %4765 = vmatpush.msrb.mxu3 %v10561_v35  ;;  %v6656_v39 = vld [vmem:[#allocation2 + $0x2a0] sm:$0xff]  ;;  %v6683_v55 = vld [vmem:[#allocation2 + $0x110] sm:$0xff] }
 0xea8   :  { %v4692_v13 = vrot.slane %v4456_v63, 6  ;;  %v6658_v35 = vld [vmem:[#allocation2 + $0x280] sm:$0xff]  ;;  %v13544_v7 = vld [vmem:[#allocation30_spill] sm:$0xff] }
 0xea9   :  { %v4460_v24 = vrot.slane %v4457_v36, 7  ;;  %v4693_v51 = vrot.slane %v4457_v36, 5  ;;  %4726 = vmatpush.msra.mxu1 %v10564_v32  ;;  %4766 = vmatpush.msrb.mxu3 %v10567_v62  ;;  %v6657_v62 = vld [vmem:[#allocation2 + $0x2b0] sm:$0xff]  ;;  %v6680_v18 = vld [vmem:[#allocation2 + $0x120] sm:$0xff] }
 0xeaa   :  { %v6659_v32 = vld [vmem:[#allocation2 + $0x290] sm:$0xff]  ;;  %v6682_v10 = vld [vmem:[#allocation2 + $0x100] sm:$0xff] }
 0xeab   :  { %v4462_v40 = vsel %vm4461_vm4, %v4460_v24, %v4456_v63  ;;  %v11211_v26 = vsel %vm115_vm2, %v4693_v51, %v4692_v13  ;;  %4727 = vmatpush.msra.mxu1 %v10573_v58  ;;  %4767 = vmatpush.msrb.mxu3 %v10576_v61  ;;  %v6660_v58 = vld [vmem:[#allocation2 + $0x260] sm:$0xff]  ;;  %v6661_v61 = vld [vmem:[#allocation2 + $0x270] sm:$0xff] }
 0xeac   :  { %v4465_v6 = vrot.slane %v4462_v40, 6  ;;  %v13543_v28 = vld [vmem:[#allocation64_spill] sm:$0xff]  ;;  %v6685_v63 = vld [vmem:[#allocation2 + $0xf0] sm:$0xff]  ;;  %v13546_v13 = vld [vmem:[#allocation31_spill] sm:$0xff] }
 0xead   :  { %4728 = vmatpush.msra.mxu1 %v10579_v33  ;;  %4768 = vmatpush.msrb.mxu3 %v10582_v20  ;;  %v6662_v33 = vld [vmem:[#allocation2 + $0x240] sm:$0xff]  ;;  %v6663_v20 = vld [vmem:[#allocation2 + $0x250] sm:$0xff] }
 0xeae   :  { %4485 = vmatmul.f32.vlgmr.msrb.gmra.mxu0 %v4465_v6  ;;  %4525 = vmatmul.f32.vlgmr.msrb.gmra.mxu2 %v4465_v6  ;;  %v6684_v8 = vld [vmem:[#allocation2 + $0xe0] sm:$0xff]  ;;  %v13545_v36 = vld [vmem:[#allocation65_spill] sm:$0xff] }
 0xeaf   :  { %4696 = vmatpush.msrb.mxu0 %v6656_v39  ;;  %4729 = vmatpush.msra.mxu1 %v10586_v3  ;;  %v6664_v3 = vld [vmem:[#allocation2 + $0x220] sm:$0xff]  ;;  %v6687_v51 = vld [vmem:[#allocation2 + $0xd0] sm:$0xff] }
 0xeb0   :  { %4736 = vmatpush.msrb.mxu2 %v6657_v62  ;;  %4769 = vmatpush.msrb.mxu3 %v10590_v4  ;;  %v6665_v4 = vld [vmem:[#allocation2 + $0x230] sm:$0xff]  ;;  %v6686_v24 = vld [vmem:[#allocation2 + $0xc0] sm:$0xff] }
 0xeb1   :  { %4697 = vmatpush.msrb.mxu0 %v6658_v35  ;;  %4730 = vmatpush.msra.mxu1 %v10594_v15  ;;  %v13525_v15 = vld [vmem:[#allocation32_spill] sm:$0xff]  ;;  %v13549_v39 = vld [vmem:[#allocation69_spill] sm:$0xff]  ;;  %v13550_v62 = vld [vmem:[#allocation35_spill] sm:$0xff] }
 0xeb2   :  { %4737 = vmatpush.msrb.mxu2 %v6659_v32  ;;  %4770 = vmatpush.msrb.mxu3 %v10598_v50  ;;  %v13526_v50 = vld [vmem:[#allocation33_spill] sm:$0xff]  ;;  %v13547_v40 = vld [vmem:[#allocation68_spill] sm:$0xff]  ;;  %v13552_v32 = vld [vmem:[#allocation38_spill] sm:$0xff] }
 0xeb3   :  { %4698 = vmatpush.msrb.mxu0 %v6660_v58  ;;  %4731 = vmatpush.msra.mxu1 %v10602_v34  ;;  %v6666_v34 = vld [vmem:[#allocation2 + $0x200] sm:$0xff]  ;;  %v13553_v58 = vld [vmem:[#allocation73_spill] sm:$0xff] }
 0xeb4   :  { %4738 = vmatpush.msrb.mxu2 %v6661_v61  ;;  %4771 = vmatpush.msrb.mxu3 %v10606_v25  ;;  %v6667_v25 = vld [vmem:[#allocation2 + $0x210] sm:$0xff]  ;;  %v13551_v35 = vld [vmem:[#allocation72_spill] sm:$0xff]  ;;  %v13554_v61 = vld [vmem:[#allocation39_spill] sm:$0xff] }
 0xeb5   :  { %4732 = vmatmul.f32.vlgmr.msra.gmra.mxu1 %v11211_v26  ;;  %4772 = vmatmul.f32.vlgmr.msrb.gmra.mxu3 %v11211_v26 }
 0xeb6   :  { %4699 = vmatpush.msrb.mxu0 %v6662_v33  ;;  %4739 = vmatpush.msrb.mxu2 %v6663_v20  ;;  %v13555_v33 = vld [vmem:[#allocation76_spill] sm:$0xff]  ;;  %v13556_v20 = vld [vmem:[#allocation42_spill] sm:$0xff] }
 0xeb7   :  { %4565 = vmatmul.f32.vlgmr.msra.gmra.mxu0 %v4465_v6  ;;  %4605 = vmatmul.f32.vlgmr.msra.gmra.mxu2 %v4465_v6  ;;  %v13548_v6 = vld [vmem:[#allocation34_spill] sm:$0xff] }
 0xeb8   :  { %4700 = vmatpush.msrb.mxu0 %v6664_v3  ;;  %4740 = vmatpush.msrb.mxu2 %v6665_v4  ;;  %v13558_v3 = vld [vmem:[#allocation43_spill] sm:$0xff]  ;;  %v13559_v4 = vld [vmem:[#allocation80_spill] sm:$0xff] }
 0xeb9   :  { %4969 = vmatpush.msrb.mxu1 %v13525_v15  ;;  %5009 = vmatpush.msra.mxu3 %v13526_v50  ;;  %v13560_v15 = vld [vmem:[#allocation46_spill] sm:$0xff]  ;;  %v13561_v50 = vld [vmem:[#allocation81_spill] sm:$0xff] }
 0xeba   :  { %4701 = vmatpush.msrb.mxu0 %v6666_v34  ;;  %4741 = vmatpush.msrb.mxu2 %v6667_v25  ;;  %v13562_v34 = vld [vmem:[#allocation47_spill] sm:$0xff]  ;;  %v13563_v25 = vld [vmem:[#allocation84_spill] sm:$0xff] }
 0xebb   :  { %4970 = vmatpush.msrb.mxu1 %v13527_v30  ;;  %5010 = vmatpush.msra.mxu3 %v13528_v45  ;;  %v13564_v30 = vld [vmem:[#allocation50_spill] sm:$0xff]  ;;  %v13565_v45 = vld [vmem:[#allocation85_spill] sm:$0xff] }
 0xebc   :  { %4702 = vmatpush.msrb.mxu0 %v6668_v53  ;;  %4742 = vmatpush.msrb.mxu2 %v6669_v23  ;;  %v13566_v53 = vld [vmem:[#allocation51_spill] sm:$0xff]  ;;  %v13567_v23 = vld [vmem:[#allocation88_spill] sm:$0xff] }
 0xebd   :  { %4971 = vmatpush.msrb.mxu1 %v13529_v47  ;;  %5011 = vmatpush.msra.mxu3 %v13530_v44  ;;  %v13568_v47 = vld [vmem:[#allocation54_spill] sm:$0xff]  ;;  %v13569_v44 = vld [vmem:[#allocation89_spill] sm:$0xff] }
 0xebe   :  { %4703 = vmatpush.msrb.mxu0 %v6670_v1  ;;  %4743 = vmatpush.msrb.mxu2 %v6671_v16  ;;  %v13570_v1 = vld [vmem:[#allocation55_spill] sm:$0xff]  ;;  %v13571_v16 = vld [vmem:[#allocation58_spill] sm:$0xff] }
 0xebf   :  { %4972 = vmatpush.msrb.mxu1 %v13531_v46  ;;  %5012 = vmatpush.msra.mxu3 %v13532_v43  ;;  %v13572_v46 = vld [vmem:[#allocation59_spill] sm:$0xff]  ;;  %v13573_v43 = vld [vmem:[#allocation62_spill] sm:$0xff] }
 0xec0   :  { %4704 = vmatpush.msrb.mxu0 %v6672_v5  ;;  %4744 = vmatpush.msrb.mxu2 %v6673_v22  ;;  %v13574_v5 = vld [vmem:[#allocation63_spill] sm:$0xff]  ;;  %v13575_v22 = vld [vmem:[#allocation66_spill] sm:$0xff] }
 0xec1   :  { %4973 = vmatpush.msrb.mxu1 %v13533_v27  ;;  %5013 = vmatpush.msra.mxu3 %v13534_v37  ;;  %v13576_v27 = vld [vmem:[#allocation67_spill] sm:$0xff]  ;;  %v13577_v37 = vld [vmem:[#allocation70_spill] sm:$0xff] }
 0xec2   :  { %4705 = vmatpush.msrb.mxu0 %v6674_v59  ;;  %4745 = vmatpush.msrb.mxu2 %v6675_v38  ;;  %v13578_v59 = vld [vmem:[#allocation71_spill] sm:$0xff]  ;;  %v13579_v38 = vld [vmem:[#allocation74_spill] sm:$0xff] }
 0xec3   :  { %4974 = vmatpush.msrb.mxu1 %v13535_v2  ;;  %5014 = vmatpush.msra.mxu3 %v13536_v19  ;;  %v13580_v2 = vld [vmem:[#allocation75_spill] sm:$0xff]  ;;  %v13581_v19 = vld [vmem:[#allocation78_spill] sm:$0xff] }
 0xec4   :  { %4706 = vmatpush.msrb.mxu0 %v6676_v29  ;;  %4746 = vmatpush.msrb.mxu2 %v6677_v21  ;;  %v13582_v29 = vld [vmem:[#allocation79_spill] sm:$0xff]  ;;  %v13583_v21 = vld [vmem:[#allocation82_spill] sm:$0xff] }
 0xec5   :  { %4975 = vmatpush.msrb.mxu1 %v13537_v56  ;;  %5015 = vmatpush.msra.mxu3 %v13538_v11  ;;  %v13584_v56 = vld [vmem:[#allocation83_spill] sm:$0xff]  ;;  %v13585_v11 = vld [vmem:[#allocation86_spill] sm:$0xff] }
 0xec6   :  { %4707 = vmatpush.msrb.mxu0 %v6678_v52  ;;  %4747 = vmatpush.msrb.mxu2 %v6679_v49  ;;  %v13586_v52 = vld [vmem:[#allocation87_spill] sm:$0xff]  ;;  %v13587_v49 = vld [vmem:[#allocation90_spill] sm:$0xff] }
 0xec7   :  { %4976 = vmatpush.msrb.mxu1 %v13539_v31  ;;  %5016 = vmatpush.msra.mxu3 %v13540_v9  ;;  %v13588_v31 = vld [vmem:[#allocation91_spill] sm:$0xff]  ;;  %v13589_v9 = vld [vmem:[#allocation92_spill] sm:$0xff] }
 0xec8   :  { %4708 = vmatpush.msrb.mxu0 %v6680_v18  ;;  %4748 = vmatpush.msrb.mxu2 %v6681_v17  ;;  %v13590_v18 = vld [vmem:[#allocation93_spill] sm:$0xff]  ;;  %v13591_v17 = vld [vmem:[#allocation94_spill] sm:$0xff] }
 0xec9   :  { %4977 = vmatpush.msrb.mxu1 %v13541_v14  ;;  %5017 = vmatpush.msra.mxu3 %v13542_v12  ;;  %v13592_v14 = vld [vmem:[#allocation95_spill] sm:$0xff]  ;;  %v13593_v12 = vld [vmem:[#allocation104_spill] sm:$0xff] }
 0xeca   :  { %4709 = vmatpush.msrb.mxu0 %v6682_v10  ;;  %4749 = vmatpush.msrb.mxu2 %v6683_v55  ;;  %v13594_v10 = vld [vmem:[#allocation105_spill] sm:$0xff]  ;;  %v13595_v55 = vld [vmem:[#allocation106_spill] sm:$0xff] }
 0xecb   :  { %4978 = vmatpush.msrb.mxu1 %v13543_v28  ;;  %5018 = vmatpush.msra.mxu3 %v13544_v7  ;;  %v13596_v28 = vld [vmem:[#allocation107_spill] sm:$0xff]  ;;  %v13597_v7 = vld [vmem:[#allocation108_spill] sm:$0xff] }
 0xecc   :  { %4710 = vmatpush.msrb.mxu0 %v6684_v8  ;;  %4750 = vmatpush.msrb.mxu2 %v6685_v63  ;;  %v13598_v8 = vld [vmem:[#allocation109_spill] sm:$0xff]  ;;  %v13599_v63 = vld [vmem:[#allocation110_spill] sm:$0xff] }
 0xecd   :  { %4979 = vmatpush.msrb.mxu1 %v13545_v36  ;;  %5019 = vmatpush.msra.mxu3 %v13546_v13  ;;  %v13600_v36 = vld [vmem:[#allocation111_spill] sm:$0xff]  ;;  %v13601_v13 = vld [vmem:[#allocation112_spill] sm:$0xff] }
 0xece   :  { %4711 = vmatpush.msrb.mxu0 %v6686_v24  ;;  %4751 = vmatpush.msrb.mxu2 %v6687_v51  ;;  %v13602_v24 = vld [vmem:[#allocation113_spill] sm:$0xff]  ;;  %v13603_v51 = vld [vmem:[#allocation114_spill] sm:$0xff] }
 0xecf   :  { %4712 = vmatmul.f32.vlgmr.msrb.gmra.mxu0 %v11211_v26  ;;  %4752 = vmatmul.f32.vlgmr.msrb.gmra.mxu2 %v11211_v26  ;;  %v13557_v26 = vld [vmem:[#allocation77_spill] sm:$0xff] }
 0xed0   :  { %4980 = vmatpush.msrb.mxu1 %v13547_v40  ;;  %5020 = vmatpush.msra.mxu3 %v13548_v6  ;;  %v13604_v40 = vld [vmem:[#allocation115_spill] sm:$0xff]  ;;  %v13605_v6 = vld [vmem:[#allocation116_spill] sm:$0xff] }
 0xed1   :  { %4949 = vmatpush.msra.mxu0 %v13549_v39  ;;  %4989 = vmatpush.msra.mxu2 %v13550_v62  ;;  %v13606_v39 = vld [vmem:[#allocation117_spill] sm:$0xff]  ;;  %v13607_v62 = vld [vmem:[#allocation118_spill] sm:$0xff] }
 0xed2   :  { %4981 = vmatpush.msrb.mxu1 %v13551_v35  ;;  %5021 = vmatpush.msra.mxu3 %v13552_v32  ;;  %v13608_v35 = vld [vmem:[#allocation119_spill] sm:$0xff]  ;;  %v13609_v32 = vld [vmem:[#allocation120_spill] sm:$0xff] }
 0xed3   :  { %4950 = vmatpush.msra.mxu0 %v13553_v58  ;;  %4990 = vmatpush.msra.mxu2 %v13554_v61  ;;  %v13610_v58 = vld [vmem:[#allocation121_spill] sm:$0xff]  ;;  %v13611_v61 = vld [vmem:[#allocation122_spill] sm:$0xff] }
 0xed4   :  { %4982 = vmatpush.msrb.mxu1 %v13555_v33  ;;  %5022 = vmatpush.msra.mxu3 %v13556_v20  ;;  %v13612_v33 = vld [vmem:[#allocation123_spill] sm:$0xff]  ;;  %v13613_v20 = vld [vmem:[#allocation126_spill] sm:$0xff] }
 0xed5   :  { %4951 = vmatpush.msra.mxu0 %v13557_v26  ;;  %4991 = vmatpush.msra.mxu2 %v13558_v3  ;;  %v13614_v26 = vld [vmem:[#allocation124_spill] sm:$0xff]  ;;  %v13615_v3 = vld [vmem:[#allocation127_spill] sm:$0xff] }
 0xed6   :  { %4983 = vmatpush.msrb.mxu1 %v13559_v4  ;;  %5023 = vmatpush.msra.mxu3 %v13560_v15  ;;  %v13616_v4 = vld [vmem:[#allocation125_spill] sm:$0xff]  ;;  %v13617_v15 = vld [vmem:[#allocation130_spill] sm:$0xff] }
 0xed7   :  { %4952 = vmatpush.msra.mxu0 %v13561_v50  ;;  %4992 = vmatpush.msra.mxu2 %v13562_v34  ;;  %v13618_v50 = vld [vmem:[#allocation128_spill] sm:$0xff]  ;;  %v13619_v34 = vld [vmem:[#allocation131_spill] sm:$0xff] }
 0xed8   :  { %4984 = vmatpush.msrb.mxu1 %v13563_v25  ;;  %5024 = vmatpush.msra.mxu3 %v13564_v30  ;;  %v13620_v25 = vld [vmem:[#allocation129_spill] sm:$0xff]  ;;  %v13621_v30 = vld [vmem:[#allocation134_spill] sm:$0xff] }
 0xed9   :  { %4953 = vmatpush.msra.mxu0 %v13567_v23  ;;  %4993 = vmatpush.msra.mxu2 %v13568_v47  ;;  %v13624_v23 = vld [vmem:[#allocation133_spill] sm:$0xff]  ;;  %v13625_v47 = vld [vmem:[#allocation138_spill] sm:$0xff] }
 0xeda   :  { %5049 = vmatpush.msra.mxu1 %v13565_v45  ;;  %5089 = vmatpush.msrb.mxu3 %v13566_v53  ;;  %v13622_v45 = vld [vmem:[#allocation132_spill] sm:$0xff]  ;;  %v13623_v53 = vld [vmem:[#allocation135_spill] sm:$0xff] }
 0xedb   :  { %4954 = vmatpush.msra.mxu0 %v13571_v16  ;;  %4994 = vmatpush.msra.mxu2 %v13572_v46  ;;  %v13628_v16 = vld [vmem:[#allocation137_spill] sm:$0xff]  ;;  %v13629_v46 = vld [vmem:[#allocation140_spill] sm:$0xff] }
 0xedc   :  { %5050 = vmatpush.msra.mxu1 %v13569_v44  ;;  %5090 = vmatpush.msrb.mxu3 %v13570_v1  ;;  %v13626_v44 = vld [vmem:[#allocation136_spill] sm:$0xff]  ;;  %v13627_v1 = vld [vmem:[#allocation139_spill] sm:$0xff] }
 0xedd   :  { %4955 = vmatpush.msra.mxu0 %v13575_v22  ;;  %4995 = vmatpush.msra.mxu2 %v13576_v27  ;;  %v13632_v22 = vld [vmem:[#allocation143_spill] sm:$0xff]  ;;  %v13633_v27 = vld [vmem:[#allocation144_spill] sm:$0xff] }
 0xede   :  { %5051 = vmatpush.msra.mxu1 %v13573_v43  ;;  %5091 = vmatpush.msrb.mxu3 %v13574_v5  ;;  %v13630_v43 = vld [vmem:[#allocation141_spill] sm:$0xff]  ;;  %v13631_v5 = vld [vmem:[#allocation142_spill] sm:$0xff] }
 0xedf   :  { %4956 = vmatpush.msra.mxu0 %v13579_v38  ;;  %4996 = vmatpush.msra.mxu2 %v13580_v2  ;;  %v13636_v38 = vld [vmem:[#allocation147_spill] sm:$0xff]  ;;  %v13637_v2 = vld [vmem:[#allocation148_spill] sm:$0xff] }
 0xee0   :  { %5052 = vmatpush.msra.mxu1 %v13577_v37  ;;  %5092 = vmatpush.msrb.mxu3 %v13578_v59  ;;  %v13634_v37 = vld [vmem:[#allocation145_spill] sm:$0xff]  ;;  %v13635_v59 = vld [vmem:[#allocation146_spill] sm:$0xff] }
 0xee1   :  { %4957 = vmatpush.msra.mxu0 %v13583_v21  ;;  %4997 = vmatpush.msra.mxu2 %v13584_v56  ;;  %v13640_v21 = vld [vmem:[#allocation100_spill] sm:$0xff]  ;;  %v13641_v56 = vld [vmem:[#allocation101_spill] sm:$0xff] }
 0xee2   :  { %5053 = vmatpush.msra.mxu1 %v13581_v19  ;;  %5093 = vmatpush.msrb.mxu3 %v13582_v29  ;;  %v13638_v19 = vld [vmem:[#allocation149_spill] sm:$0xff]  ;;  %v13639_v29 = vld [vmem:[#allocation98_spill] sm:$0xff] }
 0xee3   :  { %4958 = vmatpush.msra.mxu0 %v13587_v49  ;;  %4998 = vmatpush.msra.mxu2 %v13588_v31  ;;  %v13644_v49 = vld [vmem:[#allocation150_spill] sm:$0xff]  ;;  %v13645_v31 = vld [vmem:[#allocation17_spill] sm:$0xff] }
 0xee4   :  { %5054 = vmatpush.msra.mxu1 %v13585_v11  ;;  %5094 = vmatpush.msrb.mxu3 %v13586_v52  ;;  %v13642_v11 = vld [vmem:[#allocation14_spill] sm:$0xff]  ;;  %v13643_v52 = vld [vmem:[#allocation15_spill] sm:$0xff] }
 0xee5   :  { %4959 = vmatpush.msra.mxu0 %v13591_v17  ;;  %4999 = vmatpush.msra.mxu2 %v13592_v14  ;;  %v13648_v17 = vld [vmem:[#allocation20_spill] sm:$0xff]  ;;  %v13649_v14 = vld [vmem:[#allocation21_spill] sm:$0xff] }
 0xee6   :  { %5055 = vmatpush.msra.mxu1 %v13589_v9  ;;  %5095 = vmatpush.msrb.mxu3 %v13590_v18  ;;  %v13646_v9 = vld [vmem:[#allocation18_spill] sm:$0xff]  ;;  %v13647_v18 = vld [vmem:[#allocation19_spill] sm:$0xff] }
 0xee7   :  { %4960 = vmatpush.msra.mxu0 %v13595_v55  ;;  %5000 = vmatpush.msra.mxu2 %v13596_v28  ;;  %v13652_v55 = vld [vmem:[#allocation152_spill] sm:$0xff] }
 0xee8   :  { %5056 = vmatpush.msra.mxu1 %v13593_v12  ;;  %5096 = vmatpush.msrb.mxu3 %v13594_v10  ;;  %v13650_v12 = vld [vmem:[#allocation22_spill] sm:$0xff]  ;;  %v13651_v10 = vld [vmem:[#allocation151_spill] sm:$0xff] }
 0xee9   :  { %4961 = vmatpush.msra.mxu0 %v13599_v63  ;;  %5001 = vmatpush.msra.mxu2 %v13600_v36  ;;  %v13653_v63 = vld [vmem:[#allocation8_spill] sm:$0xff] }
 0xeea   :  { %5057 = vmatpush.msra.mxu1 %v13597_v7  ;;  %5097 = vmatpush.msrb.mxu3 %v13598_v8 }
 0xeeb   :  { %4962 = vmatpush.msra.mxu0 %v13603_v51  ;;  %5002 = vmatpush.msra.mxu2 %v13604_v40 }
 0xeec   :  { %5058 = vmatpush.msra.mxu1 %v13601_v13  ;;  %5098 = vmatpush.msrb.mxu3 %v13602_v24 }
 0xeed   :  { %4963 = vmatpush.msra.mxu0 %v13607_v62  ;;  %5003 = vmatpush.msra.mxu2 %v13608_v35 }
 0xeee   :  { %5059 = vmatpush.msra.mxu1 %v13605_v6  ;;  %5099 = vmatpush.msrb.mxu3 %v13606_v39  ;;  %v13654_v6 = vld [vmem:[#allocation9_spill] sm:$0xff] }
 0xeef   :  { %4964 = vmatpush.msra.mxu0 %v13611_v61  ;;  %5004 = vmatpush.msra.mxu2 %v13612_v33  ;;  %v13655_v33 = vld [vmem:[#allocation97_spill] sm:$0xff] }
 0xef0   :  { %5060 = vmatpush.msra.mxu1 %v13609_v32  ;;  %5100 = vmatpush.msrb.mxu3 %v13610_v58 }
 0xef1   :  { %5029 = vmatpush.msrb.mxu0 %v13613_v20  ;;  %5069 = vmatpush.msrb.mxu2 %v13615_v3 }
 0xef2   :  { %5061 = vmatpush.msra.mxu1 %v13614_v26  ;;  %5101 = vmatpush.msrb.mxu3 %v13616_v4  ;;  %v13656_v26 = vld [vmem:[#allocation10_spill] sm:$0xff]  ;;  %v13657_v4 = vld [vmem:[#allocation99_spill] sm:$0xff] }
 0xef3   :  { %5030 = vmatpush.msrb.mxu0 %v13617_v15  ;;  %5070 = vmatpush.msrb.mxu2 %v13619_v34 }
 0xef4   :  { %5062 = vmatpush.msra.mxu1 %v13618_v50  ;;  %5102 = vmatpush.msrb.mxu3 %v13620_v25 }
 0xef5   :  { %5031 = vmatpush.msrb.mxu0 %v13621_v30  ;;  %5071 = vmatpush.msrb.mxu2 %v13623_v53 }
 0xef6   :  { %5063 = vmatpush.msra.mxu1 %v13622_v45  ;;  %5103 = vmatpush.msrb.mxu3 %v13624_v23 }
 0xef7   :  { %5032 = vmatpush.msrb.mxu0 %v13625_v47  ;;  %5072 = vmatpush.msrb.mxu2 %v13627_v1 }
 0xef8   :  { %5064 = vmatpush.msra.mxu1 %v13626_v44  ;;  %5104 = vmatpush.msrb.mxu3 %v13628_v16 }
 0xef9   :  { %5033 = vmatpush.msrb.mxu0 %v13629_v46  ;;  %5073 = vmatpush.msrb.mxu2 %v13630_v43  ;;  %v13658_v46 = vld [vmem:[#allocation11_spill] sm:$0xff] }
 0xefb   :  { %5034 = vmatpush.msrb.mxu0 %v13631_v5  ;;  %5074 = vmatpush.msrb.mxu2 %v13632_v22 }
 0xefd   :  { %5035 = vmatpush.msrb.mxu0 %v13633_v27  ;;  %5075 = vmatpush.msrb.mxu2 %v13634_v37 }
 0xeff   :  { %5036 = vmatpush.msrb.mxu0 %v13635_v59  ;;  %5076 = vmatpush.msrb.mxu2 %v13636_v38 }
 0xf01   :  { %5037 = vmatpush.msrb.mxu0 %v13637_v2  ;;  %5077 = vmatpush.msrb.mxu2 %v13638_v19 }
 0xf03   :  { %5038 = vmatpush.msrb.mxu0 %v13639_v29  ;;  %5078 = vmatpush.msrb.mxu2 %v13640_v21 }
 0xf05   :  { %5039 = vmatpush.msrb.mxu0 %v13641_v56  ;;  %5079 = vmatpush.msrb.mxu2 %v13642_v11 }
 0xf07   :  { %5040 = vmatpush.msrb.mxu0 %v13643_v52  ;;  %5080 = vmatpush.msrb.mxu2 %v13644_v49 }
 0xf09   :  { %5041 = vmatpush.msrb.mxu0 %v13645_v31  ;;  %5081 = vmatpush.msrb.mxu2 %v13646_v9 }
 0xf0b   :  { %5042 = vmatpush.msrb.mxu0 %v13647_v18  ;;  %5082 = vmatpush.msrb.mxu2 %v13648_v17 }
 0xf0d   :  { %5043 = vmatpush.msrb.mxu0 %v13649_v14  ;;  %5083 = vmatpush.msrb.mxu2 %v13650_v12 }
 0xf0f   :  { %5044 = vmatpush.msrb.mxu0 %v13651_v10  ;;  %5084 = vmatpush.msrb.mxu2 %v13652_v55 }
 0xf11   :  { %v4506_v28 = vpop.f32.mrf.mxu1 }
 0xf17   :  { %v4546_v62 = vpop.f32.mrf.mxu3 }
 0xf19   :  { %v4586_v7 = vpop.f32.mrf.mxu1 }
 0xf1f   :  { %v4626_v59 = vpop.f32.mrf.mxu3 }
 0xf2b   :  { %v4486_v8 = vpop.f32.mrf.mxu0 }
 0xf2c   :  { %v4487_v36 = vadd.f32 %v4486_v8, %v13653_v63 }
 0xf2e   :  { %v4507_v13 = vadd.f32 %v4506_v28, %v4487_v36 }
 0xf30   :  { %v5606_v24 = vmul.f32 -1.442695, %v4507_v13 }
 0xf31   :  { %v4526_v51 = vpop.f32.mrf.mxu2 }
 0xf32   :  { %6012 = vpow2.f32 %v5606_v24  ;;  %v4733_v40 = vpop.f32.mrf.mxu1  ;;  %v4527_v39 = vadd.f32 %v4526_v51, %v13654_v6 }
 0xf33   :  { %v4781_v35 = vrot.slane %v4733_v40, 1  ;;  %v4785_v32 = vrot.slane %v4733_v40, 2 }
 0xf34   :  { %v4547_v58 = vadd.f32 %v4546_v62, %v4527_v39  ;;  %v4566_v61 = vpop.f32.mrf.mxu0 }
 0xf35   :  { %v4797_v20 = vadd.f32 %v4781_v35, %v13655_v33  ;;  %v4567_v3 = vadd.f32 %v4566_v61, %v13656_v26  ;;  %v4801_v15 = vadd.f32 %v4785_v32, %v13657_v4 }
 0xf36   :  { %v5607_v50 = vmul.f32 -1.442695, %v4547_v58 }
 0xf37   :  { %v4587_v34 = vadd.f32 %v4586_v7, %v4567_v3  ;;  %v5610_v45 = vmul.f32 -1.442695, %v4797_v20  ;;  %v5613_v23 = vmul.f32 -1.442695, %v4801_v15 }
 0xf38   :  { %v6013_v25 = vpop.eup %6012  ;;  %6014 = vpow2.f32 %v5607_v50 }
 0xf39   :  { %v4638_v30 = vadd.f32 1.0, %v6013_v25  ;;  %v5608_v53 = vmul.f32 -1.442695, %v4587_v34 }
 0xf3a   :  { %v4606_v44 = vpop.f32.mrf.mxu2 }
 0xf3b   :  { %6016 = vrcp.f32 %v4638_v30  ;;  %v4607_v43 = vadd.f32 %v4606_v44, %v13658_v46  ;;  %v4652_v31 = vand.u32 2147483648, %v4638_v30  ;;  %vm4646_vm5 = vweird.f32 %v4638_v30 }
 0xf3c   :  { %6018 = vpow2.f32 %v5608_v53  ;;  %v4650_v18 = vand.u32 2147483647, %v4638_v30 }
 0xf3d   :  { %6020 = vpow2.f32 %v5610_v45  ;;  %v4627_v19 = vadd.f32 %v4626_v59, %v4607_v43  ;;  %v4653_v8 = vor.u32 1.1754944e-38, %v4652_v31 }
 0xf3e   :  { %v6015_v47 = vpop.eup %6014  ;;  %6022 = vpow2.f32 %v5613_v23  ;;  %vm4651_vm10 = vcmp.eq.f32.partialorder %v4650_v18, 8.507059e+37 }
 0xf3f   :  { %v4639_v1 = vadd.f32 1.0, %v6015_v47 }
 0xf41   :  { %v6017_v16 = vpop.eup %6016  ;;  %6024 = vrcp.f32 %v4639_v1  ;;  %v4667_v17 = vand.u32 2147483648, %v4639_v1  ;;  %v4665_v55 = vand.u32 2147483647, %v4639_v1  ;;  %vm4661_vm8 = vweird.f32 %v4639_v1 }
 0xf42   :  { %v6019_v5 = vpop.eup %6018  ;;  %v4642_v22 = vmul.f32 %v6017_v16, %v4638_v30  ;;  %vm4647_vm2 = vweird.f32 %v6017_v16 }
 0xf43   :  { %v6021_v27 = vpop.eup %6020  ;;  %v11361_v2 = vadd.f32 1.0, %v6019_v5  ;;  %vm11370_vm6 = vmor %vm4646_vm5, %vm4647_vm2  ;;  %v4668_v39 = vor.u32 1.1754944e-38, %v4667_v17  ;;  %vm4666_vm12 = vcmp.eq.f32.partialorder %v4665_v55, 8.507059e+37 }
 0xf44   :  { %v6023_v37 = vpop.eup %6022  ;;  %v4643_v38 = vsub.f32 1.0, %v4642_v22  ;;  %v11363_v29 = vadd.f32 1.0, %v6021_v27 }
 0xf45   :  { %v11365_v11 = vadd.f32 1.0, %v6023_v37  ;;  %6026 = vrcp.f32 %v11361_v2  ;;  %v4682_v5 = vand.u32 2147483648, %v11361_v2  ;;  %vm4676_vm9 = vweird.f32 %v11361_v2 }
 0xf46   :  { %v4644_v21 = vmul.f32 %v6017_v16, %v4643_v38  ;;  %6028 = vtanh.f32 %v4627_v19  ;;  %v4680_v37 = vand.u32 2147483647, %v11361_v2  ;;  %vm4848_vm3 = vweird.f32 %v11363_v29 }
 0xf47   :  { %v6025_v56 = vpop.eup %6024  ;;  %6030 = vrcp.f32 %v11363_v29  ;;  %vm4893_vm2 = vweird.f32 %v11365_v11 }
 0xf48   :  { %v4657_v52 = vmul.f32 %v6025_v56, %v4639_v1  ;;  %v4645_v49 = vadd.f32 %v6017_v16, %v4644_v21  ;;  %6032 = vrcp.f32 %v11365_v11  ;;  %vm4662_vm7 = vweird.f32 %v6025_v56 }
 0xf49   :  { %vm4663_vm11 = vmor %vm4661_vm8, %vm4662_vm7  ;;  %vm4681_vm14 = vcmp.eq.f32.partialorder %v4680_v37, 8.507059e+37 }
 0xf4a   :  { %v4658_v9 = vsub.f32 1.0, %v4657_v52  ;;  %v4649_v10 = vsel %vm11370_vm6, %v6017_v16, %v4645_v49  ;;  %v4683_v49 = vor.u32 1.1754944e-38, %v4682_v5 }
 0xf4b   :  { %v11376_v7 = vpop.eup %6026  ;;  %v4654_v62 = vsel %vm4651_vm10, %v4653_v8, %v4649_v10 }
 0xf4c   :  { %v4659_v12 = vmul.f32 %v6025_v56, %v4658_v9  ;;  %v4713_v28 = vpop.f32.mrf.mxu0  ;;  %v4672_v24 = vmul.f32 %v11376_v7, %v11361_v2  ;;  %v6029_v40 = vpop.eup %6028  ;;  %vm4677_vm13 = vweird.f32 %v11376_v7  ;;  %v13663_v2 = vld [vmem:[#allocation102_spill] sm:$0xff] }
 0xf4d   :  { %v4780_v36 = vrot.slane %v4713_v28, 1  ;;  %v4784_v13 = vrot.slane %v4713_v28, 2  ;;  %v11382_v58 = vpop.eup %6030  ;;  %v4688_v25 = vmul.f32 %v6029_v40, %v4654_v62  ;;  %vm11402_vm1 = vmor %vm4676_vm9, %vm4677_vm13 }
 0xf4e   :  { %v4660_v51 = vadd.f32 %v6025_v56, %v4659_v12  ;;  %v4673_v61 = vsub.f32 1.0, %v4672_v24  ;;  %v11384_v20 = vpop.eup %6032  ;;  %v13664_v12 = vld [vmem:[#allocation103_spill] sm:$0xff]  ;;  %vm4849_vm15 = vweird.f32 %v11382_v58 }
 0xf4f   :  { %v4796_v35 = vadd.f32 %v4780_v36, %v13186_v0  ;;  %v4800_v32 = vadd.f32 %v4784_v13, %v12868_v54  ;;  %v4844_v0 = vmul.f32 %v11382_v58, %v11363_v29  ;;  %v4773_v54 = vpop.f32.mrf.mxu3  ;;  %v4889_v47 = vmul.f32 %v11384_v20, %v11365_v11  ;;  %vm11436_vm4 = vmor %vm4848_vm3, %vm4849_vm15 }
 0xf50   :  { %v4664_v33 = vsel %vm4663_vm11, %v6025_v56, %v4660_v51  ;;  %v4674_v50 = vmul.f32 %v11376_v7, %v4673_v61  ;;  %v4787_v19 = vrot.slane %v4773_v54, 2  ;;  %v4852_v36 = vand.u32 2147483647, %v11363_v29 }
 0xf51   :  { %v4669_v3 = vsel %vm4666_vm12, %v4668_v39, %v4664_v33  ;;  %v5609_v4 = vmul.f32 -1.442695, %v4796_v35  ;;  %v5612_v15 = vmul.f32 -1.442695, %v4800_v32  ;;  %v4845_v43 = vsub.f32 1.0, %v4844_v0  ;;  %v5203_v33 = vld [vmem:[%s11954_s6 + $0xf8] sm:$0xff] }
 0xf52   :  { %v4687_v34 = vmul.f32 %v4669_v3, %v11056_v57  ;;  %v4753_v30 = vpop.f32.mrf.mxu2  ;;  %v4783_v57 = vrot.slane %v4773_v54, 1  ;;  %v4675_v16 = vadd.f32 %v11376_v7, %v4674_v50  ;;  %v4803_v10 = vadd.f32 %v4787_v19, %v13664_v12  ;;  %v5235_v3 = vld [vmem:[%s11954_s6 + $0x1f8] sm:$0xff] }
 0xf53   :  { %6034 = vpow2.f32 %v5609_v4  ;;  %v4782_v45 = vrot.slane %v4753_v30, 1  ;;  %v4786_v53 = vrot.slane %v4753_v30, 2  ;;  %v4846_v52 = vmul.f32 %v11382_v58, %v4845_v43  ;;  %v5233_v43 = vld [vmem:[%s11954_s6 + $0x1e8] sm:$0xff]  ;;  %v5199_v12 = vld [vmem:[%s11954_s6 + $0xd8] sm:$0xff] }
 0xf54   :  { %v11390_v23 = vadd.f32 %v4688_v25, %v4687_v34  ;;  %6036 = vpow2.f32 %v5612_v15  ;;  %v4679_v56 = vsel %vm11402_vm1, %v11376_v7, %v4675_v16  ;;  %v4799_v31 = vadd.f32 %v4783_v57, %v13663_v2  ;;  %v5201_v16 = vld [vmem:[%s11954_s6 + $0xe8] sm:$0xff] }
 0xf55   :  { %v4798_v44 = vadd.f32 %v4782_v45, %v12871_v41  ;;  %v4802_v1 = vadd.f32 %v4786_v53, %v12872_v42  ;;  %v4890_v41 = vsub.f32 1.0, %v4889_v47  ;;  %v4684_v14 = vsel %vm4681_vm14, %v4683_v49, %v4679_v56  ;;  %v5200_v42 = vld [vmem:[%s11954_s6 + $0xe0] sm:$0xff]  ;;  %v5261_v53 = vld [vmem:[%s11954_s6 + $0x2c8] sm:$0xff] }
 0xf56   :  { %6038 = vtanh.f32 %v11390_v23  ;;  %v4847_v7 = vadd.f32 %v11382_v58, %v4846_v52  ;;  %v4854_v13 = vand.u32 2147483648, %v11363_v29  ;;  %vm4894_vm0 = vweird.f32 %v11384_v20 }
 0xf57   :  { %v5611_v22 = vmul.f32 -1.442695, %v4798_v44  ;;  %v5614_v27 = vmul.f32 -1.442695, %v4802_v1  ;;  %v4891_v17 = vmul.f32 %v11384_v20, %v4890_v41  ;;  %v4897_v39 = vand.u32 2147483647, %v11365_v11  ;;  %vm11462_vm5 = vmor %vm4893_vm2, %vm4894_vm0 }
 0xf58   :  { %v4899_v29 = vand.u32 2147483648, %v11365_v11  ;;  %v4922_v4 = vrot.slane %v11166_v48, 7  ;;  %v4851_v50 = vsel %vm11436_vm4, %v11382_v58, %v4847_v7  ;;  %v4855_v25 = vor.u32 1.1754944e-38, %v4854_v13  ;;  %v5202_v11 = vld [vmem:[%s11954_s6 + $0xf0] sm:$0xff] }
 0xf59   :  { %v6035_v59 = vpop.eup %6034  ;;  %6040 = vpow2.f32 %v5611_v22  ;;  %v4892_v40 = vadd.f32 %v11384_v20, %v4891_v17  ;;  %v5234_v58 = vld [vmem:[%s11954_s6 + $0x1f0] sm:$0xff]  ;;  %v4923_v0 = vrot.slane %v11168_v60, 7  ;;  %vm4853_vm6 = vcmp.eq.f32.partialorder %v4852_v36, 8.507059e+37 }
 0xf5a   :  { %v6037_v38 = vpop.eup %6036  ;;  %v11406_v21 = vadd.f32 1.0, %v6035_v59  ;;  %6042 = vpow2.f32 %v5614_v27  ;;  %vm11480_vm7 = vcmp.eq.f32.partialorder %v4897_v39, 8.507059e+37  ;;  %v4900_v44 = vor.u32 1.1754944e-38, %v4899_v29 }
 0xf5b   :  { %v11413_v9 = vadd.f32 1.0, %v6037_v38  ;;  %v4896_v45 = vsel %vm11462_vm5, %v11384_v20, %v4892_v40  ;;  %v4856_v20 = vsel %vm4853_vm6, %v4855_v25, %v4851_v50  ;;  %v5232_v38 = vld [vmem:[%s11954_s6 + $0x1e0] sm:$0xff]  ;;  %v5230_v40 = vld [vmem:[%s11954_s6 + $0x1d0] sm:$0xff] }
 0xf5c   :  { %v6039_v18 = vpop.eup %6038  ;;  %6044 = vrcp.f32 %v11406_v21  ;;  %v4839_v1 = vand.u32 2147483648, %v11406_v21  ;;  %v4837_v22 = vand.u32 2147483647, %v11406_v21  ;;  %v4901_v19 = vsel %vm11480_vm7, %v4900_v44, %v4896_v45  ;;  %v5228_v25 = vld [vmem:[%s11954_s6 + $0x1c0] sm:$0xff]  ;;  %v5194_v44 = vld [vmem:[%s11954_s6 + $0xb0] sm:$0xff] }
 0xf5d   :  { %6046 = vrcp.f32 %v11413_v9  ;;  %v11419_v55 = vmul.f32 %v6039_v18, %v4684_v14  ;;  %v4884_v27 = vand.u32 2147483648, %v11413_v9  ;;  %v4882_v41 = vand.u32 2147483647, %v11413_v9  ;;  %v5219_v18 = vld [vmem:[%s11954_s6 + $0x178] sm:$0xff] }
 0xf5e   :  { %6048 = vtanh.f32 %v4799_v31  ;;  %vm4833_vm11 = vweird.f32 %v11406_v21  ;;  %v4926_v2 = vmul.f32 %v4922_v4, %v4856_v20  ;;  %v4840_v17 = vor.u32 1.1754944e-38, %v4839_v1  ;;  %v5225_v20 = vld [vmem:[%s11954_s6 + $0x1a8] sm:$0xff] }
 0xf5f   :  { %v6041_v28 = vpop.eup %6040  ;;  %v4940_v51 = vrot.slane %v11419_v55, 1  ;;  %vm4878_vm13 = vweird.f32 %v11413_v9  ;;  %vm4838_vm9 = vcmp.eq.f32.partialorder %v4837_v22, 8.507059e+37  ;;  %v4885_v7 = vor.u32 1.1754944e-38, %v4884_v27 }
 0xf60   :  { %v6043_v8 = vpop.eup %6042  ;;  %v11426_v24 = vadd.f32 1.0, %v6041_v28  ;;  %vm4883_vm14 = vcmp.eq.f32.partialorder %v4882_v41, 8.507059e+37  ;;  %v4927_v4 = vmul.f32 %v4923_v0, %v4901_v19  ;;  %v5227_v0 = vld [vmem:[%s11954_s6 + $0x1b8] sm:$0xff]  ;;  %v5224_v41 = vld [vmem:[%s11954_s6 + $0x1a0] sm:$0xff] }
 0xf61   :  { %v11432_v62 = vadd.f32 1.0, %v6043_v8  ;;  %v11442_v61 = vrot.slane %v4940_v51, 7  ;;  %v5198_v51 = vld [vmem:[%s11954_s6 + $0xd0] sm:$0xff] }
 0xf62   :  { %v11434_v35 = vpop.eup %6044  ;;  %6050 = vrcp.f32 %v11426_v24  ;;  %v4869_v60 = vand.u32 2147483648, %v11426_v24  ;;  %vm4863_vm0 = vweird.f32 %v11426_v24 }
 0xf63   :  { %v11451_v15 = vpop.eup %6046  ;;  %v4829_v34 = vmul.f32 %v11434_v35, %v11406_v21  ;;  %6052 = vrcp.f32 %v11432_v62  ;;  %4985 = vmatmul.f32.vlgmr.msrb.gmra.mxu1 %v11442_v61  ;;  %5025 = vmatmul.f32.vlgmr.msra.gmra.mxu3 %v11442_v61  ;;  %vm4834_vm8 = vweird.f32 %v11434_v35  ;;  %v4914_v45 = vand.u32 2147483648, %v11432_v62 }
 0xf64   :  { %6054 = vtanh.f32 %v4803_v10  ;;  %v4874_v48 = vmul.f32 %v11451_v15, %v11413_v9  ;;  %v6049_v54 = vpop.eup %6048  ;;  %5325 = vmatpush.msrb.mxu1 %v5203_v33  ;;  %5365 = vmatpush.msra.mxu3 %v5235_v3  ;;  %vm4879_vm10 = vweird.f32 %v11451_v15  ;;  %vm11516_vm12 = vmor %vm4833_vm11, %vm4834_vm8  ;;  %v5231_v10 = vld [vmem:[%s11954_s6 + $0x1d8] sm:$0xff]  ;;  %v5197_v33 = vld [vmem:[%s11954_s6 + $0xc8] sm:$0xff]  ;;  %vm4908_vm2 = vweird.f32 %v11432_v62 }
 0xf65   :  { %v4830_v47 = vsub.f32 1.0, %v4829_v34  ;;  %vm11535_vm1 = vmor %vm4878_vm13, %vm4879_vm10  ;;  %v5196_v34 = vld [vmem:[%s11954_s6 + $0xc0] sm:$0xff]  ;;  %vm4941_vm8 = vcmask 1040384   ;;  %v5221_v9 = vld [vmem:[%s11954_s6 + $0x188] sm:$0xff] }
 0xf66   :  { %v4875_v57 = vsub.f32 1.0, %v4874_v48  ;;  %5326 = vmatpush.msrb.mxu1 %v5202_v11  ;;  %5366 = vmatpush.msra.mxu3 %v5234_v58  ;;  %v5195_v58 = vld [vmem:[%s11954_s6 + $0xb8] sm:$0xff] }
 0xf67   :  { %v4831_v5 = vmul.f32 %v11434_v35, %v4830_v47  ;;  %v4912_v47 = vand.u32 2147483647, %v11432_v62 }
 0xf68   :  { %v11495_v37 = vpop.eup %6050  ;;  %v4876_v59 = vmul.f32 %v11451_v15, %v4875_v57  ;;  %5327 = vmatpush.msrb.mxu1 %v5201_v16  ;;  %5367 = vmatpush.msra.mxu3 %v5233_v43  ;;  %v5193_v43 = vld [vmem:[%s11954_s6 + $0xa8] sm:$0xff]  ;;  %v5208_v57 = vld [vmem:[%s11954_s6 + $0x120] sm:$0xff] }
 0xf69   :  { %v11508_v56 = vpop.eup %6052  ;;  %v4832_v52 = vadd.f32 %v11434_v35, %v4831_v5  ;;  %v4859_v49 = vmul.f32 %v11495_v37, %v11426_v24  ;;  %vm4864_vm3 = vweird.f32 %v11495_v37  ;;  %v4915_v5 = vor.u32 1.1754944e-38, %v4914_v45  ;;  %v5210_v45 = vld [vmem:[%s11954_s6 + $0x130] sm:$0xff] }
 0xf6a   :  { %v6055_v31 = vpop.eup %6054  ;;  %v4877_v14 = vadd.f32 %v11451_v15, %v4876_v59  ;;  %v4904_v21 = vmul.f32 %v11508_v56, %v11432_v62  ;;  %5328 = vmatpush.msrb.mxu1 %v5200_v42  ;;  %5368 = vmatpush.msra.mxu3 %v5232_v38  ;;  %vm4909_vm15 = vweird.f32 %v11508_v56  ;;  %vm11582_vm4 = vmor %vm4863_vm0, %vm4864_vm3  ;;  %v4870_v62 = vor.u32 1.1754944e-38, %v4869_v60  ;;  %v5192_v59 = vld [vmem:[%s11954_s6 + $0xa0] sm:$0xff]  ;;  %v5263_v60 = vld [vmem:[%s11954_s6 + $0x2d8] sm:$0xff] }
 0xf6b   :  { %v4836_v28 = vsel %vm11516_vm12, %v11434_v35, %v4832_v52  ;;  %v4860_v8 = vsub.f32 1.0, %v4859_v49  ;;  %5065 = vmatmul.f32.vlgmr.msra.gmra.mxu1 %v11442_v61  ;;  %5105 = vmatmul.f32.vlgmr.msrb.gmra.mxu3 %v11442_v61  ;;  %v5229_v61 = vld [vmem:[%s11954_s6 + $0x1c8] sm:$0xff]  ;;  %vm11599_vm5 = vmor %vm4908_vm2, %vm4909_vm15  ;;  %vm4913_vm7 = vcmp.eq.f32.partialorder %v4912_v47, 8.507059e+37  ;;  %v5191_v52 = vld [vmem:[%s11954_s6 + $0x98] sm:$0xff] }
 0xf6c   :  { %v4881_v36 = vsel %vm11535_vm1, %v11451_v15, %v4877_v14  ;;  %v4905_v13 = vsub.f32 1.0, %v4904_v21  ;;  %v4841_v39 = vsel %vm4838_vm9, %v4840_v17, %v4836_v28  ;;  %5329 = vmatpush.msrb.mxu1 %v5199_v12  ;;  %5369 = vmatpush.msra.mxu3 %v5231_v10  ;;  %v5223_v49 = vld [vmem:[%s11954_s6 + $0x198] sm:$0xff]  ;;  %v5190_v14 = vld [vmem:[%s11954_s6 + $0x90] sm:$0xff]  ;;  %v5189_v28 = vld [vmem:[%s11954_s6 + $0x88] sm:$0xff] }
 0xf6d   :  { %v4861_v35 = vmul.f32 %v11495_v37, %v4860_v8  ;;  %v4886_v32 = vsel %vm4883_vm14, %v4885_v7, %v4881_v36  ;;  %v4928_v29 = vmul.f32 %v6049_v54, %v4841_v39  ;;  %v4867_v54 = vand.u32 2147483647, %v11426_v24  ;;  %v5226_v24 = vld [vmem:[%s11954_s6 + $0x1b0] sm:$0xff]  ;;  %v5185_v7 = vld [vmem:[%s11954_s6 + $0x68] sm:$0xff]  ;;  %v5188_v36 = vld [vmem:[%s11954_s6 + $0x80] sm:$0xff] }
 0xf6e   :  { %v4906_v3 = vmul.f32 %v11508_v56, %v4905_v13  ;;  %v4929_v15 = vmul.f32 %v6055_v31, %v4886_v32  ;;  %5330 = vmatpush.msrb.mxu1 %v5198_v51  ;;  %5370 = vmatpush.msra.mxu3 %v5230_v40  ;;  %v5187_v31 = vld [vmem:[%s11954_s6 + $0x78] sm:$0xff]  ;;  %v5222_v21 = vld [vmem:[%s11954_s6 + $0x190] sm:$0xff]  ;;  %v5217_v8 = vld [vmem:[%s11954_s6 + $0x168] sm:$0xff] }
 0xf6f   :  { %v4930_v50 = vadd.f32 %v4928_v29, %v4926_v2  ;;  %v4862_v30 = vadd.f32 %v11495_v37, %v4861_v35  ;;  %vm4868_vm6 = vcmp.eq.f32.partialorder %v4867_v54, 8.507059e+37  ;;  %v5186_v12 = vld [vmem:[%s11954_s6 + $0x70] sm:$0xff]  ;;  %v5220_v13 = vld [vmem:[%s11954_s6 + $0x180] sm:$0xff]  ;;  %v5267_v39 = vld [vmem:[%s11954_s6 + $0x2f8] sm:$0xff] }
 0xf70   :  { %v4931_v48 = vadd.f32 %v4929_v15, %v4927_v4  ;;  %5331 = vmatpush.msrb.mxu1 %v5197_v33  ;;  %5371 = vmatpush.msra.mxu3 %v5229_v61  ;;  %v4907_v11 = vadd.f32 %v11508_v56, %v4906_v3  ;;  %v5218_v10 = vld [vmem:[%s11954_s6 + $0x170] sm:$0xff]  ;;  %v5184_v51 = vld [vmem:[%s11954_s6 + $0x60] sm:$0xff]  ;;  %v5183_v35 = vld [vmem:[%s11954_s6 + $0x58] sm:$0xff] }
 0xf71   :  { %6056 = vtanh.f32 %v4930_v50  ;;  %v4866_v1 = vsel %vm11582_vm4, %v11495_v37, %v4862_v30  ;;  %v5216_v40 = vld [vmem:[%s11954_s6 + $0x160] sm:$0xff]  ;;  %v5215_v33 = vld [vmem:[%s11954_s6 + $0x158] sm:$0xff]  ;;  %v5266_v61 = vld [vmem:[%s11954_s6 + $0x2f0] sm:$0xff] }
 0xf72   :  { %6058 = vtanh.f32 %v4931_v48  ;;  %5332 = vmatpush.msrb.mxu1 %v5196_v34  ;;  %5372 = vmatpush.msra.mxu3 %v5228_v25  ;;  %v4911_v16 = vsel %vm11599_vm5, %v11508_v56, %v4907_v11  ;;  %v4871_v27 = vsel %vm4868_vm6, %v4870_v62, %v4866_v1  ;;  %v13679_v32 = vld [vmem:[#allocation12_spill] sm:$0xff]  ;;  %v5182_v3 = vld [vmem:[%s11954_s6 + $0x50] sm:$0xff]  ;;  %v5179_v11 = vld [vmem:[%s11954_s6 + $0x38] sm:$0xff] }
 0xf73   :  { %v4916_v42 = vsel %vm4913_vm7, %v4915_v5, %v4911_v16  ;;  %v13680_v29 = vld [vmem:[#allocation96_spill] sm:$0xff]  ;;  %v5214_v4 = vld [vmem:[%s11954_s6 + $0x150] sm:$0xff]  ;;  %v5259_v62 = vld [vmem:[%s11954_s6 + $0x2b8] sm:$0xff] }
 0xf74   :  { %5333 = vmatpush.msrb.mxu1 %v5195_v58  ;;  %5373 = vmatpush.msra.mxu3 %v5227_v0  ;;  %v5265_v15 = vld [vmem:[%s11954_s6 + $0x2e8] sm:$0xff]  ;;  %v5264_v25 = vld [vmem:[%s11954_s6 + $0x2e0] sm:$0xff]  ;;  %v5211_v58 = vld [vmem:[%s11954_s6 + $0x138] sm:$0xff] }
 0xf75   :  { %v5181_v50 = vld [vmem:[%s11954_s6 + $0x48] sm:$0xff]  ;;  %v5180_v30 = vld [vmem:[%s11954_s6 + $0x40] sm:$0xff]  ;;  %v5262_v0 = vld [vmem:[%s11954_s6 + $0x2d0] sm:$0xff] }
 0xf76   :  { %5334 = vmatpush.msrb.mxu1 %v5194_v44  ;;  %5374 = vmatpush.msra.mxu3 %v5226_v24  ;;  %v5213_v34 = vld [vmem:[%s11954_s6 + $0x148] sm:$0xff]  ;;  %v5212_v48 = vld [vmem:[%s11954_s6 + $0x140] sm:$0xff]  ;;  %v5178_v54 = vld [vmem:[%s11954_s6 + $0x30] sm:$0xff] }
 0xf77   :  { %v6057_v22 = vpop.eup %6056  ;;  %v5177_v47 = vld [vmem:[%s11954_s6 + $0x28] sm:$0xff]  ;;  %v5260_v24 = vld [vmem:[%s11954_s6 + $0x2c0] sm:$0xff]  ;;  %v5175_v16 = vld [vmem:[%s11954_s6 + $0x18] sm:$0xff] }
 0xf78   :  { %v6059_v37 = vpop.eup %6058  ;;  %v4934_v38 = vmul.f32 %v6057_v22, %v4871_v27  ;;  %5335 = vmatpush.msrb.mxu1 %v5193_v43  ;;  %5375 = vmatpush.msra.mxu3 %v5225_v20  ;;  %v5209_v44 = vld [vmem:[%s11954_s6 + $0x128] sm:$0xff]  ;;  %v5176_v1 = vld [vmem:[%s11954_s6 + $0x20] sm:$0xff]  ;;  %v5207_v43 = vld [vmem:[%s11954_s6 + $0x118] sm:$0xff] }
 0xf79   :  { %v4935_v19 = vmul.f32 %v6059_v37, %v4916_v42  ;;  %v5258_v20 = vld [vmem:[%s11954_s6 + $0x2b0] sm:$0xff]  ;;  %v5257_v27 = vld [vmem:[%s11954_s6 + $0x2a8] sm:$0xff]  ;;  %v5172_v42 = vld [vmem:[%s11954_s6] sm:$0xff] }
 0xf7a   :  { %v4942_v56 = vrot.slane %v4934_v38, 7  ;;  %5336 = vmatpush.msrb.mxu1 %v5192_v59  ;;  %5376 = vmatpush.msra.mxu3 %v5224_v41  ;;  %v5174_v5 = vld [vmem:[%s11954_s6 + $0x10] sm:$0xff]  ;;  %v5173_v37 = vld [vmem:[%s11954_s6 + $0x8] sm:$0xff]  ;;  %v5256_v41 = vld [vmem:[%s11954_s6 + $0x2a0] sm:$0xff] }
 0xf7b   :  { %v5615_v2 = vrot.slane %v4935_v19, 14  ;;  %v5206_v22 = vld [vmem:[%s11954_s6 + $0x110] sm:$0xff]  ;;  %v5205_v59 = vld [vmem:[%s11954_s6 + $0x108] sm:$0xff]  ;;  %v5204_v38 = vld [vmem:[%s11954_s6 + $0x100] sm:$0xff] }
 0xf7c   :  { %5337 = vmatpush.msrb.mxu1 %v5191_v52  ;;  %5377 = vmatpush.msra.mxu3 %v5223_v49  ;;  %v5251_v19 = vld [vmem:[%s11954_s6 + $0x278] sm:$0xff]  ;;  %v13681_v49 = vld [vmem:[#allocation13_spill] sm:$0xff] }
 0xf7d   :  { %v4944_v17 = vsel %vm4941_vm8, %v4942_v56, %v5615_v2  ;;  %v5255_v56 = vld [vmem:[%s11954_s6 + $0x298] sm:$0xff]  ;;  %v5250_v2 = vld [vmem:[%s11954_s6 + $0x270] sm:$0xff]  ;;  %vm5484_vm8 = vcmask 58368  }
 0xf7e   :  { %4965 = vmatmul.f32.vlgmr.msra.gmra.mxu0 %v4944_v17  ;;  %5005 = vmatmul.f32.vlgmr.msra.gmra.mxu2 %v4944_v17  ;;  %v5283_v52 = vld [vmem:[%s11954_s6 + $0x378] sm:$0xff] }
 0xf7f   :  { %5305 = vmatpush.msra.mxu0 %v5187_v31  ;;  %5345 = vmatpush.msra.mxu2 %v5219_v18  ;;  %v13682_v31 = vld [vmem:[#allocation16_spill] sm:$0xff]  ;;  %v5254_v18 = vld [vmem:[%s11954_s6 + $0x290] sm:$0xff] }
 0xf80   :  { %5338 = vmatpush.msrb.mxu1 %v5190_v14  ;;  %5378 = vmatpush.msra.mxu3 %v5222_v21  ;;  %v5249_v14 = vld [vmem:[%s11954_s6 + $0x268] sm:$0xff] }
 0xf81   :  { %5306 = vmatpush.msra.mxu0 %v5186_v12  ;;  %5346 = vmatpush.msra.mxu2 %v5218_v10  ;;  %v5253_v21 = vld [vmem:[%s11954_s6 + $0x288] sm:$0xff]  ;;  %v5248_v10 = vld [vmem:[%s11954_s6 + $0x260] sm:$0xff] }
 0xf82   :  { %5339 = vmatpush.msrb.mxu1 %v5189_v28  ;;  %5379 = vmatpush.msra.mxu3 %v5221_v9  ;;  %v5281_v12 = vld [vmem:[%s11954_s6 + $0x368] sm:$0xff]  ;;  %v5252_v28 = vld [vmem:[%s11954_s6 + $0x280] sm:$0xff] }
 0xf83   :  { %5307 = vmatpush.msra.mxu0 %v5185_v7  ;;  %5347 = vmatpush.msra.mxu2 %v5217_v8  ;;  %v5280_v9 = vld [vmem:[%s11954_s6 + $0x360] sm:$0xff]  ;;  %v5247_v7 = vld [vmem:[%s11954_s6 + $0x258] sm:$0xff] }
 0xf84   :  { %5340 = vmatpush.msrb.mxu1 %v5188_v36  ;;  %5380 = vmatpush.msra.mxu3 %v5220_v13  ;;  %v5279_v8 = vld [vmem:[%s11954_s6 + $0x358] sm:$0xff]  ;;  %v5246_v36 = vld [vmem:[%s11954_s6 + $0x250] sm:$0xff] }
 0xf85   :  { %5308 = vmatpush.msra.mxu0 %v5184_v51  ;;  %5348 = vmatpush.msra.mxu2 %v5216_v40  ;;  %v13683_v13 = vld [vmem:[#allocation153_spill] sm:$0xff] }
 0xf86   :  { %5341 = vmatmul.f32.vlgmr.msrb.gmra.mxu1 %v13679_v32  ;;  %5381 = vmatmul.f32.vlgmr.msra.gmra.mxu3 %v13680_v29  ;;  %v5278_v51 = vld [vmem:[%s11954_s6 + $0x350] sm:$0xff]  ;;  %v5245_v40 = vld [vmem:[%s11954_s6 + $0x248] sm:$0xff]  ;;  %v5276_v32 = vld [vmem:[%s11954_s6 + $0x340] sm:$0xff] }
 0xf87   :  { %5405 = vmatpush.msra.mxu1 %v5267_v39  ;;  %5045 = vmatmul.f32.vlgmr.msrb.gmra.mxu0 %v4944_v17  ;;  %v5277_v39 = vld [vmem:[%s11954_s6 + $0x348] sm:$0xff]  ;;  %v5243_v29 = vld [vmem:[%s11954_s6 + $0x238] sm:$0xff] }
 0xf88   :  { %5085 = vmatmul.f32.vlgmr.msrb.gmra.mxu2 %v4944_v17  ;;  %5309 = vmatpush.msra.mxu0 %v5183_v35  ;;  %v5282_v17 = vld [vmem:[%s11954_s6 + $0x370] sm:$0xff]  ;;  %v5244_v35 = vld [vmem:[%s11954_s6 + $0x240] sm:$0xff] }
 0xf89   :  { %5349 = vmatpush.msra.mxu2 %v5215_v33  ;;  %5406 = vmatpush.msra.mxu1 %v5266_v61  ;;  %v5275_v33 = vld [vmem:[%s11954_s6 + $0x338] sm:$0xff]  ;;  %v5242_v61 = vld [vmem:[%s11954_s6 + $0x230] sm:$0xff] }
 0xf8a   :  { %5310 = vmatpush.msra.mxu0 %v5182_v3  ;;  %v5274_v3 = vld [vmem:[%s11954_s6 + $0x330] sm:$0xff] }
 0xf8b   :  { %5350 = vmatpush.msra.mxu2 %v5214_v4  ;;  %5407 = vmatpush.msra.mxu1 %v5265_v15  ;;  %v5241_v4 = vld [vmem:[%s11954_s6 + $0x228] sm:$0xff] }
 0xf8c   :  { %5311 = vmatpush.msra.mxu0 %v5181_v50  ;;  %v5273_v15 = vld [vmem:[%s11954_s6 + $0x328] sm:$0xff]  ;;  %v5240_v50 = vld [vmem:[%s11954_s6 + $0x220] sm:$0xff] }
 0xf8d   :  { %5351 = vmatpush.msra.mxu2 %v5213_v34  ;;  %5408 = vmatpush.msra.mxu1 %v5264_v25  ;;  %v5272_v34 = vld [vmem:[%s11954_s6 + $0x320] sm:$0xff]  ;;  %v5239_v25 = vld [vmem:[%s11954_s6 + $0x218] sm:$0xff] }
 0xf8e   :  { %5312 = vmatpush.msra.mxu0 %v5180_v30  ;;  %v5271_v30 = vld [vmem:[%s11954_s6 + $0x318] sm:$0xff] }
 0xf8f   :  { %5352 = vmatpush.msra.mxu2 %v5212_v48  ;;  %5409 = vmatpush.msra.mxu1 %v5263_v60  ;;  %v5238_v48 = vld [vmem:[%s11954_s6 + $0x210] sm:$0xff] }
 0xf90   :  { %5313 = vmatpush.msra.mxu0 %v5179_v11  ;;  %v5270_v60 = vld [vmem:[%s11954_s6 + $0x310] sm:$0xff]  ;;  %v5237_v11 = vld [vmem:[%s11954_s6 + $0x208] sm:$0xff] }
 0xf91   :  { %5353 = vmatpush.msra.mxu2 %v5211_v58  ;;  %5410 = vmatpush.msra.mxu1 %v5262_v0  ;;  %v5269_v58 = vld [vmem:[%s11954_s6 + $0x308] sm:$0xff]  ;;  %v5236_v0 = vld [vmem:[%s11954_s6 + $0x200] sm:$0xff] }
 0xf92   :  { %5314 = vmatpush.msra.mxu0 %v5178_v54  ;;  %v5268_v54 = vld [vmem:[%s11954_s6 + $0x300] sm:$0xff] }
 0xf93   :  { %5354 = vmatpush.msra.mxu2 %v5210_v45  ;;  %5411 = vmatpush.msra.mxu1 %v5261_v53  ;;  %v13684_v45 = vld [vmem:[#allocation23_spill] sm:$0xff]  ;;  %v6688_v53 = vld [vmem:[%s11951_s3 + $0x8] sm:$0xf] }
 0xf94   :  { %5315 = vmatpush.msra.mxu0 %v5177_v47  ;;  %v5301_v47 = vrot.slane %v6688_v53, 3 }
 0xf95   :  { %5355 = vmatpush.msra.mxu2 %v5209_v44  ;;  %5412 = vmatpush.msra.mxu1 %v5260_v24  ;;  %v5299_v44 = vld [vmem:[%s11954_s6 + $0x3f8] sm:$0xff]  ;;  %v5298_v24 = vld [vmem:[%s11954_s6 + $0x3f0] sm:$0xff] }
 0xf96   :  { %5316 = vmatpush.msra.mxu0 %v5176_v1  ;;  %5626 = vpush %v5301_v47  ;;  %5445 = vmatpush.msrb.mxu3 %v5299_v44  ;;  %v5296_v1 = vld [vmem:[%s11954_s6 + $0x3e0] sm:$0xff] }
 0xf97   :  { %5356 = vmatpush.msra.mxu2 %v5208_v57  ;;  %5413 = vmatpush.msra.mxu1 %v5259_v62  ;;  %v5295_v62 = vld [vmem:[%s11954_s6 + $0x3d8] sm:$0xff] }
 0xf98   :  { %5317 = vmatpush.msra.mxu0 %v5175_v16  ;;  %5446 = vmatpush.msrb.mxu3 %v5298_v24 }
 0xf99   :  { %5357 = vmatpush.msra.mxu2 %v5207_v43  ;;  %5414 = vmatpush.msra.mxu1 %v5258_v20  ;;  %v5294_v20 = vld [vmem:[%s11954_s6 + $0x3d0] sm:$0xff] }
 0xf9a   :  { %5318 = vmatpush.msra.mxu0 %v5174_v5 }
 0xf9b   :  { %5358 = vmatpush.msra.mxu2 %v5206_v22  ;;  %5415 = vmatpush.msra.mxu1 %v5257_v27  ;;  %v5293_v22 = vld [vmem:[%s11954_s6 + $0x3c8] sm:$0xff] }
 0xf9c   :  { %5319 = vmatpush.msra.mxu0 %v5173_v37 }
 0xf9d   :  { %5359 = vmatpush.msra.mxu2 %v5205_v59  ;;  %5416 = vmatpush.msra.mxu1 %v5256_v41  ;;  %v5292_v59 = vld [vmem:[%s11954_s6 + $0x3c0] sm:$0xff] }
 0xf9e   :  { %5320 = vmatpush.msra.mxu0 %v5172_v42  ;;  %v5291_v42 = vld [vmem:[%s11954_s6 + $0x3b8] sm:$0xff] }
 0xf9f   :  { %5360 = vmatpush.msra.mxu2 %v5204_v38  ;;  %5321 = vmatmul.f32.vlgmr.msra.gmra.mxu0 %v13681_v49 }
 0xfa0   :  { %5361 = vmatmul.f32.vlgmr.msra.gmra.mxu2 %v13682_v31  ;;  %5385 = vmatpush.msrb.mxu0 %v5251_v19 }
 0xfa1   :  { %5417 = vmatpush.msra.mxu1 %v5255_v56  ;;  %5425 = vmatpush.msrb.mxu2 %v5283_v52  ;;  %v5290_v52 = vld [vmem:[%s11954_s6 + $0x3b0] sm:$0xff] }
 0xfa2   :  { %5386 = vmatpush.msrb.mxu0 %v5250_v2 }
 0xfa3   :  { %5418 = vmatpush.msra.mxu1 %v5254_v18  ;;  %5426 = vmatpush.msrb.mxu2 %v5282_v17  ;;  %v5288_v18 = vld [vmem:[%s11954_s6 + $0x3a0] sm:$0xff] }
 0xfa4   :  { %5387 = vmatpush.msrb.mxu0 %v5249_v14 }
 0xfa5   :  { %5419 = vmatpush.msra.mxu1 %v5253_v21  ;;  %5427 = vmatpush.msrb.mxu2 %v5281_v12  ;;  %v5287_v21 = vld [vmem:[%s11954_s6 + $0x398] sm:$0xff]  ;;  %v5286_v12 = vld [vmem:[%s11954_s6 + $0x390] sm:$0xff] }
 0xfa6   :  { %5388 = vmatpush.msrb.mxu0 %v5248_v10  ;;  %v5285_v10 = vld [vmem:[%s11954_s6 + $0x388] sm:$0xff] }
 0xfa7   :  { %5420 = vmatpush.msra.mxu1 %v5252_v28  ;;  %5428 = vmatpush.msrb.mxu2 %v5280_v9 }
 0xfa8   :  { %5421 = vmatmul.f32.vlgmr.msra.gmra.mxu1 %v13683_v13  ;;  %5389 = vmatpush.msrb.mxu0 %v5247_v7  ;;  %v5284_v7 = vld [vmem:[%s11954_s6 + $0x380] sm:$0xff] }
 0xfa9   :  { %5429 = vmatpush.msrb.mxu2 %v5279_v8 }
 0xfaa   :  { %5390 = vmatpush.msrb.mxu0 %v5246_v36 }
 0xfab   :  { %5430 = vmatpush.msrb.mxu2 %v5278_v51 }
 0xfac   :  { %5391 = vmatpush.msrb.mxu0 %v5245_v40 }
 0xfad   :  { %5431 = vmatpush.msrb.mxu2 %v5277_v39 }
 0xfae   :  { %5392 = vmatpush.msrb.mxu0 %v5244_v35 }
 0xfaf   :  { %5432 = vmatpush.msrb.mxu2 %v5276_v32 }
 0xfb0   :  { %5393 = vmatpush.msrb.mxu0 %v5243_v29 }
 0xfb1   :  { %5433 = vmatpush.msrb.mxu2 %v5275_v33 }
 0xfb2   :  { %5394 = vmatpush.msrb.mxu0 %v5242_v61 }
 0xfb3   :  { %5434 = vmatpush.msrb.mxu2 %v5274_v3 }
 0xfb4   :  { %5395 = vmatpush.msrb.mxu0 %v5241_v4 }
 0xfb5   :  { %5435 = vmatpush.msrb.mxu2 %v5273_v15 }
 0xfb6   :  { %5396 = vmatpush.msrb.mxu0 %v5240_v50 }
 0xfb7   :  { %5436 = vmatpush.msrb.mxu2 %v5272_v34 }
 0xfb8   :  { %5397 = vmatpush.msrb.mxu0 %v5239_v25 }
 0xfb9   :  { %5437 = vmatpush.msrb.mxu2 %v5271_v30 }
 0xfba   :  { %5398 = vmatpush.msrb.mxu0 %v5238_v48 }
 0xfbb   :  { %5438 = vmatpush.msrb.mxu2 %v5270_v60 }
 0xfbc   :  { %5399 = vmatpush.msrb.mxu0 %v5237_v11 }
 0xfbd   :  { %5439 = vmatpush.msrb.mxu2 %v5269_v58 }
 0xfbe   :  { %5400 = vmatpush.msrb.mxu0 %v5236_v0 }
 0xfbf   :  { %5440 = vmatpush.msrb.mxu2 %v5268_v54  ;;  %5401 = vmatmul.f32.vlgmr.msrb.gmra.mxu0 %v13684_v45 }
 0xfc0   :  { %5441 = vmatmul.f32.vlgmr.msrb.gmra.mxu2 %v11419_v55  ;;  %v5297_v55 = vld [vmem:[%s11954_s6 + $0x3e8] sm:$0xff] }
 0xfc1   :  { %5447 = vmatpush.msrb.mxu3 %v5297_v55 }
 0xfc3   :  { %5448 = vmatpush.msrb.mxu3 %v5296_v1 }
 0xfc5   :  { %5449 = vmatpush.msrb.mxu3 %v5295_v62 }
 0xfc7   :  { %5450 = vmatpush.msrb.mxu3 %v5294_v20 }
 0xfc9   :  { %5451 = vmatpush.msrb.mxu3 %v5293_v22 }
 0xfcb   :  { %5452 = vmatpush.msrb.mxu3 %v5292_v59 }
 0xfcd   :  { %5453 = vmatpush.msrb.mxu3 %v5291_v42 }
 0xfcf   :  { %5454 = vmatpush.msrb.mxu3 %v5290_v52 }
 0xfe0   :  { %v4986_v16 = vpop.f32.mrf.mxu1 }
 0xfe6   :  { %v5026_v41 = vpop.f32.mrf.mxu3 }
 0xfe8   :  { %v5066_v49 = vpop.f32.mrf.mxu1 }
 0xfee   :  { %v5106_v32 = vpop.f32.mrf.mxu3 }
 0xffb   :  { %v4966_v57 = vpop.f32.mrf.mxu0 }
 0xffc   :  { %v4967_v43 = vadd.f32 %v4966_v57, %v13653_v63 }
 0xffe   :  { %v4987_v5 = vadd.f32 %v4986_v16, %v4967_v43 }
0x1000   :  { %v5616_v27 = vmul.f32 -1.442695, %v4987_v5 }
0x1001   :  { %v5006_v37 = vpop.f32.mrf.mxu2 }
0x1002   :  { %6060 = vpow2.f32 %v5616_v27  ;;  %v5007_v63 = vadd.f32 %v5006_v37, %v13654_v6  ;;  %v5289_v6 = vld [vmem:[%s11954_s6 + $0x3a8] sm:$0xff]  ;;  %s5627_s6 = spop %5626 }
0x1003   :  { %5455 = vmatpush.msrb.mxu3 %v5289_v6  ;;  %v5342_v42 = vpop.f32.mrf.mxu1 }
0x1004   :  { %v5027_v38 = vadd.f32 %v5026_v41, %v5007_v63  ;;  %v5046_v19 = vpop.f32.mrf.mxu0  ;;  %v5303_v63 = vstv %s5627_s6 }
0x1005   :  { %v5047_v56 = vadd.f32 %v5046_v19, %v13656_v26  ;;  %5456 = vmatpush.msrb.mxu3 %v5288_v18 }
0x1006   :  { %v5617_v2 = vmul.f32 -1.442695, %v5027_v38 }
0x1007   :  { %v5067_v31 = vadd.f32 %v5066_v49, %v5047_v56  ;;  %5457 = vmatpush.msrb.mxu3 %v5287_v21 }
0x1008   :  { %v6061_v17 = vpop.eup %6060  ;;  %6062 = vpow2.f32 %v5617_v2 }
0x1009   :  { %v5118_v26 = vadd.f32 1.0, %v6061_v17  ;;  %v5618_v14 = vmul.f32 -1.442695, %v5067_v31  ;;  %5458 = vmatpush.msrb.mxu3 %v5286_v12  ;;  %v5382_v52 = vpop.f32.mrf.mxu3 }
0x100b   :  { %6064 = vrcp.f32 %v5118_v26  ;;  %v5086_v8 = vpop.f32.mrf.mxu2  ;;  %5459 = vmatpush.msrb.mxu3 %v5285_v10  ;;  %v5132_v15 = vand.u32 2147483648, %v5118_v26  ;;  %vm5126_vm11 = vweird.f32 %v5118_v26  ;;  %v5130_v34 = vand.u32 2147483647, %v5118_v26 }
0x100c   :  { %6066 = vpow2.f32 %v5618_v14  ;;  %v5087_v39 = vadd.f32 %v5086_v8, %v13658_v46 }
0x100d   :  { %5460 = vmatpush.msrb.mxu3 %v5284_v7  ;;  %v5133_v58 = vor.u32 1.1754944e-38, %v5132_v15  ;;  %vm5131_vm1 = vcmp.eq.f32.partialorder %v5130_v34, 8.507059e+37 }
0x100e   :  { %v6063_v28 = vpop.eup %6062  ;;  %v5107_v61 = vadd.f32 %v5106_v32, %v5087_v39 }
0x100f   :  { %v5119_v9 = vadd.f32 1.0, %v6063_v28 }
0x1011   :  { %v6065_v36 = vpop.eup %6064  ;;  %6068 = vrcp.f32 %v5119_v9  ;;  %v5147_v30 = vand.u32 2147483648, %v5119_v9  ;;  %v5145_v48 = vand.u32 2147483647, %v5119_v9  ;;  %vm5141_vm9 = vweird.f32 %v5119_v9 }
0x1012   :  { %v6067_v13 = vpop.eup %6066  ;;  %v5122_v51 = vmul.f32 %v6065_v36, %v5118_v26  ;;  %vm5127_vm10 = vweird.f32 %v6065_v36 }
0x1013   :  { %v5120_v40 = vadd.f32 1.0, %v6067_v13  ;;  %vm5128_vm12 = vmor %vm5126_vm11, %vm5127_vm10  ;;  %v5148_v45 = vor.u32 1.1754944e-38, %v5147_v30  ;;  %vm5146_vm3 = vcmp.eq.f32.partialorder %v5145_v48, 8.507059e+37 }
0x1014   :  { %v5123_v35 = vsub.f32 1.0, %v5122_v51 }
0x1015   :  { %6070 = vrcp.f32 %v5120_v40  ;;  %v5162_v43 = vand.u32 2147483648, %v5120_v40  ;;  %vm5156_vm0 = vweird.f32 %v5120_v40  ;;  %v5160_v20 = vand.u32 2147483647, %v5120_v40 }
0x1016   :  { %v5124_v29 = vmul.f32 %v6065_v36, %v5123_v35  ;;  %6072 = vtanh.f32 %v5107_v61 }
0x1017   :  { %v6069_v33 = vpop.eup %6068  ;;  %v5163_v22 = vor.u32 1.1754944e-38, %v5162_v43  ;;  %vm5161_vm2 = vcmp.eq.f32.partialorder %v5160_v20, 8.507059e+37 }
0x1018   :  { %v5137_v3 = vmul.f32 %v6069_v33, %v5119_v9  ;;  %v5125_v4 = vadd.f32 %v6065_v36, %v5124_v29  ;;  %vm5142_vm13 = vweird.f32 %v6069_v33 }
0x1019   :  { %vm5143_vm14 = vmor %vm5141_vm9, %vm5142_vm13 }
0x101a   :  { %v5138_v50 = vsub.f32 1.0, %v5137_v3  ;;  %v5129_v11 = vsel %vm5128_vm12, %v6065_v36, %v5125_v4 }
0x101b   :  { %v6071_v25 = vpop.eup %6070  ;;  %v5134_v53 = vsel %vm5131_vm1, %v5133_v58, %v5129_v11 }
0x101c   :  { %v5139_v60 = vmul.f32 %v6069_v33, %v5138_v50  ;;  %v5152_v46 = vmul.f32 %v6071_v25, %v5120_v40  ;;  %v6073_v44 = vpop.eup %6072  ;;  %vm5157_vm15 = vweird.f32 %v6071_v25  ;;  %v5322_v41 = vpop.f32.mrf.mxu0 }
0x101d   :  { %v5168_v57 = vmul.f32 %v6073_v44, %v5134_v53  ;;  %vm5158_vm4 = vmor %vm5156_vm0, %vm5157_vm15 }
0x101e   :  { %v5153_v0 = vsub.f32 1.0, %v5152_v46  ;;  %v5140_v54 = vadd.f32 %v6069_v33, %v5139_v60 }
0x1020   :  { %v5144_v47 = vsel %vm5143_vm14, %v6069_v33, %v5140_v54  ;;  %v5154_v24 = vmul.f32 %v6071_v25, %v5153_v0 }
0x1021   :  { %v5149_v55 = vsel %vm5146_vm3, %v5148_v45, %v5144_v47 }
0x1022   :  { %v5167_v1 = vmul.f32 %v5149_v55, %v11390_v23  ;;  %v5155_v16 = vadd.f32 %v6071_v25, %v5154_v24  ;;  %v5323_v23 = vadd.f32 %v5322_v41, %v5303_v63 }
0x1023   :  { %v5362_v38 = vpop.f32.mrf.mxu2 }
0x1024   :  { %v5169_v62 = vadd.f32 %v5168_v57, %v5167_v1  ;;  %v5159_v5 = vsel %vm5158_vm4, %v6071_v25, %v5155_v16  ;;  %v5343_v19 = vadd.f32 %v5342_v42, %v5323_v23 }
0x1025   :  { %v5164_v37 = vsel %vm5161_vm2, %v5163_v22, %v5159_v5  ;;  %v5422_v31 = vpop.f32.mrf.mxu1 }
0x1026   :  { %6074 = vtanh.f32 %v5169_v62  ;;  %v5363_v56 = vadd.f32 %v5362_v38, %v5343_v19 }
0x1028   :  { %v5383_v2 = vadd.f32 %v5382_v52, %v5363_v56 }
0x102c   :  { %v6075_v27 = vpop.eup %6074 }
0x102d   :  { %v5171_v59 = vmul.f32 %v6075_v27, %v5164_v37 }
0x102f   :  { %5461 = vmatmul.f32.vlgmr.msrb.gmra.mxu3 %v5171_v59 }
0x103c   :  { %v5402_v49 = vpop.f32.mrf.mxu0 }
0x103d   :  { %v5403_v6 = vadd.f32 %v5402_v49, %v5383_v2 }
0x103f   :  { %v5423_v17 = vadd.f32 %v5422_v31, %v5403_v6 }
0x1043   :  { %v5442_v18 = vpop.f32.mrf.mxu2 }
0x1044   :  { %v5443_v26 = vadd.f32 %v5442_v18, %v5423_v17 }
0x10b2   :  { %v5462_v14 = vpop.f32.mrf.mxu3 }
0x10b3   :  { %v5463_v21 = vadd.f32 %v5462_v14, %v5443_v26 }
0x10b5   :  { %v5619_v12 = vmul.f32 -1.442695, %v5463_v21 }
0x10b7   :  { %6076 = vpow2.f32 %v5619_v12 }
0x10bd   :  { %v6077_v10 = vpop.eup %6076 }
0x10be   :  { %v5468_v28 = vadd.f32 1.0, %v6077_v10 }
0x10c0   :  { %6078 = vrcp.f32 %v5468_v28  ;;  %v5480_v36 = vand.u32 2147483648, %v5468_v28  ;;  %v5478_v51 = vand.u32 2147483647, %v5468_v28  ;;  %vm5474_vm6 = vweird.f32 %v5468_v28 }
0x10c2   :  { %v5481_v39 = vor.u32 1.1754944e-38, %v5480_v36  ;;  %vm5479_vm10 = vcmp.eq.f32.partialorder %v5478_v51, 8.507059e+37 }
0x10c6   :  { %v6079_v9 = vpop.eup %6078 }
0x10c7   :  { %v5470_v7 = vmul.f32 %v6079_v9, %v5468_v28  ;;  %vm5475_vm5 = vweird.f32 %v6079_v9 }
0x10c8   :  { %vm5476_vm7 = vmor %vm5474_vm6, %vm5475_vm5 }
0x10c9   :  { %v5471_v8 = vsub.f32 1.0, %v5470_v7 }
0x10cb   :  { %v5472_v13 = vmul.f32 %v6079_v9, %v5471_v8 }
0x10cd   :  { %v5473_v40 = vadd.f32 %v6079_v9, %v5472_v13 }
0x10cf   :  { %v5477_v35 = vsel %vm5476_vm7, %v6079_v9, %v5473_v40 }
0x10d0   :  { %v5482_v32 = vsel %vm5479_vm10, %v5481_v39, %v5477_v35 }
0x10d1   :  { %5485 = vst.msk [vmem:[#allocation5] sm:$0x3] %vm5484_vm8, %v5482_v32 }
0x10d2   :  { %5496 = dma.vmem_to_hbm [thread:$0]  %s5492_s9, 32, %s5494_s12, [#allocation4]  }
0x10d3   :  { %6739 = dma.done.wait [#allocation4], 32  }
0x10d4   :  { %6740 = vsyncadd [#allocation4], 4294967264 }
0x10d5   :  { %5501 = vsyncpa [#allocation3], 1 }
0x10d6   :  { %5502 = vsyncpa [#allocation4], 1 }

</bundles_post_ra>
